<compile_context>
chip_gen: v7x
topology: tpu7x:2x2x1
jax: 0.10.0
libtpu: 0.0.40
codegen_flags: <defaults>
</compile_context>

<pallas_src>
import math

import jax
import jax.numpy as jnp
from jax.experimental import pallas as pl
from jax.experimental.pallas import tpu as pltpu


def _layer_norm(x, gamma, beta, eps=1e-5):
    # x: (T, D) f32; gamma/beta: (1, D) f32
    mu = jnp.mean(x, axis=-1, keepdims=True)
    xc = x - mu
    var = jnp.mean(xc * xc, axis=-1, keepdims=True)
    inv = jax.lax.rsqrt(var + eps)
    return xc * inv * gamma + beta


def _make_kernel(n_heads, head_dim, seq_len, tq, tk, d_ff, ff_chunk):
    d_model = n_heads * head_dim
    n_kv_tiles = seq_len // tk
    n_ff_chunks = d_ff // ff_chunk

    def kernel(x_ref,
               wq_ref, bq_ref, wk_ref, bk_ref, wv_ref, bv_ref,
               w1_ref, b1_ref, w2_ref, b2_ref,
               g1_ref, be1_ref, g2_ref, be2_ref,
               o_ref,
               k_hm, v_hm, q_hm, attn_sc):
        qi = pl.program_id(1)

        # ---- K/V projection over the FULL sequence, once per batch element ----
        # (scratch persists across the "arbitrary" q-tile grid axis)
        @pl.when(qi == 0)
        def _():
            xf = x_ref[...].astype(jnp.bfloat16)                       # (S, D)
            k = jnp.dot(xf, wk_ref[...], preferred_element_type=jnp.float32) + bk_ref[...]
            v = jnp.dot(xf, wv_ref[...], preferred_element_type=jnp.float32) + bv_ref[...]
            kb = k.astype(jnp.bfloat16)
            vb = v.astype(jnp.bfloat16)
            for h in range(n_heads):                                   # one-time head split
                lo = h * head_dim
                k_hm[h] = kb[:, lo:lo + head_dim]
                v_hm[h] = vb[:, lo:lo + head_dim]

        # ---- Q projection for this query tile (scale folded into Wq/bq host-side) ----
        q_start = pl.multiple_of(qi * tq, tq)
        x_tile = x_ref[pl.ds(q_start, tq), :]                          # (tq, D) f32
        x_bf = x_tile.astype(jnp.bfloat16)
        q = jnp.dot(x_bf, wq_ref[...], preferred_element_type=jnp.float32) + bq_ref[...]
        qb = q.astype(jnp.bfloat16)
        for h in range(n_heads):
            lo = h * head_dim
            q_hm[h] = qb[:, lo:lo + head_dim]
        q_all = q_hm[...]                                              # (H, tq, hd) bf16

        # ---- head-batched flash-style attention (online softmax over KV tiles) ----
        m_i = None
        l_i = None
        acc = None
        for kv in range(n_kv_tiles):                                   # static, short, unrolled
            lo = kv * tk
            k_t = k_hm[:, lo:lo + tk, :]                               # (H, tk, hd) bf16
            v_t = v_hm[:, lo:lo + tk, :]
            s = jnp.einsum("hqd,hkd->hqk", q_all, k_t,
                           preferred_element_type=jnp.float32)         # pre-scaled Q
            m_t = jnp.max(s, axis=-1, keepdims=True)
            if kv == 0:
                m_i = m_t
                p = jnp.exp(s - m_i)
                l_i = jnp.sum(p, axis=-1, keepdims=True)
                acc = jnp.einsum("hqk,hkd->hqd", p.astype(jnp.bfloat16), v_t,
                                 preferred_element_type=jnp.float32)
            else:
                m_new = jnp.maximum(m_i, m_t)
                alpha = jnp.exp(m_i - m_new)
                p = jnp.exp(s - m_new)
                l_i = alpha * l_i + jnp.sum(p, axis=-1, keepdims=True)
                acc = alpha * acc + jnp.einsum("hqk,hkd->hqd", p.astype(jnp.bfloat16), v_t,
                                               preferred_element_type=jnp.float32)
                m_i = m_new
        attn = acc * pl.reciprocal(l_i, approx=True)                   # (H, tq, hd) f32

        # recombine heads into a lane-dense (tq, D) slab via scratch stores
        for h in range(n_heads):
            lo = h * head_dim
            attn_sc[:, lo:lo + head_dim] = attn[h]
        attn_flat = attn_sc[...]                                       # (tq, D) f32

        # ---- residual + LayerNorm 1 (f32) ----
        x1 = _layer_norm(x_tile + attn_flat, g1_ref[...], be1_ref[...])
        x1_bf = x1.astype(jnp.bfloat16)

        # ---- FFN: Linear -> ReLU -> Linear, chunked over d_ff ----
        ff = jnp.zeros((tq, d_model), jnp.float32)
        for c in range(n_ff_chunks):
            lo = c * ff_chunk
            h1 = jnp.dot(x1_bf, w1_ref[:, lo:lo + ff_chunk],
                         preferred_element_type=jnp.float32) + b1_ref[:, lo:lo + ff_chunk]
            h1 = jnp.maximum(h1, 0.0).astype(jnp.bfloat16)
            ff = ff + jnp.dot(h1, w2_ref[lo:lo + ff_chunk, :],
                              preferred_element_type=jnp.float32)
        ff = ff + b2_ref[...]

        # ---- residual + LayerNorm 2 (f32) ----
        x2 = _layer_norm(x1 + ff, g2_ref[...], be2_ref[...])
        o_ref[...] = x2.astype(o_ref.dtype)

    return kernel


def _pick_tile(n, candidates):
    for c in candidates:
        if c <= n and n % c == 0:
            return c
    return n


def temporal_transformer_layer(x, params, n_heads):
    """x: (B, S, D) float32.  params: dict of weights (see init_params)."""
    B, S, D = x.shape
    d_ff = params["w1"].shape[-1]
    assert D % n_heads == 0, "d_model must be divisible by n_heads"
    head_dim = D // n_heads
    scale = 1.0 / math.sqrt(head_dim)

    tq = _pick_tile(S, (128, 64, 32, 16, 8))            # query tile (rows)
    tk = _pick_tile(S, (512, 256, 128, 64, 32, 16, 8))  # KV tile for online softmax
    ff_chunk = _pick_tile(d_ff, (1024, 512, 256, 128))  # d_ff chunk size

    kernel = _make_kernel(n_heads, head_dim, S, tq, tk, d_ff, ff_chunk)

    f32, bf16 = jnp.float32, jnp.bfloat16
    # Matmul operand weights in bf16 (f32 accumulation on the MXU);
    # biases / LayerNorm params stay f32.  Attention scale folded into Wq/bq.
    weight_args = [
        (params["wq"] * scale).astype(bf16), (params["bq"] * scale).reshape(1, D).astype(f32),
        params["wk"].astype(bf16), params["bk"].reshape(1, D).astype(f32),
        params["wv"].astype(bf16), params["bv"].reshape(1, D).astype(f32),
        params["w1"].astype(bf16), params["b1"].reshape(1, d_ff).astype(f32),
        params["w2"].astype(bf16), params["b2"].reshape(1, D).astype(f32),
        params["g1"].reshape(1, D).astype(f32), params["be1"].reshape(1, D).astype(f32),
        params["g2"].reshape(1, D).astype(f32), params["be2"].reshape(1, D).astype(f32),
    ]

    def full_spec(shape):
        nd = len(shape)
        return pl.BlockSpec(shape, lambda b, qi, _nd=nd: (0,) * _nd)

    in_specs = [pl.BlockSpec((None, S, D), lambda b, qi: (b, 0, 0))]   # full-seq x slab
    in_specs += [full_spec(w.shape) for w in weight_args]              # resident weights

    out_spec = pl.BlockSpec((None, tq, D), lambda b, qi: (b, qi, 0))

    return pl.pallas_call(
        kernel,
        out_shape=jax.ShapeDtypeStruct((B, S, D), x.dtype),
        grid_spec=pltpu.PrefetchScalarGridSpec(
            num_scalar_prefetch=0,
            grid=(B, S // tq),
            in_specs=in_specs,
            out_specs=out_spec,
            scratch_shapes=[
                pltpu.VMEM((n_heads, S, head_dim), bf16),   # K, head-major, per-batch
                pltpu.VMEM((n_heads, S, head_dim), bf16),   # V, head-major, per-batch
                pltpu.VMEM((n_heads, tq, head_dim), bf16),  # Q, head-major, per-tile
                pltpu.VMEM((tq, D), f32),                   # recombined attention out
            ],
        ),
        compiler_params=pltpu.CompilerParams(
            dimension_semantics=("parallel", "arbitrary"),
            vmem_limit_bytes=64 * 1024 * 1024,
        ),
    )(x, *weight_args)


def init_params(key, d_model, d_ff):
    ks = jax.random.split(key, 10)
    s = 0.05
    # Linear weights stored already transposed to (in, out) so the kernel does x @ W.
    return {
        "wq": jax.random.normal(ks[0], (d_model, d_model), jnp.float32) * s,
        "bq": jax.random.normal(ks[1], (d_model,), jnp.float32) * s,
        "wk": jax.random.normal(ks[2], (d_model, d_model), jnp.float32) * s,
        "bk": jax.random.normal(ks[3], (d_model,), jnp.float32) * s,
        "wv": jax.random.normal(ks[4], (d_model, d_model), jnp.float32) * s,
        "bv": jax.random.normal(ks[5], (d_model,), jnp.float32) * s,
        "w1": jax.random.normal(ks[6], (d_model, d_ff), jnp.float32) * s,
        "b1": jax.random.normal(ks[7], (d_ff,), jnp.float32) * s,
        "w2": jax.random.normal(ks[8], (d_ff, d_model), jnp.float32) * s,
        "b2": jax.random.normal(ks[9], (d_model,), jnp.float32) * s,
        "g1": jnp.ones((d_model,), jnp.float32),
        "be1": jnp.zeros((d_model,), jnp.float32),
        "g2": jnp.ones((d_model,), jnp.float32),
        "be2": jnp.zeros((d_model,), jnp.float32),
    }


def _reference(x, p, n_heads):
    # pure-JAX f32 reference mirroring the PyTorch forward
    B, S, D = x.shape
    hd = D // n_heads
    q = x @ p["wq"] + p["bq"]
    k = x @ p["wk"] + p["bk"]
    v = x @ p["wv"] + p["bv"]
    q = q.reshape(B, S, n_heads, hd).transpose(0, 2, 1, 3)
    k = k.reshape(B, S, n_heads, hd).transpose(0, 2, 1, 3)
    v = v.reshape(B, S, n_heads, hd).transpose(0, 2, 1, 3)
    attn = jax.nn.softmax(jnp.einsum("bhqd,bhkd->bhqk", q, k) / math.sqrt(hd), axis=-1)
    out = jnp.einsum("bhqk,bhkd->bhqd", attn, v).transpose(0, 2, 1, 3).reshape(B, S, D)

    def ln(y, g, b, eps=1e-5):
        mu = y.mean(-1, keepdims=True)
        var = ((y - mu) ** 2).mean(-1, keepdims=True)
        return (y - mu) / jnp.sqrt(var + eps) * g + b

    x1 = ln(x + out, p["g1"], p["be1"])
    ff = jnp.maximum(x1 @ p["w1"] + p["b1"], 0.0) @ p["w2"] + p["b2"]
    return ln(x1 + ff, p["g2"], p["be2"])


if __name__ == "__main__":
    # Small but TPU-friendly shapes: lane-dense d_model (=128), tiled seq (=256).
    B, S, D, H, DFF = 2, 256, 128, 4, 256
    key = jax.random.PRNGKey(0)
    kx, kp = jax.random.split(key)
    x = jax.random.normal(kx, (B, S, D), jnp.float32)
    params = init_params(kp, D, DFF)

    out = jax.block_until_ready(temporal_transformer_layer(x, params, H))
    assert out.shape == (B, S, D)

    ref = _reference(x, params, H)
    # bf16 MXU operands (f32 accumulation) => relaxed tolerance vs the pure-f32 reference.
    max_err = float(jnp.max(jnp.abs(out - ref)))
    assert max_err < 5e-2, f"mismatch vs reference: max|diff|={max_err}"
    print("KERNEL_OK")
</pallas_src>

<mosaic_0001>
module attributes {stable_mosaic.version = 11 : i64} {
  func.func @kernel(%arg0: i32, %arg1: i32, %arg2: memref<1x256x128xf32, #tpu.memory_space<vmem>>, %arg3: memref<128x128xbf16, #tpu.memory_space<vmem>>, %arg4: memref<1x128xf32, #tpu.memory_space<vmem>>, %arg5: memref<128x128xbf16, #tpu.memory_space<vmem>>, %arg6: memref<1x128xf32, #tpu.memory_space<vmem>>, %arg7: memref<128x128xbf16, #tpu.memory_space<vmem>>, %arg8: memref<1x128xf32, #tpu.memory_space<vmem>>, %arg9: memref<128x256xbf16, #tpu.memory_space<vmem>>, %arg10: memref<1x256xf32, #tpu.memory_space<vmem>>, %arg11: memref<256x128xbf16, #tpu.memory_space<vmem>>, %arg12: memref<1x128xf32, #tpu.memory_space<vmem>>, %arg13: memref<1x128xf32, #tpu.memory_space<vmem>>, %arg14: memref<1x128xf32, #tpu.memory_space<vmem>>, %arg15: memref<1x128xf32, #tpu.memory_space<vmem>>, %arg16: memref<1x128xf32, #tpu.memory_space<vmem>>, %arg17: memref<1x128x128xf32, #tpu.memory_space<vmem>>, %arg18: memref<4x256x32xbf16, #tpu.memory_space<vmem>>, %arg19: memref<4x256x32xbf16, #tpu.memory_space<vmem>>, %arg20: memref<4x128x32xbf16, #tpu.memory_space<vmem>>, %arg21: memref<128x128xf32, #tpu.memory_space<vmem>>) attributes {dimension_semantics = [#tpu.dimension_semantics<parallel>, #tpu.dimension_semantics<arbitrary>], iteration_bounds = array<i64: 2, 2>, scalar_prefetch = 0 : i64, scratch_operands = 4 : i64, tpu.core_type = #tpu.core_type<tc>, window_params = [{transform_indices = @transform_0, window_bounds = array<i64: 1, 256, 128>}, {pipeline_mode = #tpu.pipeline_mode<synchronous>, transform_indices = @transform_1, window_bounds = array<i64: 128, 128>}, {pipeline_mode = #tpu.pipeline_mode<synchronous>, transform_indices = @transform_2, window_bounds = array<i64: 1, 128>}, {pipeline_mode = #tpu.pipeline_mode<synchronous>, transform_indices = @transform_3, window_bounds = array<i64: 128, 128>}, {pipeline_mode = #tpu.pipeline_mode<synchronous>, transform_indices = @transform_4, window_bounds = array<i64: 1, 128>}, {pipeline_mode = #tpu.pipeline_mode<synchronous>, transform_indices = @transform_5, window_bounds = array<i64: 128, 128>}, {pipeline_mode = #tpu.pipeline_mode<synchronous>, transform_indices = @transform_6, window_bounds = array<i64: 1, 128>}, {pipeline_mode = #tpu.pipeline_mode<synchronous>, transform_indices = @transform_7, window_bounds = array<i64: 128, 256>}, {pipeline_mode = #tpu.pipeline_mode<synchronous>, transform_indices = @transform_8, window_bounds = array<i64: 1, 256>}, {pipeline_mode = #tpu.pipeline_mode<synchronous>, transform_indices = @transform_9, window_bounds = array<i64: 256, 128>}, {pipeline_mode = #tpu.pipeline_mode<synchronous>, transform_indices = @transform_10, window_bounds = array<i64: 1, 128>}, {pipeline_mode = #tpu.pipeline_mode<synchronous>, transform_indices = @transform_11, window_bounds = array<i64: 1, 128>}, {pipeline_mode = #tpu.pipeline_mode<synchronous>, transform_indices = @transform_12, window_bounds = array<i64: 1, 128>}, {pipeline_mode = #tpu.pipeline_mode<synchronous>, transform_indices = @transform_13, window_bounds = array<i64: 1, 128>}, {pipeline_mode = #tpu.pipeline_mode<synchronous>, transform_indices = @transform_14, window_bounds = array<i64: 1, 128>}, {transform_indices = @transform_15, window_bounds = array<i64: 1, 128, 128>}]} {
    %c0_i32 = arith.constant 0 : i32
    %0 = arith.cmpi eq, %arg1, %c0_i32 : i32
    %1 = arith.extui %0 : i1 to i32
    %c0_i32_0 = arith.constant 0 : i32
    %2 = arith.cmpi ne, %1, %c0_i32_0 : i32
    scf.if %2 {
      %c0_68 = arith.constant 0 : index
      %c0_69 = arith.constant 0 : index
      %c0_70 = arith.constant 0 : index
      %125 = vector.load %arg2[%c0_68, %c0_69, %c0_70] : memref<1x256x128xf32, #tpu.memory_space<vmem>>, vector<1x256x128xf32>
      %126 = vector.shape_cast %125 : vector<1x256x128xf32> to vector<256x128xf32>
      %127 = arith.truncf %126 : vector<256x128xf32> to vector<256x128xbf16>
      %c0_71 = arith.constant 0 : index
      %c0_72 = arith.constant 0 : index
      %128 = vector.load %arg5[%c0_71, %c0_72] : memref<128x128xbf16, #tpu.memory_space<vmem>>, vector<128x128xbf16>
      %cst_73 = arith.constant dense<0.000000e+00> : vector<256x128xf32>
      %129 = tpu.matmul %127, %128, %cst_73 {dimension_numbers = #tpu.dot_dimension_numbers<[1], [0], [0], [1], [0, 0, 1, 1], [], []>} : vector<256x128xbf16>, vector<128x128xbf16>, vector<256x128xf32> -> vector<256x128xf32>
      %c0_74 = arith.constant 0 : index
      %c0_75 = arith.constant 0 : index
      %130 = vector.load %arg6[%c0_74, %c0_75] : memref<1x128xf32, #tpu.memory_space<vmem>>, vector<1x128xf32>
      %131 = vector.broadcast %130 : vector<1x128xf32> to vector<256x128xf32>
      %132 = arith.addf %129, %131 : vector<256x128xf32>
      %c0_76 = arith.constant 0 : index
      %c0_77 = arith.constant 0 : index
      %133 = vector.load %arg7[%c0_76, %c0_77] : memref<128x128xbf16, #tpu.memory_space<vmem>>, vector<128x128xbf16>
      %cst_78 = arith.constant dense<0.000000e+00> : vector<256x128xf32>
      %134 = tpu.matmul %127, %133, %cst_78 {dimension_numbers = #tpu.dot_dimension_numbers<[1], [0], [0], [1], [0, 0, 1, 1], [], []>} : vector<256x128xbf16>, vector<128x128xbf16>, vector<256x128xf32> -> vector<256x128xf32>
      %c0_79 = arith.constant 0 : index
      %c0_80 = arith.constant 0 : index
      %135 = vector.load %arg8[%c0_79, %c0_80] : memref<1x128xf32, #tpu.memory_space<vmem>>, vector<1x128xf32>
      %136 = vector.broadcast %135 : vector<1x128xf32> to vector<256x128xf32>
      %137 = arith.addf %134, %136 : vector<256x128xf32>
      %138 = arith.truncf %132 : vector<256x128xf32> to vector<256x128xbf16>
      %139 = arith.truncf %137 : vector<256x128xf32> to vector<256x128xbf16>
      %140 = vector.extract_strided_slice %138 {offsets = [0, 0], sizes = [256, 32], strides = [1, 1]} : vector<256x128xbf16> to vector<256x32xbf16>
      %c0_81 = arith.constant 0 : index
      %c0_82 = arith.constant 0 : index
      %c0_83 = arith.constant 0 : index
      %141 = vector.load %arg18[%c0_81, %c0_82, %c0_83] : memref<4x256x32xbf16, #tpu.memory_space<vmem>>, vector<1x256x32xbf16>
      %142 = vector.shape_cast %141 : vector<1x256x32xbf16> to vector<256x32xbf16>
      %143 = vector.shape_cast %140 : vector<256x32xbf16> to vector<1x256x32xbf16>
      tpu.vector_store %arg18[%c0_81, %c0_82, %c0_83], %143 {strides = array<i32>} : memref<4x256x32xbf16, #tpu.memory_space<vmem>>, vector<1x256x32xbf16>,
      %144 = vector.extract_strided_slice %139 {offsets = [0, 0], sizes = [256, 32], strides = [1, 1]} : vector<256x128xbf16> to vector<256x32xbf16>
      %c0_84 = arith.constant 0 : index
      %c0_85 = arith.constant 0 : index
      %c0_86 = arith.constant 0 : index
      %145 = vector.load %arg19[%c0_84, %c0_85, %c0_86] : memref<4x256x32xbf16, #tpu.memory_space<vmem>>, vector<1x256x32xbf16>
      %146 = vector.shape_cast %145 : vector<1x256x32xbf16> to vector<256x32xbf16>
      %147 = vector.shape_cast %144 : vector<256x32xbf16> to vector<1x256x32xbf16>
      tpu.vector_store %arg19[%c0_84, %c0_85, %c0_86], %147 {strides = array<i32>} : memref<4x256x32xbf16, #tpu.memory_space<vmem>>, vector<1x256x32xbf16>,
      %148 = vector.extract_strided_slice %138 {offsets = [0, 32], sizes = [256, 32], strides = [1, 1]} : vector<256x128xbf16> to vector<256x32xbf16>
      %c1_87 = arith.constant 1 : index
      %c0_88 = arith.constant 0 : index
      %c0_89 = arith.constant 0 : index
      %149 = vector.load %arg18[%c1_87, %c0_88, %c0_89] : memref<4x256x32xbf16, #tpu.memory_space<vmem>>, vector<1x256x32xbf16>
      %150 = vector.shape_cast %149 : vector<1x256x32xbf16> to vector<256x32xbf16>
      %151 = vector.shape_cast %148 : vector<256x32xbf16> to vector<1x256x32xbf16>
      tpu.vector_store %arg18[%c1_87, %c0_88, %c0_89], %151 {strides = array<i32>} : memref<4x256x32xbf16, #tpu.memory_space<vmem>>, vector<1x256x32xbf16>,
      %152 = vector.extract_strided_slice %139 {offsets = [0, 32], sizes = [256, 32], strides = [1, 1]} : vector<256x128xbf16> to vector<256x32xbf16>
      %c1_90 = arith.constant 1 : index
      %c0_91 = arith.constant 0 : index
      %c0_92 = arith.constant 0 : index
      %153 = vector.load %arg19[%c1_90, %c0_91, %c0_92] : memref<4x256x32xbf16, #tpu.memory_space<vmem>>, vector<1x256x32xbf16>
      %154 = vector.shape_cast %153 : vector<1x256x32xbf16> to vector<256x32xbf16>
      %155 = vector.shape_cast %152 : vector<256x32xbf16> to vector<1x256x32xbf16>
      tpu.vector_store %arg19[%c1_90, %c0_91, %c0_92], %155 {strides = array<i32>} : memref<4x256x32xbf16, #tpu.memory_space<vmem>>, vector<1x256x32xbf16>,
      %156 = vector.extract_strided_slice %138 {offsets = [0, 64], sizes = [256, 32], strides = [1, 1]} : vector<256x128xbf16> to vector<256x32xbf16>
      %c2_93 = arith.constant 2 : index
      %c0_94 = arith.constant 0 : index
      %c0_95 = arith.constant 0 : index
      %157 = vector.load %arg18[%c2_93, %c0_94, %c0_95] : memref<4x256x32xbf16, #tpu.memory_space<vmem>>, vector<1x256x32xbf16>
      %158 = vector.shape_cast %157 : vector<1x256x32xbf16> to vector<256x32xbf16>
      %159 = vector.shape_cast %156 : vector<256x32xbf16> to vector<1x256x32xbf16>
      tpu.vector_store %arg18[%c2_93, %c0_94, %c0_95], %159 {strides = array<i32>} : memref<4x256x32xbf16, #tpu.memory_space<vmem>>, vector<1x256x32xbf16>,
      %160 = vector.extract_strided_slice %139 {offsets = [0, 64], sizes = [256, 32], strides = [1, 1]} : vector<256x128xbf16> to vector<256x32xbf16>
      %c2_96 = arith.constant 2 : index
      %c0_97 = arith.constant 0 : index
      %c0_98 = arith.constant 0 : index
      %161 = vector.load %arg19[%c2_96, %c0_97, %c0_98] : memref<4x256x32xbf16, #tpu.memory_space<vmem>>, vector<1x256x32xbf16>
      %162 = vector.shape_cast %161 : vector<1x256x32xbf16> to vector<256x32xbf16>
      %163 = vector.shape_cast %160 : vector<256x32xbf16> to vector<1x256x32xbf16>
      tpu.vector_store %arg19[%c2_96, %c0_97, %c0_98], %163 {strides = array<i32>} : memref<4x256x32xbf16, #tpu.memory_space<vmem>>, vector<1x256x32xbf16>,
      %164 = vector.extract_strided_slice %138 {offsets = [0, 96], sizes = [256, 32], strides = [1, 1]} : vector<256x128xbf16> to vector<256x32xbf16>
      %c3_99 = arith.constant 3 : index
      %c0_100 = arith.constant 0 : index
      %c0_101 = arith.constant 0 : index
      %165 = vector.load %arg18[%c3_99, %c0_100, %c0_101] : memref<4x256x32xbf16, #tpu.memory_space<vmem>>, vector<1x256x32xbf16>
      %166 = vector.shape_cast %165 : vector<1x256x32xbf16> to vector<256x32xbf16>
      %167 = vector.shape_cast %164 : vector<256x32xbf16> to vector<1x256x32xbf16>
      tpu.vector_store %arg18[%c3_99, %c0_100, %c0_101], %167 {strides = array<i32>} : memref<4x256x32xbf16, #tpu.memory_space<vmem>>, vector<1x256x32xbf16>,
      %168 = vector.extract_strided_slice %139 {offsets = [0, 96], sizes = [256, 32], strides = [1, 1]} : vector<256x128xbf16> to vector<256x32xbf16>
      %c3_102 = arith.constant 3 : index
      %c0_103 = arith.constant 0 : index
      %c0_104 = arith.constant 0 : index
      %169 = vector.load %arg19[%c3_102, %c0_103, %c0_104] : memref<4x256x32xbf16, #tpu.memory_space<vmem>>, vector<1x256x32xbf16>
      %170 = vector.shape_cast %169 : vector<1x256x32xbf16> to vector<256x32xbf16>
      %171 = vector.shape_cast %168 : vector<256x32xbf16> to vector<1x256x32xbf16>
      tpu.vector_store %arg19[%c3_102, %c0_103, %c0_104], %171 {strides = array<i32>} : memref<4x256x32xbf16, #tpu.memory_space<vmem>>, vector<1x256x32xbf16>,
    } else {
    }
    %c128_i32 = arith.constant 128 : i32
    %3 = arith.muli %arg1, %c128_i32 : i32
    %4 = tpu.assume_multiple %3, 128 : i32
    %c0 = arith.constant 0 : index
    %5 = arith.index_cast %4 : i32 to index
    %c0_1 = arith.constant 0 : index
    %6 = vector.load %arg2[%c0, %5, %c0_1] : memref<1x256x128xf32, #tpu.memory_space<vmem>>, vector<1x128x128xf32>
    %7 = vector.shape_cast %6 : vector<1x128x128xf32> to vector<128x128xf32>
    %8 = arith.truncf %7 : vector<128x128xf32> to vector<128x128xbf16>
    %c0_2 = arith.constant 0 : index
    %c0_3 = arith.constant 0 : index
    %9 = vector.load %arg3[%c0_2, %c0_3] : memref<128x128xbf16, #tpu.memory_space<vmem>>, vector<128x128xbf16>
    %cst = arith.constant dense<0.000000e+00> : vector<128x128xf32>
    %10 = tpu.matmul %8, %9, %cst {dimension_numbers = #tpu.dot_dimension_numbers<[1], [0], [0], [1], [0, 0, 1, 1], [], []>} : vector<128x128xbf16>, vector<128x128xbf16>, vector<128x128xf32> -> vector<128x128xf32>
    %c0_4 = arith.constant 0 : index
    %c0_5 = arith.constant 0 : index
    %11 = vector.load %arg4[%c0_4, %c0_5] : memref<1x128xf32, #tpu.memory_space<vmem>>, vector<1x128xf32>
    %12 = vector.broadcast %11 : vector<1x128xf32> to vector<128x128xf32>
    %13 = arith.addf %10, %12 : vector<128x128xf32>
    %14 = arith.truncf %13 : vector<128x128xf32> to vector<128x128xbf16>
    %15 = vector.extract_strided_slice %14 {offsets = [0, 0], sizes = [128, 32], strides = [1, 1]} : vector<128x128xbf16> to vector<128x32xbf16>
    %c0_6 = arith.constant 0 : index
    %c0_7 = arith.constant 0 : index
    %c0_8 = arith.constant 0 : index
    %16 = vector.load %arg20[%c0_6, %c0_7, %c0_8] : memref<4x128x32xbf16, #tpu.memory_space<vmem>>, vector<1x128x32xbf16>
    %17 = vector.shape_cast %16 : vector<1x128x32xbf16> to vector<128x32xbf16>
    %18 = vector.shape_cast %15 : vector<128x32xbf16> to vector<1x128x32xbf16>
    tpu.vector_store %arg20[%c0_6, %c0_7, %c0_8], %18 {strides = array<i32>} : memref<4x128x32xbf16, #tpu.memory_space<vmem>>, vector<1x128x32xbf16>,
    %19 = vector.extract_strided_slice %14 {offsets = [0, 32], sizes = [128, 32], strides = [1, 1]} : vector<128x128xbf16> to vector<128x32xbf16>
    %c1 = arith.constant 1 : index
    %c0_9 = arith.constant 0 : index
    %c0_10 = arith.constant 0 : index
    %20 = vector.load %arg20[%c1, %c0_9, %c0_10] : memref<4x128x32xbf16, #tpu.memory_space<vmem>>, vector<1x128x32xbf16>
    %21 = vector.shape_cast %20 : vector<1x128x32xbf16> to vector<128x32xbf16>
    %22 = vector.shape_cast %19 : vector<128x32xbf16> to vector<1x128x32xbf16>
    tpu.vector_store %arg20[%c1, %c0_9, %c0_10], %22 {strides = array<i32>} : memref<4x128x32xbf16, #tpu.memory_space<vmem>>, vector<1x128x32xbf16>,
    %23 = vector.extract_strided_slice %14 {offsets = [0, 64], sizes = [128, 32], strides = [1, 1]} : vector<128x128xbf16> to vector<128x32xbf16>
    %c2 = arith.constant 2 : index
    %c0_11 = arith.constant 0 : index
    %c0_12 = arith.constant 0 : index
    %24 = vector.load %arg20[%c2, %c0_11, %c0_12] : memref<4x128x32xbf16, #tpu.memory_space<vmem>>, vector<1x128x32xbf16>
    %25 = vector.shape_cast %24 : vector<1x128x32xbf16> to vector<128x32xbf16>
    %26 = vector.shape_cast %23 : vector<128x32xbf16> to vector<1x128x32xbf16>
    tpu.vector_store %arg20[%c2, %c0_11, %c0_12], %26 {strides = array<i32>} : memref<4x128x32xbf16, #tpu.memory_space<vmem>>, vector<1x128x32xbf16>,
    %27 = vector.extract_strided_slice %14 {offsets = [0, 96], sizes = [128, 32], strides = [1, 1]} : vector<128x128xbf16> to vector<128x32xbf16>
    %c3 = arith.constant 3 : index
    %c0_13 = arith.constant 0 : index
    %c0_14 = arith.constant 0 : index
    %28 = vector.load %arg20[%c3, %c0_13, %c0_14] : memref<4x128x32xbf16, #tpu.memory_space<vmem>>, vector<1x128x32xbf16>
    %29 = vector.shape_cast %28 : vector<1x128x32xbf16> to vector<128x32xbf16>
    %30 = vector.shape_cast %27 : vector<128x32xbf16> to vector<1x128x32xbf16>
    tpu.vector_store %arg20[%c3, %c0_13, %c0_14], %30 {strides = array<i32>} : memref<4x128x32xbf16, #tpu.memory_space<vmem>>, vector<1x128x32xbf16>,
    %c0_15 = arith.constant 0 : index
    %c0_16 = arith.constant 0 : index
    %c0_17 = arith.constant 0 : index
    %31 = vector.load %arg20[%c0_15, %c0_16, %c0_17] : memref<4x128x32xbf16, #tpu.memory_space<vmem>>, vector<4x128x32xbf16>
    %c0_18 = arith.constant 0 : index
    %c0_19 = arith.constant 0 : index
    %c0_20 = arith.constant 0 : index
    %32 = vector.load %arg18[%c0_18, %c0_19, %c0_20] : memref<4x256x32xbf16, #tpu.memory_space<vmem>>, vector<4x256x32xbf16>
    %c0_21 = arith.constant 0 : index
    %c0_22 = arith.constant 0 : index
    %c0_23 = arith.constant 0 : index
    %33 = vector.load %arg19[%c0_21, %c0_22, %c0_23] : memref<4x256x32xbf16, #tpu.memory_space<vmem>>, vector<4x256x32xbf16>
    "tpu.trace_start"() <{level = 10 : i32, message = "hqd,hkd->hqk"}> : () -> ()
    %cst_24 = arith.constant dense<0.000000e+00> : vector<4x128x256xf32>
    %34 = tpu.matmul %31, %32, %cst_24 {dimension_numbers = #tpu.dot_dimension_numbers<[2], [2], [1], [1], [0, 0, 0, 1, 1, 1], [0], [0]>} : vector<4x128x32xbf16>, vector<4x256x32xbf16>, vector<4x128x256xf32> -> vector<4x128x256xf32>
    "tpu.trace_stop"() : () -> ()
    %cst_25 = arith.constant dense<0xFF800000> : vector<4x128xf32>
    %35 = vector.multi_reduction <maximumf>, %34, %cst_25 [2] : vector<4x128x256xf32> to vector<4x128xf32>
    %36 = vector.shape_cast %35 : vector<4x128xf32> to vector<4x128x1xf32>
    %37 = vector.broadcast %36 : vector<4x128x1xf32> to vector<4x128x256xf32>
    %38 = arith.subf %34, %37 : vector<4x128x256xf32>
    %39 = math.exp %38 : vector<4x128x256xf32>
    %cst_26 = arith.constant dense<0.000000e+00> : vector<4x128xf32>
    %40 = vector.multi_reduction <add>, %39, %cst_26 [2] : vector<4x128x256xf32> to vector<4x128xf32>
    %41 = vector.shape_cast %40 : vector<4x128xf32> to vector<4x128x1xf32>
    %42 = arith.truncf %39 : vector<4x128x256xf32> to vector<4x128x256xbf16>
    "tpu.trace_start"() <{level = 10 : i32, message = "hqk,hkd->hqd"}> : () -> ()
    %cst_27 = arith.constant dense<0.000000e+00> : vector<4x128x32xf32>
    %43 = tpu.matmul %42, %33, %cst_27 {dimension_numbers = #tpu.dot_dimension_numbers<[2], [1], [1], [2], [0, 0, 0, 1, 1, 2], [0], [0]>} : vector<4x128x256xbf16>, vector<4x256x32xbf16>, vector<4x128x32xf32> -> vector<4x128x32xf32>
    "tpu.trace_stop"() : () -> ()
    %44 = tpu.reciprocal %41 {approx = true} : vector<4x128x1xf32> -> vector<4x128x1xf32>
    %45 = vector.broadcast %44 : vector<4x128x1xf32> to vector<4x128x32xf32>
    %46 = arith.mulf %43, %45 : vector<4x128x32xf32>
    %47 = vector.extract_strided_slice %46 {offsets = [0, 0, 0], sizes = [1, 128, 32], strides = [1, 1, 1]} : vector<4x128x32xf32> to vector<1x128x32xf32>
    %48 = vector.shape_cast %47 : vector<1x128x32xf32> to vector<128x32xf32>
    %c0_28 = arith.constant 0 : index
    %c0_29 = arith.constant 0 : index
    %49 = vector.load %arg21[%c0_28, %c0_29] : memref<128x128xf32, #tpu.memory_space<vmem>>, vector<128x32xf32>
    tpu.vector_store %arg21[%c0_28, %c0_29], %48 {strides = array<i32>} : memref<128x128xf32, #tpu.memory_space<vmem>>, vector<128x32xf32>,
    %50 = vector.extract_strided_slice %46 {offsets = [1, 0, 0], sizes = [1, 128, 32], strides = [1, 1, 1]} : vector<4x128x32xf32> to vector<1x128x32xf32>
    %51 = vector.shape_cast %50 : vector<1x128x32xf32> to vector<128x32xf32>
    %c0_30 = arith.constant 0 : index
    %c32 = arith.constant 32 : index
    %52 = vector.load %arg21[%c0_30, %c32] : memref<128x128xf32, #tpu.memory_space<vmem>>, vector<128x32xf32>
    tpu.vector_store %arg21[%c0_30, %c32], %51 {strides = array<i32>} : memref<128x128xf32, #tpu.memory_space<vmem>>, vector<128x32xf32>,
    %53 = vector.extract_strided_slice %46 {offsets = [2, 0, 0], sizes = [1, 128, 32], strides = [1, 1, 1]} : vector<4x128x32xf32> to vector<1x128x32xf32>
    %54 = vector.shape_cast %53 : vector<1x128x32xf32> to vector<128x32xf32>
    %c0_31 = arith.constant 0 : index
    %c64 = arith.constant 64 : index
    %55 = vector.load %arg21[%c0_31, %c64] : memref<128x128xf32, #tpu.memory_space<vmem>>, vector<128x32xf32>
    tpu.vector_store %arg21[%c0_31, %c64], %54 {strides = array<i32>} : memref<128x128xf32, #tpu.memory_space<vmem>>, vector<128x32xf32>,
    %56 = vector.extract_strided_slice %46 {offsets = [3, 0, 0], sizes = [1, 128, 32], strides = [1, 1, 1]} : vector<4x128x32xf32> to vector<1x128x32xf32>
    %57 = vector.shape_cast %56 : vector<1x128x32xf32> to vector<128x32xf32>
    %c0_32 = arith.constant 0 : index
    %c96 = arith.constant 96 : index
    %58 = vector.load %arg21[%c0_32, %c96] : memref<128x128xf32, #tpu.memory_space<vmem>>, vector<128x32xf32>
    tpu.vector_store %arg21[%c0_32, %c96], %57 {strides = array<i32>} : memref<128x128xf32, #tpu.memory_space<vmem>>, vector<128x32xf32>,
    %c0_33 = arith.constant 0 : index
    %c0_34 = arith.constant 0 : index
    %59 = vector.load %arg21[%c0_33, %c0_34] : memref<128x128xf32, #tpu.memory_space<vmem>>, vector<128x128xf32>
    %60 = arith.addf %7, %59 : vector<128x128xf32>
    %c0_35 = arith.constant 0 : index
    %c0_36 = arith.constant 0 : index
    %61 = vector.load %arg13[%c0_35, %c0_36] : memref<1x128xf32, #tpu.memory_space<vmem>>, vector<1x128xf32>
    %c0_37 = arith.constant 0 : index
    %c0_38 = arith.constant 0 : index
    %62 = vector.load %arg14[%c0_37, %c0_38] : memref<1x128xf32, #tpu.memory_space<vmem>>, vector<1x128xf32>
    %cst_39 = arith.constant dense<0.000000e+00> : vector<128xf32>
    %63 = vector.multi_reduction <add>, %60, %cst_39 [1] : vector<128x128xf32> to vector<128xf32>
    %64 = vector.shape_cast %63 : vector<128xf32> to vector<128x1xf32>
    %cst_40 = arith.constant 1.280000e+02 : f32
    %65 = vector.broadcast %cst_40 : f32 to vector<128x1xf32>
    %66 = arith.divf %64, %65 : vector<128x1xf32>
    %67 = vector.broadcast %66 : vector<128x1xf32> to vector<128x128xf32>
    %68 = arith.subf %60, %67 : vector<128x128xf32>
    %69 = arith.mulf %68, %68 : vector<128x128xf32>
    %cst_41 = arith.constant dense<0.000000e+00> : vector<128xf32>
    %70 = vector.multi_reduction <add>, %69, %cst_41 [1] : vector<128x128xf32> to vector<128xf32>
    %71 = vector.shape_cast %70 : vector<128xf32> to vector<128x1xf32>
    %cst_42 = arith.constant 1.280000e+02 : f32
    %72 = vector.broadcast %cst_42 : f32 to vector<128x1xf32>
    %73 = arith.divf %71, %72 : vector<128x1xf32>
    %cst_43 = arith.constant 9.99999974E-6 : f32
    %74 = vector.broadcast %cst_43 : f32 to vector<128x1xf32>
    %75 = arith.addf %73, %74 : vector<128x1xf32>
    %76 = math.rsqrt %75 : vector<128x1xf32>
    %77 = vector.broadcast %76 : vector<128x1xf32> to vector<128x128xf32>
    %78 = arith.mulf %68, %77 : vector<128x128xf32>
    %79 = vector.broadcast %61 : vector<1x128xf32> to vector<128x128xf32>
    %80 = arith.mulf %78, %79 : vector<128x128xf32>
    %81 = vector.broadcast %62 : vector<1x128xf32> to vector<128x128xf32>
    %82 = arith.addf %80, %81 : vector<128x128xf32>
    %83 = arith.truncf %82 : vector<128x128xf32> to vector<128x128xbf16>
    %cst_44 = arith.constant 0.000000e+00 : f32
    %84 = vector.broadcast %cst_44 : f32 to vector<128x128xf32>
    %c0_45 = arith.constant 0 : index
    %c0_46 = arith.constant 0 : index
    %85 = vector.load %arg9[%c0_45, %c0_46] : memref<128x256xbf16, #tpu.memory_space<vmem>>, vector<128x256xbf16>
    %cst_47 = arith.constant dense<0.000000e+00> : vector<128x256xf32>
    %86 = tpu.matmul %83, %85, %cst_47 {dimension_numbers = #tpu.dot_dimension_numbers<[1], [0], [0], [1], [0, 0, 1, 1], [], []>} : vector<128x128xbf16>, vector<128x256xbf16>, vector<128x256xf32> -> vector<128x256xf32>
    %c0_48 = arith.constant 0 : index
    %c0_49 = arith.constant 0 : index
    %87 = vector.load %arg10[%c0_48, %c0_49] : memref<1x256xf32, #tpu.memory_space<vmem>>, vector<1x256xf32>
    %88 = vector.broadcast %87 : vector<1x256xf32> to vector<128x256xf32>
    %89 = arith.addf %86, %88 : vector<128x256xf32>
    %cst_50 = arith.constant 0.000000e+00 : f32
    %90 = vector.broadcast %cst_50 : f32 to vector<128x256xf32>
    %91 = arith.maximumf %89, %90 : vector<128x256xf32>
    %92 = arith.truncf %91 : vector<128x256xf32> to vector<128x256xbf16>
    %c0_51 = arith.constant 0 : index
    %c0_52 = arith.constant 0 : index
    %93 = vector.load %arg11[%c0_51, %c0_52] : memref<256x128xbf16, #tpu.memory_space<vmem>>, vector<256x128xbf16>
    %cst_53 = arith.constant dense<0.000000e+00> : vector<128x128xf32>
    %94 = tpu.matmul %92, %93, %cst_53 {dimension_numbers = #tpu.dot_dimension_numbers<[1], [0], [0], [1], [0, 0, 1, 1], [], []>} : vector<128x256xbf16>, vector<256x128xbf16>, vector<128x128xf32> -> vector<128x128xf32>
    %95 = arith.addf %84, %94 : vector<128x128xf32>
    %c0_54 = arith.constant 0 : index
    %c0_55 = arith.constant 0 : index
    %96 = vector.load %arg12[%c0_54, %c0_55] : memref<1x128xf32, #tpu.memory_space<vmem>>, vector<1x128xf32>
    %97 = vector.broadcast %96 : vector<1x128xf32> to vector<128x128xf32>
    %98 = arith.addf %95, %97 : vector<128x128xf32>
    %99 = arith.addf %82, %98 : vector<128x128xf32>
    %c0_56 = arith.constant 0 : index
    %c0_57 = arith.constant 0 : index
    %100 = vector.load %arg15[%c0_56, %c0_57] : memref<1x128xf32, #tpu.memory_space<vmem>>, vector<1x128xf32>
    %c0_58 = arith.constant 0 : index
    %c0_59 = arith.constant 0 : index
    %101 = vector.load %arg16[%c0_58, %c0_59] : memref<1x128xf32, #tpu.memory_space<vmem>>, vector<1x128xf32>
    %cst_60 = arith.constant dense<0.000000e+00> : vector<128xf32>
    %102 = vector.multi_reduction <add>, %99, %cst_60 [1] : vector<128x128xf32> to vector<128xf32>
    %103 = vector.shape_cast %102 : vector<128xf32> to vector<128x1xf32>
    %cst_61 = arith.constant 1.280000e+02 : f32
    %104 = vector.broadcast %cst_61 : f32 to vector<128x1xf32>
    %105 = arith.divf %103, %104 : vector<128x1xf32>
    %106 = vector.broadcast %105 : vector<128x1xf32> to vector<128x128xf32>
    %107 = arith.subf %99, %106 : vector<128x128xf32>
    %108 = arith.mulf %107, %107 : vector<128x128xf32>
    %cst_62 = arith.constant dense<0.000000e+00> : vector<128xf32>
    %109 = vector.multi_reduction <add>, %108, %cst_62 [1] : vector<128x128xf32> to vector<128xf32>
    %110 = vector.shape_cast %109 : vector<128xf32> to vector<128x1xf32>
    %cst_63 = arith.constant 1.280000e+02 : f32
    %111 = vector.broadcast %cst_63 : f32 to vector<128x1xf32>
    %112 = arith.divf %110, %111 : vector<128x1xf32>
    %cst_64 = arith.constant 9.99999974E-6 : f32
    %113 = vector.broadcast %cst_64 : f32 to vector<128x1xf32>
    %114 = arith.addf %112, %113 : vector<128x1xf32>
    %115 = math.rsqrt %114 : vector<128x1xf32>
    %116 = vector.broadcast %115 : vector<128x1xf32> to vector<128x128xf32>
    %117 = arith.mulf %107, %116 : vector<128x128xf32>
    %118 = vector.broadcast %100 : vector<1x128xf32> to vector<128x128xf32>
    %119 = arith.mulf %117, %118 : vector<128x128xf32>
    %120 = vector.broadcast %101 : vector<1x128xf32> to vector<128x128xf32>
    %121 = arith.addf %119, %120 : vector<128x128xf32>
    %c0_65 = arith.constant 0 : index
    %c0_66 = arith.constant 0 : index
    %c0_67 = arith.constant 0 : index
    %122 = vector.load %arg17[%c0_65, %c0_66, %c0_67] : memref<1x128x128xf32, #tpu.memory_space<vmem>>, vector<1x128x128xf32>
    %123 = vector.shape_cast %122 : vector<1x128x128xf32> to vector<128x128xf32>
    %124 = vector.shape_cast %121 : vector<128x128xf32> to vector<1x128x128xf32>
    tpu.vector_store %arg17[%c0_65, %c0_66, %c0_67], %124 {strides = array<i32>} : memref<1x128x128xf32, #tpu.memory_space<vmem>>, vector<1x128x128xf32>,
    return
  }
  func.func @transform_0(%arg0: i32, %arg1: i32) -> (i32, i32, i32) {
    %c0_i32 = arith.constant 0 : i32
    %c0_i32_0 = arith.constant 0 : i32
    %c0_i32_1 = arith.constant 0 : i32
    return %arg0, %c0_i32, %c0_i32_0 : i32, i32, i32
  }
  func.func @transform_1(%arg0: i32, %arg1: i32) -> (i32, i32) {
    %c0_i32 = arith.constant 0 : i32
    %c0_i32_0 = arith.constant 0 : i32
    %c0_i32_1 = arith.constant 0 : i32
    return %c0_i32, %c0_i32_0 : i32, i32
  }
  func.func @transform_2(%arg0: i32, %arg1: i32) -> (i32, i32) {
    %c0_i32 = arith.constant 0 : i32
    %c0_i32_0 = arith.constant 0 : i32
    %c0_i32_1 = arith.constant 0 : i32
    return %c0_i32, %c0_i32_0 : i32, i32
  }
  func.func @transform_3(%arg0: i32, %arg1: i32) -> (i32, i32) {
    %c0_i32 = arith.constant 0 : i32
    %c0_i32_0 = arith.constant 0 : i32
    %c0_i32_1 = arith.constant 0 : i32
    return %c0_i32, %c0_i32_0 : i32, i32
  }
  func.func @transform_4(%arg0: i32, %arg1: i32) -> (i32, i32) {
    %c0_i32 = arith.constant 0 : i32
    %c0_i32_0 = arith.constant 0 : i32
    %c0_i32_1 = arith.constant 0 : i32
    return %c0_i32, %c0_i32_0 : i32, i32
  }
  func.func @transform_5(%arg0: i32, %arg1: i32) -> (i32, i32) {
    %c0_i32 = arith.constant 0 : i32
    %c0_i32_0 = arith.constant 0 : i32
    %c0_i32_1 = arith.constant 0 : i32
    return %c0_i32, %c0_i32_0 : i32, i32
  }
  func.func @transform_6(%arg0: i32, %arg1: i32) -> (i32, i32) {
    %c0_i32 = arith.constant 0 : i32
    %c0_i32_0 = arith.constant 0 : i32
    %c0_i32_1 = arith.constant 0 : i32
    return %c0_i32, %c0_i32_0 : i32, i32
  }
  func.func @transform_7(%arg0: i32, %arg1: i32) -> (i32, i32) {
    %c0_i32 = arith.constant 0 : i32
    %c0_i32_0 = arith.constant 0 : i32
    %c0_i32_1 = arith.constant 0 : i32
    return %c0_i32, %c0_i32_0 : i32, i32
  }
  func.func @transform_8(%arg0: i32, %arg1: i32) -> (i32, i32) {
    %c0_i32 = arith.constant 0 : i32
    %c0_i32_0 = arith.constant 0 : i32
    %c0_i32_1 = arith.constant 0 : i32
    return %c0_i32, %c0_i32_0 : i32, i32
  }
  func.func @transform_9(%arg0: i32, %arg1: i32) -> (i32, i32) {
    %c0_i32 = arith.constant 0 : i32
    %c0_i32_0 = arith.constant 0 : i32
    %c0_i32_1 = arith.constant 0 : i32
    return %c0_i32, %c0_i32_0 : i32, i32
  }
  func.func @transform_10(%arg0: i32, %arg1: i32) -> (i32, i32) {
    %c0_i32 = arith.constant 0 : i32
    %c0_i32_0 = arith.constant 0 : i32
    %c0_i32_1 = arith.constant 0 : i32
    return %c0_i32, %c0_i32_0 : i32, i32
  }
  func.func @transform_11(%arg0: i32, %arg1: i32) -> (i32, i32) {
    %c0_i32 = arith.constant 0 : i32
    %c0_i32_0 = arith.constant 0 : i32
    %c0_i32_1 = arith.constant 0 : i32
    return %c0_i32, %c0_i32_0 : i32, i32
  }
  func.func @transform_12(%arg0: i32, %arg1: i32) -> (i32, i32) {
    %c0_i32 = arith.constant 0 : i32
    %c0_i32_0 = arith.constant 0 : i32
    %c0_i32_1 = arith.constant 0 : i32
    return %c0_i32, %c0_i32_0 : i32, i32
  }
  func.func @transform_13(%arg0: i32, %arg1: i32) -> (i32, i32) {
    %c0_i32 = arith.constant 0 : i32
    %c0_i32_0 = arith.constant 0 : i32
    %c0_i32_1 = arith.constant 0 : i32
    return %c0_i32, %c0_i32_0 : i32, i32
  }
  func.func @transform_14(%arg0: i32, %arg1: i32) -> (i32, i32) {
    %c0_i32 = arith.constant 0 : i32
    %c0_i32_0 = arith.constant 0 : i32
    %c0_i32_1 = arith.constant 0 : i32
    return %c0_i32, %c0_i32_0 : i32, i32
  }
  func.func @transform_15(%arg0: i32, %arg1: i32) -> (i32, i32, i32) {
    %c0_i32 = arith.constant 0 : i32
    %c0_i32_0 = arith.constant 0 : i32
    return %arg0, %arg1, %c0_i32 : i32, i32, i32
  }
}

</mosaic_0001>

<bundles_post_ra>
// kernel: tpu_custom_call.1
= control target key start
LH: loop header
LB: loop body
LE: loop exit
PB: predicated region body
PF: predicated region fallthrough
CT: control target
= control target key end

     0   :  { %s11202_s0 = inlined_call_operand.hbm [shape: f32[2,256,128], index: 0, kind: input, shape index: {}]   ;;  %s11203_s1 = inlined_call_operand.hbm [shape: bf16[128,128], index: 1, kind: input, shape index: {}]   ;;  %s11204_s2 = inlined_call_operand.hbm [shape: f32[1,128], index: 2, kind: input, shape index: {}]   ;;  %s11205_s3 = inlined_call_operand.hbm [shape: bf16[128,128], index: 3, kind: input, shape index: {}]   ;;  %s11206_s4 = inlined_call_operand.hbm [shape: f32[1,128], index: 4, kind: input, shape index: {}]   ;;  %s11207_s5 = inlined_call_operand.hbm [shape: bf16[128,128], index: 5, kind: input, shape index: {}]   ;;  %s11208_s6 = inlined_call_operand.hbm [shape: f32[1,128], index: 6, kind: input, shape index: {}]   ;;  %s11209_s7 = inlined_call_operand.hbm [shape: bf16[128,256], index: 7, kind: input, shape index: {}]   ;;  %s11210_s8 = inlined_call_operand.hbm [shape: f32[1,256], index: 8, kind: input, shape index: {}]   ;;  %s11211_s9 = inlined_call_operand.hbm [shape: bf16[256,128], index: 9, kind: input, shape index: {}]   ;;  %s11212_s10 = inlined_call_operand.hbm [shape: f32[1,128], index: 10, kind: input, shape index: {}]   ;;  %s11213_s11 = inlined_call_operand.hbm [shape: f32[1,128], index: 11, kind: input, shape index: {}]   ;;  %s11214_s12 = inlined_call_operand.hbm [shape: f32[1,128], index: 12, kind: input, shape index: {}]   ;;  %s11215_s13 = inlined_call_operand.hbm [shape: f32[1,128], index: 13, kind: input, shape index: {}]   ;;  %s11216_s14 = inlined_call_operand.hbm [shape: f32[1,128], index: 14, kind: input, shape index: {}]   ;;  %s11217_s15 = inlined_call_operand.hbm [shape: f32[2,256,128], index: 15, kind: output, shape index: {}]  }
   0x1   :  { %11313 = sst [smem:[#allocation125_spill]] %s11202_s0 }
   0x2   :  { %11314 = sst [smem:[#allocation126_spill]] %s11203_s1 }
   0x3   :  { %11315 = sst [smem:[#allocation127_spill]] %s11204_s2 }
   0x4   :  { %11316 = sst [smem:[#allocation128_spill]] %s11205_s3 }
   0x5   :  { %11317 = sst [smem:[#allocation129_spill]] %s11206_s4 }
   0x6   :  { %11318 = sst [smem:[#allocation130_spill]] %s11207_s5 }
   0x7   :  { %11319 = sst [smem:[#allocation131_spill]] %s11208_s6 }
   0x8   :  { %11320 = sst [smem:[#allocation132_spill]] %s11217_s15 }
   0x9   :  { %20 = vsyncpa [#allocation7], 0 }
   0xa   :  { %22 = vsyncpa [#allocation7 + $0x1], 0 }
   0xb   :  { %23 = vsyncpa [#allocation10], 0 }
   0xc   :  { %24 = vsyncpa [#allocation13], 0 }
   0xd   :  { %25 = vsyncpa [#allocation16], 0 }
   0xe   :  { %26 = vsyncpa [#allocation19], 0 }
   0xf   :  { %27 = vsyncpa [#allocation22], 0 }
  0x10   :  { %28 = vsyncpa [#allocation25], 0 }
  0x11   :  { %29 = vsyncpa [#allocation28], 0 }
  0x12   :  { %30 = vsyncpa [#allocation8], 0 }
  0x13   :  { %32 = vsyncpa [#allocation8 + $0x1], 0  ;;  %s8096_s18 = smov 0   ;;  %s8098_s19 = smov 0  }
  0x14   :  { %s8100_s20 = smov 0   ;;  %s8102_s21 = smov 0  }
  0x15   :  { %s8104_s22 = smov 0   ;;  %s8106_s23 = smov 0  }
  0x16   :  { %s8108_s24 = smov 0   ;;  %s8110_s25 = smov 0  }
  0x17   :  { %s8112_s26 = smov 0   ;;  %s8114_s27 = smov 0  }
  0x18   :  { %s8116_s28 = smov 0  }
  0x19 LB: > { %11321 = sst [smem:[#allocation40_spill]] %s7945_s18  ;;  %s11219_s29 = sadd.s32 4294967295, %s7985_s28   ;;  %s7985_s28 = sphi %s8116_s28, %s38_s28   ;;  %s7981_s27 = sphi %s8114_s27, %s11555_s27   ;;  %s7977_s26 = sphi %s8112_s26, %s11554_s26   ;;  %s7973_s25 = sphi %s8110_s25, %s11550_s25   ;;  %s7969_s24 = sphi %s8108_s24, %s11549_s24   ;;  %s7965_s23 = sphi %s8106_s23, %s11553_s23   ;;  %s7961_s22 = sphi %s8104_s22, %s11548_s22   ;;  %s7957_s21 = sphi %s8102_s21, %s11547_s21   ;;  %s7953_s20 = sphi %s8100_s20, %s11552_s20   ;;  %s7949_s19 = sphi %s8098_s19, %s11546_s19   ;;  %s7945_s18 = sphi %s8096_s18, %s11545_s18  }
  0x1a   : > { %11322 = sst [smem:[#allocation41_spill]] %s7949_s19  ;;  %p5800_p0 = scmp.ge.s32.totalorder %s7985_s28, 1 }
  0x1b   : > { %11323 = sst [smem:[#allocation42_spill]] %s7953_s20  ;;  %p8155_p1 = scmp.eq.s32.totalorder %s11219_s29, 0 }
  0x1c   : > { %11324 = sst [smem:[#allocation43_spill]] %s7957_s21  ;;  %p403_p2 = scmp.lt.s32.totalorder %s7985_s28, 5 }
  0x1d   : > { %11325 = sst [smem:[#allocation44_spill]] %s7961_s22  ;;  %s7987_s17 = smov [#allocation9]  }
  0x1e   : > { %11326 = sst [smem:[#allocation45_spill]] %s7965_s23  ;;  %p8160_p3 = pnand %p5800_p0, %p403_p2 }
  0x1f   : > { %11327 = sst [smem:[#allocation46_spill]] %s7969_s24  ;;  %s415_s15 = sshll.u32 %s7987_s17, 4  ;;  %s8164_s15 = int_to_ptr.vmem [resolvable:$true] %s415_s15 }
  0x20   : > { %11328 = sst [smem:[#allocation47_spill]] %s7973_s25  ;;  %p6689_p4 = pneg %p8160_p3 }
  0x21   : > { %11329 = sst [smem:[#allocation48_spill]] %s7977_s26  ;;  %s7988_s29 = smov [#allocation12]  }
  0x22   : > { %11330 = sst [smem:[#allocation49_spill]] %s7981_s27  ;;  %p8170_p5 = pnand %p6689_p4, %p8155_p1 }
  0x23   : > { %s11331_s30 = scalar_select %p8155_p1, 1, 0 }
  0x24   : > { %s11333_s16 = scalar_select %p8160_p3, 1, 0 }
  0x25   : > { %11332 = sst [smem:[#allocation50_spill]] %s11331_s30  ;;  %s439_s24 = sshll.u32 %s7988_s29, 4  ;;  %s8174_s24 = int_to_ptr.vmem [resolvable:$true] %s439_s24 }
  0x26   : > { %11334 = sst [smem:[#allocation51_spill]] %s11333_s16  ;;  %s7989_s0 = smov [#allocation15]  }
  0x27   : > { %s8176_s18 = sshll.u32 %s7989_s0, 4  ;;  %s11336_s1 = sld [smem:[#allocation126_spill]]  ;;  %s464_s18 = int_to_ptr.vmem [resolvable:$true] %s8176_s18 }
  0x28   : > { %p8186_p7 = pneg %p8170_p5 }
  0x2d   : > { %s7413_s17 = scalar_lea.hbm %s11336_s1, 1024 }
  0x2e   : > { %p7414_p6 = scmp.ne.s32.totalorder %s11336_s1, %s7413_s17  ;;  %p7420_p10 = scmp.lt.u32.totalorder %s7413_s17, %s11336_s1 }
  0x30   : > { %p7416_p8 = pnand %p8186_p7, %p7414_p6 }
  0x32   : > { %p7417_p9 = pneg %p7416_p8 }
  0x34   : > { %p7422_p11 = pnand %p7420_p10, %p7417_p9 }
  0x36   : > { %7425 = shalt.err (!%p7422_p11)
}
  0x37   : > { %s7426_s19 = scalar_lea.vmem %s8164_s15, 1024  ;;  %p7434_p2 = scmp.lt.s32.totalorder %s8164_s15, %s8164_s15 }
  0x38   : > { %p7427_p12 = scmp.ne.s32.totalorder %s8164_s15, %s7426_s19  ;;  %p7435_p4 = scmp.lt.s32.totalorder %s7426_s19, %s7426_s19 }
  0x3a   : > { %p7429_p13 = pnand %p7427_p12, %p8186_p7  ;;  %p7436_p6 = por %p7435_p4, %p7434_p2 }
  0x3c   : > { %p7430_p0 = pneg %p7429_p13 }
  0x3e   : > { %p7437_p8 = pnand %p7436_p6, %p7430_p0 }
  0x40   : > { %7440 = shalt.err (!%p7437_p8)
}
  0x41   : > { %s11235_s20 = smov 64   ;;  %s11236_s21 = smov 4  }
  0x42   : > { %6692 = dma.hbm_to_vmem [thread:$0]  (!%p8170_p5), %s11336_s1, 1024, %s8164_s15, [#allocation10], %s11235_s20, %s11235_s20, %s11236_s21  }
  0x43   : > { %s11338_s3 = sld [smem:[#allocation128_spill]] }
  0x49   : > { %s7441_s19 = scalar_lea.hbm %s11338_s3, 1024 }
  0x4a   : > { %p7442_p9 = scmp.ne.s32.totalorder %s11338_s3, %s7441_s19  ;;  %p7448_p12 = scmp.lt.u32.totalorder %s7441_s19, %s11338_s3 }
  0x4c   : > { %p7444_p10 = pnand %p7442_p9, %p8186_p7 }
  0x4e   : > { %p7445_p11 = pneg %p7444_p10 }
  0x50   : > { %p7450_p13 = pnand %p7448_p12, %p7445_p11 }
  0x52   : > { %7453 = shalt.err (!%p7450_p13)
}
  0x53   : > { %s7454_s15 = scalar_lea.vmem %s8174_s24, 1024  ;;  %p7462_p6 = scmp.lt.s32.totalorder %s8174_s24, %s8174_s24 }
  0x54   : > { %p7455_p0 = scmp.ne.s32.totalorder %s8174_s24, %s7454_s15  ;;  %p7463_p8 = scmp.lt.s32.totalorder %s7454_s15, %s7454_s15 }
  0x56   : > { %p7457_p2 = pnand %p7455_p0, %p8186_p7  ;;  %p7464_p9 = por %p7463_p8, %p7462_p6 }
  0x58   : > { %p7458_p4 = pneg %p7457_p2 }
  0x5a   : > { %p7465_p10 = pnand %p7464_p9, %p7458_p4 }
  0x5c   : > { %7468 = shalt.err (!%p7465_p10)
}
  0x5d   : > { %6698 = dma.hbm_to_vmem [thread:$0]  (!%p8170_p5), %s11338_s3, 1024, %s8174_s24, [#allocation13], %s11235_s20, %s11235_s20, %s11236_s21  }
  0x5e   : > { %s11339_s5 = sld [smem:[#allocation130_spill]] }
  0x64   : > { %s7469_s16 = scalar_lea.hbm %s11339_s5, 1024 }
  0x65   : > { %p7470_p11 = scmp.ne.s32.totalorder %s11339_s5, %s7469_s16  ;;  %p7476_p0 = scmp.lt.u32.totalorder %s7469_s16, %s11339_s5 }
  0x67   : > { %p7472_p12 = pnand %p7470_p11, %p8186_p7 }
  0x69   : > { %p7473_p13 = pneg %p7472_p12 }
  0x6b   : > { %p7478_p2 = pnand %p7476_p0, %p7473_p13 }
  0x6d   : > { %7481 = shalt.err (!%p7478_p2)
}
  0x6e   : > { %s7482_s15 = scalar_lea.vmem %s464_s18, 1024  ;;  %p7490_p9 = scmp.lt.s32.totalorder %s464_s18, %s464_s18 }
  0x6f   : > { %p7483_p4 = scmp.ne.s32.totalorder %s464_s18, %s7482_s15  ;;  %p7491_p10 = scmp.lt.s32.totalorder %s7482_s15, %s7482_s15 }
  0x71   : > { %p7485_p6 = pnand %p7483_p4, %p8186_p7  ;;  %p7492_p3 = por %p7491_p10, %p7490_p9 }
  0x73   : > { %p7486_p8 = pneg %p7485_p6 }
  0x75   : > { %p7493_p1 = pnand %p7492_p3, %p7486_p8 }
  0x77   : > { %7496 = shalt.err (!%p7493_p1)
}
  0x78   : > { %6704 = dma.hbm_to_vmem [thread:$0]  (!%p8170_p5), %s11339_s5, 1024, %s464_s18, [#allocation16], %s11235_s20, %s11235_s20, %s11236_s21  }
  0x79   : > { %s7992_s23 = smov [#allocation18]   ;;  %s7497_s17 = scalar_lea.hbm %s11209_s7, 2048 }
  0x7a   : > { %s487_s26 = sshll.u32 %s7992_s23, 4  ;;  %p7498_p1 = scmp.ne.s32.totalorder %s11209_s7, %s7497_s17  ;;  %s488_s26 = int_to_ptr.vmem [resolvable:$true] %s487_s26 }
  0x7b   : > { %p7504_p12 = scmp.lt.u32.totalorder %s7497_s17, %s11209_s7 }
  0x7c   : > { %p7500_p3 = pnand %p7498_p1, %p8186_p7 }
  0x7e   : > { %p7501_p11 = pneg %p7500_p3 }
  0x80   : > { %p7506_p13 = pnand %p7504_p12, %p7501_p11 }
  0x82   : > { %7509 = shalt.err (!%p7506_p13)
}
  0x83   : > { %s7510_s18 = scalar_lea.vmem %s488_s26, 2048  ;;  %p7518_p6 = scmp.lt.s32.totalorder %s488_s26, %s488_s26 }
  0x84   : > { %p7511_p0 = scmp.ne.s32.totalorder %s488_s26, %s7510_s18  ;;  %p7519_p8 = scmp.lt.s32.totalorder %s7510_s18, %s7510_s18 }
  0x86   : > { %p7513_p2 = pnand %p7511_p0, %p8186_p7  ;;  %p7520_p9 = por %p7519_p8, %p7518_p6 }
  0x88   : > { %p7514_p4 = pneg %p7513_p2 }
  0x8a   : > { %p7521_p10 = pnand %p7520_p9, %p7514_p4 }
  0x8c   : > { %7524 = shalt.err (!%p7521_p10)
}
  0x8d   : > { %s11237_s24 = smov 128   ;;  %s11238_s22 = smov 8  }
  0x8e   : > { %6710 = dma.hbm_to_vmem [thread:$0]  (!%p8170_p5), %s11209_s7, 2048, %s488_s26, [#allocation19], %s11237_s24, %s11237_s24, %s11238_s22  }
  0x8f   : > { %s7995_s16 = smov [#allocation21]   ;;  %s7996_s29 = smov [#allocation24]  }
  0x90   : > { %s511_s17 = sshll.u32 %s7995_s16, 4  ;;  %s536_s0 = sshll.u32 %s7996_s29, 4  ;;  %s512_s17 = int_to_ptr.vmem [resolvable:$true] %s511_s17  ;;  %s8279_s0 = int_to_ptr.vmem [resolvable:$true] %s536_s0 }
  0x91   : > { %s7525_s18 = scalar_lea.hbm %s11211_s9, 2048 }
  0x92   : > { %p7526_p1 = scmp.ne.s32.totalorder %s11211_s9, %s7525_s18  ;;  %p7532_p12 = scmp.lt.u32.totalorder %s7525_s18, %s11211_s9 }
  0x94   : > { %p7528_p3 = pnand %p7526_p1, %p8186_p7 }
  0x96   : > { %p7529_p11 = pneg %p7528_p3 }
  0x98   : > { %p7534_p13 = pnand %p7532_p12, %p7529_p11 }
  0x9a   : > { %7537 = shalt.err (!%p7534_p13)
}
  0x9b   : > { %s7538_s27 = scalar_lea.vmem %s512_s17, 2048  ;;  %p7546_p6 = scmp.lt.s32.totalorder %s512_s17, %s512_s17 }
  0x9c   : > { %p7539_p0 = scmp.ne.s32.totalorder %s512_s17, %s7538_s27  ;;  %p7547_p8 = scmp.lt.s32.totalorder %s7538_s27, %s7538_s27 }
  0x9e   : > { %p7541_p2 = pnand %p7539_p0, %p8186_p7  ;;  %p7548_p9 = por %p7547_p8, %p7546_p6 }
  0xa0   : > { %p7542_p4 = pneg %p7541_p2 }
  0xa2   : > { %p7549_p10 = pnand %p7548_p9, %p7542_p4 }
  0xa4   : > { %7552 = shalt.err (!%p7549_p10)
}
  0xa5   : > { %s11340_s20 = smov 4   ;;  %s11341_s21 = smov 64  }
  0xa6   : > { %6716 = dma.hbm_to_vmem [thread:$0]  (!%p8170_p5), %s11211_s9, 2048, %s512_s17, [#allocation22], %s11341_s21, %s11341_s21, %s11340_s20  }
  0xa7   : > { %s7553_s18 = scalar_lea.hbm %s11213_s11, 16 }
  0xa8   : > { %p7554_p1 = scmp.ne.s32.totalorder %s11213_s11, %s7553_s18  ;;  %p7560_p12 = scmp.lt.u32.totalorder %s7553_s18, %s11213_s11 }
  0xaa   : > { %p7556_p3 = pnand %p7554_p1, %p8186_p7 }
  0xac   : > { %p7557_p11 = pneg %p7556_p3 }
  0xae   : > { %p7562_p13 = pnand %p7560_p12, %p7557_p11 }
  0xb0   : > { %7565 = shalt.err (!%p7562_p13)
}
  0xb1   : > { %s7566_s17 = scalar_lea.vmem %s8279_s0, 16  ;;  %s7573_s20 = scalar_lea.vmem %s8279_s0, 32 }
  0xb2   : > { %p7567_p0 = scmp.ne.s32.totalorder %s8279_s0, %s7566_s17  ;;  %p7574_p6 = scmp.lt.s32.totalorder %s8279_s0, %s8279_s0 }
  0xb3   : > { %p7575_p8 = scmp.lt.s32.totalorder %s7573_s20, %s7566_s17 }
  0xb4   : > { %p7569_p2 = pnand %p7567_p0, %p8186_p7 }
  0xb5   : > { %p7576_p9 = por %p7575_p8, %p7574_p6 }
  0xb6   : > { %p7570_p4 = pneg %p7569_p2 }
  0xb8   : > { %p7577_p10 = pnand %p7576_p9, %p7570_p4 }
  0xba   : > { %7580 = shalt.err (!%p7577_p10)
}
  0xbb   : > { %6722 = dma.hbm_to_vmem [thread:$0]  (!%p8170_p5), %s11213_s11, 16, %s8279_s0, [#allocation25]  }
  0xbc   : > { %s7997_s16 = smov [#allocation27]   ;;  %s7998_s19 = smov [#allocation11]  }
  0xbd   : > { %s558_s29 = sshll.u32 %s7997_s16, 4  ;;  %s429_s15 = sshll.u32 %s7998_s19, 4  ;;  %s559_s29 = int_to_ptr.vmem [resolvable:$true] %s558_s29  ;;  %s8326_s15 = int_to_ptr.vmem [resolvable:$true] %s429_s15 }
  0xbe   : > { %s7581_s26 = scalar_lea.hbm %s11215_s13, 16 }
  0xbf   : > { %p7582_p1 = scmp.ne.s32.totalorder %s11215_s13, %s7581_s26  ;;  %p7588_p12 = scmp.lt.u32.totalorder %s7581_s26, %s11215_s13 }
  0xc1   : > { %p7584_p3 = pnand %p7582_p1, %p8186_p7 }
  0xc3   : > { %p7585_p11 = pneg %p7584_p3 }
  0xc5   : > { %p7590_p13 = pnand %p7588_p12, %p7585_p11 }
  0xc7   : > { %7593 = shalt.err (!%p7590_p13)
}
  0xc8   : > { %s7594_s24 = scalar_lea.vmem %s559_s29, 16  ;;  %s7601_s21 = scalar_lea.vmem %s559_s29, 32 }
  0xc9   : > { %p7595_p0 = scmp.ne.s32.totalorder %s559_s29, %s7594_s24  ;;  %p7602_p6 = scmp.lt.s32.totalorder %s559_s29, %s559_s29 }
  0xca   : > { %p7603_p8 = scmp.lt.s32.totalorder %s7601_s21, %s7594_s24 }
  0xcb   : > { %p7597_p2 = pnand %p7595_p0, %p8186_p7 }
  0xcc   : > { %p7604_p9 = por %p7603_p8, %p7602_p6 }
  0xcd   : > { %p7598_p4 = pneg %p7597_p2 }
  0xcf   : > { %p7605_p10 = pnand %p7604_p9, %p7598_p4 }
  0xd1   : > { %7608 = shalt.err (!%p7605_p10)
}
  0xd2   : > { %6728 = dma.hbm_to_vmem [thread:$0]  (!%p8170_p5), %s11215_s13, 16, %s559_s29, [#allocation28]  }
  0xd3   : > { %s11342_s2 = sld [smem:[#allocation127_spill]] }
  0xd9   : > { %s7609_s26 = scalar_lea.hbm %s11342_s2, 16 }
  0xda   : > { %p7610_p1 = scmp.ne.s32.totalorder %s11342_s2, %s7609_s26  ;;  %p7616_p12 = scmp.lt.u32.totalorder %s7609_s26, %s11342_s2 }
  0xdc   : > { %p7612_p3 = pnand %p7610_p1, %p8186_p7 }
  0xde   : > { %p7613_p11 = pneg %p7612_p3 }
  0xe0   : > { %p7618_p13 = pnand %p7616_p12, %p7613_p11 }
  0xe2   : > { %7621 = shalt.err (!%p7618_p13)
}
  0xe3   : > { %s7622_s29 = scalar_lea.vmem %s8326_s15, 16  ;;  %s7629_s24 = scalar_lea.vmem %s8326_s15, 32 }
  0xe4   : > { %p7623_p0 = scmp.ne.s32.totalorder %s8326_s15, %s7622_s29  ;;  %p7630_p6 = scmp.lt.s32.totalorder %s8326_s15, %s8326_s15 }
  0xe5   : > { %p7631_p8 = scmp.lt.s32.totalorder %s7629_s24, %s7622_s29 }
  0xe6   : > { %p7625_p2 = pnand %p7623_p0, %p8186_p7 }
  0xe7   : > { %p7632_p9 = por %p7631_p8, %p7630_p6 }
  0xe8   : > { %p7626_p4 = pneg %p7625_p2 }
  0xea   : > { %p7633_p10 = pnand %p7632_p9, %p7626_p4 }
  0xec   : > { %7636 = shalt.err (!%p7633_p10)
}
  0xed   : > { %6695 = dma.hbm_to_vmem [thread:$0]  (!%p8170_p5), %s11342_s2, 16, %s8326_s15, [#allocation10]  }
  0xee   : > { %s7999_s19 = smov [#allocation14]   ;;  %s8000_s23 = smov [#allocation17]  }
  0xef   : > { %s453_s18 = sshll.u32 %s7999_s19, 4  ;;  %s477_s26 = sshll.u32 %s8000_s23, 4  ;;  %s454_s18 = int_to_ptr.vmem [resolvable:$true] %s453_s18  ;;  %s8370_s26 = int_to_ptr.vmem [resolvable:$true] %s477_s26 }
  0xf0   : > { %s11343_s4 = sld [smem:[#allocation129_spill]] }
  0xf6   : > { %s7637_s20 = scalar_lea.hbm %s11343_s4, 16 }
  0xf7   : > { %p7638_p1 = scmp.ne.s32.totalorder %s11343_s4, %s7637_s20  ;;  %p7644_p12 = scmp.lt.u32.totalorder %s7637_s20, %s11343_s4 }
  0xf9   : > { %p7640_p3 = pnand %p7638_p1, %p8186_p7 }
  0xfb   : > { %p7641_p11 = pneg %p7640_p3 }
  0xfd   : > { %p7646_p13 = pnand %p7644_p12, %p7641_p11 }
  0xff   : > { %7649 = shalt.err (!%p7646_p13)
}
 0x100   : > { %s7650_s21 = scalar_lea.vmem %s454_s18, 16  ;;  %s7657_s16 = scalar_lea.vmem %s454_s18, 32 }
 0x101   : > { %p7651_p0 = scmp.ne.s32.totalorder %s454_s18, %s7650_s21  ;;  %p7658_p6 = scmp.lt.s32.totalorder %s454_s18, %s454_s18 }
 0x102   : > { %p7659_p8 = scmp.lt.s32.totalorder %s7657_s16, %s7650_s21 }
 0x103   : > { %p7653_p2 = pnand %p7651_p0, %p8186_p7 }
 0x104   : > { %p7660_p9 = por %p7659_p8, %p7658_p6 }
 0x105   : > { %p7654_p4 = pneg %p7653_p2 }
 0x107   : > { %p7661_p10 = pnand %p7660_p9, %p7654_p4 }
 0x109   : > { %7664 = shalt.err (!%p7661_p10)
}
 0x10a   : > { %6701 = dma.hbm_to_vmem [thread:$0]  (!%p8170_p5), %s11343_s4, 16, %s454_s18, [#allocation13]  }
 0x10b   : > { %s11344_s6 = sld [smem:[#allocation131_spill]] }
 0x111   : > { %s7665_s20 = scalar_lea.hbm %s11344_s6, 16 }
 0x112   : > { %p7666_p1 = scmp.ne.s32.totalorder %s11344_s6, %s7665_s20  ;;  %p7672_p12 = scmp.lt.u32.totalorder %s7665_s20, %s11344_s6 }
 0x114   : > { %p7668_p3 = pnand %p7666_p1, %p8186_p7 }
 0x116   : > { %p7669_p11 = pneg %p7668_p3 }
 0x118   : > { %p7674_p13 = pnand %p7672_p12, %p7669_p11 }
 0x11a   : > { %7677 = shalt.err (!%p7674_p13)
}
 0x11b   : > { %s7678_s18 = scalar_lea.vmem %s8370_s26, 16  ;;  %s7685_s21 = scalar_lea.vmem %s8370_s26, 32 }
 0x11c   : > { %p7679_p0 = scmp.ne.s32.totalorder %s8370_s26, %s7678_s18  ;;  %p7686_p6 = scmp.lt.s32.totalorder %s8370_s26, %s8370_s26 }
 0x11d   : > { %p7687_p8 = scmp.lt.s32.totalorder %s7685_s21, %s7678_s18 }
 0x11e   : > { %p7681_p2 = pnand %p7679_p0, %p8186_p7 }
 0x11f   : > { %p7688_p9 = por %p7687_p8, %p7686_p6 }
 0x120   : > { %p7682_p4 = pneg %p7681_p2 }
 0x122   : > { %p7689_p10 = pnand %p7688_p9, %p7682_p4 }
 0x124   : > { %7692 = shalt.err (!%p7689_p10)
}
 0x125   : > { %6707 = dma.hbm_to_vmem [thread:$0]  (!%p8170_p5), %s11344_s6, 16, %s8370_s26, [#allocation16]  }
 0x126   : > { %s8001_s23 = smov [#allocation20]   ;;  %s8002_s17 = smov [#allocation23]  }
 0x127   : > { %s501_s27 = sshll.u32 %s8001_s23, 4  ;;  %s525_s20 = sshll.u32 %s8002_s17, 4  ;;  %s502_s27 = int_to_ptr.vmem [resolvable:$true] %s501_s27  ;;  %s8414_s20 = int_to_ptr.vmem [resolvable:$true] %s525_s20 }
 0x128   : > { %s7693_s24 = scalar_lea.hbm %s11210_s8, 32 }
 0x129   : > { %p7694_p1 = scmp.ne.s32.totalorder %s11210_s8, %s7693_s24  ;;  %p7700_p12 = scmp.lt.u32.totalorder %s7693_s24, %s11210_s8 }
 0x12b   : > { %p7696_p3 = pnand %p7694_p1, %p8186_p7 }
 0x12d   : > { %p7697_p11 = pneg %p7696_p3 }
 0x12f   : > { %p7702_p13 = pnand %p7700_p12, %p7697_p11 }
 0x131   : > { %7705 = shalt.err (!%p7702_p13)
}
 0x132   : > { %s7706_s16 = scalar_lea.vmem %s502_s27, 32  ;;  %p7714_p6 = scmp.lt.s32.totalorder %s502_s27, %s502_s27 }
 0x133   : > { %p7707_p0 = scmp.ne.s32.totalorder %s502_s27, %s7706_s16  ;;  %p7715_p8 = scmp.lt.s32.totalorder %s7706_s16, %s7706_s16 }
 0x135   : > { %p7709_p2 = pnand %p7707_p0, %p8186_p7  ;;  %p7716_p9 = por %p7715_p8, %p7714_p6 }
 0x137   : > { %p7710_p4 = pneg %p7709_p2 }
 0x139   : > { %p7717_p10 = pnand %p7716_p9, %p7710_p4 }
 0x13b   : > { %7720 = shalt.err (!%p7717_p10)
}
 0x13c   : > { %6713 = dma.hbm_to_vmem [thread:$0]  (!%p8170_p5), %s11210_s8, 32, %s502_s27, [#allocation19]  }
 0x13d   : > { %s7721_s29 = scalar_lea.hbm %s11212_s10, 16 }
 0x13e   : > { %p7722_p1 = scmp.ne.s32.totalorder %s11212_s10, %s7721_s29  ;;  %p7728_p12 = scmp.lt.u32.totalorder %s7721_s29, %s11212_s10 }
 0x140   : > { %p7724_p3 = pnand %p7722_p1, %p8186_p7 }
 0x142   : > { %p7725_p11 = pneg %p7724_p3 }
 0x144   : > { %p7730_p13 = pnand %p7728_p12, %p7725_p11 }
 0x146   : > { %7733 = shalt.err (!%p7730_p13)
}
 0x147   : > { %s7734_s27 = scalar_lea.vmem %s8414_s20, 16  ;;  %s7741_s26 = scalar_lea.vmem %s8414_s20, 32 }
 0x148   : > { %p7735_p0 = scmp.ne.s32.totalorder %s8414_s20, %s7734_s27  ;;  %p7742_p6 = scmp.lt.s32.totalorder %s8414_s20, %s8414_s20 }
 0x149   : > { %p7743_p8 = scmp.lt.s32.totalorder %s7741_s26, %s7734_s27 }
 0x14a   : > { %p7737_p2 = pnand %p7735_p0, %p8186_p7 }
 0x14b   : > { %p7744_p9 = por %p7743_p8, %p7742_p6 }
 0x14c   : > { %p7738_p4 = pneg %p7737_p2 }
 0x14e   : > { %p7745_p10 = pnand %p7744_p9, %p7738_p4 }
 0x150   : > { %7748 = shalt.err (!%p7745_p10)
}
 0x151   : > { %6719 = dma.hbm_to_vmem [thread:$0]  (!%p8170_p5), %s11212_s10, 16, %s8414_s20, [#allocation22]  }
 0x152   : > { %s8003_s23 = smov [#allocation26]   ;;  %s8004_s0 = smov [#allocation29]  }
 0x153   : > { %s547_s17 = sshll.u32 %s8003_s23, 4  ;;  %s569_s29 = sshll.u32 %s8004_s0, 4  ;;  %s548_s17 = int_to_ptr.vmem [resolvable:$true] %s547_s17  ;;  %s8458_s29 = int_to_ptr.vmem [resolvable:$true] %s569_s29 }
 0x154   : > { %s7749_s18 = scalar_lea.hbm %s11214_s12, 16 }
 0x155   : > { %p7750_p1 = scmp.ne.s32.totalorder %s11214_s12, %s7749_s18  ;;  %p7756_p12 = scmp.lt.u32.totalorder %s7749_s18, %s11214_s12 }
 0x157   : > { %p7752_p3 = pnand %p7750_p1, %p8186_p7 }
 0x159   : > { %p7753_p11 = pneg %p7752_p3 }
 0x15b   : > { %p7758_p13 = pnand %p7756_p12, %p7753_p11 }
 0x15d   : > { %7761 = shalt.err (!%p7758_p13)
}
 0x15e   : > { %s7762_s16 = scalar_lea.vmem %s548_s17, 16  ;;  %s7769_s19 = scalar_lea.vmem %s548_s17, 32 }
 0x15f   : > { %p7763_p0 = scmp.ne.s32.totalorder %s548_s17, %s7762_s16  ;;  %p7770_p6 = scmp.lt.s32.totalorder %s548_s17, %s548_s17 }
 0x160   : > { %p7771_p8 = scmp.lt.s32.totalorder %s7769_s19, %s7762_s16 }
 0x161   : > { %p7765_p2 = pnand %p7763_p0, %p8186_p7 }
 0x162   : > { %p7772_p9 = por %p7771_p8, %p7770_p6 }
 0x163   : > { %p7766_p4 = pneg %p7765_p2 }
 0x165   : > { %p7773_p10 = pnand %p7772_p9, %p7766_p4 }
 0x167   : > { %7776 = shalt.err (!%p7773_p10)
}
 0x168   : > { %6725 = dma.hbm_to_vmem [thread:$0]  (!%p8170_p5), %s11214_s12, 16, %s548_s17, [#allocation25]  }
 0x169   : > { %s7777_s18 = scalar_lea.hbm %s11216_s14, 16 }
 0x16a   : > { %p7778_p1 = scmp.ne.s32.totalorder %s11216_s14, %s7777_s18  ;;  %p7784_p12 = scmp.lt.u32.totalorder %s7777_s18, %s11216_s14 }
 0x16c   : > { %p7780_p3 = pnand %p7778_p1, %p8186_p7 }
 0x16e   : > { %p7781_p11 = pneg %p7780_p3 }
 0x170   : > { %p7786_p13 = pnand %p7784_p12, %p7781_p11 }
 0x172   : > { %7789 = shalt.err (!%p7786_p13)
}
 0x173   : > { %s7790_s17 = scalar_lea.vmem %s8458_s29, 16  ;;  %s7797_s16 = scalar_lea.vmem %s8458_s29, 32 }
 0x174   : > { %p7791_p0 = scmp.ne.s32.totalorder %s8458_s29, %s7790_s17  ;;  %p7798_p6 = scmp.lt.s32.totalorder %s8458_s29, %s8458_s29 }
 0x175   : > { %p7799_p8 = scmp.lt.s32.totalorder %s7797_s16, %s7790_s17 }
 0x176   : > { %p7793_p2 = pnand %p7791_p0, %p8186_p7 }
 0x177   : > { %p7800_p9 = por %p7799_p8, %p7798_p6 }
 0x178   : > { %p7794_p4 = pneg %p7793_p2 }
 0x17a   : > { %p7801_p10 = pnand %p7800_p9, %p7794_p4 }
 0x17c   : > { %7804 = shalt.err (!%p7801_p10)
}
 0x17d   : > { %s11345_s0 = sld [smem:[#allocation48_spill]]  ;;  %s11346_s24 = sld [smem:[#allocation49_spill]] }
 0x17e   : > { %s11347_s15 = sld [smem:[#allocation45_spill]]  ;;  %s11348_s30 = sld [smem:[#allocation44_spill]] }
 0x17f   : > { %s11349_s18 = sld [smem:[#allocation43_spill]]  ;;  %s11350_s21 = sld [smem:[#allocation50_spill]] }
 0x180   : > { %6731 = dma.hbm_to_vmem [thread:$0]  (!%p8170_p5), %s11216_s14, 16, %s8458_s29, [#allocation28]  }
 0x181   : > { %s11351_s27 = sld [smem:[#allocation42_spill]]  ;;  %s5799_s26 = sadd.s32 4294967294, %s7985_s28  }
 0x182   : > { %s11352_s25 = sld [smem:[#allocation41_spill]]  ;;  %p65_p3 = scmp.eq.s32.totalorder %s7985_s28, 0 }
 0x183   : > { %s47_s20 = sadd.s32 1, %s11345_s0  ;;  %s50_s17 = sadd.s32 1, %s11346_s24 }
 0x184   : > { %p48_p7 = scmp.ge.s32.totalorder %s47_s20, 2  ;;  %s57_s16 = sadd.s32 1, %s11347_s15 }
 0x185   : > { %p64_p1 = scmp.ne.s32.totalorder %s11347_s15, %s11348_s30  ;;  %p70_p11 = scmp.ne.s32.totalorder %s11348_s30, %s11349_s18 }
 0x186   : > { %s11557_s20 = smov (%p48_p7, %s47_s20), 0  ;;  %s11559_s17 = smov (!%p48_p7, %s50_s17), %s11346_s24 }
 0x187   : > { %s11353_s29 = sld [smem:[#allocation40_spill]]  ;;  %p52_p5 = scmp.ge.s32.totalorder %s11559_s17, 2 }
 0x188   : > { %s375_s19 = ssub.s32 %s11345_s0, %s11557_s20  ;;  %p8516_p12 = por %p65_p3, %p64_p1 }
 0x189   : > { %p11355_p13 = scmp.ne.s32.totalorder %s11350_s21, 0  ;;  %s11561_s17 = smov (%p52_p5, %s11559_s17), 0 }
 0x18a   : > { %s379_s1 = sadd.s32 1, %s11351_s27  ;;  %p389_p2 = scmp.ne.s32.totalorder %s11351_s27, %s11352_s25 }
 0x18b   : > { %p8522_p0 = por %p11355_p13, %p70_p11  ;;  %s54_s30 = ssub.s32 %s11346_s24, %s11561_s17 }
 0x18c   : > { %s11357_s18 = sadd.s32 4294967295, %s7985_s28   ;;  %p55_p6 = scmp.eq.s32.totalorder %s54_s30, 0 }
 0x18d   : > { %p390_p4 = scmp.eq.s32.totalorder %s11357_s18, 3  ;;  %s376_s0 = sor.u32 %s375_s19, %s54_s30 }
 0x18e   : > { %p377_p8 = scmp.eq.s32.totalorder %s376_s0, 0  ;;  %p395_p10 = scmp.ne.s32.totalorder %s11352_s25, %s11353_s29 }
 0x18f   : > { %p8535_p9 = por %p390_p4, %p389_p2  ;;  %p396_p7 = scmp.eq.s32.totalorder %s5799_s26, 3 }
 0x190   : > { %s8540_s2 = scalar_select %p55_p6, %s11347_s15, %s57_s16  }
 0x191   : > { %s11358_s21 = scalar_select %p8535_p9, 1, 0 }
 0x192   : > { %s11563_s27 = smov (!%p377_p8, %s11351_s27), %s379_s1  ;;  %p6754_p1 = scmp.lt.s32.totalorder %s7985_s28, 4 }
 0x193   : > { %s580_s3 = sand.u32 1, %s11347_s15   ;;  %p8549_p3 = por %p396_p7, %p395_p10 }
 0x194   : > { %s5816_s18 = sshll.u32 %s580_s3, 8  ;;  %s5940_s5 = sshll.u32 %s11346_s24, 12 }
 0x195   : > { %s11359_s4 = scalar_select %p8549_p3, 1, 0 }
 0x196   : > { %s11360_s0 = sld [smem:[#allocation125_spill]]  ;;  %s584_s1 = scalar_lea.vmem [#allocation6], %s5816_s18 }
 0x197   : > { %s591_s25 = sshll.u32 %s584_s1, 4  ;;  %p8561_p11 = pnand %p6754_p1, %p8516_p12  ;;  %s8565_s25 = int_to_ptr.vmem [resolvable:$true] %s591_s25 }
 0x198   : > { %s8567_s24 = scalar_lea.sflag [#allocation7], %s580_s3 }
 0x199   : > { %p7807_p13 = pneg %p8561_p11 }
 0x19c   : > { %s8557_s6 = scalar_lea.hbm %s11360_s0, %s5940_s5  ;;  %s7810_s29 = scalar_lea.hbm %s11360_s0, 8192 }
 0x19d   : > { %s7805_s26 = scalar_lea.hbm %s8557_s6, 4096  ;;  %p7811_p12 = scmp.lt.u32.totalorder %s8557_s6, %s11360_s0 }
 0x19e   : > { %p7806_p5 = scmp.ne.s32.totalorder %s8557_s6, %s7805_s26  ;;  %p7812_p6 = scmp.lt.u32.totalorder %s7810_s29, %s7805_s26 }
 0x19f   : > { %p7814_p10 = scmp.lt.u32.totalorder %s7805_s26, %s8557_s6 }
 0x1a0   : > { %p7808_p2 = pnand %p7807_p13, %p7806_p5  ;;  %p7813_p8 = por %p7812_p6, %p7811_p12 }
 0x1a2   : > { %p7809_p4 = pneg %p7808_p2  ;;  %p7815_p7 = por %p7814_p10, %p7813_p8 }
 0x1a4   : > { %p7816_p1 = pnand %p7815_p7, %p7809_p4 }
 0x1a6   : > { %7819 = shalt.err (!%p7816_p1)
}
 0x1a7   : > { %s7820_s3 = scalar_lea.vmem %s8565_s25, 4096  ;;  %s8005_s19 = smov [#allocation6]  }
 0x1a8   : > { %p7821_p5 = scmp.ne.s32.totalorder %s8565_s25, %s7820_s3  ;;  %s7825_s30 = sshll.u32 %s8005_s19, 4  ;;  %s7826_s30 = int_to_ptr.vmem [resolvable:$false] %s7825_s30 }
 0x1a9   : > { %s7827_s1 = scalar_lea.vmem %s7826_s30, 8192  ;;  %p7828_p9 = scmp.lt.s32.totalorder %s8565_s25, %s7826_s30 }
 0x1aa   : > { %p7823_p2 = pnand %p7821_p5, %p7807_p13  ;;  %p7829_p12 = scmp.lt.s32.totalorder %s7827_s1, %s7820_s3 }
 0x1ac   : > { %p7824_p3 = pneg %p7823_p2  ;;  %p7830_p6 = por %p7829_p12, %p7828_p9 }
 0x1ae   : > { %p7831_p8 = pnand %p7830_p6, %p7824_p3 }
 0x1b0   : > { %7834 = shalt.err (!%p7831_p8)
}
 0x1b1   : > { %s11362_s26 = smov 8   ;;  %s11363_s5 = smov 128  }
 0x1b2   : > { %6735 = dma.hbm_to_vmem [thread:$0]  (!%p8561_p11), %s8557_s6, 4096, %s8565_s25, %s8567_s24, %s11363_s5, %s11363_s5, %s11362_s26  }
 0x1b3   : > { %s11364_s16 = sld [smem:[#allocation51_spill]] }
 0x1b9   : > { %p11365_p13 = scmp.ne.s32.totalorder %s11364_s16, 0 }
 0x1bb   : > { %603 = sbr.rel (%p11365_p13) target bundleno = 3389 (0xd3d), region = 80 }
 0x1c2   : > { %s11366_s29 = sld [smem:[#allocation44_spill]] }
 0x1c8   : > { %s605_s23 = sand.u32 1, %s11366_s29  }
 0x1c9   : > { %s5820_s18 = sshll.u32 %s605_s23, 8  ;;  %s606_s3 = scalar_lea.sflag [#allocation7], %s605_s23 }
 0x1ca   : > { %s8601_s19 = scalar_lea.vmem [#allocation6], %s5820_s18 }
 0x1cb   : > { %7908 = dma.done.wait (%p8522_p0), %s606_s3, 4096  }
 0x1cc   : > { %7910 = vsyncadd (%p8522_p0), %s606_s3, 4294963200  ;;  %s11367_s15 = sld [smem:[#allocation50_spill]] }
 0x1d2   : > { %p11368_p9 = scmp.ne.s32.totalorder %s11367_s15, 0 }
 0x1d4   : > { %7912 = dma.done.wait (%p11368_p9), [#allocation10], 1040  }
 0x1d5   : > { %7914 = vsyncadd (%p11368_p9), [#allocation10], 4294966256 }
 0x1d6   : > { %7916 = dma.done.wait (%p11368_p9), [#allocation13], 1040  }
 0x1d7   : > { %7918 = vsyncadd (%p11368_p9), [#allocation13], 4294966256 }
 0x1d8   : > { %7920 = dma.done.wait (%p11368_p9), [#allocation16], 1040  }
 0x1d9   : > { %7922 = vsyncadd (%p11368_p9), [#allocation16], 4294966256 }
 0x1da   : > { %7924 = dma.done.wait (%p11368_p9), [#allocation19], 2080  }
 0x1db   : > { %7926 = vsyncadd (%p11368_p9), [#allocation19], 4294965216 }
 0x1dc   : > { %7928 = dma.done.wait (%p11368_p9), [#allocation22], 2064  }
 0x1dd   : > { %7930 = vsyncadd (%p11368_p9), [#allocation22], 4294965232 }
 0x1de   : > { %7932 = dma.done.wait (%p11368_p9), [#allocation25], 32  }
 0x1df   : > { %7934 = vsyncadd (%p11368_p9), [#allocation25], 4294967264 }
 0x1e0   : > { %7936 = dma.done.wait (%p11368_p9), [#allocation28], 32  }
 0x1e1   : > { %7938 = vsyncadd (%p11368_p9), [#allocation28], 4294967264  ;;  %s11369_s6 = sld [smem:[#allocation41_spill]] }
 0x1e2   : > { %s11370_s30 = sld [smem:[#allocation46_spill]] }
 0x1e7   : > { %s709_s22 = sand.u32 1, %s11369_s6  }
 0x1e8   : > { %s5835_s25 = sshll.u32 %s709_s22, 7  ;;  %p5836_p0 = scmp.ne.s32.totalorder %s11370_s30, 0 }
 0x1e9   : > { %s8638_s24 = scalar_lea.vmem [#allocation30], %s5835_s25  ;;  %v6885_v0 = vld [vmem:[#allocation12] sm:$0xff] (!%p5836_p0)   ;;  %v6887_v2 = vld [vmem:[#allocation12 + $0x8] sm:$0xff] (!%p5836_p0)   ;;  %v6889_v4 = vld [vmem:[#allocation12 + $0x10] sm:$0xff] (!%p5836_p0)   ;;  %vm1262_vm0 = vcmask (!%p5836_p0), 261120   ;;  %s8006_s1 = smov (!%p5836_p0), 96  }
 0x1ea   : > { %717 = sbr.rel (%p5836_p0) target bundleno = 1045 (0x415), region = 144  ;;  %v6886_v1 = vld [vmem:[#allocation15] sm:$0xff] (!%p5836_p0)   ;;  %6453 = vmatprep.subr.bf16.mxu0 (!%p5836_p0), %v6885_v0  ;;  %v6888_v3 = vld [vmem:[#allocation15 + $0x8] sm:$0xff] (!%p5836_p0)   ;;  %v6890_v5 = vld [vmem:[#allocation15 + $0x10] sm:$0xff] (!%p5836_p0)   ;;  %s8007_s26 = smov (!%p5836_p0), 64  }
 0x1eb   : > { %6501 = vmatprep.subr.bf16.mxu1 (!%p5836_p0), %v6886_v1  ;;  %6454 = vmatpush3.bf16.msra.mxu0 (!%p5836_p0), %v6885_v0  ;;  %v6891_v6 = vld [vmem:[#allocation12 + $0x18] sm:$0xff] (!%p5836_p0)   ;;  %v6893_v8 = vld [vmem:[#allocation12 + $0x20] sm:$0xff] (!%p5836_p0)   ;;  %v6895_v10 = vld [vmem:[#allocation12 + $0x28] sm:$0xff] (!%p5836_p0)   ;;  %s8008_s5 = smov (!%p5836_p0), 32  }
 0x1ec   : > { %6502 = vmatpush3.bf16.msra.mxu1 (!%p5836_p0), %v6886_v1  ;;  %6455 = vmatprep.subr.bf16.mxu0 (!%p5836_p0), %v6887_v2  ;;  %v6892_v7 = vld [vmem:[#allocation15 + $0x18] sm:$0xff] (!%p5836_p0)   ;;  %v6894_v9 = vld [vmem:[#allocation15 + $0x20] sm:$0xff] (!%p5836_p0)   ;;  %v6896_v13 = vld [vmem:[#allocation15 + $0x28] sm:$0xff] (!%p5836_p0)  }
 0x1ed   : > { %6503 = vmatprep.subr.bf16.mxu1 (!%p5836_p0), %v6888_v3  ;;  %v718_v11 = vld [vmem:[%s8601_s19] sm:$0xff] (!%p5836_p0)  ;;  %v719_v12 = vld [vmem:[%s8601_s19 + $0x8] sm:$0xff] (!%p5836_p0)  ;;  %v6897_v15 = vld [vmem:[#allocation12 + $0x30] sm:$0xff] (!%p5836_p0)  }
 0x1ee   : > { %v750_v14 = vpack.c.bf16 (!%p5836_p0), %v719_v12, %v718_v11  ;;  %v6898_v16 = vld [vmem:[#allocation15 + $0x30] sm:$0xff] (!%p5836_p0)   ;;  %v6900_v18 = vld [vmem:[#allocation15 + $0x38] sm:$0xff] (!%p5836_p0)   ;;  %v723_v22 = vld [vmem:[%s8601_s19 + $0x28] sm:$0xff] (!%p5836_p0) }
 0x1ef   : > { %6456 = vmatpush3.bf16.msra.mxu0 (!%p5836_p0), %v6887_v2  ;;  %v6899_v17 = vld [vmem:[#allocation12 + $0x38] sm:$0xff] (!%p5836_p0)   ;;  %v720_v19 = vld [vmem:[%s8601_s19 + $0x10] sm:$0xff] (!%p5836_p0)  ;;  %v727_v28 = vld [vmem:[%s8601_s19 + $0x48] sm:$0xff] (!%p5836_p0) }
 0x1f0   : > { %6504 = vmatpush3.bf16.msra.mxu1 (!%p5836_p0), %v6888_v3  ;;  %6457 = vmatprep.subr.bf16.mxu0 (!%p5836_p0), %v6889_v4  ;;  %v721_v20 = vld [vmem:[%s8601_s19 + $0x18] sm:$0xff] (!%p5836_p0)  ;;  %v722_v21 = vld [vmem:[%s8601_s19 + $0x20] sm:$0xff] (!%p5836_p0)  ;;  %v724_v25 = vld [vmem:[%s8601_s19 + $0x30] sm:$0xff] (!%p5836_p0) }
 0x1f1   : > { %6505 = vmatprep.subr.bf16.mxu1 %v6890_v5  ;;  %6469 = vmatprep.mubr.bf16.mxu0 %v750_v14  ;;  %v751_v23 = vpack.c.bf16 %v721_v20, %v720_v19  ;;  %v752_v24 = vpack.c.bf16 %v723_v22, %v722_v21  ;;  %v725_v26 = vld [vmem:[%s8601_s19 + $0x38] sm:$0xff]  ;;  %v726_v27 = vld [vmem:[%s8601_s19 + $0x40] sm:$0xff]  ;;  %v728_v31 = vld [vmem:[%s8601_s19 + $0x50] sm:$0xff] }
 0x1f2   : > { %6517 = vmatprep.mubr.bf16.mxu1 %v750_v14  ;;  %v753_v29 = vpack.c.bf16 %v725_v26, %v724_v25  ;;  %v754_v30 = vpack.c.bf16 %v727_v28, %v726_v27  ;;  %v729_v32 = vld [vmem:[%s8601_s19 + $0x58] sm:$0xff]  ;;  %v730_v33 = vld [vmem:[%s8601_s19 + $0x60] sm:$0xff]  ;;  %v731_v34 = vld [vmem:[%s8601_s19 + $0x68] sm:$0xff] }
 0x1f3   : > { %6458 = vmatpush3.bf16.msra.mxu0 %v6889_v4  ;;  %v755_v35 = vpack.c.bf16 %v729_v32, %v728_v31  ;;  %v756_v36 = vpack.c.bf16 %v731_v34, %v730_v33  ;;  %v732_v37 = vld [vmem:[%s8601_s19 + $0x70] sm:$0xff]  ;;  %v733_v38 = vld [vmem:[%s8601_s19 + $0x78] sm:$0xff]  ;;  %v734_v39 = vld [vmem:[%s8601_s19 + $0x80] sm:$0xff] }
 0x1f4   : > { %6506 = vmatpush3.bf16.msra.mxu1 %v6890_v5  ;;  %6459 = vmatprep.subr.bf16.mxu0 %v6891_v6  ;;  %v735_v40 = vld [vmem:[%s8601_s19 + $0x88] sm:$0xff]  ;;  %v757_v41 = vpack.c.bf16 %v733_v38, %v732_v37  ;;  %v736_v43 = vld [vmem:[%s8601_s19 + $0x90] sm:$0xff]  ;;  %v737_v44 = vld [vmem:[%s8601_s19 + $0x98] sm:$0xff] }
 0x1f5   : > { %6507 = vmatprep.subr.bf16.mxu1 %v6892_v7  ;;  %v758_v42 = vpack.c.bf16 %v735_v40, %v734_v39  ;;  %v738_v45 = vld [vmem:[%s8601_s19 + $0xa0] sm:$0xff]  ;;  %v739_v46 = vld [vmem:[%s8601_s19 + $0xa8] sm:$0xff]  ;;  %v759_v47 = vpack.c.bf16 %v737_v44, %v736_v43  ;;  %v740_v49 = vld [vmem:[%s8601_s19 + $0xb0] sm:$0xff] }
 0x1f6   : > { %v760_v48 = vpack.c.bf16 %v739_v46, %v738_v45  ;;  %v741_v50 = vld [vmem:[%s8601_s19 + $0xb8] sm:$0xff]  ;;  %v742_v51 = vld [vmem:[%s8601_s19 + $0xc0] sm:$0xff]  ;;  %v743_v52 = vld [vmem:[%s8601_s19 + $0xc8] sm:$0xff] }
 0x1f7   : > { %6460 = vmatpush3.bf16.msra.mxu0 %v6891_v6  ;;  %v761_v53 = vpack.c.bf16 %v741_v50, %v740_v49  ;;  %v762_v54 = vpack.c.bf16 %v743_v52, %v742_v51  ;;  %v744_v55 = vld [vmem:[%s8601_s19 + $0xd0] sm:$0xff]  ;;  %v745_v56 = vld [vmem:[%s8601_s19 + $0xd8] sm:$0xff]  ;;  %v746_v57 = vld [vmem:[%s8601_s19 + $0xe0] sm:$0xff] }
 0x1f8   : > { %6508 = vmatpush3.bf16.msra.mxu1 %v6892_v7  ;;  %6461 = vmatprep.subr.bf16.mxu0 %v6893_v8  ;;  %v747_v58 = vld [vmem:[%s8601_s19 + $0xe8] sm:$0xff]  ;;  %v763_v59 = vpack.c.bf16 %v745_v56, %v744_v55  ;;  %v748_v61 = vld [vmem:[%s8601_s19 + $0xf0] sm:$0xff]  ;;  %v749_v62 = vld [vmem:[%s8601_s19 + $0xf8] sm:$0xff] }
 0x1f9   : > { %6509 = vmatprep.subr.bf16.mxu1 %v6894_v9  ;;  %v764_v60 = vpack.c.bf16 %v747_v58, %v746_v57  ;;  %v765_v63 = vpack.c.bf16 %v749_v62, %v748_v61  ;;  %v8673_v1 = vld [vmem:[#allocation14] ss:$0 sm:$0xff]  ;;  %v8675_v3 = vld [vmem:[#allocation17] ss:$0 sm:$0xff] }
 0x1fb   : > { %6462 = vmatpush3.bf16.msra.mxu0 %v6893_v8 }
 0x1fc   : > { %6510 = vmatpush3.bf16.msra.mxu1 %v6894_v9  ;;  %6463 = vmatprep.subr.bf16.mxu0 %v6895_v10 }
 0x1fd   : > { %6511 = vmatprep.subr.bf16.mxu1 %v6896_v13 }
 0x1ff   : > { %6464 = vmatpush3.bf16.msra.mxu0 %v6895_v10 }
 0x200   : > { %6512 = vmatpush3.bf16.msra.mxu1 %v6896_v13  ;;  %6465 = vmatprep.subr.bf16.mxu0 %v6897_v15 }
 0x201   : > { %6513 = vmatprep.subr.bf16.mxu1 %v6898_v16 }
 0x203   : > { %6466 = vmatpush3.bf16.msra.mxu0 %v6897_v15 }
 0x204   : > { %6514 = vmatpush3.bf16.msra.mxu1 %v6898_v16  ;;  %6467 = vmatprep.subr.bf16.mxu0 %v6899_v17 }
 0x205   : > { %6515 = vmatprep.subr.bf16.mxu1 %v6900_v18 }
 0x207   : > { %6468 = vmatpush3.bf16.msra.mxu0 %v6899_v17 }
 0x208   : > { %6516 = vmatpush3.bf16.msra.mxu1 %v6900_v18 }
 0x20a   : > { %6470 = vmatmul.mubr.bf16.vlgmr.msra.gmra.mrb[0].mxu0 %v751_v23 }
 0x20b   : > { %6518 = vmatmul.mubr.bf16.vlgmr.msra.gmra.mrb[0].mxu1 %v751_v23  ;;  %6473 = vmatprep.mubr.bf16.mxu0 %v752_v24 }
 0x20c   : > { %6521 = vmatprep.mubr.bf16.mxu1 %v752_v24 }
 0x212   : > { %6474 = vmatmul.mubr.bf16.gmra.mrb[4].mxu0 %v753_v29 }
 0x213   : > { %6522 = vmatmul.mubr.bf16.gmra.mrb[4].mxu1 %v753_v29  ;;  %6477 = vmatprep.mubr.bf16.mxu0 %v754_v30 }
 0x214   : > { %6525 = vmatprep.mubr.bf16.mxu1 %v754_v30 }
 0x21a   : > { %6478 = vmatmul.mubr.bf16.gmra.mrb[8].mxu0 %v755_v35 }
 0x21b   : > { %6526 = vmatmul.mubr.bf16.gmra.mrb[8].mxu1 %v755_v35  ;;  %6481 = vmatprep.mubr.bf16.mxu0 %v756_v36 }
 0x21c   : > { %6529 = vmatprep.mubr.bf16.mxu1 %v756_v36 }
 0x222   : > { %6482 = vmatmul.mubr.bf16.gmra.mrb[12].mxu0 %v757_v41 }
 0x223   : > { %6530 = vmatmul.mubr.bf16.gmra.mrb[12].mxu1 %v757_v41  ;;  %6485 = vmatprep.mubr.bf16.mxu0 %v758_v42 }
 0x224   : > { %6533 = vmatprep.mubr.bf16.mxu1 %v758_v42 }
 0x22a   : > { %6486 = vmatmul.mubr.bf16.gmra.mrb[16].mxu0 %v759_v47 }
 0x22b   : > { %6534 = vmatmul.mubr.bf16.gmra.mrb[16].mxu1 %v759_v47  ;;  %6489 = vmatprep.mubr.bf16.mxu0 %v760_v48 }
 0x22c   : > { %6537 = vmatprep.mubr.bf16.mxu1 %v760_v48 }
 0x232   : > { %6490 = vmatmul.mubr.bf16.gmra.mrb[20].mxu0 %v761_v53 }
 0x233   : > { %6538 = vmatmul.mubr.bf16.gmra.mrb[20].mxu1 %v761_v53  ;;  %6493 = vmatprep.mubr.bf16.mxu0 %v762_v54 }
 0x234   : > { %6541 = vmatprep.mubr.bf16.mxu1 %v762_v54 }
 0x23a   : > { %6494 = vmatmul.mubr.bf16.gmra.mrb[24].mxu0 %v763_v59 }
 0x23b   : > { %6542 = vmatmul.mubr.bf16.gmra.mrb[24].mxu1 %v763_v59  ;;  %6497 = vmatprep.mubr.bf16.mxu0 %v764_v60 }
 0x23c   : > { %6545 = vmatprep.mubr.bf16.mxu1 %v764_v60 }
 0x242   : > { %6498 = vmatmul.mubr.bf16.gmra.mrb[28].mxu0 %v765_v63 }
 0x243   : > { %6546 = vmatmul.mubr.bf16.gmra.mrb[28].mxu1 %v765_v63 }
 0x2dd   : > { %v6471_v0 = vpop.f32.mrb[0].mxu0 }
 0x2de   : > { %v6519_v2 = vpop.f32.mrb[0].mxu1  ;;  %v871_v4 = vpop.f32.mrb[1].mxu0  ;;  %v880_v7 = vadd.f32 %v6471_v0, %v8673_v1 }
 0x2df   : > { %v1103_v5 = vpop.f32.mrb[1].mxu1  ;;  %v6472_v6 = vpop.f32.mrb[2].mxu0  ;;  %v1112_v11 = vadd.f32 %v6519_v2, %v8675_v3  ;;  %v872_v12 = vadd.f32 %v8673_v1, %v871_v4 }
 0x2e0   : > { %v883_v8 = vadd.f32 %v6472_v6, %v8673_v1  ;;  %v6520_v9 = vpop.f32.mrb[2].mxu1  ;;  %v874_v10 = vpop.f32.mrb[3].mxu0  ;;  %v1104_v16 = vadd.f32 %v8675_v3, %v1103_v5 }
 0x2e1   : > { %v1115_v13 = vadd.f32 %v6520_v9, %v8675_v3  ;;  %v875_v14 = vadd.f32 %v8673_v1, %v874_v10  ;;  %v1106_v15 = vpop.f32.mrb[3].mxu1 }
 0x2e2   : > { %v1231_v17 = vpack.c.bf16 %v883_v8, %v880_v7  ;;  %v1107_v18 = vadd.f32 %v8675_v3, %v1106_v15 }
 0x2e3   : > { %v8685_v19 = vpack.c.bf16 %v1115_v13, %v1112_v11  ;;  %v8687_v20 = vpack.c.bf16 %v875_v14, %v872_v12 }
 0x2e4   : > { %1264 = vst.msk [vmem:[#allocation2 + $0x8] sm:$0xff] %vm1262_vm0, %v1231_v17  ;;  %v8690_v21 = vpack.c.bf16 %v1107_v18, %v1104_v16  ;;  %1313 = vrot.lane.b32.xlu0 %v1231_v17, %s8006_s1 }
 0x2e5   : > { %1280 = vst.msk [vmem:[#allocation3 + $0x8] sm:$0xff] %vm1262_vm0, %v8685_v19  ;;  %1263 = vst.msk [vmem:[#allocation2] sm:$0xff] %vm1262_vm0, %v8687_v20  ;;  %1394 = vrot.lane.b32.xlu1 %v8685_v19, %s8006_s1  ;;  %v6475_v22 = vpop.f32.mrb[4].mxu0 }
 0x2e6   : > { %1279 = vst.msk [vmem:[#allocation3] sm:$0xff] %vm1262_vm0, %v8690_v21  ;;  %v896_v23 = vadd.f32 %v6475_v22, %v8673_v1  ;;  %v887_v24 = vpop.f32.mrb[5].mxu0  ;;  %v6523_v25 = vpop.f32.mrb[4].mxu1 }
 0x2e7   : > { %v888_v26 = vadd.f32 %v8673_v1, %v887_v24  ;;  %v6476_v27 = vpop.f32.mrb[6].mxu0  ;;  %v1128_v28 = vadd.f32 %v6523_v25, %v8675_v3  ;;  %v1119_v29 = vpop.f32.mrb[5].mxu1 }
 0x2e8   : > { %1311 = vrot.lane.b32.xlu0 %v8687_v20, %s8006_s1  ;;  %v899_v30 = vadd.f32 %v6476_v27, %v8673_v1  ;;  %v890_v31 = vpop.f32.mrb[7].mxu0  ;;  %v1120_v32 = vadd.f32 %v8675_v3, %v1119_v29  ;;  %v6524_v33 = vpop.f32.mrb[6].mxu1 }
 0x2e9   : > { %1459 = vrot.lane.b32.xlu1 %v1231_v17, %s8007_s26  ;;  %v891_v34 = vadd.f32 %v8673_v1, %v890_v31  ;;  %v1131_v35 = vadd.f32 %v6524_v33, %v8675_v3  ;;  %v1122_v36 = vpop.f32.mrb[7].mxu1 }
 0x2ea   : > { %v8711_v37 = vpack.c.bf16 %v899_v30, %v896_v23  ;;  %v1123_v38 = vadd.f32 %v8675_v3, %v1122_v36 }
 0x2eb   : > { %v8714_v39 = vpack.c.bf16 %v891_v34, %v888_v26  ;;  %v8716_v40 = vpack.c.bf16 %v1131_v35, %v1128_v28 }
 0x2ec   : > { %1392 = vrot.lane.b32.xlu0 %v8690_v21, %s8006_s1  ;;  %1266 = vst.msk [vmem:[#allocation2 + $0x18] sm:$0xff] %vm1262_vm0, %v8711_v37  ;;  %v8722_v41 = vpack.c.bf16 %v1123_v38, %v1120_v32 }
 0x2ed   : > { %1524 = vrot.lane.b32.xlu1 %v8685_v19, %s8007_s26  ;;  %1265 = vst.msk [vmem:[#allocation2 + $0x10] sm:$0xff] %vm1262_vm0, %v8714_v39  ;;  %1282 = vst.msk [vmem:[#allocation3 + $0x18] sm:$0xff] %vm1262_vm0, %v8716_v40  ;;  %v6479_v42 = vpop.f32.mrb[8].mxu0 }
 0x2ee   : > { %1281 = vst.msk [vmem:[#allocation3 + $0x10] sm:$0xff] %vm1262_vm0, %v8722_v41  ;;  %v912_v43 = vadd.f32 %v6479_v42, %v8673_v1  ;;  %v903_v44 = vpop.f32.mrb[9].mxu0  ;;  %v6527_v45 = vpop.f32.mrb[8].mxu1 }
 0x2ef   : > { %v904_v46 = vadd.f32 %v8673_v1, %v903_v44  ;;  %v6480_v47 = vpop.f32.mrb[10].mxu0  ;;  %v1144_v48 = vadd.f32 %v6527_v45, %v8675_v3  ;;  %v1135_v49 = vpop.f32.mrb[9].mxu1 }
 0x2f0   : > { %1457 = vrot.lane.b32.xlu0 %v8687_v20, %s8007_s26  ;;  %v915_v50 = vadd.f32 %v6480_v47, %v8673_v1  ;;  %v906_v51 = vpop.f32.mrb[11].mxu0  ;;  %v1136_v52 = vadd.f32 %v8675_v3, %v1135_v49  ;;  %v6528_v53 = vpop.f32.mrb[10].mxu1 }
 0x2f1   : > { %1589 = vrot.lane.b32.xlu1 %v1231_v17, %s8008_s5  ;;  %v907_v54 = vadd.f32 %v8673_v1, %v906_v51  ;;  %v1147_v55 = vadd.f32 %v6528_v53, %v8675_v3  ;;  %v1138_v56 = vpop.f32.mrb[11].mxu1 }
 0x2f2   : > { %v8742_v57 = vpack.c.bf16 %v915_v50, %v912_v43  ;;  %v1139_v58 = vadd.f32 %v8675_v3, %v1138_v56 }
 0x2f3   : > { %v8745_v59 = vpack.c.bf16 %v907_v54, %v904_v46  ;;  %v8747_v60 = vpack.c.bf16 %v1147_v55, %v1144_v48 }
 0x2f4   : > { %1522 = vrot.lane.b32.xlu0 %v8690_v21, %s8007_s26  ;;  %1268 = vst.msk [vmem:[#allocation2 + $0x28] sm:$0xff] %vm1262_vm0, %v8742_v57  ;;  %v8753_v61 = vpack.c.bf16 %v1139_v58, %v1136_v52 }
 0x2f5   : > { %1654 = vrot.lane.b32.xlu1 %v8685_v19, %s8008_s5  ;;  %1267 = vst.msk [vmem:[#allocation2 + $0x20] sm:$0xff] %vm1262_vm0, %v8745_v59  ;;  %1284 = vst.msk [vmem:[#allocation3 + $0x28] sm:$0xff] %vm1262_vm0, %v8747_v60  ;;  %v6483_v62 = vpop.f32.mrb[12].mxu0 }
 0x2f6   : > { %1283 = vst.msk [vmem:[#allocation3 + $0x20] sm:$0xff] %vm1262_vm0, %v8753_v61  ;;  %v928_v63 = vadd.f32 %v6483_v62, %v8673_v1  ;;  %v919_v0 = vpop.f32.mrb[13].mxu0  ;;  %v6531_v2 = vpop.f32.mrb[12].mxu1 }
 0x2f7   : > { %v920_v4 = vadd.f32 %v8673_v1, %v919_v0  ;;  %v6484_v5 = vpop.f32.mrb[14].mxu0  ;;  %v1160_v6 = vadd.f32 %v6531_v2, %v8675_v3  ;;  %v1151_v7 = vpop.f32.mrb[13].mxu1 }
 0x2f8   : > { %1587 = vrot.lane.b32.xlu0 %v8687_v20, %s8008_s5  ;;  %v931_v8 = vadd.f32 %v6484_v5, %v8673_v1  ;;  %v922_v9 = vpop.f32.mrb[15].mxu0  ;;  %v1152_v10 = vadd.f32 %v8675_v3, %v1151_v7  ;;  %v6532_v11 = vpop.f32.mrb[14].mxu1 }
 0x2f9   : > { %1317 = vrot.lane.b32.xlu1 %v8711_v37, %s8006_s1  ;;  %v923_v12 = vadd.f32 %v8673_v1, %v922_v9  ;;  %v1163_v13 = vadd.f32 %v6532_v11, %v8675_v3  ;;  %v1154_v14 = vpop.f32.mrb[15].mxu1 }
 0x2fa   : > { %v8774_v15 = vpack.c.bf16 %v931_v8, %v928_v63  ;;  %v1155_v16 = vadd.f32 %v8675_v3, %v1154_v14 }
 0x2fb   : > { %v8777_v17 = vpack.c.bf16 %v923_v12, %v920_v4  ;;  %v8779_v18 = vpack.c.bf16 %v1163_v13, %v1160_v6 }
 0x2fc   : > { %1652 = vrot.lane.b32.xlu0 %v8690_v21, %s8008_s5  ;;  %1270 = vst.msk [vmem:[#allocation2 + $0x38] sm:$0xff] %vm1262_vm0, %v8774_v15  ;;  %v8785_v19 = vpack.c.bf16 %v1155_v16, %v1152_v10 }
 0x2fd   : > { %1398 = vrot.lane.b32.xlu1 %v8716_v40, %s8006_s1  ;;  %1269 = vst.msk [vmem:[#allocation2 + $0x30] sm:$0xff] %vm1262_vm0, %v8777_v17  ;;  %1286 = vst.msk [vmem:[#allocation3 + $0x38] sm:$0xff] %vm1262_vm0, %v8779_v18  ;;  %v6487_v20 = vpop.f32.mrb[16].mxu0 }
 0x2fe   : > { %1285 = vst.msk [vmem:[#allocation3 + $0x30] sm:$0xff] %vm1262_vm0, %v8785_v19  ;;  %v944_v21 = vadd.f32 %v6487_v20, %v8673_v1  ;;  %v935_v22 = vpop.f32.mrb[17].mxu0  ;;  %v6535_v23 = vpop.f32.mrb[16].mxu1 }
 0x2ff   : > { %v936_v24 = vadd.f32 %v8673_v1, %v935_v22  ;;  %v6488_v25 = vpop.f32.mrb[18].mxu0  ;;  %v1176_v26 = vadd.f32 %v6535_v23, %v8675_v3  ;;  %v1167_v27 = vpop.f32.mrb[17].mxu1 }
 0x300   : > { %1396 = vrot.lane.b32.xlu0 %v8722_v41, %s8006_s1  ;;  %v947_v28 = vadd.f32 %v6488_v25, %v8673_v1  ;;  %v938_v29 = vpop.f32.mrb[19].mxu0  ;;  %v1168_v30 = vadd.f32 %v8675_v3, %v1167_v27  ;;  %v6536_v31 = vpop.f32.mrb[18].mxu1 }
 0x301   : > { %1463 = vrot.lane.b32.xlu1 %v8711_v37, %s8007_s26  ;;  %v939_v32 = vadd.f32 %v8673_v1, %v938_v29  ;;  %v1179_v33 = vadd.f32 %v6536_v31, %v8675_v3  ;;  %v1170_v34 = vpop.f32.mrb[19].mxu1 }
 0x302   : > { %v8806_v35 = vpack.c.bf16 %v947_v28, %v944_v21  ;;  %v1171_v36 = vadd.f32 %v8675_v3, %v1170_v34 }
 0x303   : > { %v8809_v38 = vpack.c.bf16 %v939_v32, %v936_v24  ;;  %v8811_v42 = vpack.c.bf16 %v1179_v33, %v1176_v26 }
 0x304   : > { %1461 = vrot.lane.b32.xlu0 %v8714_v39, %s8007_s26  ;;  %1272 = vst.msk [vmem:[#allocation2 + $0x48] sm:$0xff] %vm1262_vm0, %v8806_v35  ;;  %v8817_v43 = vpack.c.bf16 %v1171_v36, %v1168_v30 }
 0x305   : > { %1528 = vrot.lane.b32.xlu1 %v8716_v40, %s8007_s26  ;;  %1271 = vst.msk [vmem:[#allocation2 + $0x40] sm:$0xff] %vm1262_vm0, %v8809_v38  ;;  %1288 = vst.msk [vmem:[#allocation3 + $0x48] sm:$0xff] %vm1262_vm0, %v8811_v42  ;;  %v6491_v44 = vpop.f32.mrb[20].mxu0 }
 0x306   : > { %1287 = vst.msk [vmem:[#allocation3 + $0x40] sm:$0xff] %vm1262_vm0, %v8817_v43  ;;  %v960_v45 = vadd.f32 %v6491_v44, %v8673_v1  ;;  %v951_v46 = vpop.f32.mrb[21].mxu0  ;;  %v6539_v47 = vpop.f32.mrb[20].mxu1 }
 0x307   : > { %v952_v48 = vadd.f32 %v8673_v1, %v951_v46  ;;  %v6492_v49 = vpop.f32.mrb[22].mxu0  ;;  %v1192_v50 = vadd.f32 %v6539_v47, %v8675_v3  ;;  %v1183_v51 = vpop.f32.mrb[21].mxu1 }
 0x308   : > { %1526 = vrot.lane.b32.xlu0 %v8722_v41, %s8007_s26  ;;  %v963_v52 = vadd.f32 %v6492_v49, %v8673_v1  ;;  %v954_v53 = vpop.f32.mrb[23].mxu0  ;;  %v1184_v54 = vadd.f32 %v8675_v3, %v1183_v51  ;;  %v6540_v55 = vpop.f32.mrb[22].mxu1 }
 0x309   : > { %1593 = vrot.lane.b32.xlu1 %v8711_v37, %s8008_s5  ;;  %v955_v56 = vadd.f32 %v8673_v1, %v954_v53  ;;  %v1195_v58 = vadd.f32 %v6540_v55, %v8675_v3  ;;  %v1186_v62 = vpop.f32.mrb[23].mxu1 }
 0x30a   : > { %v8838_v63 = vpack.c.bf16 %v963_v52, %v960_v45  ;;  %v1187_v0 = vadd.f32 %v8675_v3, %v1186_v62 }
 0x30b   : > { %v8841_v2 = vpack.c.bf16 %v955_v56, %v952_v48  ;;  %v8843_v4 = vpack.c.bf16 %v1195_v58, %v1192_v50 }
 0x30c   : > { %1591 = vrot.lane.b32.xlu0 %v8714_v39, %s8008_s5  ;;  %1274 = vst.msk [vmem:[#allocation2 + $0x58] sm:$0xff] %vm1262_vm0, %v8838_v63  ;;  %v8849_v37 = vpack.c.bf16 %v1187_v0, %v1184_v54 }
 0x30d   : > { %1658 = vrot.lane.b32.xlu1 %v8716_v40, %s8008_s5  ;;  %1273 = vst.msk [vmem:[#allocation2 + $0x50] sm:$0xff] %vm1262_vm0, %v8841_v2  ;;  %1290 = vst.msk [vmem:[#allocation3 + $0x58] sm:$0xff] %vm1262_vm0, %v8843_v4  ;;  %v6495_v5 = vpop.f32.mrb[24].mxu0 }
 0x30e   : > { %1289 = vst.msk [vmem:[#allocation3 + $0x50] sm:$0xff] %vm1262_vm0, %v8849_v37  ;;  %v976_v6 = vadd.f32 %v6495_v5, %v8673_v1  ;;  %v967_v7 = vpop.f32.mrb[25].mxu0  ;;  %v6543_v8 = vpop.f32.mrb[24].mxu1 }
 0x30f   : > { %v968_v9 = vadd.f32 %v8673_v1, %v967_v7  ;;  %v6496_v10 = vpop.f32.mrb[26].mxu0  ;;  %v1208_v11 = vadd.f32 %v6543_v8, %v8675_v3  ;;  %v1199_v40 = vpop.f32.mrb[25].mxu1 }
 0x310   : > { %1656 = vrot.lane.b32.xlu0 %v8722_v41, %s8008_s5  ;;  %v979_v12 = vadd.f32 %v6496_v10, %v8673_v1  ;;  %v970_v13 = vpop.f32.mrb[27].mxu0  ;;  %v1200_v14 = vadd.f32 %v8675_v3, %v1199_v40  ;;  %v6544_v16 = vpop.f32.mrb[26].mxu1 }
 0x311   : > { %1315 = vrot.lane.b32.xlu1 %v8714_v39, %s8006_s1  ;;  %v971_v20 = vadd.f32 %v8673_v1, %v970_v13  ;;  %v1211_v21 = vadd.f32 %v6544_v16, %v8675_v3  ;;  %v1202_v22 = vpop.f32.mrb[27].mxu1 }
 0x312   : > { %v8870_v23 = vpack.c.bf16 %v979_v12, %v976_v6  ;;  %v1203_v24 = vadd.f32 %v8675_v3, %v1202_v22 }
 0x313   : > { %v8873_v25 = vpack.c.bf16 %v971_v20, %v968_v9  ;;  %v8875_v41 = vpack.c.bf16 %v1211_v21, %v1208_v11 }
 0x314   : > { %1319 = vrot.lane.b32.xlu0 %v8745_v59, %s8006_s1  ;;  %1276 = vst.msk [vmem:[#allocation2 + $0x68] sm:$0xff] %vm1262_vm0, %v8870_v23  ;;  %v8881_v39 = vpack.c.bf16 %v1203_v24, %v1200_v14 }
 0x315   : > { %1321 = vrot.lane.b32.xlu1 %v8742_v57, %s8006_s1  ;;  %1275 = vst.msk [vmem:[#allocation2 + $0x60] sm:$0xff] %vm1262_vm0, %v8873_v25  ;;  %1292 = vst.msk [vmem:[#allocation3 + $0x68] sm:$0xff] %vm1262_vm0, %v8875_v41  ;;  %v6499_v26 = vpop.f32.mrb[28].mxu0 }
 0x316   : > { %1291 = vst.msk [vmem:[#allocation3 + $0x60] sm:$0xff] %vm1262_vm0, %v8881_v39  ;;  %v992_v27 = vadd.f32 %v6499_v26, %v8673_v1  ;;  %v983_v28 = vpop.f32.mrb[29].mxu0  ;;  %v6547_v29 = vpop.f32.mrb[28].mxu1 }
 0x317   : > { %v984_v30 = vadd.f32 %v8673_v1, %v983_v28  ;;  %v6500_v31 = vpop.f32.mrb[30].mxu0  ;;  %v1224_v32 = vadd.f32 %v6547_v29, %v8675_v3  ;;  %v1215_v33 = vpop.f32.mrb[29].mxu1 }
 0x318   : > { %1400 = vrot.lane.b32.xlu0 %v8753_v61, %s8006_s1  ;;  %v995_v34 = vadd.f32 %v6500_v31, %v8673_v1  ;;  %v986_v36 = vpop.f32.mrb[31].mxu0  ;;  %v1216_v44 = vadd.f32 %v8675_v3, %v1215_v33  ;;  %v6548_v45 = vpop.f32.mrb[30].mxu1 }
 0x319   : > { %1402 = vrot.lane.b32.xlu1 %v8747_v60, %s8006_s1  ;;  %v987_v46 = vadd.f32 %v8673_v1, %v986_v36  ;;  %v1227_v47 = vadd.f32 %v6548_v45, %v8675_v3  ;;  %v1218_v48 = vpop.f32.mrb[31].mxu1 }
 0x31a   : > { %v8902_v49 = vpack.c.bf16 %v995_v34, %v992_v27  ;;  %v1219_v50 = vadd.f32 %v8675_v3, %v1218_v48 }
 0x31b   : > { %v8905_v51 = vpack.c.bf16 %v987_v46, %v984_v30  ;;  %v8907_v52 = vpack.c.bf16 %v1227_v47, %v1224_v32 }
 0x31c   : > { %1465 = vrot.lane.b32.xlu0 %v8745_v59, %s8007_s26  ;;  %1278 = vst.msk [vmem:[#allocation2 + $0x78] sm:$0xff] %vm1262_vm0, %v8902_v49  ;;  %v8913_v53 = vpack.c.bf16 %v1219_v50, %v1216_v44 }
 0x31d   : > { %1467 = vrot.lane.b32.xlu1 %v8742_v57, %s8007_s26  ;;  %1277 = vst.msk [vmem:[#allocation2 + $0x70] sm:$0xff] %vm1262_vm0, %v8905_v51  ;;  %1294 = vst.msk [vmem:[#allocation3 + $0x78] sm:$0xff] %vm1262_vm0, %v8907_v52 }
 0x31e   : > { %1293 = vst.msk [vmem:[#allocation3 + $0x70] sm:$0xff] %vm1262_vm0, %v8913_v53 }
 0x320   : > { %1530 = vrot.lane.b32.xlu0 %v8753_v61, %s8007_s26 }
 0x321   : > { %1532 = vrot.lane.b32.xlu1 %v8747_v60, %s8007_s26 }
 0x324   : > { %1595 = vrot.lane.b32.xlu0 %v8745_v59, %s8008_s5 }
 0x325   : > { %1597 = vrot.lane.b32.xlu1 %v8742_v57, %s8008_s5 }
 0x328   : > { %1660 = vrot.lane.b32.xlu0 %v8753_v61, %s8008_s5 }
 0x329   : > { %1662 = vrot.lane.b32.xlu1 %v8747_v60, %s8008_s5 }
 0x32c   : > { %1323 = vrot.lane.b32.xlu0 %v8777_v17, %s8006_s1 }
 0x32d   : > { %1325 = vrot.lane.b32.xlu1 %v8774_v15, %s8006_s1 }
 0x330   : > { %1404 = vrot.lane.b32.xlu0 %v8785_v19, %s8006_s1 }
 0x331   : > { %1406 = vrot.lane.b32.xlu1 %v8779_v18, %s8006_s1 }
 0x334   : > { %1469 = vrot.lane.b32.xlu0 %v8777_v17, %s8007_s26 }
 0x335   : > { %1471 = vrot.lane.b32.xlu1 %v8774_v15, %s8007_s26 }
 0x338   : > { %1534 = vrot.lane.b32.xlu0 %v8785_v19, %s8007_s26 }
 0x339   : > { %1536 = vrot.lane.b32.xlu1 %v8779_v18, %s8007_s26 }
 0x33c   : > { %1599 = vrot.lane.b32.xlu0 %v8777_v17, %s8008_s5 }
 0x33d   : > { %1601 = vrot.lane.b32.xlu1 %v8774_v15, %s8008_s5 }
 0x340   : > { %1664 = vrot.lane.b32.xlu0 %v8785_v19, %s8008_s5 }
 0x341   : > { %1666 = vrot.lane.b32.xlu1 %v8779_v18, %s8008_s5 }
 0x344   : > { %1327 = vrot.lane.b32.xlu0 %v8809_v38, %s8006_s1 }
 0x345   : > { %1329 = vrot.lane.b32.xlu1 %v8806_v35, %s8006_s1 }
 0x348   : > { %1408 = vrot.lane.b32.xlu0 %v8817_v43, %s8006_s1 }
 0x349   : > { %1410 = vrot.lane.b32.xlu1 %v8811_v42, %s8006_s1 }
 0x34c   : > { %1473 = vrot.lane.b32.xlu0 %v8809_v38, %s8007_s26 }
 0x34d   : > { %1475 = vrot.lane.b32.xlu1 %v8806_v35, %s8007_s26 }
 0x350   : > { %1538 = vrot.lane.b32.xlu0 %v8817_v43, %s8007_s26 }
 0x351   : > { %1540 = vrot.lane.b32.xlu1 %v8811_v42, %s8007_s26 }
 0x354   : > { %1603 = vrot.lane.b32.xlu0 %v8809_v38, %s8008_s5 }
 0x355   : > { %1605 = vrot.lane.b32.xlu1 %v8806_v35, %s8008_s5 }
 0x356   : > { %v1314_v1 = vpop.permute.xlu0 %1313 }
 0x357   : > { %v1395_v3 = vpop.permute.xlu1 %1394  ;;  %1361 = vst.msk [vmem:[#allocation2 + $0x88] sm:$0xff] %vm1262_vm0, %v1314_v1 }
 0x358   : > { %1442 = vst.msk [vmem:[#allocation3 + $0x88] sm:$0xff] %vm1262_vm0, %v1395_v3  ;;  %1668 = vrot.lane.b32.xlu0 %v8817_v43, %s8008_s5 }
 0x359   : > { %1670 = vrot.lane.b32.xlu1 %v8811_v42, %s8008_s5 }
 0x35a   : > { %v1312_v57 = vpop.permute.xlu0 %1311 }
 0x35b   : > { %v1460_v59 = vpop.permute.xlu1 %1459  ;;  %1360 = vst.msk [vmem:[#allocation2 + $0x80] sm:$0xff] %vm1262_vm0, %v1312_v57 }
 0x35c   : > { %1507 = vst.msk [vmem:[#allocation2 + $0x108] sm:$0xff] %vm1262_vm0, %v1460_v59  ;;  %1331 = vrot.lane.b32.xlu0 %v8841_v2, %s8006_s1 }
 0x35d   : > { %1333 = vrot.lane.b32.xlu1 %v8838_v63, %s8006_s1 }
 0x35e   : > { %v1393_v60 = vpop.permute.xlu0 %1392 }
 0x35f   : > { %v1525_v61 = vpop.permute.xlu1 %1524  ;;  %1441 = vst.msk [vmem:[#allocation3 + $0x80] sm:$0xff] %vm1262_vm0, %v1393_v60 }
 0x360   : > { %1572 = vst.msk [vmem:[#allocation3 + $0x108] sm:$0xff] %vm1262_vm0, %v1525_v61  ;;  %1412 = vrot.lane.b32.xlu0 %v8849_v37, %s8006_s1 }
 0x361   : > { %1414 = vrot.lane.b32.xlu1 %v8843_v4, %s8006_s1 }
 0x362   : > { %v1458_v15 = vpop.permute.xlu0 %1457 }
 0x363   : > { %v1590_v17 = vpop.permute.xlu1 %1589  ;;  %1506 = vst.msk [vmem:[#allocation2 + $0x100] sm:$0xff] %vm1262_vm0, %v1458_v15 }
 0x364   : > { %1637 = vst.msk [vmem:[#allocation2 + $0x188] sm:$0xff] %vm1262_vm0, %v1590_v17  ;;  %1477 = vrot.lane.b32.xlu0 %v8841_v2, %s8007_s26 }
 0x365   : > { %1479 = vrot.lane.b32.xlu1 %v8838_v63, %s8007_s26 }
 0x366   : > { %v1523_v18 = vpop.permute.xlu0 %1522 }
 0x367   : > { %v1655_v19 = vpop.permute.xlu1 %1654  ;;  %1571 = vst.msk [vmem:[#allocation3 + $0x100] sm:$0xff] %vm1262_vm0, %v1523_v18 }
 0x368   : > { %1702 = vst.msk [vmem:[#allocation3 + $0x188] sm:$0xff] %vm1262_vm0, %v1655_v19  ;;  %1542 = vrot.lane.b32.xlu0 %v8849_v37, %s8007_s26 }
 0x369   : > { %1544 = vrot.lane.b32.xlu1 %v8843_v4, %s8007_s26 }
 0x36a   : > { %v1588_v35 = vpop.permute.xlu0 %1587 }
 0x36b   : > { %v1318_v38 = vpop.permute.xlu1 %1317  ;;  %1636 = vst.msk [vmem:[#allocation2 + $0x180] sm:$0xff] %vm1262_vm0, %v1588_v35 }
 0x36c   : > { %1363 = vst.msk [vmem:[#allocation2 + $0x98] sm:$0xff] %vm1262_vm0, %v1318_v38  ;;  %1607 = vrot.lane.b32.xlu0 %v8841_v2, %s8008_s5 }
 0x36d   : > { %1609 = vrot.lane.b32.xlu1 %v8838_v63, %s8008_s5 }
 0x36e   : > { %v1653_v42 = vpop.permute.xlu0 %1652 }
 0x36f   : > { %v1399_v43 = vpop.permute.xlu1 %1398  ;;  %1701 = vst.msk [vmem:[#allocation3 + $0x180] sm:$0xff] %vm1262_vm0, %v1653_v42 }
 0x370   : > { %1444 = vst.msk [vmem:[#allocation3 + $0x98] sm:$0xff] %vm1262_vm0, %v1399_v43  ;;  %1672 = vrot.lane.b32.xlu0 %v8849_v37, %s8008_s5 }
 0x371   : > { %1674 = vrot.lane.b32.xlu1 %v8843_v4, %s8008_s5 }
 0x372   : > { %v1397_v54 = vpop.permute.xlu0 %1396 }
 0x373   : > { %v1464_v55 = vpop.permute.xlu1 %1463  ;;  %1443 = vst.msk [vmem:[#allocation3 + $0x90] sm:$0xff] %vm1262_vm0, %v1397_v54 }
 0x374   : > { %1509 = vst.msk [vmem:[#allocation2 + $0x118] sm:$0xff] %vm1262_vm0, %v1464_v55  ;;  %1335 = vrot.lane.b32.xlu0 %v8873_v25, %s8006_s1 }
 0x375   : > { %1337 = vrot.lane.b32.xlu1 %v8870_v23, %s8006_s1 }
 0x376   : > { %v1462_v56 = vpop.permute.xlu0 %1461 }
 0x377   : > { %v1529_v58 = vpop.permute.xlu1 %1528  ;;  %1508 = vst.msk [vmem:[#allocation2 + $0x110] sm:$0xff] %vm1262_vm0, %v1462_v56 }
 0x378   : > { %1574 = vst.msk [vmem:[#allocation3 + $0x118] sm:$0xff] %vm1262_vm0, %v1529_v58  ;;  %1416 = vrot.lane.b32.xlu0 %v8881_v39, %s8006_s1 }
 0x379   : > { %1418 = vrot.lane.b32.xlu1 %v8875_v41, %s8006_s1 }
 0x37a   : > { %v1527_v62 = vpop.permute.xlu0 %1526 }
 0x37b   : > { %v1594_v63 = vpop.permute.xlu1 %1593  ;;  %1573 = vst.msk [vmem:[#allocation3 + $0x110] sm:$0xff] %vm1262_vm0, %v1527_v62 }
 0x37c   : > { %1639 = vst.msk [vmem:[#allocation2 + $0x198] sm:$0xff] %vm1262_vm0, %v1594_v63  ;;  %1481 = vrot.lane.b32.xlu0 %v8873_v25, %s8007_s26 }
 0x37d   : > { %1483 = vrot.lane.b32.xlu1 %v8870_v23, %s8007_s26 }
 0x37e   : > { %v1592_v0 = vpop.permute.xlu0 %1591 }
 0x37f   : > { %v1659_v2 = vpop.permute.xlu1 %1658  ;;  %1638 = vst.msk [vmem:[#allocation2 + $0x190] sm:$0xff] %vm1262_vm0, %v1592_v0 }
 0x380   : > { %1704 = vst.msk [vmem:[#allocation3 + $0x198] sm:$0xff] %vm1262_vm0, %v1659_v2  ;;  %1546 = vrot.lane.b32.xlu0 %v8881_v39, %s8007_s26 }
 0x381   : > { %1548 = vrot.lane.b32.xlu1 %v8875_v41, %s8007_s26 }
 0x382   : > { %v1657_v4 = vpop.permute.xlu0 %1656 }
 0x383   : > { %v1316_v37 = vpop.permute.xlu1 %1315  ;;  %1703 = vst.msk [vmem:[#allocation3 + $0x190] sm:$0xff] %vm1262_vm0, %v1657_v4 }
 0x384   : > { %1362 = vst.msk [vmem:[#allocation2 + $0x90] sm:$0xff] %vm1262_vm0, %v1316_v37  ;;  %1611 = vrot.lane.b32.xlu0 %v8873_v25, %s8008_s5 }
 0x385   : > { %1613 = vrot.lane.b32.xlu1 %v8870_v23, %s8008_s5 }
 0x386   : > { %v1320_v5 = vpop.permute.xlu0 %1319 }
 0x387   : > { %v1322_v6 = vpop.permute.xlu1 %1321  ;;  %1364 = vst.msk [vmem:[#allocation2 + $0xa0] sm:$0xff] %vm1262_vm0, %v1320_v5 }
 0x388   : > { %1365 = vst.msk [vmem:[#allocation2 + $0xa8] sm:$0xff] %vm1262_vm0, %v1322_v6  ;;  %1676 = vrot.lane.b32.xlu0 %v8881_v39, %s8008_s5 }
 0x389   : > { %1678 = vrot.lane.b32.xlu1 %v8875_v41, %s8008_s5 }
 0x38a   : > { %v1401_v7 = vpop.permute.xlu0 %1400 }
 0x38b   : > { %v1403_v8 = vpop.permute.xlu1 %1402  ;;  %1445 = vst.msk [vmem:[#allocation3 + $0xa0] sm:$0xff] %vm1262_vm0, %v1401_v7 }
 0x38c   : > { %1446 = vst.msk [vmem:[#allocation3 + $0xa8] sm:$0xff] %vm1262_vm0, %v1403_v8  ;;  %1339 = vrot.lane.b32.xlu0 %v8905_v51, %s8006_s1 }
 0x38d   : > { %1341 = vrot.lane.b32.xlu1 %v8902_v49, %s8006_s1 }
 0x38e   : > { %v1466_v9 = vpop.permute.xlu0 %1465 }
 0x38f   : > { %v1468_v10 = vpop.permute.xlu1 %1467  ;;  %1510 = vst.msk [vmem:[#allocation2 + $0x120] sm:$0xff] %vm1262_vm0, %v1466_v9 }
 0x390   : > { %1511 = vst.msk [vmem:[#allocation2 + $0x128] sm:$0xff] %vm1262_vm0, %v1468_v10  ;;  %1420 = vrot.lane.b32.xlu0 %v8913_v53, %s8006_s1 }
 0x391   : > { %1422 = vrot.lane.b32.xlu1 %v8907_v52, %s8006_s1 }
 0x392   : > { %v1531_v11 = vpop.permute.xlu0 %1530 }
 0x393   : > { %v1533_v40 = vpop.permute.xlu1 %1532  ;;  %1575 = vst.msk [vmem:[#allocation3 + $0x120] sm:$0xff] %vm1262_vm0, %v1531_v11 }
 0x394   : > { %1576 = vst.msk [vmem:[#allocation3 + $0x128] sm:$0xff] %vm1262_vm0, %v1533_v40  ;;  %1485 = vrot.lane.b32.xlu0 %v8905_v51, %s8007_s26 }
 0x395   : > { %1487 = vrot.lane.b32.xlu1 %v8902_v49, %s8007_s26 }
 0x396   : > { %v1596_v12 = vpop.permute.xlu0 %1595 }
 0x397   : > { %v1598_v13 = vpop.permute.xlu1 %1597  ;;  %1640 = vst.msk [vmem:[#allocation2 + $0x1a0] sm:$0xff] %vm1262_vm0, %v1596_v12 }
 0x398   : > { %1641 = vst.msk [vmem:[#allocation2 + $0x1a8] sm:$0xff] %vm1262_vm0, %v1598_v13  ;;  %1550 = vrot.lane.b32.xlu0 %v8913_v53, %s8007_s26 }
 0x399   : > { %1552 = vrot.lane.b32.xlu1 %v8907_v52, %s8007_s26 }
 0x39a   : > { %v1661_v14 = vpop.permute.xlu0 %1660 }
 0x39b   : > { %v1663_v16 = vpop.permute.xlu1 %1662  ;;  %1705 = vst.msk [vmem:[#allocation3 + $0x1a0] sm:$0xff] %vm1262_vm0, %v1661_v14 }
 0x39c   : > { %1706 = vst.msk [vmem:[#allocation3 + $0x1a8] sm:$0xff] %vm1262_vm0, %v1663_v16  ;;  %1615 = vrot.lane.b32.xlu0 %v8905_v51, %s8008_s5 }
 0x39d   : > { %1617 = vrot.lane.b32.xlu1 %v8902_v49, %s8008_s5 }
 0x39e   : > { %v1324_v20 = vpop.permute.xlu0 %1323 }
 0x39f   : > { %v1326_v21 = vpop.permute.xlu1 %1325  ;;  %1366 = vst.msk [vmem:[#allocation2 + $0xb0] sm:$0xff] %vm1262_vm0, %v1324_v20 }
 0x3a0   : > { %1367 = vst.msk [vmem:[#allocation2 + $0xb8] sm:$0xff] %vm1262_vm0, %v1326_v21  ;;  %1680 = vrot.lane.b32.xlu0 %v8913_v53, %s8008_s5 }
 0x3a1   : > { %1682 = vrot.lane.b32.xlu1 %v8907_v52, %s8008_s5 }
 0x3a2   : > { %v1405_v22 = vpop.permute.xlu0 %1404 }
 0x3a3   : > { %v1407_v23 = vpop.permute.xlu1 %1406  ;;  %1447 = vst.msk [vmem:[#allocation3 + $0xb0] sm:$0xff] %vm1262_vm0, %v1405_v22 }
 0x3a4   : > { %1448 = vst.msk [vmem:[#allocation3 + $0xb8] sm:$0xff] %vm1262_vm0, %v1407_v23 }
 0x3a6   : > { %v1470_v24 = vpop.permute.xlu0 %1469 }
 0x3a7   : > { %v1472_v25 = vpop.permute.xlu1 %1471  ;;  %1512 = vst.msk [vmem:[#allocation2 + $0x130] sm:$0xff] %vm1262_vm0, %v1470_v24 }
 0x3a8   : > { %1513 = vst.msk [vmem:[#allocation2 + $0x138] sm:$0xff] %vm1262_vm0, %v1472_v25 }
 0x3aa   : > { %v1535_v41 = vpop.permute.xlu0 %1534 }
 0x3ab   : > { %v1537_v39 = vpop.permute.xlu1 %1536  ;;  %1577 = vst.msk [vmem:[#allocation3 + $0x130] sm:$0xff] %vm1262_vm0, %v1535_v41 }
 0x3ac   : > { %1578 = vst.msk [vmem:[#allocation3 + $0x138] sm:$0xff] %vm1262_vm0, %v1537_v39 }
 0x3ae   : > { %v1600_v26 = vpop.permute.xlu0 %1599 }
 0x3af   : > { %v1602_v27 = vpop.permute.xlu1 %1601  ;;  %1642 = vst.msk [vmem:[#allocation2 + $0x1b0] sm:$0xff] %vm1262_vm0, %v1600_v26 }
 0x3b0   : > { %1643 = vst.msk [vmem:[#allocation2 + $0x1b8] sm:$0xff] %vm1262_vm0, %v1602_v27 }
 0x3b2   : > { %v1665_v28 = vpop.permute.xlu0 %1664 }
 0x3b3   : > { %v1667_v29 = vpop.permute.xlu1 %1666  ;;  %1707 = vst.msk [vmem:[#allocation3 + $0x1b0] sm:$0xff] %vm1262_vm0, %v1665_v28 }
 0x3b4   : > { %1708 = vst.msk [vmem:[#allocation3 + $0x1b8] sm:$0xff] %vm1262_vm0, %v1667_v29 }
 0x3b6   : > { %v1328_v30 = vpop.permute.xlu0 %1327 }
 0x3b7   : > { %v1330_v31 = vpop.permute.xlu1 %1329  ;;  %1368 = vst.msk [vmem:[#allocation2 + $0xc0] sm:$0xff] %vm1262_vm0, %v1328_v30 }
 0x3b8   : > { %1369 = vst.msk [vmem:[#allocation2 + $0xc8] sm:$0xff] %vm1262_vm0, %v1330_v31 }
 0x3ba   : > { %v1409_v32 = vpop.permute.xlu0 %1408 }
 0x3bb   : > { %v1411_v33 = vpop.permute.xlu1 %1410  ;;  %1449 = vst.msk [vmem:[#allocation3 + $0xc0] sm:$0xff] %vm1262_vm0, %v1409_v32 }
 0x3bc   : > { %1450 = vst.msk [vmem:[#allocation3 + $0xc8] sm:$0xff] %vm1262_vm0, %v1411_v33 }
 0x3be   : > { %v1474_v34 = vpop.permute.xlu0 %1473 }
 0x3bf   : > { %v1476_v36 = vpop.permute.xlu1 %1475  ;;  %1514 = vst.msk [vmem:[#allocation2 + $0x140] sm:$0xff] %vm1262_vm0, %v1474_v34 }
 0x3c0   : > { %1515 = vst.msk [vmem:[#allocation2 + $0x148] sm:$0xff] %vm1262_vm0, %v1476_v36 }
 0x3c2   : > { %v1539_v44 = vpop.permute.xlu0 %1538 }
 0x3c3   : > { %v1541_v45 = vpop.permute.xlu1 %1540  ;;  %1579 = vst.msk [vmem:[#allocation3 + $0x140] sm:$0xff] %vm1262_vm0, %v1539_v44 }
 0x3c4   : > { %1580 = vst.msk [vmem:[#allocation3 + $0x148] sm:$0xff] %vm1262_vm0, %v1541_v45 }
 0x3c6   : > { %v1604_v46 = vpop.permute.xlu0 %1603 }
 0x3c7   : > { %v1606_v47 = vpop.permute.xlu1 %1605  ;;  %1644 = vst.msk [vmem:[#allocation2 + $0x1c0] sm:$0xff] %vm1262_vm0, %v1604_v46 }
 0x3c8   : > { %1645 = vst.msk [vmem:[#allocation2 + $0x1c8] sm:$0xff] %vm1262_vm0, %v1606_v47 }
 0x3ca   : > { %v1669_v48 = vpop.permute.xlu0 %1668 }
 0x3cb   : > { %v1671_v49 = vpop.permute.xlu1 %1670  ;;  %1709 = vst.msk [vmem:[#allocation3 + $0x1c0] sm:$0xff] %vm1262_vm0, %v1669_v48 }
 0x3cc   : > { %1710 = vst.msk [vmem:[#allocation3 + $0x1c8] sm:$0xff] %vm1262_vm0, %v1671_v49 }
 0x3ce   : > { %v1332_v50 = vpop.permute.xlu0 %1331 }
 0x3cf   : > { %v1334_v51 = vpop.permute.xlu1 %1333  ;;  %1370 = vst.msk [vmem:[#allocation2 + $0xd0] sm:$0xff] %vm1262_vm0, %v1332_v50 }
 0x3d0   : > { %1371 = vst.msk [vmem:[#allocation2 + $0xd8] sm:$0xff] %vm1262_vm0, %v1334_v51 }
 0x3d2   : > { %v1413_v52 = vpop.permute.xlu0 %1412 }
 0x3d3   : > { %v1415_v53 = vpop.permute.xlu1 %1414  ;;  %1451 = vst.msk [vmem:[#allocation3 + $0xd0] sm:$0xff] %vm1262_vm0, %v1413_v52 }
 0x3d4   : > { %1452 = vst.msk [vmem:[#allocation3 + $0xd8] sm:$0xff] %vm1262_vm0, %v1415_v53 }
 0x3d6   : > { %v1478_v1 = vpop.permute.xlu0 %1477 }
 0x3d7   : > { %v1480_v3 = vpop.permute.xlu1 %1479  ;;  %1516 = vst.msk [vmem:[#allocation2 + $0x150] sm:$0xff] %vm1262_vm0, %v1478_v1 }
 0x3d8   : > { %1517 = vst.msk [vmem:[#allocation2 + $0x158] sm:$0xff] %vm1262_vm0, %v1480_v3 }
 0x3da   : > { %v1543_v57 = vpop.permute.xlu0 %1542 }
 0x3db   : > { %v1545_v59 = vpop.permute.xlu1 %1544  ;;  %1581 = vst.msk [vmem:[#allocation3 + $0x150] sm:$0xff] %vm1262_vm0, %v1543_v57 }
 0x3dc   : > { %1582 = vst.msk [vmem:[#allocation3 + $0x158] sm:$0xff] %vm1262_vm0, %v1545_v59 }
 0x3de   : > { %v1608_v60 = vpop.permute.xlu0 %1607 }
 0x3df   : > { %v1610_v61 = vpop.permute.xlu1 %1609  ;;  %1646 = vst.msk [vmem:[#allocation2 + $0x1d0] sm:$0xff] %vm1262_vm0, %v1608_v60 }
 0x3e0   : > { %1647 = vst.msk [vmem:[#allocation2 + $0x1d8] sm:$0xff] %vm1262_vm0, %v1610_v61 }
 0x3e2   : > { %v1673_v15 = vpop.permute.xlu0 %1672 }
 0x3e3   : > { %v1675_v17 = vpop.permute.xlu1 %1674  ;;  %1711 = vst.msk [vmem:[#allocation3 + $0x1d0] sm:$0xff] %vm1262_vm0, %v1673_v15 }
 0x3e4   : > { %1712 = vst.msk [vmem:[#allocation3 + $0x1d8] sm:$0xff] %vm1262_vm0, %v1675_v17 }
 0x3e6   : > { %v1336_v18 = vpop.permute.xlu0 %1335 }
 0x3e7   : > { %v1338_v19 = vpop.permute.xlu1 %1337  ;;  %1372 = vst.msk [vmem:[#allocation2 + $0xe0] sm:$0xff] %vm1262_vm0, %v1336_v18 }
 0x3e8   : > { %1373 = vst.msk [vmem:[#allocation2 + $0xe8] sm:$0xff] %vm1262_vm0, %v1338_v19 }
 0x3ea   : > { %v1417_v35 = vpop.permute.xlu0 %1416 }
 0x3eb   : > { %v1419_v38 = vpop.permute.xlu1 %1418  ;;  %1453 = vst.msk [vmem:[#allocation3 + $0xe0] sm:$0xff] %vm1262_vm0, %v1417_v35 }
 0x3ec   : > { %1454 = vst.msk [vmem:[#allocation3 + $0xe8] sm:$0xff] %vm1262_vm0, %v1419_v38 }
 0x3ee   : > { %v1482_v42 = vpop.permute.xlu0 %1481 }
 0x3ef   : > { %v1484_v43 = vpop.permute.xlu1 %1483  ;;  %1518 = vst.msk [vmem:[#allocation2 + $0x160] sm:$0xff] %vm1262_vm0, %v1482_v42 }
 0x3f0   : > { %1519 = vst.msk [vmem:[#allocation2 + $0x168] sm:$0xff] %vm1262_vm0, %v1484_v43 }
 0x3f2   : > { %v1547_v54 = vpop.permute.xlu0 %1546 }
 0x3f3   : > { %v1549_v55 = vpop.permute.xlu1 %1548  ;;  %1583 = vst.msk [vmem:[#allocation3 + $0x160] sm:$0xff] %vm1262_vm0, %v1547_v54 }
 0x3f4   : > { %1584 = vst.msk [vmem:[#allocation3 + $0x168] sm:$0xff] %vm1262_vm0, %v1549_v55 }
 0x3f6   : > { %v1612_v56 = vpop.permute.xlu0 %1611 }
 0x3f7   : > { %v1614_v58 = vpop.permute.xlu1 %1613  ;;  %1648 = vst.msk [vmem:[#allocation2 + $0x1e0] sm:$0xff] %vm1262_vm0, %v1612_v56 }
 0x3f8   : > { %1649 = vst.msk [vmem:[#allocation2 + $0x1e8] sm:$0xff] %vm1262_vm0, %v1614_v58 }
 0x3fa   : > { %v1677_v62 = vpop.permute.xlu0 %1676 }
 0x3fb   : > { %v1679_v63 = vpop.permute.xlu1 %1678  ;;  %1713 = vst.msk [vmem:[#allocation3 + $0x1e0] sm:$0xff] %vm1262_vm0, %v1677_v62 }
 0x3fc   : > { %1714 = vst.msk [vmem:[#allocation3 + $0x1e8] sm:$0xff] %vm1262_vm0, %v1679_v63 }
 0x3fe   : > { %v1340_v0 = vpop.permute.xlu0 %1339 }
 0x3ff   : > { %v1342_v2 = vpop.permute.xlu1 %1341  ;;  %1374 = vst.msk [vmem:[#allocation2 + $0xf0] sm:$0xff] %vm1262_vm0, %v1340_v0 }
 0x400   : > { %1375 = vst.msk [vmem:[#allocation2 + $0xf8] sm:$0xff] %vm1262_vm0, %v1342_v2 }
 0x402   : > { %v1421_v4 = vpop.permute.xlu0 %1420 }
 0x403   : > { %v1423_v37 = vpop.permute.xlu1 %1422  ;;  %1455 = vst.msk [vmem:[#allocation3 + $0xf0] sm:$0xff] %vm1262_vm0, %v1421_v4 }
 0x404   : > { %1456 = vst.msk [vmem:[#allocation3 + $0xf8] sm:$0xff] %vm1262_vm0, %v1423_v37 }
 0x406   : > { %v1486_v5 = vpop.permute.xlu0 %1485 }
 0x407   : > { %v1488_v6 = vpop.permute.xlu1 %1487  ;;  %1520 = vst.msk [vmem:[#allocation2 + $0x170] sm:$0xff] %vm1262_vm0, %v1486_v5 }
 0x408   : > { %1521 = vst.msk [vmem:[#allocation2 + $0x178] sm:$0xff] %vm1262_vm0, %v1488_v6 }
 0x40a   : > { %v1551_v7 = vpop.permute.xlu0 %1550 }
 0x40b   : > { %v1553_v8 = vpop.permute.xlu1 %1552  ;;  %1585 = vst.msk [vmem:[#allocation3 + $0x170] sm:$0xff] %vm1262_vm0, %v1551_v7 }
 0x40c   : > { %1586 = vst.msk [vmem:[#allocation3 + $0x178] sm:$0xff] %vm1262_vm0, %v1553_v8 }
 0x40e   : > { %v1616_v9 = vpop.permute.xlu0 %1615 }
 0x40f   : > { %v1618_v10 = vpop.permute.xlu1 %1617  ;;  %1650 = vst.msk [vmem:[#allocation2 + $0x1f0] sm:$0xff] %vm1262_vm0, %v1616_v9 }
 0x410   : > { %1651 = vst.msk [vmem:[#allocation2 + $0x1f8] sm:$0xff] %vm1262_vm0, %v1618_v10 }
 0x412   : > { %v1681_v11 = vpop.permute.xlu0 %1680 }
 0x413   : > { %v1683_v40 = vpop.permute.xlu1 %1682  ;;  %1715 = vst.msk [vmem:[#allocation3 + $0x1f0] sm:$0xff] %vm1262_vm0, %v1681_v11 }
 0x414   : > { %1716 = vst.msk [vmem:[#allocation3 + $0x1f8] sm:$0xff] %vm1262_vm0, %v1683_v40 }
 0x415 PF: > { %v6901_v12 = vld [vmem:[#allocation9] sm:$0xff]   ;;  %s11371_s16 = sld [smem:[#allocation46_spill]]  ;;  %v6902_v13 = vld [vmem:[#allocation9 + $0x8] sm:$0xff]   ;;  %v6903_v14 = vld [vmem:[#allocation9 + $0x10] sm:$0xff]   ;;  %vm1919_vm1 = vcmask 261120   ;;  %s8009_s18 = smov 96  }
 0x416   : > { %6549 = vmatprep.subr.bf16.mxu0 %v6901_v12  ;;  %v6904_v16 = vld [vmem:[#allocation9 + $0x18] sm:$0xff]   ;;  %v6905_v23 = vld [vmem:[#allocation9 + $0x20] sm:$0xff]   ;;  %v2076_v39 = vld [vmem:[#allocation2 + $0x48] sm:$0xff]  ;;  %s8010_s3 = smov 32   ;;  %vm4363_vm2 = vcmask 523520   ;;  %vm4444_vm3 = vcmask 785920  }
 0x417   : > { %6550 = vmatpush3.bf16.msra.mxu0 %v6901_v12  ;;  %v2075_v24 = vld [vmem:[#allocation2 + $0x40] sm:$0xff]  ;;  %v6906_v26 = vld [vmem:[#allocation9 + $0x28] sm:$0xff]   ;;  %v2069_v28 = vld [vmem:[#allocation2 + $0x10] sm:$0xff]  ;;  %vm4525_vm4 = vcmask 1048320   ;;  %s11538_s15 = sld [smem:[#allocation47_spill]]  ;;  %s5576_s5 = sshll.u32 %s8638_s24, 4  ;;  %s11134_s5 = int_to_ptr.vmem [resolvable:$true] %s5576_s5 }
 0x418   : > { %6551 = vmatprep.subr.bf16.mxu0 %v6902_v13  ;;  %v2067_v25 = vld [vmem:[#allocation2] sm:$0xff]  ;;  %6597 = vmatprep.subr.msk.bf16.mxu1 %vm1919_vm1, %v2075_v24  ;;  %v2068_v27 = vld [vmem:[#allocation2 + $0x8] sm:$0xff]  ;;  %v6907_v29 = vld [vmem:[#allocation9 + $0x30] sm:$0xff]   ;;  %v2226_v33 = vsel %vm1919_vm1, %v2069_v28, 0  ;;  %p11542_p11 = scmp.ne.s32.totalorder %s11358_s21, 0 }
 0x419   : > { %v2220_v41 = vsel %vm1919_vm1, %v2067_v25, 0  ;;  %v2077_v30 = vld [vmem:[#allocation2 + $0x50] sm:$0xff]  ;;  %v2223_v31 = vsel %vm1919_vm1, %v2068_v27, 0  ;;  %v6908_v32 = vld [vmem:[#allocation9 + $0x38] sm:$0xff]   ;;  %v2079_v3 = vld [vmem:[#allocation2 + $0x60] sm:$0xff] }
 0x41a   : > { %6006 = vmatpush3.bf16.xpose.msra.mxu1 %v2220_v41  ;;  %v2078_v46 = vld [vmem:[#allocation2 + $0x58] sm:$0xff]  ;;  %v2071_v60 = vld [vmem:[#allocation2 + $0x20] sm:$0xff]  ;;  %v2080_v35 = vld [vmem:[#allocation2 + $0x68] sm:$0xff] }
 0x41b   : > { %s5855_s29 = sshll.u32 %s11371_s16, 7  ;;  %6552 = vmatpush3.bf16.msra.mxu0 %v6902_v13  ;;  %6598 = vmatprep.subr.msk.bf16.mxu1 %vm1919_vm1, %v2076_v39  ;;  %v2070_v49 = vld [vmem:[#allocation2 + $0x18] sm:$0xff]  ;;  %v2232_v19 = vsel %vm1919_vm1, %v2071_v60, 0  ;;  %v2072_v43 = vld [vmem:[#allocation2 + $0x28] sm:$0xff]  ;;  %v2081_v62 = vld [vmem:[#allocation2 + $0x70] sm:$0xff]  ;;  %s5935_s6 = sshll.u32 %s11371_s16, 4 }
 0x41c   : > { %s9153_s23 = scalar_lea.vmem %s8601_s19, %s5855_s29 [#allocation6]  ;;  %6553 = vmatprep.subr.bf16.mxu0 %v6903_v14  ;;  %v2229_v1 = vsel %vm1919_vm1, %v2070_v49, 0  ;;  %v2235_v56 = vsel %vm1919_vm1, %v2072_v43, 0  ;;  %v2073_v63 = vld [vmem:[#allocation2 + $0x30] sm:$0xff]  ;;  %v2082_v2 = vld [vmem:[#allocation2 + $0x78] sm:$0xff]  ;;  %v2091_v5 = vld [vmem:[#allocation2 + $0xc0] sm:$0xff]  ;;  %s8011_s19 = smov 64  }
 0x41d   : > { %v1719_v20 = vld [vmem:[%s9153_s23] sm:$0xff]  ;;  %v1720_v21 = vld [vmem:[%s9153_s23 + $0x8] sm:$0xff]  ;;  %v1721_v34 = vld [vmem:[%s9153_s23 + $0x10] sm:$0xff]  ;;  %v2238_v0 = vsel %vm1919_vm1, %v2073_v63, 0  ;;  %s5936_s25 = sshll.u32 %s11538_s15, 5  ;;  %s7835_s15 = scalar_lea.vmem %s11134_s5, 2048 }
 0x41e   : > { %v1735_v22 = vpack.c.bf16 %v1720_v21, %v1719_v20  ;;  %v1722_v36 = vld [vmem:[%s9153_s23 + $0x18] sm:$0xff]  ;;  %v1723_v44 = vld [vmem:[%s9153_s23 + $0x20] sm:$0xff]  ;;  %v1724_v45 = vld [vmem:[%s9153_s23 + $0x28] sm:$0xff]  ;;  %s5573_s1 = sadd.s32 %s5936_s25, %s5935_s6  ;;  %p7836_p3 = scmp.ne.s32.totalorder %s11134_s5, %s7835_s15 }
 0x41f   : > { %6554 = vmatpush3.bf16.msra.mxu0 %v6903_v14  ;;  %v1736_v47 = vpack.c.bf16 %v1722_v36, %v1721_v34  ;;  %v1737_v48 = vpack.c.bf16 %v1724_v45, %v1723_v44  ;;  %v1725_v50 = vld [vmem:[%s9153_s23 + $0x30] sm:$0xff]  ;;  %v1726_v51 = vld [vmem:[%s9153_s23 + $0x38] sm:$0xff]  ;;  %v1727_v52 = vld [vmem:[%s9153_s23 + $0x40] sm:$0xff]  ;;  %s5937_s26 = sshll.u32 %s5573_s1, 7  ;;  %s8013_s6 = smov [#allocation30]  }
 0x420   : > { %6565 = vmatprep.mubr.bf16.mxu0 %v1735_v22  ;;  %6555 = vmatprep.subr.bf16.mxu0 %v6904_v16  ;;  %v1728_v53 = vld [vmem:[%s9153_s23 + $0x48] sm:$0xff]  ;;  %v1738_v57 = vpack.c.bf16 %v1726_v51, %v1725_v50  ;;  %v1729_v61 = vld [vmem:[%s9153_s23 + $0x50] sm:$0xff]  ;;  %v1730_v15 = vld [vmem:[%s9153_s23 + $0x58] sm:$0xff]  ;;  %p7837_p4 = pnand %p7836_p3, %p11542_p11  ;;  %s7839_s25 = sshll.u32 %s8013_s6, 4  ;;  %s7840_s25 = int_to_ptr.vmem [resolvable:$false] %s7839_s25 }
 0x421   : > { %v1739_v59 = vpack.c.bf16 %v1728_v53, %v1727_v52  ;;  %v1731_v17 = vld [vmem:[%s9153_s23 + $0x60] sm:$0xff]  ;;  %v1732_v18 = vld [vmem:[%s9153_s23 + $0x68] sm:$0xff]  ;;  %v1740_v38 = vpack.c.bf16 %v1730_v15, %v1729_v61  ;;  %v1733_v54 = vld [vmem:[%s9153_s23 + $0x70] sm:$0xff]  ;;  %s7841_s1 = scalar_lea.vmem %s7840_s25, 4096  ;;  %p7842_p7 = scmp.lt.s32.totalorder %s11134_s5, %s7840_s25 }
 0x422   : > { %6008 = vmatpush3.bf16.xpose.msra.mxu1 %v2223_v31  ;;  %v1741_v42 = vpack.c.bf16 %v1732_v18, %v1731_v17  ;;  %v1734_v55 = vld [vmem:[%s9153_s23 + $0x78] sm:$0xff]  ;;  %v2083_v6 = vld [vmem:[#allocation2 + $0x80] sm:$0xff]  ;;  %v2092_v8 = vld [vmem:[#allocation2 + $0xc8] sm:$0xff]  ;;  %p7838_p10 = pneg %p7837_p4  ;;  %p7843_p1 = scmp.lt.s32.totalorder %s7841_s1, %s7835_s15 }
 0x423   : > { %6556 = vmatpush3.bf16.msra.mxu0 %v6904_v16  ;;  %6599 = vmatprep.subr.msk.bf16.mxu1 %vm1919_vm1, %v2077_v30  ;;  %v1742_v58 = vpack.c.bf16 %v1734_v55, %v1733_v54  ;;  %v2074_v4 = vld [vmem:[#allocation2 + $0x38] sm:$0xff]  ;;  %v2405_v7 = vsel %vm1919_vm1, %v2083_v6, 0  ;;  %v2084_v9 = vld [vmem:[#allocation2 + $0x88] sm:$0xff]  ;;  %v2093_v11 = vld [vmem:[#allocation2 + $0xd0] sm:$0xff] }
 0x424   : > { %6557 = vmatprep.subr.bf16.mxu0 %v6905_v23  ;;  %v2241_v37 = vsel %vm1919_vm1, %v2074_v4, 0  ;;  %v2408_v10 = vsel %vm1919_vm1, %v2084_v9, 0  ;;  %v2107_v40 = vld [vmem:[#allocation2 + $0x140] sm:$0xff]  ;;  %v2085_v12 = vld [vmem:[#allocation2 + $0x90] sm:$0xff]  ;;  %v2094_v14 = vld [vmem:[#allocation2 + $0xd8] sm:$0xff]  ;;  %p7844_p5 = por %p7843_p1, %p7842_p7 }
 0x425   : > { %v2411_v13 = vsel %vm1919_vm1, %v2085_v12, 0  ;;  %v2086_v16 = vld [vmem:[#allocation2 + $0x98] sm:$0xff]  ;;  %v2095_v21 = vld [vmem:[#allocation2 + $0xe0] sm:$0xff]  ;;  %v2096_v24 = vld [vmem:[#allocation2 + $0xe8] sm:$0xff] }
 0x426   : > { %v2414_v20 = vsel %vm1919_vm1, %v2086_v16, 0  ;;  %v2087_v22 = vld [vmem:[#allocation2 + $0xa0] sm:$0xff]  ;;  %v2088_v25 = vld [vmem:[#allocation2 + $0xa8] sm:$0xff]  ;;  %v2097_v39 = vld [vmem:[#allocation2 + $0xf0] sm:$0xff]  ;;  %p7845_p2 = pnand %p7844_p5, %p7838_p10 }
 0x427   : > { %6558 = vmatpush3.bf16.msra.mxu0 %v6905_v23  ;;  %v2417_v23 = vsel %vm1919_vm1, %v2087_v22, 0  ;;  %v2420_v41 = vsel %vm1919_vm1, %v2088_v25, 0  ;;  %v2098_v28 = vld [vmem:[#allocation2 + $0xf8] sm:$0xff]  ;;  %v2099_v61 = vld [vmem:[#allocation2 + $0x100] sm:$0xff] }
 0x428   : > { %6559 = vmatprep.subr.bf16.mxu0 %v6906_v26  ;;  %v2110_v22 = vld [vmem:[#allocation2 + $0x158] sm:$0xff] }
 0x42a   : > { %6010 = vmatpush3.bf16.xpose.msra.mxu1 %v2226_v33 }
 0x42b   : > { %6560 = vmatpush3.bf16.msra.mxu0 %v6906_v26  ;;  %6600 = vmatprep.subr.msk.bf16.mxu1 %vm1919_vm1, %v2078_v46  ;;  %v2089_v26 = vld [vmem:[#allocation2 + $0xb0] sm:$0xff]  ;;  %v2123_v46 = vld [vmem:[#allocation2 + $0x1c0] sm:$0xff] }
 0x42c   : > { %6561 = vmatprep.subr.bf16.mxu0 %v6907_v29  ;;  %v2423_v27 = vsel %vm1919_vm1, %v2089_v26, 0  ;;  %v2103_v26 = vld [vmem:[#allocation2 + $0x120] sm:$0xff] }
 0x42f   : > { %6562 = vmatpush3.bf16.msra.mxu0 %v6907_v29  ;;  %v2090_v29 = vld [vmem:[#allocation2 + $0xb8] sm:$0xff] }
 0x430   : > { %6563 = vmatprep.subr.bf16.mxu0 %v6908_v32  ;;  %v2426_v30 = vsel %vm1919_vm1, %v2090_v29, 0 }
 0x432   : > { %6012 = vmatpush3.bf16.xpose.msra.mxu1 %v2229_v1 }
 0x433   : > { %6564 = vmatpush3.bf16.msra.mxu0 %v6908_v32  ;;  %6601 = vmatprep.subr.msk.bf16.mxu1 %vm1919_vm1, %v2079_v3  ;;  %v9204_v32 = vld [vmem:[#allocation11] ss:$0 sm:$0xff] }
 0x434   : > { %6605 = vmatprep.subr.msk.bf16.mxu0 %vm1919_vm1, %v2091_v5 }
 0x436   : > { %6566 = vmatmul.mubr.bf16.vlgmr.msra.gmra.mrb[0].mxu0 %v1736_v47 }
 0x437   : > { %6569 = vmatprep.mubr.bf16.mxu0 %v1737_v48 }
 0x43a   : > { %6014 = vmatpush3.bf16.xpose.msra.mxu1 %v2232_v19  ;;  %v2590_v19 = vsel %vm1919_vm1, %v2099_v61, 0 }
 0x43b   : > { %6602 = vmatprep.subr.msk.bf16.mxu1 %vm1919_vm1, %v2080_v35 }
 0x43c   : > { %6038 = vmatpush3.bf16.xpose.msra.mxu0 %v2405_v7  ;;  %v2109_v7 = vld [vmem:[#allocation2 + $0x150] sm:$0xff] }
 0x43d   : > { %6606 = vmatprep.subr.msk.bf16.mxu0 %vm1919_vm1, %v2092_v8 }
 0x43e   : > { %6570 = vmatmul.mubr.bf16.gmra.mrb[4].mxu0 %v1738_v57 }
 0x43f   : > { %6573 = vmatprep.mubr.bf16.mxu0 %v1739_v59 }
 0x442   : > { %6016 = vmatpush3.bf16.xpose.msra.mxu1 %v2235_v56 }
 0x443   : > { %6603 = vmatprep.subr.msk.bf16.mxu1 %vm1919_vm1, %v2081_v62 }
 0x444   : > { %6040 = vmatpush3.bf16.xpose.msra.mxu0 %v2408_v10 }
 0x445   : > { %6607 = vmatprep.subr.msk.bf16.mxu0 %vm1919_vm1, %v2093_v11 }
 0x446   : > { %6574 = vmatmul.mubr.bf16.gmra.mrb[8].mxu0 %v1740_v38  ;;  %v2108_v38 = vld [vmem:[#allocation2 + $0x148] sm:$0xff] }
 0x447   : > { %6577 = vmatprep.mubr.bf16.mxu0 %v1741_v42 }
 0x44a   : > { %6018 = vmatpush3.bf16.xpose.msra.mxu1 %v2238_v0  ;;  %v2100_v0 = vld [vmem:[#allocation2 + $0x108] sm:$0xff] }
 0x44b   : > { %6604 = vmatprep.subr.msk.bf16.mxu1 %vm1919_vm1, %v2082_v2  ;;  %v2593_v5 = vsel %vm1919_vm1, %v2100_v0, 0 }
 0x44c   : > { %6042 = vmatpush3.bf16.xpose.msra.mxu0 %v2411_v13 }
 0x44d   : > { %6608 = vmatprep.subr.msk.bf16.mxu0 %vm1919_vm1, %v2094_v14  ;;  %v2101_v14 = vld [vmem:[#allocation2 + $0x110] sm:$0xff] }
 0x44e   : > { %6578 = vmatmul.mubr.bf16.gmra.mrb[12].mxu0 %v1742_v58 }
 0x452   : > { %6020 = vmatpush3.bf16.xpose.msra.mxu1 %v2241_v37 }
 0x453   : > { %6613 = vmatprep.subr.msk.bf16.mxu1 %vm1919_vm1, %v2107_v40 }
 0x454   : > { %6044 = vmatpush3.bf16.xpose.msra.mxu0 %v2414_v20 }
 0x455   : > { %6609 = vmatprep.subr.msk.bf16.mxu0 %vm1919_vm1, %v2095_v21  ;;  %v2596_v21 = vsel %vm1919_vm1, %v2101_v14, 0 }
 0x45c   : > { %6046 = vmatpush3.bf16.xpose.msra.mxu0 %v2417_v23 }
 0x45d   : > { %6610 = vmatprep.subr.msk.bf16.mxu0 %vm1919_vm1, %v2096_v24  ;;  %v2102_v24 = vld [vmem:[#allocation2 + $0x118] sm:$0xff] }
 0x464   : > { %6048 = vmatpush3.bf16.xpose.msra.mxu0 %v2420_v41  ;;  %v2599_v41 = vsel %vm1919_vm1, %v2102_v24, 0 }
 0x465   : > { %6611 = vmatprep.subr.msk.bf16.mxu0 %vm1919_vm1, %v2097_v39  ;;  %v2111_v39 = vld [vmem:[#allocation2 + $0x160] sm:$0xff] }
 0x46c   : > { %6050 = vmatpush3.bf16.xpose.msra.mxu0 %v2423_v27  ;;  %v2602_v27 = vsel %vm1919_vm1, %v2103_v26, 0  ;;  %v2121_v26 = vld [vmem:[#allocation2 + $0x1b0] sm:$0xff] }
 0x46d   : > { %6612 = vmatprep.subr.msk.bf16.mxu0 %vm1919_vm1, %v2098_v28  ;;  %v2112_v28 = vld [vmem:[#allocation2 + $0x168] sm:$0xff] }
 0x474   : > { %6052 = vmatpush3.bf16.xpose.msra.mxu0 %v2426_v30  ;;  %v2104_v30 = vld [vmem:[#allocation2 + $0x128] sm:$0xff] }
 0x475   : > { %6621 = vmatprep.subr.msk.bf16.mxu0 %vm1919_vm1, %v2123_v46  ;;  %v2106_v46 = vld [vmem:[#allocation2 + $0x138] sm:$0xff] }
 0x509   : > { %v6567_v31 = vpop.f32.mrb[0].mxu0 }
 0x50a   : > { %v1848_v33 = vpop.f32.mrb[1].mxu0  ;;  %v1857_v36 = vadd.f32 %v6567_v31, %v9204_v32 }
 0x50b   : > { %v6568_v34 = vpop.f32.mrb[2].mxu0  ;;  %v1849_v47 = vadd.f32 %v9204_v32, %v1848_v33  ;;  %v2113_v33 = vld [vmem:[#allocation2 + $0x170] sm:$0xff] }
 0x50c   : > { %v1860_v44 = vadd.f32 %v6568_v34, %v9204_v32  ;;  %v1851_v45 = vpop.f32.mrb[3].mxu0  ;;  %v2105_v34 = vld [vmem:[#allocation2 + $0x130] sm:$0xff] }
 0x50d   : > { %v1852_v48 = vadd.f32 %v9204_v32, %v1851_v45 }
 0x50e   : > { %v9211_v49 = vpack.c.bf16 %v1860_v44, %v1857_v36  ;;  %v2608_v36 = vsel %vm1919_vm1, %v2105_v34, 0  ;;  %v2114_v44 = vld [vmem:[#allocation2 + $0x178] sm:$0xff] }
 0x50f   : > { %v9213_v50 = vpack.c.bf16 %v1852_v48, %v1849_v47  ;;  %v2611_v47 = vsel %vm1919_vm1, %v2106_v46, 0 }
 0x510   : > { %1921 = vst.msk [vmem:[#allocation4 + $0x8] sm:$0xff] %vm1919_vm1, %v9211_v49 }
 0x511   : > { %1920 = vst.msk [vmem:[#allocation4] sm:$0xff] %vm1919_vm1, %v9213_v50  ;;  %1936 = vrot.lane.b32.xlu0 %v9213_v50, %s8009_s18  ;;  %v6571_v51 = vpop.f32.mrb[4].mxu0 }
 0x512   : > { %v1873_v52 = vadd.f32 %v6571_v51, %v9204_v32  ;;  %v1864_v53 = vpop.f32.mrb[5].mxu0 }
 0x513   : > { %v1865_v1 = vadd.f32 %v9204_v32, %v1864_v53  ;;  %v6572_v3 = vpop.f32.mrb[6].mxu0 }
 0x514   : > { %v1876_v57 = vadd.f32 %v6572_v3, %v9204_v32  ;;  %v1867_v59 = vpop.f32.mrb[7].mxu0 }
 0x515   : > { %1938 = vrot.lane.b32.xlu0 %v9211_v49, %s8009_s18  ;;  %v1868_v60 = vadd.f32 %v9204_v32, %v1867_v59  ;;  %v2116_v59 = vld [vmem:[#allocation2 + $0x188] sm:$0xff] }
 0x516   : > { %v9227_v15 = vpack.c.bf16 %v1876_v57, %v1873_v52  ;;  %v2778_v61 = vsel %vm1919_vm1, %v2116_v59, 0 }
 0x517   : > { %v9229_v17 = vpack.c.bf16 %v1868_v60, %v1865_v1  ;;  %v2036_v42 = vld [vmem:[#allocation4 + $0x8] sm:$0xff] }
 0x518   : > { %1923 = vst.msk [vmem:[#allocation4 + $0x18] sm:$0xff] %vm1919_vm1, %v9227_v15  ;;  %v2035_v18 = vld [vmem:[#allocation4] sm:$0xff]  ;;  %v2124_v1 = vld [vmem:[#allocation2 + $0x1c8] sm:$0xff] }
 0x519   : > { %1922 = vst.msk [vmem:[#allocation4 + $0x10] sm:$0xff] %vm1919_vm1, %v9229_v17  ;;  %6021 = vmatprep.mubr.msk.bf16.mxu1 %vm1919_vm1, %v2035_v18  ;;  %1940 = vrot.lane.b32.xlu1 %v9229_v17, %s8009_s18  ;;  %v6575_v35 = vpop.f32.mrb[8].mxu0 }
 0x51a   : > { %6022 = vmatmul.mubr.msk.bf16.vlgmr.msra.gmra.mrb[0].mxu1 %vm1919_vm1, %v2035_v18  ;;  %v1889_v43 = vadd.f32 %v6575_v35, %v9204_v32  ;;  %v1880_v54 = vpop.f32.mrb[9].mxu0  ;;  %v2125_v18 = vld [vmem:[#allocation2 + $0x1d0] sm:$0xff] }
 0x51b   : > { %6023 = vmatprep.mubr.msk.bf16.mxu1 %vm1919_vm1, %v2036_v42  ;;  %v1881_v55 = vadd.f32 %v9204_v32, %v1880_v54  ;;  %v6576_v56 = vpop.f32.mrb[10].mxu0  ;;  %6070 = vmatpush3.bf16.xpose.msra.mxu1 %v2590_v19  ;;  %v2117_v19 = vld [vmem:[#allocation2 + $0x190] sm:$0xff] }
 0x51c   : > { %v1892_v58 = vadd.f32 %v6576_v56, %v9204_v32  ;;  %v1883_v62 = vpop.f32.mrb[11].mxu0  ;;  %6614 = vmatprep.subr.msk.bf16.mxu1 %vm1919_vm1, %v2108_v38 }
 0x51d   : > { %v1884_v63 = vadd.f32 %v9204_v32, %v1883_v62  ;;  %1942 = vrot.lane.b32.xlu1 %v9227_v15, %s8009_s18 }
 0x51e   : > { %v9248_v2 = vpack.c.bf16 %v1892_v58, %v1889_v43  ;;  %v2126_v43 = vld [vmem:[#allocation2 + $0x1d8] sm:$0xff] }
 0x51f   : > { %v1915_v4 = vpack.c.bf16 %v1884_v63, %v1881_v55  ;;  %v2038_v23 = vld [vmem:[#allocation4 + $0x18] sm:$0xff] }
 0x520   : > { %1925 = vst.msk [vmem:[#allocation4 + $0x28] sm:$0xff] %vm1919_vm1, %v9248_v2  ;;  %v2037_v37 = vld [vmem:[#allocation4 + $0x10] sm:$0xff]  ;;  %v2118_v58 = vld [vmem:[#allocation2 + $0x198] sm:$0xff] }
 0x521   : > { %1924 = vst.msk [vmem:[#allocation4 + $0x20] sm:$0xff] %vm1919_vm1, %v1915_v4  ;;  %v6579_v6 = vpop.f32.mrb[12].mxu0  ;;  %1946 = vrot.lane.b32.xlu1 %v9248_v2, %s8009_s18  ;;  %1944 = vrot.lane.b32.xlu0 %v1915_v4, %s8009_s18  ;;  %v2784_v0 = vsel %vm1919_vm1, %v2118_v58, 0  ;;  %v2133_v58 = vld [vmem:[#allocation3 + $0x10] sm:$0xff] }
 0x522   : > { %v1905_v8 = vadd.f32 %v6579_v6, %v9204_v32  ;;  %v1896_v9 = vpop.f32.mrb[13].mxu0  ;;  %6024 = vmatmul.mubr.msk.bf16.gmra.mrb[4].mxu1 %vm1919_vm1, %v2036_v42  ;;  %v2781_v42 = vsel %vm1919_vm1, %v2117_v19, 0 }
 0x523   : > { %v1897_v10 = vadd.f32 %v9204_v32, %v1896_v9  ;;  %v6580_v11 = vpop.f32.mrb[14].mxu0  ;;  %6025 = vmatprep.mubr.msk.bf16.mxu1 %vm1919_vm1, %v2037_v37  ;;  %6072 = vmatpush3.bf16.xpose.msra.mxu1 %v2593_v5 }
 0x524   : > { %v1908_v40 = vadd.f32 %v6580_v11, %v9204_v32  ;;  %v1899_v12 = vpop.f32.mrb[15].mxu0  ;;  %6615 = vmatprep.subr.msk.bf16.mxu1 %vm1919_vm1, %v2109_v7  ;;  %v2119_v7 = vld [vmem:[#allocation2 + $0x1a0] sm:$0xff] }
 0x525   : > { %v1900_v13 = vadd.f32 %v9204_v32, %v1899_v12  ;;  %v2605_v32 = vsel %vm1919_vm1, %v2104_v30, 0  ;;  %v2787_v11 = vsel %vm1919_vm1, %v2119_v7, 0  ;;  %v2793_v30 = vsel %vm1919_vm1, %v2121_v26, 0 }
 0x526   : > { %v1918_v16 = vpack.c.bf16 %v1908_v40, %v1905_v8  ;;  %v2128_v40 = vld [vmem:[#allocation2 + $0x1e8] sm:$0xff] }
 0x527   : > { %v1917_v20 = vpack.c.bf16 %v1900_v13, %v1897_v10  ;;  %v2040_v29 = vld [vmem:[#allocation4 + $0x28] sm:$0xff] }
 0x528   : > { %1927 = vst.msk [vmem:[#allocation4 + $0x38] sm:$0xff] %vm1919_vm1, %v1918_v16  ;;  %1950 = vrot.lane.b32.xlu1 %v1918_v16, %s8009_s18  ;;  %v2039_v25 = vld [vmem:[#allocation4 + $0x20] sm:$0xff] }
 0x529   : > { %1926 = vst.msk [vmem:[#allocation4 + $0x30] sm:$0xff] %vm1919_vm1, %v1917_v20  ;;  %1948 = vrot.lane.b32.xlu0 %v1917_v20, %s8009_s18 }
 0x52a   : > { %6026 = vmatmul.mubr.msk.bf16.gmra.mrb[8].mxu1 %vm1919_vm1, %v2037_v37 }
 0x52b   : > { %6027 = vmatprep.mubr.msk.bf16.mxu1 %vm1919_vm1, %v2038_v23  ;;  %6074 = vmatpush3.bf16.xpose.msra.mxu1 %v2596_v21 }
 0x52c   : > { %2002 = vrot.lane.b32.xlu1 %v9213_v50, %s8010_s3  ;;  %6616 = vmatprep.subr.msk.bf16.mxu1 %vm1919_vm1, %v2110_v22 }
 0x52d   : > { %1969 = vrot.lane.b32.xlu0 %v9213_v50, %s8011_s19  ;;  %v2115_v50 = vld [vmem:[#allocation2 + $0x180] sm:$0xff] }
 0x52e   : > { %v2775_v53 = vsel %vm1919_vm1, %v2115_v50, 0 }
 0x52f   : > { %v2042_v45 = vld [vmem:[#allocation4 + $0x38] sm:$0xff] }
 0x530   : > { %2004 = vrot.lane.b32.xlu1 %v9211_v49, %s8010_s3  ;;  %v2041_v31 = vld [vmem:[#allocation4 + $0x30] sm:$0xff] }
 0x531   : > { %1971 = vrot.lane.b32.xlu0 %v9211_v49, %s8011_s19 }
 0x532   : > { %6028 = vmatmul.mubr.msk.bf16.gmra.mrb[12].mxu1 %vm1919_vm1, %v2038_v23 }
 0x533   : > { %6029 = vmatprep.mubr.msk.bf16.mxu1 %vm1919_vm1, %v2039_v25  ;;  %6076 = vmatpush3.bf16.xpose.msra.mxu1 %v2599_v41 }
 0x534   : > { %2006 = vrot.lane.b32.xlu1 %v9229_v17, %s8010_s3  ;;  %6617 = vmatprep.subr.msk.bf16.mxu1 %vm1919_vm1, %v2111_v39 }
 0x535   : > { %1973 = vrot.lane.b32.xlu0 %v9229_v17, %s8011_s19 }
 0x538   : > { %2008 = vrot.lane.b32.xlu1 %v9227_v15, %s8010_s3 }
 0x539   : > { %1975 = vrot.lane.b32.xlu0 %v9227_v15, %s8011_s19 }
 0x53a   : > { %6030 = vmatmul.mubr.msk.bf16.gmra.mrb[16].mxu1 %vm1919_vm1, %v2039_v25  ;;  %v2129_v25 = vld [vmem:[#allocation2 + $0x1f0] sm:$0xff] }
 0x53b   : > { %6031 = vmatprep.mubr.msk.bf16.mxu1 %vm1919_vm1, %v2040_v29  ;;  %6078 = vmatpush3.bf16.xpose.msra.mxu1 %v2602_v27 }
 0x53c   : > { %2010 = vrot.lane.b32.xlu1 %v1915_v4, %s8010_s3  ;;  %6618 = vmatprep.subr.msk.bf16.mxu1 %vm1919_vm1, %v2112_v28 }
 0x53d   : > { %1977 = vrot.lane.b32.xlu0 %v1915_v4, %s8011_s19  ;;  %v2127_v4 = vld [vmem:[#allocation2 + $0x1e0] sm:$0xff] }
 0x540   : > { %2012 = vrot.lane.b32.xlu1 %v9248_v2, %s8010_s3 }
 0x541   : > { %1979 = vrot.lane.b32.xlu0 %v9248_v2, %s8011_s19 }
 0x542   : > { %6032 = vmatmul.mubr.msk.bf16.gmra.mrb[20].mxu1 %vm1919_vm1, %v2040_v29 }
 0x543   : > { %6033 = vmatprep.mubr.msk.bf16.mxu1 %vm1919_vm1, %v2041_v31  ;;  %6080 = vmatpush3.bf16.xpose.msra.mxu1 %v2605_v32 }
 0x544   : > { %2014 = vrot.lane.b32.xlu1 %v1917_v20, %s8010_s3  ;;  %6619 = vmatprep.subr.msk.bf16.mxu1 %vm1919_vm1, %v2113_v33  ;;  %v2122_v33 = vld [vmem:[#allocation2 + $0x1b8] sm:$0xff] }
 0x545   : > { %1981 = vrot.lane.b32.xlu0 %v1917_v20, %s8011_s19 }
 0x548   : > { %2016 = vrot.lane.b32.xlu1 %v1918_v16, %s8010_s3 }
 0x549   : > { %1983 = vrot.lane.b32.xlu0 %v1918_v16, %s8011_s19  ;;  %v2120_v16 = vld [vmem:[#allocation2 + $0x1a8] sm:$0xff] }
 0x54a   : > { %6034 = vmatmul.mubr.msk.bf16.gmra.mrb[24].mxu1 %vm1919_vm1, %v2041_v31  ;;  %v2790_v23 = vsel %vm1919_vm1, %v2120_v16, 0  ;;  %v2130_v31 = vld [vmem:[#allocation2 + $0x1f8] sm:$0xff]  ;;  %v2136_v16 = vld [vmem:[#allocation3 + $0x28] sm:$0xff] }
 0x54b   : > { %6035 = vmatprep.mubr.msk.bf16.mxu1 %vm1919_vm1, %v2042_v45  ;;  %6082 = vmatpush3.bf16.xpose.msra.mxu1 %v2608_v36  ;;  %v2796_v36 = vsel %vm1919_vm1, %v2122_v33, 0 }
 0x54c   : > { %6620 = vmatprep.subr.msk.bf16.mxu1 %vm1919_vm1, %v2114_v44 }
 0x552   : > { %6036 = vmatmul.mubr.msk.bf16.gmra.mrb[28].mxu1 %vm1919_vm1, %v2042_v45 }
 0x553   : > { %6084 = vmatpush3.bf16.xpose.msra.mxu1 %v2611_v47 }
 0x583   : > { %v1937_v48 = vpop.permute.xlu0 %1936 }
 0x584   : > { %1961 = vst.msk [vmem:[#allocation4 + $0x40] sm:$0xff] %vm1919_vm1, %v1937_v48 }
 0x587   : > { %v1939_v49 = vpop.permute.xlu0 %1938 }
 0x588   : > { %1962 = vst.msk [vmem:[#allocation4 + $0x48] sm:$0xff] %vm1919_vm1, %v1939_v49 }
 0x58b   : > { %v2043_v51 = vld [vmem:[#allocation4 + $0x40] sm:$0xff]  ;;  %v1941_v52 = vpop.permute.xlu1 %1940 }
 0x58c   : > { %6053 = vmatprep.mubr.msk.bf16.mxu0 %vm1919_vm1, %v2043_v51  ;;  %1963 = vst.msk [vmem:[#allocation4 + $0x50] sm:$0xff] %vm1919_vm1, %v1941_v52 }
 0x58d   : > { %6054 = vmatmul.mubr.msk.bf16.vlgmr.msra.gmra.mrb[16].mxu0 %vm1919_vm1, %v2043_v51 }
 0x58e   : > { %6102 = vmatpush3.bf16.xpose.msra.mxu0 %v2775_v53 }
 0x58f   : > { %v2044_v3 = vld [vmem:[#allocation4 + $0x48] sm:$0xff]  ;;  %v1943_v57 = vpop.permute.xlu1 %1942  ;;  %6622 = vmatprep.subr.msk.bf16.mxu0 %vm1919_vm1, %v2124_v1 }
 0x590   : > { %6055 = vmatprep.mubr.msk.bf16.mxu0 %vm1919_vm1, %v2044_v3  ;;  %1964 = vst.msk [vmem:[#allocation4 + $0x58] sm:$0xff] %vm1919_vm1, %v1943_v57 }
 0x593   : > { %v1947_v60 = vpop.permute.xlu1 %1946  ;;  %v1945_v15 = vpop.permute.xlu0 %1944  ;;  %v2045_v17 = vld [vmem:[#allocation4 + $0x50] sm:$0xff] }
 0x594   : > { %1966 = vst.msk [vmem:[#allocation4 + $0x68] sm:$0xff] %vm1919_vm1, %v1947_v60  ;;  %1965 = vst.msk [vmem:[#allocation4 + $0x60] sm:$0xff] %vm1919_vm1, %v1945_v15  ;;  %v2131_v15 = vld [vmem:[#allocation3] sm:$0xff] }
 0x595   : > { %6056 = vmatmul.mubr.msk.bf16.gmra.mrb[20].mxu0 %vm1919_vm1, %v2044_v3 }
 0x596   : > { %6104 = vmatpush3.bf16.xpose.msra.mxu0 %v2778_v61  ;;  %6057 = vmatprep.mubr.msk.bf16.mxu0 %vm1919_vm1, %v2045_v17  ;;  %v2139_v61 = vld [vmem:[#allocation3 + $0x40] sm:$0xff] }
 0x597   : > { %6623 = vmatprep.subr.msk.bf16.mxu0 %vm1919_vm1, %v2125_v18  ;;  %v2046_v54 = vld [vmem:[#allocation4 + $0x58] sm:$0xff]  ;;  %6133 = vmatprep.subr.bf16.mxu1 %v2139_v61 }
 0x59a   : > { %v1951_v35 = vpop.permute.xlu1 %1950 }
 0x59b   : > { %1968 = vst.msk [vmem:[#allocation4 + $0x78] sm:$0xff] %vm1919_vm1, %v1951_v35  ;;  %v1949_v38 = vpop.permute.xlu0 %1948  ;;  %v2047_v2 = vld [vmem:[#allocation4 + $0x60] sm:$0xff]  ;;  %v2048_v12 = vld [vmem:[#allocation4 + $0x68] sm:$0xff] }
 0x59c   : > { %1967 = vst.msk [vmem:[#allocation4 + $0x70] sm:$0xff] %vm1919_vm1, %v1949_v38 }
 0x59d   : > { %6058 = vmatmul.mubr.msk.bf16.gmra.mrb[24].mxu0 %vm1919_vm1, %v2045_v17  ;;  %v2140_v17 = vld [vmem:[#allocation3 + $0x48] sm:$0xff] }
 0x59e   : > { %v2003_v55 = vpop.permute.xlu1 %2002  ;;  %6059 = vmatprep.mubr.msk.bf16.mxu0 %vm1919_vm1, %v2046_v54  ;;  %6106 = vmatpush3.bf16.xpose.msra.mxu0 %v2781_v42 }
 0x59f   : > { %2027 = vst.msk [vmem:[#allocation4 + $0xc0] sm:$0xff] %vm1919_vm1, %v2003_v55  ;;  %v1970_v56 = vpop.permute.xlu0 %1969  ;;  %6624 = vmatprep.subr.msk.bf16.mxu0 %vm1919_vm1, %v2126_v43  ;;  %v2132_v43 = vld [vmem:[#allocation3 + $0x8] sm:$0xff] }
 0x5a0   : > { %1994 = vst.msk [vmem:[#allocation4 + $0x80] sm:$0xff] %vm1919_vm1, %v1970_v56  ;;  %v2141_v56 = vld [vmem:[#allocation3 + $0x50] sm:$0xff] }
 0x5a2   : > { %v2005_v62 = vpop.permute.xlu1 %2004  ;;  %v2050_v32 = vld [vmem:[#allocation4 + $0x78] sm:$0xff] }
 0x5a3   : > { %2028 = vst.msk [vmem:[#allocation4 + $0xc8] sm:$0xff] %vm1919_vm1, %v2005_v62  ;;  %v1972_v63 = vpop.permute.xlu0 %1971  ;;  %v2049_v24 = vld [vmem:[#allocation4 + $0x70] sm:$0xff] }
 0x5a4   : > { %1995 = vst.msk [vmem:[#allocation4 + $0x88] sm:$0xff] %vm1919_vm1, %v1972_v63 }
 0x5a5   : > { %6060 = vmatmul.mubr.msk.bf16.gmra.mrb[28].mxu0 %vm1919_vm1, %v2046_v54 }
 0x5a6   : > { %v2007_v37 = vpop.permute.xlu1 %2006  ;;  %6108 = vmatpush3.bf16.xpose.msra.mxu0 %v2784_v0  ;;  %6061 = vmatprep.mubr.msk.bf16.mxu0 %vm1919_vm1, %v2047_v2  ;;  %v2059_v44 = vld [vmem:[#allocation4 + $0xc0] sm:$0xff] }
 0x5a7   : > { %2029 = vst.msk [vmem:[#allocation4 + $0xd0] sm:$0xff] %vm1919_vm1, %v2007_v37  ;;  %v1974_v5 = vpop.permute.xlu0 %1973  ;;  %v2051_v6 = vld [vmem:[#allocation4 + $0x80] sm:$0xff]  ;;  %6625 = vmatprep.subr.msk.bf16.mxu0 %vm1919_vm1, %v2127_v4  ;;  %v2142_v37 = vld [vmem:[#allocation3 + $0x58] sm:$0xff] }
 0x5a8   : > { %1996 = vst.msk [vmem:[#allocation4 + $0x90] sm:$0xff] %vm1919_vm1, %v1974_v5  ;;  %6085 = vmatprep.mubr.msk.bf16.mxu1 %vm1919_vm1, %v2051_v6 }
 0x5a9   : > { %6086 = vmatmul.mubr.msk.bf16.vlgmr.msra.gmra.mrb[32].mxu1 %vm1919_vm1, %v2051_v6  ;;  %v2134_v6 = vld [vmem:[#allocation3 + $0x18] sm:$0xff] }
 0x5aa   : > { %v2009_v8 = vpop.permute.xlu1 %2008  ;;  %v2060_v46 = vld [vmem:[#allocation4 + $0xc8] sm:$0xff]  ;;  %6134 = vmatpush3.bf16.msra.mxu1 %v2131_v15 }
 0x5ab   : > { %2030 = vst.msk [vmem:[#allocation4 + $0xd8] sm:$0xff] %vm1919_vm1, %v2009_v8  ;;  %v1976_v9 = vpop.permute.xlu0 %1975  ;;  %v2052_v10 = vld [vmem:[#allocation4 + $0x88] sm:$0xff]  ;;  %6135 = vmatprep.subr.bf16.mxu1 %v2140_v17  ;;  %v2143_v8 = vld [vmem:[#allocation3 + $0x60] sm:$0xff] }
 0x5ac   : > { %1997 = vst.msk [vmem:[#allocation4 + $0x98] sm:$0xff] %vm1919_vm1, %v1976_v9  ;;  %6087 = vmatprep.mubr.msk.bf16.mxu1 %vm1919_vm1, %v2052_v10  ;;  %v2135_v9 = vld [vmem:[#allocation3 + $0x20] sm:$0xff] }
 0x5ad   : > { %6062 = vmatmul.mubr.msk.bf16.gmra.mrb[32].mxu0 %vm1919_vm1, %v2047_v2 }
 0x5ae   : > { %v2011_v13 = vpop.permute.xlu1 %2010  ;;  %6063 = vmatprep.mubr.msk.bf16.mxu0 %vm1919_vm1, %v2048_v12  ;;  %6110 = vmatpush3.bf16.xpose.msra.mxu0 %v2787_v11  ;;  %v2061_v48 = vld [vmem:[#allocation4 + $0xd0] sm:$0xff] }
 0x5af   : > { %2031 = vst.msk [vmem:[#allocation4 + $0xe0] sm:$0xff] %vm1919_vm1, %v2011_v13  ;;  %v1978_v14 = vpop.permute.xlu0 %1977  ;;  %6626 = vmatprep.subr.msk.bf16.mxu0 %vm1919_vm1, %v2128_v40  ;;  %v2053_v20 = vld [vmem:[#allocation4 + $0x90] sm:$0xff]  ;;  %6136 = vmatpush3.bf16.msra.mxu1 %v2132_v43  ;;  %v2144_v13 = vld [vmem:[#allocation3 + $0x68] sm:$0xff] }
 0x5b0   : > { %1998 = vst.msk [vmem:[#allocation4 + $0xa0] sm:$0xff] %vm1919_vm1, %v1978_v14  ;;  %6137 = vmatprep.subr.bf16.mxu1 %v2141_v56  ;;  %v2155_v56 = vld [vmem:[#allocation3 + $0xc0] sm:$0xff] }
 0x5b1   : > { %6088 = vmatmul.mubr.msk.bf16.gmra.mrb[36].mxu1 %vm1919_vm1, %v2052_v10 }
 0x5b2   : > { %v2013_v21 = vpop.permute.xlu1 %2012  ;;  %6089 = vmatprep.mubr.msk.bf16.mxu1 %vm1919_vm1, %v2053_v20  ;;  %v2062_v50 = vld [vmem:[#allocation4 + $0xd8] sm:$0xff] }
 0x5b3   : > { %2032 = vst.msk [vmem:[#allocation4 + $0xe8] sm:$0xff] %vm1919_vm1, %v2013_v21  ;;  %v1980_v22 = vpop.permute.xlu0 %1979  ;;  %v2054_v27 = vld [vmem:[#allocation4 + $0x98] sm:$0xff]  ;;  %6138 = vmatpush3.bf16.msra.mxu1 %v2133_v58  ;;  %v2145_v21 = vld [vmem:[#allocation3 + $0x70] sm:$0xff]  ;;  %v2147_v58 = vld [vmem:[#allocation3 + $0x80] sm:$0xff] }
 0x5b4   : > { %1999 = vst.msk [vmem:[#allocation4 + $0xa8] sm:$0xff] %vm1919_vm1, %v1980_v22  ;;  %6139 = vmatprep.subr.bf16.mxu1 %v2142_v37  ;;  %v2137_v22 = vld [vmem:[#allocation3 + $0x30] sm:$0xff] }
 0x5b5   : > { %6064 = vmatmul.mubr.msk.bf16.gmra.mrb[36].mxu0 %vm1919_vm1, %v2048_v12 }
 0x5b6   : > { %v2015_v41 = vpop.permute.xlu1 %2014  ;;  %6112 = vmatpush3.bf16.xpose.msra.mxu0 %v2790_v23  ;;  %6065 = vmatprep.mubr.msk.bf16.mxu0 %vm1919_vm1, %v2049_v24  ;;  %v2063_v51 = vld [vmem:[#allocation4 + $0xe0] sm:$0xff] }
 0x5b7   : > { %2033 = vst.msk [vmem:[#allocation4 + $0xf0] sm:$0xff] %vm1919_vm1, %v2015_v41  ;;  %v1982_v39 = vpop.permute.xlu0 %1981  ;;  %6627 = vmatprep.subr.msk.bf16.mxu0 %vm1919_vm1, %v2129_v25  ;;  %v2055_v34 = vld [vmem:[#allocation4 + $0xa0] sm:$0xff]  ;;  %6140 = vmatpush3.bf16.msra.mxu1 %v2134_v6  ;;  %v2148_v6 = vld [vmem:[#allocation3 + $0x88] sm:$0xff] }
 0x5b8   : > { %2000 = vst.msk [vmem:[#allocation4 + $0xb0] sm:$0xff] %vm1919_vm1, %v1982_v39  ;;  %6141 = vmatprep.subr.bf16.mxu1 %v2143_v8  ;;  %v2146_v39 = vld [vmem:[#allocation3 + $0x78] sm:$0xff] }
 0x5b9   : > { %6090 = vmatmul.mubr.msk.bf16.gmra.mrb[40].mxu1 %vm1919_vm1, %v2053_v20 }
 0x5ba   : > { %v2017_v28 = vpop.permute.xlu1 %2016  ;;  %6091 = vmatprep.mubr.msk.bf16.mxu1 %vm1919_vm1, %v2054_v27  ;;  %v2064_v53 = vld [vmem:[#allocation4 + $0xe8] sm:$0xff] }
 0x5bb   : > { %2034 = vst.msk [vmem:[#allocation4 + $0xf8] sm:$0xff] %vm1919_vm1, %v2017_v28  ;;  %v1984_v29 = vpop.permute.xlu0 %1983  ;;  %v2056_v45 = vld [vmem:[#allocation4 + $0xa8] sm:$0xff]  ;;  %6142 = vmatpush3.bf16.msra.mxu1 %v2135_v9 }
 0x5bc   : > { %2001 = vst.msk [vmem:[#allocation4 + $0xb8] sm:$0xff] %vm1919_vm1, %v1984_v29  ;;  %6143 = vmatprep.subr.bf16.mxu1 %v2144_v13 }
 0x5bd   : > { %6066 = vmatmul.mubr.msk.bf16.gmra.mrb[40].mxu0 %vm1919_vm1, %v2049_v24 }
 0x5be   : > { %6067 = vmatprep.mubr.msk.bf16.mxu0 %vm1919_vm1, %v2050_v32  ;;  %6114 = vmatpush3.bf16.xpose.msra.mxu0 %v2793_v30  ;;  %v2065_v19 = vld [vmem:[#allocation4 + $0xf0] sm:$0xff] }
 0x5bf   : > { %6628 = vmatprep.subr.msk.bf16.mxu0 %vm1919_vm1, %v2130_v31  ;;  %v2057_v47 = vld [vmem:[#allocation4 + $0xb0] sm:$0xff]  ;;  %6144 = vmatpush3.bf16.msra.mxu1 %v2136_v16 }
 0x5c0   : > { %6145 = vmatprep.subr.bf16.mxu1 %v2145_v21  ;;  %v2157_v16 = vld [vmem:[#allocation3 + $0xd0] sm:$0xff] }
 0x5c1   : > { %6092 = vmatmul.mubr.msk.bf16.gmra.mrb[44].mxu1 %vm1919_vm1, %v2054_v27  ;;  %v2138_v27 = vld [vmem:[#allocation3 + $0x38] sm:$0xff] }
 0x5c2   : > { %6093 = vmatprep.mubr.msk.bf16.mxu1 %vm1919_vm1, %v2055_v34  ;;  %v2066_v63 = vld [vmem:[#allocation4 + $0xf8] sm:$0xff] }
 0x5c3   : > { %v2058_v49 = vld [vmem:[#allocation4 + $0xb8] sm:$0xff]  ;;  %6146 = vmatpush3.bf16.msra.mxu1 %v2137_v22 }
 0x5c4   : > { %6147 = vmatprep.subr.bf16.mxu1 %v2146_v39  ;;  %v2149_v39 = vld [vmem:[#allocation3 + $0x90] sm:$0xff] }
 0x5c5   : > { %6068 = vmatmul.mubr.msk.bf16.gmra.mrb[44].mxu0 %vm1919_vm1, %v2050_v32 }
 0x5c6   : > { %6116 = vmatpush3.bf16.xpose.msra.mxu0 %v2796_v36  ;;  %6117 = vmatprep.mubr.msk.bf16.mxu0 %vm1919_vm1, %v2059_v44 }
 0x5c7   : > { %6148 = vmatpush3.bf16.msra.mxu1 %v2138_v27  ;;  %6197 = vmatprep.subr.bf16.mxu0 %v2155_v56 }
 0x5c9   : > { %6094 = vmatmul.mubr.msk.bf16.gmra.mrb[48].mxu1 %vm1919_vm1, %v2055_v34 }
 0x5ca   : > { %6095 = vmatprep.mubr.msk.bf16.mxu1 %vm1919_vm1, %v2056_v45 }
 0x5cd   : > { %6118 = vmatmul.mubr.msk.bf16.vlgmr.msra.gmra.mrb[48].mxu0 %vm1919_vm1, %v2059_v44 }
 0x5ce   : > { %6119 = vmatprep.mubr.msk.bf16.mxu0 %vm1919_vm1, %v2060_v46  ;;  %6198 = vmatpush3.bf16.msra.mxu0 %v2147_v58 }
 0x5d1   : > { %6096 = vmatmul.mubr.msk.bf16.gmra.mrb[52].mxu1 %vm1919_vm1, %v2056_v45 }
 0x5d2   : > { %6097 = vmatprep.mubr.msk.bf16.mxu1 %vm1919_vm1, %v2057_v47 }
 0x5d5   : > { %6120 = vmatmul.mubr.msk.bf16.gmra.mrb[52].mxu0 %vm1919_vm1, %v2060_v46 }
 0x5d6   : > { %6121 = vmatprep.mubr.msk.bf16.mxu0 %vm1919_vm1, %v2061_v48 }
 0x5d9   : > { %6098 = vmatmul.mubr.msk.bf16.gmra.mrb[56].mxu1 %vm1919_vm1, %v2057_v47 }
 0x5da   : > { %6099 = vmatprep.mubr.msk.bf16.mxu1 %vm1919_vm1, %v2058_v49 }
 0x5dd   : > { %6122 = vmatmul.mubr.msk.bf16.gmra.mrb[56].mxu0 %vm1919_vm1, %v2061_v48 }
 0x5de   : > { %6123 = vmatprep.mubr.msk.bf16.mxu0 %vm1919_vm1, %v2062_v50 }
 0x5e1   : > { %6100 = vmatmul.mubr.msk.bf16.gmra.mrb[60].mxu1 %vm1919_vm1, %v2058_v49 }
 0x5e5   : > { %6124 = vmatmul.mubr.msk.bf16.gmra.mrb[60].mxu0 %vm1919_vm1, %v2062_v50 }
 0x5e6   : > { %6125 = vmatprep.mubr.msk.bf16.mxu0 %vm1919_vm1, %v2063_v51 }
 0x5ed   : > { %v9396_v52 = vpop.f32.mrb[0].mxu1  ;;  %6126 = vmatmul.mubr.msk.bf16.gmra.mrb[64].mxu0 %vm1919_vm1, %v2063_v51 }
 0x5ee   : > { %v9399_v1 = vpop.f32.mrb[1].mxu1  ;;  %6127 = vmatprep.mubr.msk.bf16.mxu0 %vm1919_vm1, %v2064_v53 }
 0x5ef   : > { %v9402_v3 = vpop.f32.mrb[2].mxu1  ;;  %v2935_v57 = vmax.f32 %v9396_v52, %v9399_v1 }
 0x5f0   : > { %v9406_v59 = vpop.f32.mrb[3].mxu1 }
 0x5f1   : > { %2936 = vmax.xlane.f32.xlu0 %v2935_v57  ;;  %v2938_v60 = vmax.f32 %v9402_v3, %v9406_v59 }
 0x5f3   : > { %2939 = vmax.xlane.f32.xlu1 %v2938_v60  ;;  %v2160_v60 = vld [vmem:[#allocation3 + $0xe8] sm:$0xff] }
 0x5f5   : > { %v9410_v18 = vpop.f32.mrb[4].mxu1  ;;  %6128 = vmatmul.mubr.msk.bf16.gmra.mrb[68].mxu0 %vm1919_vm1, %v2064_v53 }
 0x5f6   : > { %v9413_v35 = vpop.f32.mrb[5].mxu1  ;;  %6129 = vmatprep.mubr.msk.bf16.mxu0 %vm1919_vm1, %v2065_v19 }
 0x5f7   : > { %v9416_v38 = vpop.f32.mrb[6].mxu1  ;;  %v2941_v42 = vmax.f32 %v9410_v18, %v9413_v35 }
 0x5f8   : > { %v9420_v54 = vpop.f32.mrb[7].mxu1 }
 0x5f9   : > { %2942 = vmax.xlane.f32.xlu1 %v2941_v42  ;;  %v2944_v55 = vmax.f32 %v9416_v38, %v9420_v54 }
 0x5fd   : > { %v9424_v62 = vpop.f32.mrb[8].mxu1  ;;  %6130 = vmatmul.mubr.msk.bf16.gmra.mrb[72].mxu0 %vm1919_vm1, %v2065_v19 }
 0x5fe   : > { %v9427_v0 = vpop.f32.mrb[9].mxu1  ;;  %6131 = vmatprep.mubr.msk.bf16.mxu0 %vm1919_vm1, %v2066_v63 }
 0x5ff   : > { %v9430_v2 = vpop.f32.mrb[10].mxu1  ;;  %v2947_v4 = vmax.f32 %v9424_v62, %v9427_v0 }
 0x600   : > { %v9434_v5 = vpop.f32.mrb[11].mxu1 }
 0x601   : > { %v2950_v7 = vmax.f32 %v9430_v2, %v9434_v5 }
 0x605   : > { %v9438_v10 = vpop.f32.mrb[12].mxu1  ;;  %6132 = vmatmul.mubr.msk.bf16.gmra.mrb[76].mxu0 %vm1919_vm1, %v2066_v63  ;;  %v2156_v63 = vld [vmem:[#allocation3 + $0xc8] sm:$0xff] }
 0x606   : > { %v9441_v11 = vpop.f32.mrb[13].mxu1  ;;  %6199 = vmatprep.subr.bf16.mxu0 %v2156_v63  ;;  %v2158_v63 = vld [vmem:[#allocation3 + $0xd8] sm:$0xff] }
 0x607   : > { %v9443_v40 = vpop.f32.mrb[14].mxu1  ;;  %v2953_v12 = vmax.f32 %v9438_v10, %v9441_v11  ;;  %6200 = vmatpush3.bf16.msra.mxu0 %v2148_v6 }
 0x608   : > { %v9447_v14 = vpop.f32.mrb[15].mxu1  ;;  %6201 = vmatprep.subr.bf16.mxu0 %v2157_v16 }
 0x609   : > { %v2956_v20 = vmax.f32 %v9443_v40, %v9447_v14 }
 0x60b   : > { %6202 = vmatpush3.bf16.msra.mxu0 %v2149_v39 }
 0x60c   : > { %6203 = vmatprep.subr.bf16.mxu0 %v2158_v63 }
 0x60d   : > { %v9451_v23 = vpop.f32.mrb[16].mxu1 }
 0x60e   : > { %11372 = vst [vmem:[#allocation52_spill] sm:$0xff] %v9451_v23  ;;  %v9453_v24 = vpop.f32.mrb[17].mxu1 }
 0x60f   : > { %11373 = vst [vmem:[#allocation53_spill] sm:$0xff] %v9453_v24  ;;  %v9455_v25 = vpop.f32.mrb[18].mxu1  ;;  %v2959_v41 = vmax.f32 %v9451_v23, %v9453_v24 }
 0x610   : > { %v9459_v26 = vpop.f32.mrb[19].mxu1 }
 0x611   : > { %11374 = vst [vmem:[#allocation54_spill] sm:$0xff] %v9459_v26 }
 0x615   : > { %v9463_v29 = vpop.f32.mrb[20].mxu1 }
 0x616   : > { %11375 = vst [vmem:[#allocation55_spill] sm:$0xff] %v9463_v29  ;;  %v9465_v30 = vpop.f32.mrb[21].mxu1 }
 0x617   : > { %11376 = vst [vmem:[#allocation56_spill] sm:$0xff] %v9465_v30  ;;  %v9467_v31 = vpop.f32.mrb[22].mxu1 }
 0x618   : > { %11377 = vst [vmem:[#allocation57_spill] sm:$0xff] %v9467_v31  ;;  %v9471_v33 = vpop.f32.mrb[23].mxu1 }
 0x619   : > { %11378 = vst [vmem:[#allocation58_spill] sm:$0xff] %v9471_v33 }
 0x61d   : > { %v9475_v36 = vpop.f32.mrb[24].mxu1 }
 0x61e   : > { %11379 = vst [vmem:[#allocation59_spill] sm:$0xff] %v9475_v36  ;;  %v9477_v44 = vpop.f32.mrb[25].mxu1 }
 0x61f   : > { %11380 = vst [vmem:[#allocation60_spill] sm:$0xff] %v9477_v44  ;;  %v9479_v45 = vpop.f32.mrb[26].mxu1 }
 0x620   : > { %11381 = vst [vmem:[#allocation61_spill] sm:$0xff] %v9479_v45  ;;  %v9483_v47 = vpop.f32.mrb[27].mxu1 }
 0x621   : > { %11382 = vst [vmem:[#allocation62_spill] sm:$0xff] %v9483_v47 }
 0x625   : > { %v9487_v49 = vpop.f32.mrb[28].mxu1 }
 0x626   : > { %11383 = vst [vmem:[#allocation63_spill] sm:$0xff] %v9487_v49  ;;  %v9489_v50 = vpop.f32.mrb[29].mxu1 }
 0x627   : > { %11384 = vst [vmem:[#allocation64_spill] sm:$0xff] %v9489_v50  ;;  %v9491_v51 = vpop.f32.mrb[30].mxu1 }
 0x628   : > { %11385 = vst [vmem:[#allocation65_spill] sm:$0xff] %v9491_v51  ;;  %v9495_v57 = vpop.f32.mrb[31].mxu1 }
 0x629   : > { %11386 = vst [vmem:[#allocation66_spill] sm:$0xff] %v9495_v57 }
 0x660   : > { %v9499_v61 = vpop.f32.mrb[16].mxu0 }
 0x661   : > { %v9501_v15 = vpop.f32.mrb[17].mxu0 }
 0x662   : > { %v9503_v17 = vpop.f32.mrb[18].mxu0  ;;  %v2983_v19 = vmax.f32 %v9499_v61, %v9501_v15 }
 0x663   : > { %v9507_v42 = vpop.f32.mrb[19].mxu0 }
 0x664   : > { %2984 = vmax.xlane.f32.xlu0 %v2983_v19  ;;  %v2986_v43 = vmax.f32 %v9503_v17, %v9507_v42 }
 0x668   : > { %v9511_v37 = vpop.f32.mrb[20].mxu0  ;;  %2987 = vmax.xlane.f32.xlu0 %v2986_v43 }
 0x669   : > { %v9513_v8 = vpop.f32.mrb[21].mxu0 }
 0x66a   : > { %v9515_v9 = vpop.f32.mrb[22].mxu0  ;;  %v2989_v13 = vmax.f32 %v9511_v37, %v9513_v8 }
 0x66b   : > { %v9519_v21 = vpop.f32.mrb[23].mxu0 }
 0x66c   : > { %2990 = vmax.xlane.f32.xlu1 %v2989_v13  ;;  %2945 = vmax.xlane.f32.xlu0 %v2944_v55  ;;  %v2992_v22 = vmax.f32 %v9515_v9, %v9519_v21  ;;  %v2159_v13 = vld [vmem:[#allocation3 + $0xe0] sm:$0xff] }
 0x670   : > { %v9526_v27 = vpop.f32.mrb[24].mxu0  ;;  %2993 = vmax.xlane.f32.xlu0 %v2992_v22  ;;  %2948 = vmax.xlane.f32.xlu1 %v2947_v4  ;;  %v2150_v4 = vld [vmem:[#allocation3 + $0x98] sm:$0xff]  ;;  %v2151_v22 = vld [vmem:[#allocation3 + $0xa0] sm:$0xff] }
 0x671   : > { %v9531_v19 = vpop.f32.mrb[25].mxu0  ;;  %6204 = vmatpush3.bf16.msra.mxu0 %v2150_v4 }
 0x672   : > { %v9533_v43 = vpop.f32.mrb[26].mxu0  ;;  %v2995_v55 = vmax.f32 %v9526_v27, %v9531_v19  ;;  %6205 = vmatprep.subr.bf16.mxu0 %v2159_v13 }
 0x673   : > { %v9537_v56 = vpop.f32.mrb[27].mxu0 }
 0x674   : > { %2996 = vmax.xlane.f32.xlu1 %v2995_v55  ;;  %2951 = vmax.xlane.f32.xlu0 %v2950_v7  ;;  %v2998_v58 = vmax.f32 %v9533_v43, %v9537_v56 }
 0x675   : > { %6206 = vmatpush3.bf16.msra.mxu0 %v2151_v22 }
 0x676   : > { %6207 = vmatprep.subr.bf16.mxu0 %v2160_v60 }
 0x678   : > { %v9544_v6 = vpop.f32.mrb[28].mxu0  ;;  %2999 = vmax.xlane.f32.xlu0 %v2998_v58  ;;  %2954 = vmax.xlane.f32.xlu1 %v2953_v12 }
 0x679   : > { %v9549_v16 = vpop.f32.mrb[29].mxu0 }
 0x67a   : > { %v9551_v7 = vpop.f32.mrb[30].mxu0  ;;  %v3001_v39 = vmax.f32 %v9544_v6, %v9549_v16 }
 0x67b   : > { %v9555_v55 = vpop.f32.mrb[31].mxu0 }
 0x67c   : > { %11387 = vst [vmem:[#allocation67_spill] sm:$0xff] %v9555_v55  ;;  %3002 = vmax.xlane.f32.xlu1 %v3001_v39  ;;  %2957 = vmax.xlane.f32.xlu0 %v2956_v20  ;;  %v9560_v58 = vpop.f32.mrb[32].mxu1  ;;  %v3004_v12 = vmax.f32 %v9551_v7, %v9555_v55  ;;  %v2152_v20 = vld [vmem:[#allocation3 + $0xa8] sm:$0xff]  ;;  %v2161_v55 = vld [vmem:[#allocation3 + $0xf0] sm:$0xff] }
 0x67d   : > { %11388 = vst [vmem:[#allocation68_spill] sm:$0xff] %v9560_v58  ;;  %v9564_v63 = vpop.f32.mrb[33].mxu1  ;;  %6208 = vmatpush3.bf16.msra.mxu0 %v2152_v20 }
 0x67e   : > { %11389 = vst [vmem:[#allocation69_spill] sm:$0xff] %v9564_v63  ;;  %v2937_v4 = vpop.xlane.xlu0 %2936  ;;  %v9566_v13 = vpop.f32.mrb[34].mxu1  ;;  %6209 = vmatprep.subr.bf16.mxu0 %v2161_v55  ;;  %v2162_v55 = vld [vmem:[#allocation3 + $0xf8] sm:$0xff] }
 0x67f   : > { %11390 = vst [vmem:[#allocation70_spill] sm:$0xff] %v9566_v13  ;;  %v3127_v39 = vsub.f32 %v9396_v52, %v2937_v4  ;;  %v3128_v53 = vsub.f32 %v9399_v1, %v2937_v4  ;;  %v9572_v48 = vpop.f32.mrb[35].mxu1 }
 0x680   : > { %11391 = vst [vmem:[#allocation71_spill] sm:$0xff] %v9572_v48  ;;  %v9574_v46 = vpop.f32.mrb[32].mxu0  ;;  %v2940_v34 = vpop.xlane.xlu1 %2939  ;;  %3005 = vmax.xlane.f32.xlu0 %v3004_v12  ;;  %2960 = vmax.xlane.f32.xlu1 %v2959_v41 }
 0x681   : > { %v3255_v32 = vmul.f32 1.442695, %v3127_v39  ;;  %v3257_v28 = vmul.f32 1.442695, %v3128_v53  ;;  %v3129_v52 = vsub.f32 %v9402_v3, %v2940_v34  ;;  %v3130_v1 = vsub.f32 %v9406_v59, %v2940_v34  ;;  %v9583_v4 = vpop.f32.mrb[33].mxu0  ;;  %v2153_v53 = vld [vmem:[#allocation3 + $0xb0] sm:$0xff] }
 0x682   : > { %v9585_v60 = vpop.f32.mrb[34].mxu0  ;;  %v3007_v12 = vmax.f32 %v9574_v46, %v9583_v4  ;;  %v11394_v3 = vmax.f32 %v9455_v25, %v9459_v26  ;;  %6210 = vmatpush3.bf16.msra.mxu0 %v2153_v53  ;;  %v2163_v26 = vld [vmem:[#allocation3 + $0x100] sm:$0xff] }
 0x683   : > { %11392 = vst [vmem:[#allocation72_spill] sm:$0xff] %v9585_v60  ;;  %6949 = vpow2.f32 %v3255_v32  ;;  %v3259_v41 = vmul.f32 1.442695, %v3129_v52  ;;  %v3261_v24 = vmul.f32 1.442695, %v3130_v1  ;;  %v9589_v23 = vpop.f32.mrb[35].mxu0  ;;  %6211 = vmatprep.subr.bf16.mxu0 %v2162_v55  ;;  %v11403_v55 = vmax.f32 %v9467_v31, %v9471_v33 }
 0x684   : > { %11393 = vst [vmem:[#allocation73_spill] sm:$0xff] %v9589_v23  ;;  %6951 = vpow2.f32 %v3257_v28  ;;  %3008 = vmax.xlane.f32.xlu1 %v3007_v12  ;;  %2963 = vmax.xlane.f32.xlu0 %v11394_v3  ;;  %v9594_v59 = vpop.f32.mrb[36].mxu1  ;;  %v3010_v34 = vmax.f32 %v9585_v60, %v9589_v23  ;;  %v2154_v3 = vld [vmem:[#allocation3 + $0xb8] sm:$0xff] }
 0x685   : > { %11395 = vst [vmem:[#allocation74_spill] sm:$0xff] %v9594_v59  ;;  %6953 = vpow2.f32 %v3259_v41  ;;  %v9598_v39 = vpop.f32.mrb[37].mxu1 }
 0x686   : > { %11396 = vst [vmem:[#allocation75_spill] sm:$0xff] %v9598_v39  ;;  %6955 = vpow2.f32 %v3261_v24  ;;  %v2943_v32 = vpop.xlane.xlu1 %2942  ;;  %v9600_v20 = vpop.f32.mrb[38].mxu1  ;;  %v11399_v24 = vmax.f32 %v9463_v29, %v9465_v30  ;;  %6212 = vmatpush3.bf16.msra.mxu0 %v2154_v3 }
 0x687   : > { %v3131_v52 = vsub.f32 %v9410_v18, %v2943_v32  ;;  %v3132_v1 = vsub.f32 %v9413_v35, %v2943_v32  ;;  %v9606_v12 = vpop.f32.mrb[39].mxu1  ;;  %v2171_v18 = vld [vmem:[#allocation3 + $0x140] sm:$0xff] }
 0x688   : > { %11397 = vst [vmem:[#allocation76_spill] sm:$0xff] %v9606_v12  ;;  %v9608_v41 = vpop.f32.mrb[36].mxu0  ;;  %3011 = vmax.xlane.f32.xlu0 %v3010_v34  ;;  %2966 = vmax.xlane.f32.xlu1 %v11399_v24 }
 0x689   : > { %11398 = vst [vmem:[#allocation77_spill] sm:$0xff] %v9608_v41  ;;  %v3263_v28 = vmul.f32 1.442695, %v3131_v52  ;;  %v3265_v22 = vmul.f32 1.442695, %v3132_v1  ;;  %v9615_v23 = vpop.f32.mrb[37].mxu0  ;;  %6261 = vmatprep.subr.bf16.mxu1 %v2171_v18 }
 0x68a   : > { %11400 = vst [vmem:[#allocation78_spill] sm:$0xff] %v9615_v23  ;;  %v9617_v35 = vpop.f32.mrb[38].mxu0  ;;  %v3013_v32 = vmax.f32 %v9608_v41, %v9615_v23 }
 0x68b   : > { %11401 = vst [vmem:[#allocation79_spill] sm:$0xff] %v9617_v35  ;;  %6957 = vpow2.f32 %v3263_v28  ;;  %v9621_v34 = vpop.f32.mrb[39].mxu0 }
 0x68c   : > { %11402 = vst [vmem:[#allocation80_spill] sm:$0xff] %v9621_v34  ;;  %6959 = vpow2.f32 %v3265_v22  ;;  %3014 = vmax.xlane.f32.xlu1 %v3013_v32  ;;  %2969 = vmax.xlane.f32.xlu0 %v11403_v55  ;;  %v9626_v52 = vpop.f32.mrb[40].mxu1  ;;  %v3016_v1 = vmax.f32 %v9617_v35, %v9621_v34  ;;  %v11409_v34 = vmax.f32 %v9475_v36, %v9477_v44  ;;  %v2172_v44 = vld [vmem:[#allocation3 + $0x148] sm:$0xff] }
 0x68d   : > { %11404 = vst [vmem:[#allocation81_spill] sm:$0xff] %v9626_v52  ;;  %v6950_v3 = vpop.eup %6949  ;;  %v9630_v24 = vpop.f32.mrb[41].mxu1 }
 0x68e   : > { %11405 = vst [vmem:[#allocation82_spill] sm:$0xff] %v9630_v24  ;;  %v6952_v53 = vpop.eup %6951  ;;  %v9632_v23 = vpop.f32.mrb[42].mxu1 }
 0x68f   : > { %11406 = vst [vmem:[#allocation83_spill] sm:$0xff] %v9632_v23  ;;  %v6954_v22 = vpop.eup %6953  ;;  %v9636_v18 = vpop.f32.mrb[43].mxu1  ;;  %v9638_v32 = vadd.f32 %v6952_v53, %v6950_v3 }
 0x690   : > { %11407 = vst [vmem:[#allocation84_spill] sm:$0xff] %v9636_v18  ;;  %v6956_v55 = vpop.eup %6955  ;;  %v9640_v33 = vpop.f32.mrb[40].mxu0  ;;  %3017 = vmax.xlane.f32.xlu0 %v3016_v1  ;;  %2972 = vmax.xlane.f32.xlu1 %v11409_v34  ;;  %v3703_v35 = vpack.c.bf16 %v6954_v22, %v6950_v3 }
 0x691   : > { %11408 = vst [vmem:[#allocation85_spill] sm:$0xff] %v9640_v33  ;;  %v9647_v41 = vpop.f32.mrb[41].mxu0  ;;  %v3704_v28 = vpack.c.bf16 %v6956_v55, %v6952_v53  ;;  %v9649_v30 = vadd.f32 %v6956_v55, %v6954_v22  ;;  %v11413_v22 = vmax.f32 %v9479_v45, %v9483_v47 }
 0x692   : > { %11410 = vst [vmem:[#allocation86_spill] sm:$0xff] %v9647_v41  ;;  %v9651_v29 = vpop.f32.mrb[42].mxu0  ;;  %v3019_v60 = vmax.f32 %v9640_v33, %v9647_v41  ;;  %v2165_v33 = vld [vmem:[#allocation3 + $0x110] sm:$0xff] }
 0x693   : > { %11411 = vst [vmem:[#allocation87_spill] sm:$0xff] %v9651_v29  ;;  %3799 = vmatprep.mubr.bf16.mxu1 %v3704_v28  ;;  %v9655_v1 = vpop.f32.mrb[43].mxu0 }
 0x694   : > { %11412 = vst [vmem:[#allocation88_spill] sm:$0xff] %v9655_v1  ;;  %3800 = vmatmul.mubr.bf16.vlgmr.msra.gmra.mrb[64].mxu1 %v3703_v35  ;;  %3020 = vmax.xlane.f32.xlu1 %v3019_v60  ;;  %v9657_v34 = vpop.f32.mrb[44].mxu1  ;;  %v3022_v3 = vmax.f32 %v9651_v29, %v9655_v1  ;;  %v2164_v35 = vld [vmem:[#allocation3 + $0x108] sm:$0xff] }
 0x695   : > { %v9661_v53 = vpop.eup %6957  ;;  %2975 = vmax.xlane.f32.xlu0 %v11413_v22  ;;  %v9666_v55 = vpop.f32.mrb[45].mxu1  ;;  %6262 = vmatpush3.bf16.msra.mxu1 %v2163_v26  ;;  %v11415_v26 = vmax.f32 %v9487_v49, %v9489_v50  ;;  %v2187_v49 = vld [vmem:[#allocation3 + $0x1c0] sm:$0xff] }
 0x696   : > { %v9668_v28 = vpop.eup %6959  ;;  %v9670_v31 = vpop.f32.mrb[46].mxu1  ;;  %6263 = vmatprep.subr.bf16.mxu1 %v2172_v44  ;;  %v2173_v44 = vld [vmem:[#allocation3 + $0x150] sm:$0xff]  ;;  %6325 = vmatprep.subr.bf16.mxu0 %v2187_v49 }
 0x697   : > { %v9674_v41 = vpop.f32.mrb[47].mxu1  ;;  %v9678_v1 = vadd.f32 %v9668_v28, %v9661_v53 }
 0x698   : > { %v9680_v29 = vpop.f32.mrb[44].mxu0  ;;  %2978 = vmax.xlane.f32.xlu1 %v11415_v26 }
 0x699   : > { %11414 = vst [vmem:[#allocation89_spill] sm:$0xff] %v9680_v29  ;;  %3023 = vmax.xlane.f32.xlu0 %v3022_v3  ;;  %v9687_v47 = vpop.f32.mrb[45].mxu0  ;;  %6264 = vmatpush3.bf16.msra.mxu1 %v2164_v35  ;;  %v11419_v3 = vmax.f32 %v9491_v51, %v9495_v57 }
 0x69a   : > { %11416 = vst [vmem:[#allocation90_spill] sm:$0xff] %v9687_v47  ;;  %v9689_v60 = vpop.f32.mrb[46].mxu0  ;;  %v3025_v45 = vmax.f32 %v9680_v29, %v9687_v47  ;;  %6265 = vmatprep.subr.bf16.mxu1 %v2173_v44  ;;  %v11421_v29 = vmax.f32 %v9560_v58, %v9564_v63 }
 0x69b   : > { %11417 = vst [vmem:[#allocation91_spill] sm:$0xff] %v9689_v60  ;;  %v9693_v36 = vpop.f32.mrb[47].mxu0 }
 0x69c   : > { %11418 = vst [vmem:[#allocation92_spill] sm:$0xff] %v9693_v36  ;;  %3026 = vmax.xlane.f32.xlu1 %v3025_v45  ;;  %v9695_v50 = vpop.f32.mrb[48].mxu1  ;;  %v3028_v26 = vmax.f32 %v9689_v60, %v9693_v36  ;;  %v2166_v60 = vld [vmem:[#allocation3 + $0x118] sm:$0xff] }
 0x69d   : > { %2981 = vmax.xlane.f32.xlu0 %v11419_v3  ;;  %v9702_v35 = vpop.f32.mrb[49].mxu1  ;;  %6266 = vmatpush3.bf16.msra.mxu1 %v2165_v33  ;;  %v2174_v33 = vld [vmem:[#allocation3 + $0x158] sm:$0xff] }
 0x69e   : > { %v9704_v22 = vpop.f32.mrb[50].mxu1  ;;  %6267 = vmatprep.subr.bf16.mxu1 %v2174_v33 }
 0x69f   : > { %v9708_v47 = vpop.f32.mrb[51].mxu1 }
 0x6a0   : > { %v9710_v45 = vpop.f32.mrb[48].mxu0  ;;  %3032 = vmax.xlane.f32.xlu1 %v11421_v29 }
 0x6a1   : > { %11420 = vst [vmem:[#allocation93_spill] sm:$0xff] %v9710_v45  ;;  %3029 = vmax.xlane.f32.xlu0 %v3028_v26  ;;  %v9717_v3 = vpop.f32.mrb[49].mxu0  ;;  %6268 = vmatpush3.bf16.msra.mxu1 %v2166_v60  ;;  %v11425_v26 = vmax.f32 %v9566_v13, %v9572_v48  ;;  %v2167_v48 = vld [vmem:[#allocation3 + $0x120] sm:$0xff] }
 0x6a2   : > { %11422 = vst [vmem:[#allocation94_spill] sm:$0xff] %v9717_v3  ;;  %v9719_v57 = vpop.f32.mrb[50].mxu0  ;;  %v3079_v44 = vmax.f32 %v9710_v45, %v9717_v3 }
 0x6a3   : > { %11423 = vst [vmem:[#allocation95_spill] sm:$0xff] %v9719_v57  ;;  %v9723_v51 = vpop.f32.mrb[51].mxu0 }
 0x6a4   : > { %11424 = vst [vmem:[#allocation96_spill] sm:$0xff] %v9723_v51  ;;  %3080 = vmax.xlane.f32.xlu1 %v3079_v44  ;;  %v9725_v63 = vpop.f32.mrb[52].mxu1  ;;  %v3082_v29 = vmax.f32 %v9719_v57, %v9723_v51  ;;  %v11426_v44 = vmax.f32 %v9594_v59, %v9598_v39  ;;  %v2175_v57 = vld [vmem:[#allocation3 + $0x160] sm:$0xff]  ;;  %v11431_v51 = vmax.f32 %v9600_v20, %v9606_v12 }
 0x6a5   : > { %3035 = vmax.xlane.f32.xlu0 %v11425_v26  ;;  %v9732_v36 = vpop.f32.mrb[53].mxu1  ;;  %6269 = vmatprep.subr.bf16.mxu1 %v2175_v57 }
 0x6a6   : > { %v9734_v58 = vpop.f32.mrb[54].mxu1  ;;  %6270 = vmatpush3.bf16.msra.mxu1 %v2167_v48 }
 0x6a7   : > { %v9738_v3 = vpop.f32.mrb[55].mxu1 }
 0x6a8   : > { %v9740_v60 = vpop.f32.mrb[52].mxu0  ;;  %3038 = vmax.xlane.f32.xlu1 %v11426_v44 }
 0x6a9   : > { %3083 = vmax.xlane.f32.xlu0 %v3082_v29  ;;  %v9747_v26 = vpop.f32.mrb[53].mxu0 }
 0x6aa   : > { %11427 = vst [vmem:[#allocation97_spill] sm:$0xff] %v9747_v26  ;;  %v9749_v13 = vpop.f32.mrb[54].mxu0  ;;  %v3085_v33 = vmax.f32 %v9740_v60, %v9747_v26  ;;  %v11433_v26 = vmax.f32 %v9626_v52, %v9630_v24 }
 0x6ab   : > { %11428 = vst [vmem:[#allocation98_spill] sm:$0xff] %v9749_v13  ;;  %v9753_v45 = vpop.f32.mrb[55].mxu0 }
 0x6ac   : > { %11429 = vst [vmem:[#allocation99_spill] sm:$0xff] %v9753_v45  ;;  %3086 = vmax.xlane.f32.xlu1 %v3085_v33  ;;  %v9755_v44 = vpop.f32.mrb[56].mxu1  ;;  %v3088_v29 = vmax.f32 %v9749_v13, %v9753_v45  ;;  %v2176_v45 = vld [vmem:[#allocation3 + $0x168] sm:$0xff] }
 0x6ad   : > { %11430 = vst [vmem:[#allocation100_spill] sm:$0xff] %v9755_v44  ;;  %3041 = vmax.xlane.f32.xlu0 %v11431_v51  ;;  %v9762_v39 = vpop.f32.mrb[57].mxu1  ;;  %v2168_v13 = vld [vmem:[#allocation3 + $0x128] sm:$0xff]  ;;  %6271 = vmatprep.subr.bf16.mxu1 %v2176_v45 }
 0x6ae   : > { %11432 = vst [vmem:[#allocation101_spill] sm:$0xff] %v9762_v39  ;;  %v9764_v59 = vpop.f32.mrb[58].mxu1  ;;  %v3067_v57 = vmax.f32 %v9755_v44, %v9762_v39  ;;  %6272 = vmatpush3.bf16.msra.mxu1 %v2168_v13 }
 0x6af   : > { %v9768_v48 = vpop.f32.mrb[59].mxu1 }
 0x6b0   : > { %v9770_v33 = vpop.f32.mrb[56].mxu0  ;;  %3044 = vmax.xlane.f32.xlu1 %v11433_v26 }
 0x6b1   : > { %3089 = vmax.xlane.f32.xlu0 %v3088_v29  ;;  %v9777_v51 = vpop.f32.mrb[57].mxu0  ;;  %v11438_v29 = vmax.f32 %v9632_v23, %v9636_v18  ;;  %v2169_v18 = vld [vmem:[#allocation3 + $0x130] sm:$0xff] }
 0x6b2   : > { %11434 = vst [vmem:[#allocation102_spill] sm:$0xff] %v9777_v51  ;;  %v9779_v12 = vpop.f32.mrb[58].mxu0  ;;  %v3091_v39 = vmax.f32 %v9770_v33, %v9777_v51 }
 0x6b3   : > { %11435 = vst [vmem:[#allocation103_spill] sm:$0xff] %v9779_v12  ;;  %v9783_v44 = vpop.f32.mrb[59].mxu0 }
 0x6b4   : > { %11436 = vst [vmem:[#allocation104_spill] sm:$0xff] %v9783_v44  ;;  %3092 = vmax.xlane.f32.xlu1 %v3091_v39  ;;  %v9785_v24 = vpop.f32.mrb[60].mxu1  ;;  %v3094_v26 = vmax.f32 %v9779_v12, %v9783_v44  ;;  %v11443_v39 = vmax.f32 %v9657_v34, %v9666_v55  ;;  %v2177_v12 = vld [vmem:[#allocation3 + $0x170] sm:$0xff] }
 0x6b5   : > { %11437 = vst [vmem:[#allocation105_spill] sm:$0xff] %v9785_v24  ;;  %3047 = vmax.xlane.f32.xlu0 %v11438_v29  ;;  %v9792_v49 = vpop.f32.mrb[61].mxu1  ;;  %6273 = vmatprep.subr.bf16.mxu1 %v2177_v12  ;;  %v2178_v12 = vld [vmem:[#allocation3 + $0x178] sm:$0xff] }
 0x6b6   : > { %11439 = vst [vmem:[#allocation106_spill] sm:$0xff] %v9792_v49  ;;  %v9794_v52 = vpop.f32.mrb[62].mxu1  ;;  %v3073_v45 = vmax.f32 %v9785_v24, %v9792_v49  ;;  %6274 = vmatpush3.bf16.msra.mxu1 %v2169_v18 }
 0x6b7   : > { %11440 = vst [vmem:[#allocation107_spill] sm:$0xff] %v9794_v52  ;;  %v9798_v51 = vpop.f32.mrb[63].mxu1  ;;  %6275 = vmatprep.subr.bf16.mxu1 %v2178_v12 }
 0x6b8   : > { %11441 = vst [vmem:[#allocation108_spill] sm:$0xff] %v9798_v51  ;;  %v9800_v13 = vpop.f32.mrb[60].mxu0  ;;  %3050 = vmax.xlane.f32.xlu1 %v11443_v39  ;;  %v3076_v44 = vmax.f32 %v9794_v52, %v9798_v51  ;;  %v11448_v52 = vmax.f32 %v9695_v50, %v9702_v35 }
 0x6b9   : > { %11442 = vst [vmem:[#allocation109_spill] sm:$0xff] %v9800_v13  ;;  %3095 = vmax.xlane.f32.xlu0 %v3094_v26  ;;  %v9807_v29 = vpop.f32.mrb[61].mxu0  ;;  %v11447_v26 = vmax.f32 %v9670_v31, %v9674_v41 }
 0x6ba   : > { %11444 = vst [vmem:[#allocation110_spill] sm:$0xff] %v9807_v29  ;;  %v9809_v23 = vpop.f32.mrb[62].mxu0  ;;  %v3097_v49 = vmax.f32 %v9800_v13, %v9807_v29  ;;  %v2170_v13 = vld [vmem:[#allocation3 + $0x138] sm:$0xff] }
 0x6bb   : > { %11445 = vst [vmem:[#allocation111_spill] sm:$0xff] %v9809_v23  ;;  %v9813_v24 = vpop.f32.mrb[63].mxu0  ;;  %6276 = vmatpush3.bf16.msra.mxu1 %v2170_v13 }
 0x6bc   : > { %11446 = vst [vmem:[#allocation112_spill] sm:$0xff] %v9813_v24  ;;  %3098 = vmax.xlane.f32.xlu1 %v3097_v49  ;;  %v3100_v39 = vmax.f32 %v9809_v23, %v9813_v24  ;;  %v11454_v23 = vmax.f32 %v9725_v63, %v9732_v36 }
 0x6bd   : > { %3053 = vmax.xlane.f32.xlu0 %v11447_v26 }
 0x6c0   : > { %v9820_v51 = vpop.f32.mrb[64].mxu0  ;;  %3056 = vmax.xlane.f32.xlu1 %v11448_v52  ;;  %v11452_v52 = vmax.f32 %v9704_v22, %v9708_v47 }
 0x6c1   : > { %3101 = vmax.xlane.f32.xlu0 %v3100_v39  ;;  %v9825_v29 = vpop.f32.mrb[65].mxu0 }
 0x6c2   : > { %11449 = vst [vmem:[#allocation113_spill] sm:$0xff] %v9825_v29  ;;  %v9827_v18 = vpop.f32.mrb[66].mxu0  ;;  %v3103_v49 = vmax.f32 %v9820_v51, %v9825_v29 }
 0x6c3   : > { %11450 = vst [vmem:[#allocation114_spill] sm:$0xff] %v9827_v18  ;;  %v9831_v24 = vpop.f32.mrb[67].mxu0 }
 0x6c4   : > { %11451 = vst [vmem:[#allocation115_spill] sm:$0xff] %v9831_v24  ;;  %3104 = vmax.xlane.f32.xlu1 %v3103_v49  ;;  %v3106_v26 = vmax.f32 %v9827_v18, %v9831_v24  ;;  %v11457_v24 = vmax.f32 %v9734_v58, %v9738_v3 }
 0x6c5   : > { %3059 = vmax.xlane.f32.xlu0 %v11452_v52 }
 0x6c8   : > { %v9838_v39 = vpop.f32.mrb[68].mxu0  ;;  %3062 = vmax.xlane.f32.xlu1 %v11454_v23 }
 0x6c9   : > { %11453 = vst [vmem:[#allocation116_spill] sm:$0xff] %v9838_v39  ;;  %3107 = vmax.xlane.f32.xlu0 %v3106_v26  ;;  %v9843_v29 = vpop.f32.mrb[69].mxu0 }
 0x6ca   : > { %11455 = vst [vmem:[#allocation117_spill] sm:$0xff] %v9843_v29  ;;  %v9845_v12 = vpop.f32.mrb[70].mxu0  ;;  %v3109_v13 = vmax.f32 %v9838_v39, %v9843_v29 }
 0x6cb   : > { %v9849_v49 = vpop.f32.mrb[71].mxu0 }
 0x6cc   : > { %11456 = vst [vmem:[#allocation118_spill] sm:$0xff] %v9849_v49  ;;  %3110 = vmax.xlane.f32.xlu1 %v3109_v13  ;;  %v3112_v52 = vmax.f32 %v9845_v12, %v9849_v49 }
 0x6cd   : > { %3065 = vmax.xlane.f32.xlu0 %v11457_v24  ;;  %v11461_v24 = vmax.f32 %v9764_v59, %v9768_v48 }
 0x6d0   : > { %v9856_v18 = vpop.f32.mrb[72].mxu0  ;;  %3068 = vmax.xlane.f32.xlu1 %v3067_v57 }
 0x6d1   : > { %11458 = vst [vmem:[#allocation119_spill] sm:$0xff] %v9856_v18  ;;  %3113 = vmax.xlane.f32.xlu0 %v3112_v52  ;;  %v9858_v23 = vpop.f32.mrb[73].mxu0 }
 0x6d2   : > { %11459 = vst [vmem:[#allocation120_spill] sm:$0xff] %v9858_v23  ;;  %v9860_v26 = vpop.f32.mrb[74].mxu0  ;;  %v3115_v29 = vmax.f32 %v9856_v18, %v9858_v23 }
 0x6d3   : > { %v9864_v39 = vpop.f32.mrb[75].mxu0 }
 0x6d4   : > { %11460 = vst [vmem:[#allocation121_spill] sm:$0xff] %v9864_v39  ;;  %3116 = vmax.xlane.f32.xlu1 %v3115_v29  ;;  %v3118_v13 = vmax.f32 %v9860_v26, %v9864_v39 }
 0x6d5   : > { %3071 = vmax.xlane.f32.xlu0 %v11461_v24 }
 0x6d8   : > { %v9871_v49 = vpop.f32.mrb[76].mxu0  ;;  %3074 = vmax.xlane.f32.xlu1 %v3073_v45 }
 0x6d9   : > { %11462 = vst [vmem:[#allocation122_spill] sm:$0xff] %v9871_v49  ;;  %3119 = vmax.xlane.f32.xlu0 %v3118_v13  ;;  %v9873_v57 = vpop.f32.mrb[77].mxu0 }
 0x6da   : > { %11463 = vst [vmem:[#allocation123_spill] sm:$0xff] %v9873_v57  ;;  %v9875_v52 = vpop.f32.mrb[78].mxu0  ;;  %v3121_v23 = vmax.f32 %v9871_v49, %v9873_v57 }
 0x6db   : > { %v9879_v18 = vpop.f32.mrb[79].mxu0 }
 0x6dc   : > { %11464 = vst [vmem:[#allocation124_spill] sm:$0xff] %v9879_v18  ;;  %3122 = vmax.xlane.f32.xlu1 %v3121_v23  ;;  %v3124_v29 = vmax.f32 %v9875_v52, %v9879_v18 }
 0x6dd   : > { %3077 = vmax.xlane.f32.xlu0 %v3076_v44 }
 0x6e0   : > { %3512 = vadd.xlane.f32.xlu1 %v9638_v32 }
 0x6e1   : > { %3125 = vmax.xlane.f32.xlu0 %v3124_v29 }
 0x6e4   : > { %3518 = vadd.xlane.f32.xlu1 %v9678_v1 }
 0x6e5   : > { %3515 = vadd.xlane.f32.xlu0 %v9649_v30 }
 0x6f1   : > { %v2985_v45 = vpop.xlane.xlu0 %2984 }
 0x6f2   : > { %v3159_v13 = vsub.f32 %v9499_v61, %v2985_v45  ;;  %v3160_v24 = vsub.f32 %v9501_v15, %v2985_v45 }
 0x6f4   : > { %v3319_v57 = vmul.f32 1.442695, %v3159_v13  ;;  %v3321_v49 = vmul.f32 1.442695, %v3160_v24 }
 0x6f5   : > { %v2988_v39 = vpop.xlane.xlu0 %2987 }
 0x6f6   : > { %6961 = vpow2.f32 %v3319_v57  ;;  %v3161_v23 = vsub.f32 %v9503_v17, %v2988_v39  ;;  %v3162_v44 = vsub.f32 %v9507_v42, %v2988_v39 }
 0x6f7   : > { %6963 = vpow2.f32 %v3321_v49 }
 0x6f8   : > { %v3323_v32 = vmul.f32 1.442695, %v3161_v23  ;;  %v3325_v29 = vmul.f32 1.442695, %v3162_v44 }
 0x6f9   : > { %v2991_v18 = vpop.xlane.xlu1 %2990  ;;  %v2946_v1 = vpop.xlane.xlu0 %2945 }
 0x6fa   : > { %6965 = vpow2.f32 %v3323_v32  ;;  %v3163_v30 = vsub.f32 %v9511_v37, %v2991_v18  ;;  %v3164_v61 = vsub.f32 %v9513_v8, %v2991_v18  ;;  %v3133_v15 = vsub.f32 %v9416_v38, %v2946_v1 }
 0x6fb   : > { %6967 = vpow2.f32 %v3325_v29  ;;  %v3134_v45 = vsub.f32 %v9420_v54, %v2946_v1 }
 0x6fc   : > { %v3327_v57 = vmul.f32 1.442695, %v3163_v30  ;;  %v3329_v13 = vmul.f32 1.442695, %v3164_v61  ;;  %v3267_v17 = vmul.f32 1.442695, %v3133_v15 }
 0x6fd   : > { %v3269_v24 = vmul.f32 1.442695, %v3134_v45  ;;  %v2994_v42 = vpop.xlane.xlu0 %2993  ;;  %v2949_v39 = vpop.xlane.xlu1 %2948 }
 0x6fe   : > { %6969 = vpow2.f32 %v3327_v57  ;;  %v3165_v49 = vsub.f32 %v9515_v9, %v2994_v42  ;;  %v3166_v23 = vsub.f32 %v9519_v21, %v2994_v42  ;;  %v3135_v37 = vsub.f32 %v9424_v62, %v2949_v39 }
 0x6ff   : > { %6971 = vpow2.f32 %v3329_v13  ;;  %v3136_v8 = vsub.f32 %v9427_v0, %v2949_v39 }
 0x700   : > { %v6962_v38 = vpop.eup %6961  ;;  %6973 = vpow2.f32 %v3267_v17  ;;  %v3331_v18 = vmul.f32 1.442695, %v3165_v49  ;;  %v3333_v54 = vmul.f32 1.442695, %v3166_v23  ;;  %v3271_v44 = vmul.f32 1.442695, %v3135_v37 }
 0x701   : > { %v6964_v32 = vpop.eup %6963  ;;  %6975 = vpow2.f32 %v3269_v24  ;;  %v3273_v29 = vmul.f32 1.442695, %v3136_v8  ;;  %v2997_v1 = vpop.xlane.xlu1 %2996  ;;  %v2179_v37 = vld [vmem:[#allocation3 + $0x180] sm:$0xff] }
 0x702   : > { %v2952_v30 = vpop.xlane.xlu0 %2951  ;;  %6977 = vpow2.f32 %v3331_v18  ;;  %v3167_v9 = vsub.f32 %v9526_v27, %v2997_v1  ;;  %v3168_v21 = vsub.f32 %v9531_v19, %v2997_v1  ;;  %v9902_v61 = vadd.f32 %v6964_v32, %v6962_v38 }
 0x703   : > { %v3137_v62 = vsub.f32 %v9430_v2, %v2952_v30  ;;  %6979 = vpow2.f32 %v3333_v54  ;;  %v3138_v0 = vsub.f32 %v9434_v5, %v2952_v30 }
 0x704   : > { %v6966_v15 = vpop.eup %6965  ;;  %6981 = vpow2.f32 %v3271_v44  ;;  %v3335_v45 = vmul.f32 1.442695, %v3167_v9  ;;  %v3337_v57 = vmul.f32 1.442695, %v3168_v21 }
 0x705   : > { %v3275_v13 = vmul.f32 1.442695, %v3137_v62  ;;  %v6968_v17 = vpop.eup %6967  ;;  %6983 = vpow2.f32 %v3273_v29  ;;  %v3277_v24 = vmul.f32 1.442695, %v3138_v0  ;;  %v2955_v39 = vpop.xlane.xlu1 %2954  ;;  %v3719_v27 = vpack.c.bf16 %v6966_v15, %v6962_v38 }
 0x706   : > { %v3000_v42 = vpop.xlane.xlu0 %2999  ;;  %6985 = vpow2.f32 %v3335_v45  ;;  %v3139_v5 = vsub.f32 %v9438_v10, %v2955_v39  ;;  %v3140_v49 = vsub.f32 %v9441_v11, %v2955_v39  ;;  %v3720_v23 = vpack.c.bf16 %v6968_v17, %v6964_v32  ;;  %v2188_v10 = vld [vmem:[#allocation3 + $0x1c8] sm:$0xff] }
 0x707   : > { %v3169_v19 = vsub.f32 %v9533_v43, %v3000_v42  ;;  %v3170_v2 = vsub.f32 %v9537_v56, %v3000_v42  ;;  %6987 = vpow2.f32 %v3337_v57  ;;  %v9908_v8 = vadd.f32 %v6968_v17, %v6966_v15  ;;  %v2180_v39 = vld [vmem:[#allocation3 + $0x188] sm:$0xff] }
 0x708   : > { %v9910_v18 = vpop.eup %6969  ;;  %6989 = vpow2.f32 %v3275_v13  ;;  %v3279_v38 = vmul.f32 1.442695, %v3139_v5  ;;  %v3281_v43 = vmul.f32 1.442695, %v3140_v49  ;;  %3896 = vmatprep.mubr.bf16.mxu0 %v3720_v23  ;;  %v11466_v5 = vld [vmem:[#allocation52_spill] sm:$0xff] }
 0x709   : > { %v3339_v54 = vmul.f32 1.442695, %v3169_v19  ;;  %v3341_v44 = vmul.f32 1.442695, %v3170_v2  ;;  %v6972_v29 = vpop.eup %6971  ;;  %6991 = vpow2.f32 %v3277_v24  ;;  %v3003_v56 = vpop.xlane.xlu1 %3002  ;;  %3897 = vmatmul.mubr.bf16.vlgmr.msra.gmra.mrb[80].mxu0 %v3719_v27  ;;  %v11465_v19 = vld [vmem:[#allocation67_spill] sm:$0xff] }
 0x70a   : > { %v2958_v1 = vpop.xlane.xlu0 %2957  ;;  %v6974_v30 = vpop.eup %6973  ;;  %v3171_v11 = vsub.f32 %v9544_v6, %v3003_v56  ;;  %v3172_v32 = vsub.f32 %v9549_v16, %v3003_v56  ;;  %6326 = vmatpush3.bf16.msra.mxu0 %v2179_v37  ;;  %v9918_v15 = vadd.f32 %v6972_v29, %v9910_v18  ;;  %v2189_v23 = vld [vmem:[#allocation3 + $0x1d0] sm:$0xff] }
 0x70b   : > { %6993 = vpow2.f32 %v3339_v54  ;;  %v3141_v9 = vsub.f32 %v9443_v40, %v2958_v1  ;;  %v6976_v21 = vpop.eup %6975  ;;  %v3142_v62 = vsub.f32 %v9447_v14, %v2958_v1  ;;  %v3705_v0 = vpack.c.bf16 %v6974_v30, %v9661_v53  ;;  %6327 = vmatprep.subr.bf16.mxu0 %v2188_v10  ;;  %v11467_v54 = vld [vmem:[#allocation53_spill] sm:$0xff] }
 0x70c   : > { %6995 = vpow2.f32 %v3341_v44  ;;  %v6978_v45 = vpop.eup %6977  ;;  %v3343_v57 = vmul.f32 1.442695, %v3171_v11  ;;  %v3345_v13 = vmul.f32 1.442695, %v3172_v32  ;;  %v3706_v40 = vpack.c.bf16 %v6976_v21, %v9668_v28 }
 0x70d   : > { %6997 = vpow2.f32 %v3279_v38  ;;  %v3283_v17 = vmul.f32 1.442695, %v3141_v9  ;;  %v6980_v6 = vpop.eup %6979  ;;  %v3285_v16 = vmul.f32 1.442695, %v3142_v62  ;;  %v3520_v24 = vadd.f32 %v6976_v21, %v6974_v30  ;;  %v2961_v14 = vpop.xlane.xlu1 %2960 }
 0x70e   : > { %6999 = vpow2.f32 %v3281_v43  ;;  %v3006_v42 = vpop.xlane.xlu0 %3005  ;;  %v9921_v53 = vpop.eup %6981  ;;  %v3143_v49 = vsub.f32 %v11466_v5, %v2961_v14  ;;  %3807 = vmatprep.mubr.bf16.mxu1 %v3706_v40  ;;  %v3144_v28 = vsub.f32 %v11467_v54, %v2961_v14  ;;  %v3722_v44 = vpack.c.bf16 %v6980_v6, %v6972_v29  ;;  %6328 = vmatpush3.bf16.msra.mxu0 %v2180_v39  ;;  %v2181_v29 = vld [vmem:[#allocation3 + $0x190] sm:$0xff]  ;;  %v2182_v5 = vld [vmem:[#allocation3 + $0x198] sm:$0xff] }
 0x70f   : > { %7001 = vpow2.f32 %v3343_v57  ;;  %v3173_v27 = vsub.f32 %v9551_v7, %v3006_v42  ;;  %v3174_v2 = vsub.f32 %v11465_v19, %v3006_v42  ;;  %v6984_v37 = vpop.eup %6983  ;;  %3521 = vadd.xlane.f32.xlu0 %v3520_v24  ;;  %v3721_v38 = vpack.c.bf16 %v6978_v45, %v9910_v18  ;;  %3808 = vmatmul.mubr.bf16.gmra.mrb[68].mxu1 %v3705_v0  ;;  %v11470_v54 = vld [vmem:[#allocation73_spill] sm:$0xff] }
 0x710   : > { %7003 = vpow2.f32 %v3345_v13  ;;  %v9928_v43 = vpop.eup %6985  ;;  %v3287_v1 = vmul.f32 1.442695, %v3143_v49  ;;  %v3289_v30 = vmul.f32 1.442695, %v3144_v28  ;;  %3904 = vmatprep.mubr.bf16.mxu0 %v3722_v44  ;;  %v3523_v11 = vadd.f32 %v6984_v37, %v9921_v53  ;;  %6329 = vmatprep.subr.bf16.mxu0 %v2189_v23  ;;  %v2190_v13 = vld [vmem:[#allocation3 + $0x1d8] sm:$0xff]  ;;  %v11471_v44 = vld [vmem:[#allocation55_spill] sm:$0xff] }
 0x711   : > { %7005 = vpow2.f32 %v3283_v17  ;;  %v3347_v56 = vmul.f32 1.442695, %v3173_v27  ;;  %v3349_v7 = vmul.f32 1.442695, %v3174_v2  ;;  %v6988_v10 = vpop.eup %6987  ;;  %v3009_v32 = vpop.xlane.xlu1 %3008  ;;  %v9931_v21 = vadd.f32 %v6980_v6, %v6978_v45  ;;  %3905 = vmatmul.mubr.bf16.gmra.mrb[84].mxu0 %v3721_v38 }
 0x712   : > { %7007 = vpow2.f32 %v3285_v16  ;;  %v2964_v9 = vpop.xlane.xlu0 %2963  ;;  %v6990_v18 = vpop.eup %6989  ;;  %v3175_v62 = vsub.f32 %v9574_v46, %v3009_v32  ;;  %v3176_v0 = vsub.f32 %v9583_v4, %v3009_v32  ;;  %3524 = vadd.xlane.f32.xlu1 %v3523_v11  ;;  %v11468_v16 = vld [vmem:[#allocation54_spill] sm:$0xff]  ;;  %v9939_v45 = vadd.f32 %v6988_v10, %v9928_v43  ;;  %6330 = vmatpush3.bf16.msra.mxu0 %v2181_v29 }
 0x713   : > { %7009 = vpow2.f32 %v3347_v56  ;;  %v3145_v57 = vsub.f32 %v9455_v25, %v2964_v9  ;;  %v6992_v17 = vpop.eup %6991  ;;  %v3146_v40 = vsub.f32 %v11468_v16, %v2964_v9  ;;  %v3707_v24 = vpack.c.bf16 %v6990_v18, %v9921_v53  ;;  %6331 = vmatprep.subr.bf16.mxu0 %v2190_v13  ;;  %v11469_v53 = vld [vmem:[#allocation72_spill] sm:$0xff]  ;;  %v2191_v56 = vld [vmem:[#allocation3 + $0x1e0] sm:$0xff] }
 0x714   : > { %7011 = vpow2.f32 %v3349_v7  ;;  %v3351_v42 = vmul.f32 1.442695, %v3175_v62  ;;  %v3353_v14 = vmul.f32 1.442695, %v3176_v0  ;;  %v3708_v39 = vpack.c.bf16 %v6992_v17, %v6984_v37  ;;  %v11472_v37 = vld [vmem:[#allocation56_spill] sm:$0xff] }
 0x715   : > { %v6994_v6 = vpop.eup %6993  ;;  %7013 = vpow2.f32 %v3287_v1  ;;  %v3291_v46 = vmul.f32 1.442695, %v3145_v57  ;;  %v3293_v25 = vmul.f32 1.442695, %v3146_v40  ;;  %v3526_v27 = vadd.f32 %v6992_v17, %v6990_v18  ;;  %v2967_v2 = vpop.xlane.xlu1 %2966  ;;  %v11473_v40 = vld [vmem:[#allocation77_spill] sm:$0xff] }
 0x716   : > { %v6996_v4 = vpop.eup %6995  ;;  %7015 = vpow2.f32 %v3289_v30  ;;  %v3012_v19 = vpop.xlane.xlu0 %3011  ;;  %v3147_v38 = vsub.f32 %v11471_v44, %v2967_v2  ;;  %3815 = vmatprep.mubr.bf16.mxu1 %v3708_v39  ;;  %v3148_v1 = vsub.f32 %v11472_v37, %v2967_v2  ;;  %v3723_v11 = vpack.c.bf16 %v6994_v6, %v9928_v43  ;;  %6332 = vmatpush3.bf16.msra.mxu0 %v2182_v5 }
 0x717   : > { %v9941_v49 = vpop.eup %6997  ;;  %7017 = vpow2.f32 %v3351_v42  ;;  %v3177_v23 = vsub.f32 %v11469_v53, %v3012_v19  ;;  %v3178_v28 = vsub.f32 %v11470_v54, %v3012_v19  ;;  %3527 = vadd.xlane.f32.xlu0 %v3526_v27  ;;  %v3724_v30 = vpack.c.bf16 %v6996_v4, %v6988_v10  ;;  %3816 = vmatmul.mubr.bf16.gmra.mrb[72].mxu1 %v3707_v24  ;;  %v2183_v10 = vld [vmem:[#allocation3 + $0x1a0] sm:$0xff] }
 0x718   : > { %v7000_v7 = vpop.eup %6999  ;;  %7019 = vpow2.f32 %v3353_v14  ;;  %v3295_v18 = vmul.f32 1.442695, %v3147_v38  ;;  %v3297_v0 = vmul.f32 1.442695, %v3148_v1  ;;  %6333 = vmatprep.subr.bf16.mxu0 %v2191_v56  ;;  %v9951_v16 = vadd.f32 %v6996_v4, %v6994_v6  ;;  %v11474_v42 = vld [vmem:[#allocation78_spill] sm:$0xff] }
 0x719   : > { %v9948_v32 = vpop.eup %7001  ;;  %7021 = vpow2.f32 %v3291_v46  ;;  %v3355_v9 = vmul.f32 1.442695, %v3177_v23  ;;  %v3357_v29 = vmul.f32 1.442695, %v3178_v28  ;;  %3912 = vmatprep.mubr.bf16.mxu0 %v3724_v30  ;;  %v3529_v57 = vadd.f32 %v7000_v7, %v9941_v49  ;;  %v3015_v13 = vpop.xlane.xlu1 %3014  ;;  %v11475_v46 = vld [vmem:[#allocation57_spill] sm:$0xff]  ;;  %v11476_v19 = vld [vmem:[#allocation58_spill] sm:$0xff] }
 0x71a   : > { %v7004_v62 = vpop.eup %7003  ;;  %7023 = vpow2.f32 %v3293_v25  ;;  %v2970_v17 = vpop.xlane.xlu0 %2969  ;;  %3913 = vmatmul.mubr.bf16.gmra.mrb[88].mxu0 %v3723_v11  ;;  %v3179_v24 = vsub.f32 %v11473_v40, %v3015_v13  ;;  %v3180_v14 = vsub.f32 %v11474_v42, %v3015_v13  ;;  %v2192_v25 = vld [vmem:[#allocation3 + $0x1e8] sm:$0xff] }
 0x71b   : > { %v7006_v43 = vpop.eup %7005  ;;  %7025 = vpow2.f32 %v3355_v9  ;;  %v3149_v39 = vsub.f32 %v11475_v46, %v2970_v17  ;;  %3530 = vadd.xlane.f32.xlu1 %v3529_v57  ;;  %v3150_v2 = vsub.f32 %v11476_v19, %v2970_v17  ;;  %v9959_v6 = vadd.f32 %v7004_v62, %v9948_v32  ;;  %6334 = vmatpush3.bf16.msra.mxu0 %v2183_v10  ;;  %v2184_v30 = vld [vmem:[#allocation3 + $0x1a8] sm:$0xff]  ;;  %v2193_v17 = vld [vmem:[#allocation3 + $0x1f0] sm:$0xff] }
 0x71c   : > { %v7008_v27 = vpop.eup %7007  ;;  %7027 = vpow2.f32 %v3357_v29  ;;  %v3709_v5 = vpack.c.bf16 %v7006_v43, %v9941_v49  ;;  %v3359_v53 = vmul.f32 1.442695, %v3179_v24  ;;  %v3361_v23 = vmul.f32 1.442695, %v3180_v14  ;;  %6335 = vmatprep.subr.bf16.mxu0 %v2192_v25  ;;  %v11477_v49 = vld [vmem:[#allocation79_spill] sm:$0xff]  ;;  %v11478_v29 = vld [vmem:[#allocation80_spill] sm:$0xff] }
 0x71d   : > { %v7010_v4 = vpop.eup %7009  ;;  %7029 = vpow2.f32 %v3295_v18  ;;  %v3299_v54 = vmul.f32 1.442695, %v3149_v39  ;;  %v3301_v44 = vmul.f32 1.442695, %v3150_v2  ;;  %v3710_v38 = vpack.c.bf16 %v7008_v27, %v7000_v7  ;;  %v2973_v1 = vpop.xlane.xlu1 %2972  ;;  %v11479_v57 = vld [vmem:[#allocation59_spill] sm:$0xff]  ;;  %v11480_v7 = vld [vmem:[#allocation60_spill] sm:$0xff] }
 0x71e   : > { %v7012_v28 = vpop.eup %7011  ;;  %7031 = vpow2.f32 %v3297_v0  ;;  %v3532_v56 = vadd.f32 %v7008_v27, %v7006_v43  ;;  %v3018_v37 = vpop.xlane.xlu0 %3017  ;;  %v3151_v13 = vsub.f32 %v11479_v57, %v2973_v1  ;;  %v3152_v0 = vsub.f32 %v11480_v7, %v2973_v1  ;;  %v2185_v2 = vld [vmem:[#allocation3 + $0x1b0] sm:$0xff]  ;;  %v11483_v1 = vld [vmem:[#allocation61_spill] sm:$0xff] }
 0x71f   : > { %v9961_v11 = vpop.eup %7013  ;;  %7033 = vpow2.f32 %v3359_v53  ;;  %v3181_v9 = vsub.f32 %v11477_v49, %v3018_v37  ;;  %v3182_v18 = vsub.f32 %v11478_v29, %v3018_v37  ;;  %3823 = vmatprep.mubr.bf16.mxu1 %v3710_v38  ;;  %v3726_v43 = vpack.c.bf16 %v7012_v28, %v7004_v62  ;;  %6336 = vmatpush3.bf16.msra.mxu0 %v2184_v30  ;;  %v11481_v53 = vld [vmem:[#allocation85_spill] sm:$0xff]  ;;  %v11484_v49 = vld [vmem:[#allocation62_spill] sm:$0xff] }
 0x720   : > { %v7016_v10 = vpop.eup %7015  ;;  %7035 = vpow2.f32 %v3361_v23  ;;  %3533 = vadd.xlane.f32.xlu0 %v3532_v56  ;;  %v3725_v40 = vpack.c.bf16 %v7010_v4, %v9948_v32  ;;  %3824 = vmatmul.mubr.bf16.gmra.mrb[76].mxu1 %v3709_v5  ;;  %v3303_v46 = vmul.f32 1.442695, %v3151_v13  ;;  %v3305_v25 = vmul.f32 1.442695, %v3152_v0  ;;  %v11482_v23 = vld [vmem:[#allocation86_spill] sm:$0xff]  ;;  %v2194_v56 = vld [vmem:[#allocation3 + $0x1f8] sm:$0xff] }
 0x721   : > { %v9968_v24 = vpop.eup %7017  ;;  %7037 = vpow2.f32 %v3299_v54  ;;  %v3363_v42 = vmul.f32 1.442695, %v3181_v9  ;;  %v3365_v14 = vmul.f32 1.442695, %v3182_v18  ;;  %3920 = vmatprep.mubr.bf16.mxu0 %v3726_v43  ;;  %v3535_v27 = vadd.f32 %v7016_v10, %v9961_v11  ;;  %v3021_v19 = vpop.xlane.xlu1 %3020  ;;  %6337 = vmatprep.subr.bf16.mxu0 %v2193_v17 }
 0x722   : > { %v7020_v39 = vpop.eup %7019  ;;  %7039 = vpow2.f32 %v3301_v44  ;;  %v9971_v62 = vadd.f32 %v7012_v28, %v7010_v4  ;;  %3921 = vmatmul.mubr.bf16.gmra.mrb[92].mxu0 %v3725_v40  ;;  %v3183_v5 = vsub.f32 %v11481_v53, %v3021_v19  ;;  %v3184_v54 = vsub.f32 %v11482_v23, %v3021_v19  ;;  %v2976_v38 = vpop.xlane.xlu0 %2975  ;;  %v2186_v53 = vld [vmem:[#allocation3 + $0x1b8] sm:$0xff] }
 0x723   : > { %v7022_v32 = vpop.eup %7021  ;;  %7041 = vpow2.f32 %v3363_v42  ;;  %v9976_v44 = vadd.f32 %v7020_v39, %v9968_v24  ;;  %v3153_v30 = vsub.f32 %v11483_v1, %v2976_v38  ;;  %v3154_v4 = vsub.f32 %v11484_v49, %v2976_v38  ;;  %6338 = vmatpush3.bf16.msra.mxu0 %v2185_v2 }
 0x724   : > { %v7024_v37 = vpop.eup %7023  ;;  %7043 = vpow2.f32 %v3365_v14  ;;  %3536 = vadd.xlane.f32.xlu0 %v3535_v27  ;;  %v3711_v28 = vpack.c.bf16 %v7022_v32, %v9961_v11  ;;  %v3367_v29 = vmul.f32 1.442695, %v3183_v5  ;;  %v3369_v18 = vmul.f32 1.442695, %v3184_v54  ;;  %6339 = vmatprep.subr.bf16.mxu0 %v2194_v56  ;;  %v11485_v14 = vld [vmem:[#allocation63_spill] sm:$0xff]  ;;  %v11486_v27 = vld [vmem:[#allocation64_spill] sm:$0xff] }
 0x725   : > { %v7026_v9 = vpop.eup %7025  ;;  %7045 = vpow2.f32 %v3303_v46  ;;  %v3712_v57 = vpack.c.bf16 %v7024_v37, %v7016_v10  ;;  %v3307_v17 = vmul.f32 1.442695, %v3153_v30  ;;  %v3309_v7 = vmul.f32 1.442695, %v3154_v4  ;;  %v2979_v43 = vpop.xlane.xlu1 %2978  ;;  %v11488_v5 = vld [vmem:[#allocation88_spill] sm:$0xff] }
 0x726   : > { %v7028_v13 = vpop.eup %7027  ;;  %7047 = vpow2.f32 %v3305_v25  ;;  %v3538_v0 = vadd.f32 %v7024_v37, %v7022_v32  ;;  %v3024_v42 = vpop.xlane.xlu0 %3023  ;;  %v3155_v11 = vsub.f32 %v11485_v14, %v2979_v43  ;;  %v3156_v46 = vsub.f32 %v11486_v27, %v2979_v43  ;;  %v11487_v25 = vld [vmem:[#allocation87_spill] sm:$0xff]  ;;  %v11492_v14 = vld [vmem:[#allocation66_spill] sm:$0xff] }
 0x727   : > { %v9981_v40 = vpop.eup %7029  ;;  %7049 = vpow2.f32 %v3367_v29  ;;  %3831 = vmatprep.mubr.bf16.mxu1 %v3712_v57  ;;  %v3728_v19 = vpack.c.bf16 %v7028_v13, %v7020_v39  ;;  %v3185_v2 = vsub.f32 %v11487_v25, %v3024_v42  ;;  %v3186_v32 = vsub.f32 %v11488_v5, %v3024_v42  ;;  %6340 = vmatpush3.bf16.msra.mxu0 %v2186_v53 }
 0x728   : > { %v7032_v10 = vpop.eup %7031  ;;  %7051 = vpow2.f32 %v3369_v18  ;;  %3539 = vadd.xlane.f32.xlu1 %v3538_v0  ;;  %v3727_v23 = vpack.c.bf16 %v7026_v9, %v9968_v24  ;;  %3832 = vmatmul.mubr.bf16.gmra.mrb[80].mxu1 %v3711_v28  ;;  %v3311_v38 = vmul.f32 1.442695, %v3155_v11  ;;  %v3313_v56 = vmul.f32 1.442695, %v3156_v46  ;;  %v11489_v24 = vld [vmem:[#allocation89_spill] sm:$0xff]  ;;  %v11490_v28 = vld [vmem:[#allocation90_spill] sm:$0xff] }
 0x729   : > { %v9988_v54 = vpop.eup %7033  ;;  %7053 = vpow2.f32 %v3307_v17  ;;  %3928 = vmatprep.mubr.bf16.mxu0 %v3728_v19  ;;  %v3541_v37 = vadd.f32 %v7032_v10, %v9981_v40  ;;  %v3371_v1 = vmul.f32 1.442695, %v3185_v2  ;;  %v3373_v30 = vmul.f32 1.442695, %v3186_v32  ;;  %v3027_v49 = vpop.xlane.xlu1 %3026 }
 0x72a   : > { %v7036_v39 = vpop.eup %7035  ;;  %7055 = vpow2.f32 %v3309_v7  ;;  %v9991_v4 = vadd.f32 %v7028_v13, %v7026_v9  ;;  %3929 = vmatmul.mubr.bf16.gmra.mrb[96].mxu0 %v3727_v23  ;;  %v3187_v18 = vsub.f32 %v11489_v24, %v3027_v49  ;;  %v3188_v57 = vsub.f32 %v11490_v28, %v3027_v49  ;;  %v2982_v17 = vpop.xlane.xlu0 %2981  ;;  %v11491_v7 = vld [vmem:[#allocation65_spill] sm:$0xff] }
 0x72b   : > { %v7038_v29 = vpop.eup %7037  ;;  %7057 = vpow2.f32 %v3311_v38  ;;  %3542 = vadd.xlane.f32.xlu0 %v3541_v37  ;;  %v9996_v0 = vadd.f32 %v7036_v39, %v9988_v54  ;;  %v3157_v42 = vsub.f32 %v11491_v7, %v2982_v17  ;;  %v3158_v11 = vsub.f32 %v11492_v14, %v2982_v17  ;;  %v11493_v37 = vld [vmem:[#allocation68_spill] sm:$0xff]  ;;  %v11494_v49 = vld [vmem:[#allocation69_spill] sm:$0xff] }
 0x72c   : > { %v7040_v43 = vpop.eup %7039  ;;  %7059 = vpow2.f32 %v3371_v1  ;;  %v3713_v9 = vpack.c.bf16 %v7038_v29, %v9981_v40  ;;  %v3375_v27 = vmul.f32 1.442695, %v3187_v18  ;;  %v3377_v46 = vmul.f32 1.442695, %v3188_v57 }
 0x72d   : > { %v7042_v13 = vpop.eup %7041  ;;  %7061 = vpow2.f32 %v3373_v30  ;;  %v3714_v19 = vpack.c.bf16 %v7040_v43, %v7032_v10  ;;  %v3315_v25 = vmul.f32 1.442695, %v3157_v42  ;;  %v3317_v2 = vmul.f32 1.442695, %v3158_v11  ;;  %v3033_v32 = vpop.xlane.xlu1 %3032  ;;  %v11495_v10 = vld [vmem:[#allocation91_spill] sm:$0xff] }
 0x72e   : > { %v7044_v53 = vpop.eup %7043  ;;  %7063 = vpow2.f32 %v3313_v56  ;;  %v3544_v5 = vadd.f32 %v7040_v43, %v7038_v29  ;;  %v3030_v38 = vpop.xlane.xlu0 %3029  ;;  %v3191_v1 = vsub.f32 %v11493_v37, %v3033_v32  ;;  %v3192_v40 = vsub.f32 %v11494_v49, %v3033_v32  ;;  %v11496_v56 = vld [vmem:[#allocation92_spill] sm:$0xff] }
 0x72f   : > { %v10001_v23 = vpop.eup %7045  ;;  %7065 = vpow2.f32 %v3375_v27  ;;  %3839 = vmatprep.mubr.bf16.mxu1 %v3714_v19  ;;  %v3730_v24 = vpack.c.bf16 %v7044_v53, %v7036_v39  ;;  %v3189_v18 = vsub.f32 %v11495_v10, %v3030_v38  ;;  %v3190_v28 = vsub.f32 %v11496_v56, %v3030_v38 }
 0x730   : > { %v7048_v30 = vpop.eup %7047  ;;  %7067 = vpow2.f32 %v3377_v46  ;;  %3545 = vadd.xlane.f32.xlu1 %v3544_v5  ;;  %v3729_v29 = vpack.c.bf16 %v7042_v13, %v9988_v54  ;;  %3840 = vmatmul.mubr.bf16.gmra.mrb[84].mxu1 %v3713_v9  ;;  %v3383_v17 = vmul.f32 1.442695, %v3191_v1  ;;  %v3385_v43 = vmul.f32 1.442695, %v3192_v40  ;;  %v11497_v54 = vld [vmem:[#allocation93_spill] sm:$0xff]  ;;  %v11500_v1 = vld [vmem:[#allocation71_spill] sm:$0xff] }
 0x731   : > { %v10008_v57 = vpop.eup %7049  ;;  %7069 = vpow2.f32 %v3315_v25  ;;  %3936 = vmatprep.mubr.bf16.mxu0 %v3730_v24  ;;  %v3547_v7 = vadd.f32 %v7048_v30, %v10001_v23  ;;  %v3379_v39 = vmul.f32 1.442695, %v3189_v18  ;;  %v3381_v14 = vmul.f32 1.442695, %v3190_v28  ;;  %v3081_v11 = vpop.xlane.xlu1 %3080  ;;  %v11498_v25 = vld [vmem:[#allocation94_spill] sm:$0xff] }
 0x732   : > { %v7052_v42 = vpop.eup %7051  ;;  %7071 = vpow2.f32 %v3317_v2  ;;  %v10011_v27 = vadd.f32 %v7044_v53, %v7042_v13  ;;  %3937 = vmatmul.mubr.bf16.gmra.mrb[100].mxu0 %v3729_v29  ;;  %v3223_v19 = vsub.f32 %v11497_v54, %v3081_v11  ;;  %v3224_v9 = vsub.f32 %v11498_v25, %v3081_v11  ;;  %v3036_v5 = vpop.xlane.xlu0 %3035  ;;  %v11499_v2 = vld [vmem:[#allocation70_spill] sm:$0xff]  ;;  %v11502_v25 = vld [vmem:[#allocation75_spill] sm:$0xff] }
 0x733   : > { %v7054_v46 = vpop.eup %7053  ;;  %7073 = vpow2.f32 %v3383_v17  ;;  %3548 = vadd.xlane.f32.xlu0 %v3547_v7  ;;  %v10016_v32 = vadd.f32 %v7052_v42, %v10008_v57  ;;  %v3193_v37 = vsub.f32 %v11499_v2, %v3036_v5  ;;  %v3194_v49 = vsub.f32 %v11500_v1, %v3036_v5  ;;  %v11501_v11 = vld [vmem:[#allocation74_spill] sm:$0xff] }
 0x734   : > { %v7056_v38 = vpop.eup %7055  ;;  %7075 = vpow2.f32 %v3379_v39  ;;  %v3715_v13 = vpack.c.bf16 %v7054_v46, %v10001_v23  ;;  %v3447_v40 = vmul.f32 1.442695, %v3223_v19  ;;  %v3449_v24 = vmul.f32 1.442695, %v3224_v9 }
 0x735   : > { %v10021_v53 = vpop.eup %7057  ;;  %7077 = vpow2.f32 %v3381_v14  ;;  %v3716_v10 = vpack.c.bf16 %v7056_v38, %v7048_v30  ;;  %v3387_v56 = vmul.f32 1.442695, %v3193_v37  ;;  %v3389_v28 = vmul.f32 1.442695, %v3194_v49  ;;  %v3039_v17 = vpop.xlane.xlu1 %3038  ;;  %v11503_v30 = vld [vmem:[#allocation95_spill] sm:$0xff] }
 0x736   : > { %v7060_v18 = vpop.eup %7059  ;;  %7079 = vpow2.f32 %v3385_v43  ;;  %v3550_v29 = vadd.f32 %v7056_v38, %v7054_v46  ;;  %v3084_v39 = vpop.xlane.xlu0 %3083  ;;  %v3195_v54 = vsub.f32 %v11501_v11, %v3039_v17  ;;  %v3196_v23 = vsub.f32 %v11502_v25, %v3039_v17  ;;  %v11504_v43 = vld [vmem:[#allocation96_spill] sm:$0xff] }
 0x737   : > { %v7062_v7 = vpop.eup %7061  ;;  %7081 = vpow2.f32 %v3447_v40  ;;  %3847 = vmatprep.mubr.bf16.mxu1 %v3716_v10  ;;  %v3731_v5 = vpack.c.bf16 %v7060_v18, %v10008_v57  ;;  %v3225_v19 = vsub.f32 %v11503_v30, %v3084_v39  ;;  %v3226_v9 = vsub.f32 %v11504_v43, %v3084_v39 }
 0x738   : > { %v7064_v14 = vpop.eup %7063  ;;  %7083 = vpow2.f32 %v3449_v24  ;;  %3551 = vadd.xlane.f32.xlu1 %v3550_v29  ;;  %v3732_v2 = vpack.c.bf16 %v7062_v7, %v7052_v42  ;;  %3848 = vmatmul.mubr.bf16.gmra.mrb[88].mxu1 %v3715_v13  ;;  %v3391_v38 = vmul.f32 1.442695, %v3195_v54  ;;  %v3393_v37 = vmul.f32 1.442695, %v3196_v23  ;;  %v11506_v54 = vld [vmem:[#allocation76_spill] sm:$0xff] }
 0x739   : > { %v10028_v46 = vpop.eup %7065  ;;  %7085 = vpow2.f32 %v3387_v56  ;;  %v3553_v1 = vadd.f32 %v7064_v14, %v10021_v53  ;;  %v3451_v40 = vmul.f32 1.442695, %v3225_v19  ;;  %v3453_v57 = vmul.f32 1.442695, %v3226_v9  ;;  %v3087_v24 = vpop.xlane.xlu1 %3086  ;;  %v11505_v56 = vld [vmem:[#allocation97_spill] sm:$0xff] }
 0x73a   : > { %v7068_v49 = vpop.eup %7067  ;;  %7087 = vpow2.f32 %v3389_v28  ;;  %3944 = vmatprep.mubr.bf16.mxu0 %v3732_v2  ;;  %v10031_v10 = vadd.f32 %v7062_v7, %v7060_v18  ;;  %v3227_v42 = vsub.f32 %v9740_v60, %v3087_v24  ;;  %v3228_v13 = vsub.f32 %v11505_v56, %v3087_v24  ;;  %v3042_v17 = vpop.xlane.xlu0 %3041  ;;  %v11510_v56 = vld [vmem:[#allocation99_spill] sm:$0xff] }
 0x73b   : > { %v7070_v29 = vpop.eup %7069  ;;  %7089 = vpow2.f32 %v3391_v38  ;;  %3554 = vadd.xlane.f32.xlu0 %v3553_v1  ;;  %3945 = vmatmul.mubr.bf16.gmra.mrb[104].mxu0 %v3731_v5  ;;  %v10036_v39 = vadd.f32 %v7068_v49, %v10028_v46  ;;  %v3197_v28 = vsub.f32 %v9600_v20, %v3042_v17  ;;  %v3198_v25 = vsub.f32 %v11506_v54, %v3042_v17  ;;  %v11507_v1 = vld [vmem:[#allocation81_spill] sm:$0xff] }
 0x73c   : > { %v7072_v11 = vpop.eup %7071  ;;  %7091 = vpow2.f32 %v3451_v40  ;;  %v3717_v18 = vpack.c.bf16 %v7070_v29, %v10021_v53  ;;  %v3455_v23 = vmul.f32 1.442695, %v3227_v42  ;;  %v3457_v5 = vmul.f32 1.442695, %v3228_v13  ;;  %v11508_v40 = vld [vmem:[#allocation82_spill] sm:$0xff] }
 0x73d   : > { %v10041_v7 = vpop.eup %7073  ;;  %7093 = vpow2.f32 %v3453_v57  ;;  %v3718_v60 = vpack.c.bf16 %v7072_v11, %v7064_v14  ;;  %v3395_v19 = vmul.f32 1.442695, %v3197_v28  ;;  %v3397_v43 = vmul.f32 1.442695, %v3198_v25  ;;  %v3045_v2 = vpop.xlane.xlu1 %3044  ;;  %v11509_v14 = vld [vmem:[#allocation98_spill] sm:$0xff] }
 0x73e   : > { %v7076_v30 = vpop.eup %7075  ;;  %7095 = vpow2.f32 %v3393_v37  ;;  %v3556_v9 = vadd.f32 %v7072_v11, %v7070_v29  ;;  %v3090_v20 = vpop.xlane.xlu0 %3089  ;;  %v3199_v53 = vsub.f32 %v11507_v1, %v3045_v2  ;;  %v3200_v24 = vsub.f32 %v11508_v40, %v3045_v2 }
 0x73f   : > { %v7078_v38 = vpop.eup %7077  ;;  %7097 = vpow2.f32 %v3455_v23  ;;  %3855 = vmatprep.mubr.bf16.mxu1 %v3718_v60  ;;  %3563 = vadd.xlane.f32.xlu0 %v9908_v8  ;;  %v3733_v57 = vpack.c.bf16 %v7076_v30, %v10028_v46  ;;  %v3229_v37 = vsub.f32 %v11509_v14, %v3090_v20  ;;  %v3230_v29 = vsub.f32 %v11510_v56, %v3090_v20 }
 0x740   : > { %v7080_v42 = vpop.eup %7079  ;;  %7099 = vpow2.f32 %v3457_v5  ;;  %3557 = vadd.xlane.f32.xlu1 %v3556_v9  ;;  %v3734_v13 = vpack.c.bf16 %v7078_v38, %v7068_v49  ;;  %3856 = vmatmul.mubr.bf16.gmra.mrb[92].mxu1 %v3717_v18  ;;  %v3399_v8 = vmul.f32 1.442695, %v3199_v53  ;;  %v3401_v11 = vmul.f32 1.442695, %v3200_v24  ;;  %v11511_v9 = vld [vmem:[#allocation102_spill] sm:$0xff]  ;;  %v11513_v53 = vld [vmem:[#allocation84_spill] sm:$0xff] }
 0x741   : > { %v10049_v17 = vpop.eup %7081  ;;  %7101 = vpow2.f32 %v3395_v19  ;;  %v3607_v28 = vadd.f32 %v7080_v42, %v10041_v7  ;;  %v3459_v25 = vmul.f32 1.442695, %v3229_v37  ;;  %v3461_v46 = vmul.f32 1.442695, %v3230_v29  ;;  %v3093_v23 = vpop.xlane.xlu1 %3092 }
 0x742   : > { %v7084_v54 = vpop.eup %7083  ;;  %7103 = vpow2.f32 %v3397_v43  ;;  %3952 = vmatprep.mubr.bf16.mxu0 %v3734_v13  ;;  %v10052_v5 = vadd.f32 %v7078_v38, %v7076_v30  ;;  %v3231_v49 = vsub.f32 %v9770_v33, %v3093_v23  ;;  %v3232_v19 = vsub.f32 %v11511_v9, %v3093_v23  ;;  %v3048_v18 = vpop.xlane.xlu0 %3047  ;;  %v11512_v43 = vld [vmem:[#allocation83_spill] sm:$0xff] }
 0x743   : > { %v7086_v60 = vpop.eup %7085  ;;  %7105 = vpow2.f32 %v3399_v8  ;;  %3953 = vmatmul.mubr.bf16.gmra.mrb[108].mxu0 %v3733_v57  ;;  %v10057_v2 = vadd.f32 %v7084_v54, %v10049_v17  ;;  %v3201_v1 = vsub.f32 %v11512_v43, %v3048_v18  ;;  %v3202_v30 = vsub.f32 %v11513_v53, %v3048_v18 }
 0x744   : > { %v7088_v20 = vpop.eup %7087  ;;  %7107 = vpow2.f32 %v3459_v25  ;;  %3560 = vadd.xlane.f32.xlu1 %v9902_v61  ;;  %v3735_v38 = vpack.c.bf16 %v7086_v60, %v10041_v7  ;;  %v3463_v33 = vmul.f32 1.442695, %v3231_v49  ;;  %v3465_v24 = vmul.f32 1.442695, %v3232_v19  ;;  %v11515_v49 = vld [vmem:[#allocation104_spill] sm:$0xff] }
 0x745   : > { %v10063_v40 = vpop.eup %7089  ;;  %7109 = vpow2.f32 %v3461_v46  ;;  %v3736_v57 = vpack.c.bf16 %v7088_v20, %v7080_v42  ;;  %v3403_v37 = vmul.f32 1.442695, %v3201_v1  ;;  %v3405_v56 = vmul.f32 1.442695, %v3202_v30  ;;  %v3051_v13 = vpop.xlane.xlu1 %3050  ;;  %v11514_v42 = vld [vmem:[#allocation103_spill] sm:$0xff] }
 0x746   : > { %v7092_v14 = vpop.eup %7091  ;;  %7111 = vpow2.f32 %v3401_v11  ;;  %v3610_v29 = vadd.f32 %v7088_v20, %v7086_v60  ;;  %v3096_v61 = vpop.xlane.xlu0 %3095  ;;  %v3203_v25 = vsub.f32 %v9657_v34, %v3051_v13  ;;  %v3204_v7 = vsub.f32 %v9666_v55, %v3051_v13 }
 0x747   : > { %v7094_v8 = vpop.eup %7093  ;;  %7113 = vpow2.f32 %v3463_v33  ;;  %3993 = vmatprep.mubr.bf16.mxu1 %v3736_v57  ;;  %v3751_v23 = vpack.c.bf16 %v7092_v14, %v10049_v17  ;;  %v3233_v11 = vsub.f32 %v11514_v42, %v3096_v61  ;;  %v3234_v9 = vsub.f32 %v11515_v49, %v3096_v61  ;;  %v11517_v33 = vld [vmem:[#allocation110_spill] sm:$0xff] }
 0x748   : > { %v7096_v46 = vpop.eup %7095  ;;  %7115 = vpow2.f32 %v3465_v24  ;;  %3608 = vadd.xlane.f32.xlu1 %v3607_v28  ;;  %3611 = vadd.xlane.f32.xlu0 %v3610_v29  ;;  %v3752_v60 = vpack.c.bf16 %v7094_v8, %v7084_v54  ;;  %v3407_v18 = vmul.f32 1.442695, %v3203_v25  ;;  %v3409_v20 = vmul.f32 1.442695, %v3204_v7  ;;  %v11516_v54 = vld [vmem:[#allocation109_spill] sm:$0xff] }
 0x749   : > { %v10070_v19 = vpop.eup %7097  ;;  %7117 = vpow2.f32 %v3403_v37  ;;  %3994 = vmatmul.mubr.bf16.vlgmr.msra.gmra.mrb[96].mxu1 %v3735_v38  ;;  %v3613_v34 = vadd.f32 %v7096_v46, %v10063_v40  ;;  %v3467_v17 = vmul.f32 1.442695, %v3233_v11  ;;  %v3469_v43 = vmul.f32 1.442695, %v3234_v9  ;;  %v3099_v28 = vpop.xlane.xlu1 %3098 }
 0x74a   : > { %v7100_v55 = vpop.eup %7099  ;;  %7119 = vpow2.f32 %v3405_v56  ;;  %4090 = vmatprep.mubr.bf16.mxu0 %v3752_v60  ;;  %v10073_v1 = vadd.f32 %v7094_v8, %v7092_v14  ;;  %v3235_v30 = vsub.f32 %v11516_v54, %v3099_v28  ;;  %v3236_v24 = vsub.f32 %v11517_v33, %v3099_v28  ;;  %v3054_v38 = vpop.xlane.xlu0 %3053 }
 0x74b   : > { %v7102_v53 = vpop.eup %7101  ;;  %7121 = vpow2.f32 %v3407_v18  ;;  %4091 = vmatmul.mubr.bf16.vlgmr.msra.gmra.mrb[112].mxu0 %v3751_v23  ;;  %v10078_v57 = vadd.f32 %v7100_v55, %v10070_v19  ;;  %v3205_v14 = vsub.f32 %v9670_v31, %v3054_v38  ;;  %v3206_v56 = vsub.f32 %v9674_v41, %v3054_v38  ;;  %v11519_v18 = vld [vmem:[#allocation112_spill] sm:$0xff] }
 0x74c   : > { %v7104_v37 = vpop.eup %7103  ;;  %7123 = vpow2.f32 %v3467_v17  ;;  %3566 = vadd.xlane.f32.xlu1 %v9918_v15  ;;  %3569 = vadd.xlane.f32.xlu0 %v9931_v21  ;;  %v3737_v29 = vpack.c.bf16 %v7102_v53, %v10063_v40  ;;  %v3471_v8 = vmul.f32 1.442695, %v3235_v30  ;;  %v3473_v61 = vmul.f32 1.442695, %v3236_v24  ;;  %v11520_v24 = vld [vmem:[#allocation113_spill] sm:$0xff] }
 0x74d   : > { %v10085_v13 = vpop.eup %7105  ;;  %7125 = vpow2.f32 %v3469_v43  ;;  %v3738_v25 = vpack.c.bf16 %v7104_v37, %v7096_v46  ;;  %v3411_v23 = vmul.f32 1.442695, %v3205_v14  ;;  %v3413_v42 = vmul.f32 1.442695, %v3206_v56  ;;  %v3057_v15 = vpop.xlane.xlu1 %3056  ;;  %v11518_v46 = vld [vmem:[#allocation111_spill] sm:$0xff] }
 0x74e   : > { %v7108_v7 = vpop.eup %7107  ;;  %7127 = vpow2.f32 %v3409_v20  ;;  %v3616_v11 = vadd.f32 %v7104_v37, %v7102_v53  ;;  %v3102_v31 = vpop.xlane.xlu0 %3101  ;;  %v3207_v41 = vsub.f32 %v9695_v50, %v3057_v15  ;;  %v3208_v21 = vsub.f32 %v9702_v35, %v3057_v15 }
 0x74f   : > { %v7110_v49 = vpop.eup %7109  ;;  %7129 = vpow2.f32 %v3471_v8  ;;  %4001 = vmatprep.mubr.bf16.mxu1 %v3738_v25  ;;  %v3753_v40 = vpack.c.bf16 %v7108_v7, %v10070_v19  ;;  %v3237_v60 = vsub.f32 %v11518_v46, %v3102_v31  ;;  %v3238_v20 = vsub.f32 %v11519_v18, %v3102_v31 }
 0x750   : > { %v7112_v9 = vpop.eup %7111  ;;  %7131 = vpow2.f32 %v3473_v61  ;;  %3614 = vadd.xlane.f32.xlu1 %v3613_v34  ;;  %3617 = vadd.xlane.f32.xlu0 %v3616_v11  ;;  %v3754_v17 = vpack.c.bf16 %v7110_v49, %v7100_v55  ;;  %v3415_v28 = vmul.f32 1.442695, %v3207_v41  ;;  %v3417_v53 = vmul.f32 1.442695, %v3208_v21  ;;  %v11521_v21 = vld [vmem:[#allocation114_spill] sm:$0xff] }
 0x751   : > { %v10092_v43 = vpop.eup %7113  ;;  %7133 = vpow2.f32 %v3411_v23  ;;  %4002 = vmatmul.mubr.bf16.gmra.mrb[100].mxu1 %v3737_v29  ;;  %v3619_v50 = vadd.f32 %v7112_v9, %v10085_v13  ;;  %v3475_v19 = vmul.f32 1.442695, %v3237_v60  ;;  %v3477_v54 = vmul.f32 1.442695, %v3238_v20  ;;  %v3105_v34 = vpop.xlane.xlu1 %3104 }
 0x752   : > { %v7116_v35 = vpop.eup %7115  ;;  %7135 = vpow2.f32 %v3413_v42  ;;  %4098 = vmatprep.mubr.bf16.mxu0 %v3754_v17  ;;  %v10095_v30 = vadd.f32 %v7110_v49, %v7108_v7  ;;  %v3239_v55 = vsub.f32 %v9820_v51, %v3105_v34  ;;  %v3240_v38 = vsub.f32 %v11520_v24, %v3105_v34  ;;  %v3060_v37 = vpop.xlane.xlu0 %3059  ;;  %v11524_v34 = vld [vmem:[#allocation117_spill] sm:$0xff] }
 0x753   : > { %v7118_v33 = vpop.eup %7117  ;;  %7137 = vpow2.f32 %v3415_v28  ;;  %4099 = vmatmul.mubr.bf16.gmra.mrb[116].mxu0 %v3753_v40  ;;  %v10100_v14 = vadd.f32 %v7116_v35, %v10092_v43  ;;  %v3209_v29 = vsub.f32 %v9704_v22, %v3060_v37  ;;  %v3210_v8 = vsub.f32 %v9708_v47, %v3060_v37 }
 0x754   : > { %v7120_v56 = vpop.eup %7119  ;;  %7139 = vpow2.f32 %v3475_v19  ;;  %3572 = vadd.xlane.f32.xlu1 %v9939_v45  ;;  %3575 = vadd.xlane.f32.xlu0 %v9951_v16  ;;  %v3739_v61 = vpack.c.bf16 %v7118_v33, %v10085_v13  ;;  %v3479_v51 = vmul.f32 1.442695, %v3239_v55  ;;  %v3481_v7 = vmul.f32 1.442695, %v3240_v38 }
 0x755   : > { %v10107_v25 = vpop.eup %7121  ;;  %7141 = vpow2.f32 %v3477_v54  ;;  %v3740_v23 = vpack.c.bf16 %v7120_v56, %v7112_v9  ;;  %v3419_v11 = vmul.f32 1.442695, %v3209_v29  ;;  %v3421_v15 = vmul.f32 1.442695, %v3210_v8  ;;  %v3063_v45 = vpop.xlane.xlu1 %3062  ;;  %v11522_v9 = vld [vmem:[#allocation115_spill] sm:$0xff] }
 0x756   : > { %v7124_v42 = vpop.eup %7123  ;;  %7143 = vpow2.f32 %v3417_v53  ;;  %v3622_v49 = vadd.f32 %v7120_v56, %v7118_v33  ;;  %v3108_v22 = vpop.xlane.xlu0 %3107  ;;  %v3211_v47 = vsub.f32 %v9725_v63, %v3063_v45  ;;  %v3212_v16 = vsub.f32 %v9732_v36, %v3063_v45  ;;  %v11526_v45 = vld [vmem:[#allocation101_spill] sm:$0xff] }
 0x757   : > { %v7126_v31 = vpop.eup %7125  ;;  %7145 = vpow2.f32 %v3479_v51  ;;  %4009 = vmatprep.mubr.bf16.mxu1 %v3740_v23  ;;  %v3755_v13 = vpack.c.bf16 %v7124_v42, %v10092_v43  ;;  %v3241_v40 = vsub.f32 %v11521_v21, %v3108_v22  ;;  %v3242_v46 = vsub.f32 %v11522_v9, %v3108_v22 }
 0x758   : > { %v7128_v41 = vpop.eup %7127  ;;  %7147 = vpow2.f32 %v3481_v7  ;;  %3620 = vadd.xlane.f32.xlu1 %v3619_v50  ;;  %3623 = vadd.xlane.f32.xlu0 %v3622_v49  ;;  %v3756_v60 = vpack.c.bf16 %v7126_v31, %v7116_v35  ;;  %v3423_v20 = vmul.f32 1.442695, %v3211_v47  ;;  %v3425_v17 = vmul.f32 1.442695, %v3212_v16  ;;  %v11523_v35 = vld [vmem:[#allocation116_spill] sm:$0xff]  ;;  %v11527_v16 = vld [vmem:[#allocation118_spill] sm:$0xff] }
 0x759   : > { %v10114_v18 = vpop.eup %7129  ;;  %7149 = vpow2.f32 %v3419_v11  ;;  %4010 = vmatmul.mubr.bf16.gmra.mrb[104].mxu1 %v3739_v61  ;;  %v3625_v63 = vadd.f32 %v7128_v41, %v10107_v25  ;;  %v3483_v43 = vmul.f32 1.442695, %v3241_v40  ;;  %v3485_v28 = vmul.f32 1.442695, %v3242_v46  ;;  %v3111_v53 = vpop.xlane.xlu1 %3110 }
 0x75a   : > { %v7132_v36 = vpop.eup %7131  ;;  %7151 = vpow2.f32 %v3421_v15  ;;  %4106 = vmatprep.mubr.bf16.mxu0 %v3756_v60  ;;  %v10117_v50 = vadd.f32 %v7126_v31, %v7124_v42  ;;  %v3243_v54 = vsub.f32 %v11523_v35, %v3111_v53  ;;  %v3244_v33 = vsub.f32 %v11524_v34, %v3111_v53  ;;  %v3066_v55 = vpop.xlane.xlu0 %3065 }
 0x75b   : > { %v7134_v19 = vpop.eup %7133  ;;  %7153 = vpow2.f32 %v3423_v20  ;;  %4107 = vmatmul.mubr.bf16.gmra.mrb[120].mxu0 %v3755_v13  ;;  %v10122_v24 = vadd.f32 %v7132_v36, %v10114_v18  ;;  %v3213_v37 = vsub.f32 %v9734_v58, %v3066_v55  ;;  %v3214_v56 = vsub.f32 %v9738_v3, %v3066_v55 }
 0x75c   : > { %v7136_v38 = vpop.eup %7135  ;;  %7155 = vpow2.f32 %v3483_v43  ;;  %3578 = vadd.xlane.f32.xlu1 %v9959_v6  ;;  %3581 = vadd.xlane.f32.xlu0 %v9971_v62  ;;  %v3741_v29 = vpack.c.bf16 %v7134_v19, %v10107_v25  ;;  %v3487_v61 = vmul.f32 1.442695, %v3243_v54  ;;  %v3489_v51 = vmul.f32 1.442695, %v3244_v33  ;;  %v11525_v62 = vld [vmem:[#allocation100_spill] sm:$0xff] }
 0x75d   : > { %v10129_v8 = vpop.eup %7137  ;;  %7157 = vpow2.f32 %v3485_v28  ;;  %v3742_v7 = vpack.c.bf16 %v7136_v38, %v7128_v41  ;;  %v3427_v42 = vmul.f32 1.442695, %v3213_v37  ;;  %v3429_v11 = vmul.f32 1.442695, %v3214_v56  ;;  %v3069_v6 = vpop.xlane.xlu1 %3068  ;;  %v11529_v28 = vld [vmem:[#allocation120_spill] sm:$0xff] }
 0x75e   : > { %v7140_v23 = vpop.eup %7139  ;;  %7159 = vpow2.f32 %v3425_v17  ;;  %v3628_v15 = vadd.f32 %v7136_v38, %v7134_v19  ;;  %v3114_v58 = vpop.xlane.xlu0 %3113  ;;  %v3215_v3 = vsub.f32 %v11525_v62, %v3069_v6  ;;  %v3216_v25 = vsub.f32 %v11526_v45, %v3069_v6 }
 0x75f   : > { %v7142_v49 = vpop.eup %7141  ;;  %7161 = vpow2.f32 %v3487_v61  ;;  %4017 = vmatprep.mubr.bf16.mxu1 %v3742_v7  ;;  %v3757_v31 = vpack.c.bf16 %v7140_v23, %v10114_v18  ;;  %v3245_v47 = vsub.f32 %v9845_v12, %v3114_v58  ;;  %v3246_v13 = vsub.f32 %v11527_v16, %v3114_v58  ;;  %v11532_v58 = vld [vmem:[#allocation121_spill] sm:$0xff] }
 0x760   : > { %v7144_v22 = vpop.eup %7143  ;;  %7163 = vpow2.f32 %v3489_v51  ;;  %3626 = vadd.xlane.f32.xlu1 %v3625_v63  ;;  %3629 = vadd.xlane.f32.xlu0 %v3628_v15  ;;  %v3758_v41 = vpack.c.bf16 %v7142_v49, %v7132_v36  ;;  %v3431_v40 = vmul.f32 1.442695, %v3215_v3  ;;  %v3433_v9 = vmul.f32 1.442695, %v3216_v25  ;;  %v11528_v36 = vld [vmem:[#allocation119_spill] sm:$0xff] }
 0x761   : > { %v10136_v21 = vpop.eup %7145  ;;  %7165 = vpow2.f32 %v3427_v42  ;;  %4018 = vmatmul.mubr.bf16.gmra.mrb[108].mxu1 %v3741_v29  ;;  %v3631_v46 = vadd.f32 %v7144_v22, %v10129_v8  ;;  %v3491_v18 = vmul.f32 1.442695, %v3245_v47  ;;  %v3493_v20 = vmul.f32 1.442695, %v3246_v13  ;;  %v3117_v17 = vpop.xlane.xlu1 %3116 }
 0x762   : > { %v7148_v60 = vpop.eup %7147  ;;  %7167 = vpow2.f32 %v3429_v11  ;;  %4114 = vmatprep.mubr.bf16.mxu0 %v3758_v41  ;;  %v10139_v63 = vadd.f32 %v7142_v49, %v7140_v23  ;;  %v3247_v43 = vsub.f32 %v11528_v36, %v3117_v17  ;;  %v3248_v53 = vsub.f32 %v11529_v28, %v3117_v17  ;;  %v3072_v19 = vpop.xlane.xlu0 %3071  ;;  %v11531_v11 = vld [vmem:[#allocation106_spill] sm:$0xff] }
 0x763   : > { %v7150_v12 = vpop.eup %7149  ;;  %7169 = vpow2.f32 %v3431_v40  ;;  %4115 = vmatmul.mubr.bf16.gmra.mrb[124].mxu0 %v3757_v31  ;;  %v10144_v35 = vadd.f32 %v7148_v60, %v10136_v21  ;;  %v3217_v34 = vsub.f32 %v9764_v59, %v3072_v19  ;;  %v3218_v33 = vsub.f32 %v9768_v48, %v3072_v19  ;;  %v11535_v19 = vld [vmem:[#allocation107_spill] sm:$0xff] }
 0x764   : > { %v7152_v54 = vpop.eup %7151  ;;  %7171 = vpow2.f32 %v3491_v18  ;;  %3584 = vadd.xlane.f32.xlu1 %v9976_v44  ;;  %3587 = vadd.xlane.f32.xlu0 %v9991_v4  ;;  %v3743_v55 = vpack.c.bf16 %v7150_v12, %v10129_v8  ;;  %v3495_v37 = vmul.f32 1.442695, %v3247_v43  ;;  %v3497_v56 = vmul.f32 1.442695, %v3248_v53  ;;  %v11530_v4 = vld [vmem:[#allocation105_spill] sm:$0xff] }
 0x765   : > { %v10151_v38 = vpop.eup %7153  ;;  %7173 = vpow2.f32 %v3493_v20  ;;  %v3744_v29 = vpack.c.bf16 %v7152_v54, %v7144_v22  ;;  %v3435_v51 = vmul.f32 1.442695, %v3217_v34  ;;  %v3437_v7 = vmul.f32 1.442695, %v3218_v33  ;;  %v3075_v44 = vpop.xlane.xlu1 %3074  ;;  %v11534_v20 = vld [vmem:[#allocation123_spill] sm:$0xff]  ;;  %v11536_v34 = vld [vmem:[#allocation108_spill] sm:$0xff] }
 0x766   : > { %v7156_v61 = vpop.eup %7155  ;;  %7175 = vpow2.f32 %v3433_v9  ;;  %v3634_v23 = vadd.f32 %v7152_v54, %v7150_v12  ;;  %v3120_v59 = vpop.xlane.xlu0 %3119  ;;  %v3219_v48 = vsub.f32 %v11530_v4, %v3075_v44  ;;  %v3220_v8 = vsub.f32 %v11531_v11, %v3075_v44 }
 0x767   : > { %v7158_v42 = vpop.eup %7157  ;;  %7177 = vpow2.f32 %v3495_v37  ;;  %4025 = vmatprep.mubr.bf16.mxu1 %v3744_v29  ;;  %v3759_v15 = vpack.c.bf16 %v7156_v61, %v10136_v21  ;;  %v3249_v49 = vsub.f32 %v9860_v26, %v3120_v59  ;;  %v3250_v62 = vsub.f32 %v11532_v58, %v3120_v59  ;;  %v6149_v3 = vpop.f32.mrb[64].mxu1 }
 0x768   : > { %v7160_v6 = vpop.eup %7159  ;;  %7179 = vpow2.f32 %v3497_v56  ;;  %3632 = vadd.xlane.f32.xlu1 %v3631_v46  ;;  %3635 = vadd.xlane.f32.xlu0 %v3634_v23  ;;  %v3760_v45 = vpack.c.bf16 %v7158_v42, %v7148_v60  ;;  %v3439_v31 = vmul.f32 1.442695, %v3219_v48  ;;  %v3441_v22 = vmul.f32 1.442695, %v3220_v8  ;;  %v6150_v47 = vpop.f32.mrb[65].mxu1  ;;  %v11533_v60 = vld [vmem:[#allocation122_spill] sm:$0xff] }
 0x769   : > { %v10158_v25 = vpop.eup %7161  ;;  %7181 = vpow2.f32 %v3435_v51  ;;  %4026 = vmatmul.mubr.bf16.gmra.mrb[112].mxu1 %v3743_v55  ;;  %v3637_v16 = vadd.f32 %v7160_v6, %v10151_v38  ;;  %v3499_v41 = vmul.f32 1.442695, %v3249_v49  ;;  %v3501_v21 = vmul.f32 1.442695, %v3250_v62  ;;  %v6152_v26 = vpop.f32.mrb[66].mxu1  ;;  %v11537_v8 = vld [vmem:[#allocation124_spill] sm:$0xff] }
 0x76a   : > { %v7164_v13 = vpop.eup %7163  ;;  %7183 = vpow2.f32 %v3437_v7  ;;  %4122 = vmatprep.mubr.bf16.mxu0 %v3760_v45  ;;  %v10161_v40 = vadd.f32 %v6150_v47, %v6149_v3  ;;  %v3123_v9 = vpop.xlane.xlu1 %3122  ;;  %v10165_v43 = vadd.f32 %v7158_v42, %v7156_v61 }
 0x76b   : > { %v7166_v46 = vpop.eup %7165  ;;  %7185 = vpow2.f32 %v3439_v31  ;;  %4123 = vmatmul.mubr.bf16.gmra.mrb[128].mxu0 %v3759_v15  ;;  %v3251_v18 = vsub.f32 %v11533_v60, %v3123_v9  ;;  %v3252_v17 = vsub.f32 %v11534_v20, %v3123_v9  ;;  %v6153_v12 = vpop.f32.mrb[67].mxu1  ;;  %v10176_v59 = vadd.f32 %v7164_v13, %v10158_v25 }
 0x76c   : > { %v3078_v36 = vpop.xlane.xlu0 %3077  ;;  %v7168_v28 = vpop.eup %7167  ;;  %7187 = vpow2.f32 %v3499_v41  ;;  %3590 = vadd.xlane.f32.xlu1 %v9996_v0  ;;  %3593 = vadd.xlane.f32.xlu0 %v10011_v27  ;;  %v10169_v53 = vadd.f32 %v6153_v12, %v6152_v26  ;;  %v3745_v0 = vpack.c.bf16 %v7166_v46, %v10151_v38 }
 0x76d   : > { %v3221_v54 = vsub.f32 %v11535_v19, %v3078_v36  ;;  %v3222_v33 = vsub.f32 %v11536_v34, %v3078_v36  ;;  %v7170_v55 = vpop.eup %7169  ;;  %7189 = vpow2.f32 %v3501_v21  ;;  %v3503_v37 = vmul.f32 1.442695, %v3251_v18 }
 0x76e   : > { %v3505_v56 = vmul.f32 1.442695, %v3252_v17  ;;  %v3746_v29 = vpack.c.bf16 %v7168_v28, %v7160_v6  ;;  %v7172_v51 = vpop.eup %7171  ;;  %7191 = vpow2.f32 %v3441_v22  ;;  %v3640_v23 = vadd.f32 %v7168_v28, %v7166_v46  ;;  %v3513_v48 = vpop.xlane.xlu1 %3512 }
 0x76f   : > { %v3443_v61 = vmul.f32 1.442695, %v3221_v54  ;;  %v3445_v7 = vmul.f32 1.442695, %v3222_v33  ;;  %v7174_v44 = vpop.eup %7173  ;;  %7193 = vpow2.f32 %v3503_v37  ;;  %v3761_v42 = vpack.c.bf16 %v7172_v51, %v10158_v25 }
 0x770   : > { %4033 = vmatprep.mubr.bf16.mxu1 %v3746_v29  ;;  %v3126_v27 = vpop.xlane.xlu0 %3125  ;;  %v7176_v4 = vpop.eup %7175  ;;  %7195 = vpow2.f32 %v3505_v56  ;;  %3638 = vadd.xlane.f32.xlu1 %v3637_v16  ;;  %v3762_v6 = vpack.c.bf16 %v7174_v44, %v7164_v13  ;;  %v10180_v58 = vadd.f32 %v7174_v44, %v7172_v51 }
 0x771   : > { %3641 = vadd.xlane.f32.xlu0 %v3640_v23  ;;  %v3253_v11 = vsub.f32 %v9875_v52, %v3126_v27  ;;  %v3254_v15 = vsub.f32 %v11537_v8, %v3126_v27  ;;  %v7178_v49 = vpop.eup %7177  ;;  %7197 = vpow2.f32 %v3443_v61  ;;  %4034 = vmatmul.mubr.bf16.gmra.mrb[116].mxu1 %v3745_v0  ;;  %v3643_v38 = vadd.f32 %v7176_v4, %v7170_v55 }
 0x772   : > { %v7180_v62 = vpop.eup %7179  ;;  %7199 = vpow2.f32 %v3445_v7  ;;  %4130 = vmatprep.mubr.bf16.mxu0 %v3762_v6 }
 0x773   : > { %v3507_v3 = vmul.f32 1.442695, %v3253_v11  ;;  %v3509_v45 = vmul.f32 1.442695, %v3254_v15  ;;  %v7182_v25 = vpop.eup %7181  ;;  %7201 = vrcp.f32 %v3513_v48  ;;  %4131 = vmatmul.mubr.bf16.gmra.mrb[132].mxu0 %v3761_v42  ;;  %v10182_v31 = vadd.f32 %v7180_v62, %v7178_v49 }
 0x774   : > { %v7184_v52 = vpop.eup %7183  ;;  %3596 = vadd.xlane.f32.xlu1 %v10016_v32  ;;  %v3516_v22 = vpop.xlane.xlu0 %3515  ;;  %v3747_v47 = vpack.c.bf16 %v7182_v25, %v7170_v55 }
 0x775   : > { %7203 = vpow2.f32 %v3507_v3  ;;  %3599 = vadd.xlane.f32.xlu0 %v10031_v10  ;;  %v7186_v16 = vpop.eup %7185  ;;  %v3748_v13 = vpack.c.bf16 %v7184_v52, %v7176_v4  ;;  %v3646_v41 = vadd.f32 %v7184_v52, %v7182_v25 }
 0x776   : > { %7205 = vpow2.f32 %v3509_v45  ;;  %v7188_v21 = vpop.eup %7187 }
 0x777   : > { %v7190_v26 = vpop.eup %7189  ;;  %7207 = vrcp.f32 %v3516_v22  ;;  %4041 = vmatprep.mubr.bf16.mxu1 %v3748_v13  ;;  %v3763_v9 = vpack.c.bf16 %v7188_v21, %v7178_v49 }
 0x778   : > { %v7192_v46 = vpop.eup %7191  ;;  %3644 = vadd.xlane.f32.xlu1 %v3643_v38  ;;  %v3764_v60 = vpack.c.bf16 %v7190_v26, %v7180_v62  ;;  %v3694_v18 = vadd.f32 %v7190_v26, %v7188_v21 }
 0x779   : > { %3647 = vadd.xlane.f32.xlu0 %v3646_v41  ;;  %v7194_v20 = vpop.eup %7193  ;;  %4042 = vmatmul.mubr.bf16.gmra.mrb[120].mxu1 %v3747_v47  ;;  %v3649_v32 = vadd.f32 %v7192_v46, %v7186_v16 }
 0x77a   : > { %v7196_v10 = vpop.eup %7195  ;;  %4138 = vmatprep.mubr.bf16.mxu0 %v3764_v60 }
 0x77b   : > { %v7198_v17 = vpop.eup %7197  ;;  %4139 = vmatmul.mubr.bf16.gmra.mrb[136].mxu0 %v3763_v9  ;;  %v3697_v12 = vadd.f32 %v7196_v10, %v7194_v20 }
 0x77c   : > { %v7200_v36 = vpop.eup %7199  ;;  %3602 = vadd.xlane.f32.xlu1 %v10036_v39  ;;  %v3749_v28 = vpack.c.bf16 %v7198_v17, %v7186_v16 }
 0x77d   : > { %3605 = vadd.xlane.f32.xlu0 %v10052_v5  ;;  %v7202_v19 = vpop.eup %7201  ;;  %v3750_v54 = vpack.c.bf16 %v7200_v36, %v7192_v46  ;;  %v3652_v34 = vadd.f32 %v7200_v36, %v7198_v17 }
 0x77e   : > { %v4219_v55 = vmul.f32 %v7202_v19, %v10161_v40 }
 0x77f   : > { %v7204_v33 = vpop.eup %7203  ;;  %4049 = vmatprep.mubr.bf16.mxu1 %v3750_v54 }
 0x780   : > { %v7206_v37 = vpop.eup %7205  ;;  %v3765_v56 = vpack.c.bf16 %v7204_v33, %v7194_v20  ;;  %3650 = vadd.xlane.f32.xlu1 %v3649_v32  ;;  %4283 = vst.msk [vmem:[#allocation5] sm:$0xff] %vm1919_vm1, %v4219_v55 }
 0x781   : > { %3653 = vadd.xlane.f32.xlu0 %v3652_v34  ;;  %v3766_v29 = vpack.c.bf16 %v7206_v37, %v7196_v10  ;;  %v3700_v51 = vadd.f32 %v7206_v37, %v7204_v33  ;;  %v7208_v61 = vpop.eup %7207  ;;  %4050 = vmatmul.mubr.bf16.gmra.mrb[124].mxu1 %v3749_v28 }
 0x782   : > { %v4220_v39 = vmul.f32 %v7208_v61, %v10169_v53 }
 0x783   : > { %4146 = vmatprep.mubr.bf16.mxu0 %v3766_v29 }
 0x784   : > { %4147 = vmatmul.mubr.bf16.gmra.mrb[140].mxu0 %v3765_v56  ;;  %3656 = vadd.xlane.f32.xlu1 %v10057_v2  ;;  %4284 = vst.msk [vmem:[#allocation5 + $0x8] sm:$0xff] %vm1919_vm1, %v4220_v39  ;;  %v3519_v2 = vpop.xlane.xlu1 %3518 }
 0x785   : > { %3659 = vadd.xlane.f32.xlu0 %v10073_v1 }
 0x788   : > { %3662 = vadd.xlane.f32.xlu1 %v10078_v57 }
 0x789   : > { %3665 = vadd.xlane.f32.xlu0 %v10095_v30 }
 0x78c   : > { %3668 = vadd.xlane.f32.xlu1 %v10100_v14 }
 0x78d   : > { %3671 = vadd.xlane.f32.xlu0 %v10117_v50 }
 0x790   : > { %3674 = vadd.xlane.f32.xlu1 %v10122_v24 }
 0x791   : > { %3677 = vadd.xlane.f32.xlu0 %v10139_v63 }
 0x794   : > { %3680 = vadd.xlane.f32.xlu1 %v10144_v35 }
 0x795   : > { %3683 = vadd.xlane.f32.xlu0 %v10165_v43 }
 0x798   : > { %3686 = vadd.xlane.f32.xlu1 %v10176_v59 }
 0x799   : > { %3689 = vadd.xlane.f32.xlu0 %v10180_v58 }
 0x79c   : > { %3692 = vadd.xlane.f32.xlu1 %v10182_v31  ;;  %v3522_v5 = vpop.xlane.xlu0 %3521 }
 0x79d   : > { %3695 = vadd.xlane.f32.xlu0 %v3694_v18 }
 0x79f   : > { %v3525_v57 = vpop.xlane.xlu1 %3524 }
 0x7a0   : > { %3698 = vadd.xlane.f32.xlu1 %v3697_v12 }
 0x7a1   : > { %3701 = vadd.xlane.f32.xlu0 %v3700_v51 }
 0x7a4   : > { %v3528_v1 = vpop.xlane.xlu0 %3527 }
 0x7a8   : > { %v3531_v14 = vpop.xlane.xlu1 %3530 }
 0x7ad   : > { %v10205_v30 = vpop.xlane.xlu0 %3533 }
 0x7b1   : > { %v10207_v50 = vpop.xlane.xlu0 %3536 }
 0x7b5   : > { %v10209_v24 = vpop.xlane.xlu1 %3539 }
 0x7b8   : > { %v10211_v63 = vpop.xlane.xlu0 %3542 }
 0x7bd   : > { %v10213_v35 = vpop.xlane.xlu1 %3545 }
 0x7c0   : > { %v10215_v40 = vpop.xlane.xlu0 %3548 }
 0x7c5   : > { %v10217_v43 = vpop.xlane.xlu1 %3551 }
 0x7c8   : > { %v10219_v53 = vpop.xlane.xlu0 %3554 }
 0x7cc   : > { %v3564_v23 = vpop.xlane.xlu0 %3563 }
 0x7cd   : > { %v10221_v7 = vpop.xlane.xlu1 %3557 }
 0x7d1   : > { %v3561_v44 = vpop.xlane.xlu1 %3560 }
 0x7d2   : > { %7209 = vrcp.f32 %v3561_v44 }
 0x7d3   : > { %7211 = vrcp.f32 %v3564_v23 }
 0x7d4   : > { %7213 = vrcp.f32 %v3519_v2 }
 0x7d5   : > { %v10223_v0 = vpop.xlane.xlu1 %3608  ;;  %v10225_v27 = vpop.xlane.xlu0 %3611  ;;  %7215 = vrcp.f32 %v3522_v5 }
 0x7d9   : > { %v3567_v42 = vpop.xlane.xlu1 %3566  ;;  %v10227_v59 = vpop.xlane.xlu0 %3569 }
 0x7da   : > { %7217 = vrcp.f32 %v3567_v42 }
 0x7db   : > { %7219 = vrcp.f32 %v3525_v57 }
 0x7dc   : > { %v6213_v11 = vpop.f32.mrb[80].mxu0  ;;  %v7210_v49 = vpop.eup %7209  ;;  %7221 = vrcp.f32 %v3528_v1 }
 0x7dd   : > { %v10229_v4 = vpop.xlane.xlu1 %3614  ;;  %v10231_v48 = vpop.xlane.xlu0 %3617  ;;  %7223 = vrcp.f32 %v3531_v14 }
 0x7de   : > { %v6214_v8 = vpop.f32.mrb[81].mxu0  ;;  %v7212_v25 = vpop.eup %7211  ;;  %7225 = vrcp.f32 %v10205_v30 }
 0x7df   : > { %v6215_v15 = vadd.f32 %v6214_v8, %v6213_v11  ;;  %v6216_v6 = vpop.f32.mrb[82].mxu0  ;;  %v7214_v21 = vpop.eup %7213  ;;  %7227 = vrcp.f32 %v10207_v50 }
 0x7e0   : > { %v6217_v3 = vpop.f32.mrb[83].mxu0  ;;  %v7216_v20 = vpop.eup %7215  ;;  %7229 = vrcp.f32 %v10209_v24 }
 0x7e1   : > { %v10233_v38 = vpop.xlane.xlu1 %3572  ;;  %v10235_v58 = vpop.xlane.xlu0 %3575  ;;  %v4235_v62 = vmul.f32 %v7210_v49, %v6215_v15  ;;  %v6218_v45 = vadd.f32 %v6217_v3, %v6216_v6  ;;  %7231 = vrcp.f32 %v10211_v63 }
 0x7e2   : > { %v6155_v31 = vpop.f32.mrb[68].mxu1  ;;  %7233 = vrcp.f32 %v10213_v35 }
 0x7e3   : > { %4315 = vrot.lane.b32.xlu1 %v4235_v62, %s8010_s3  ;;  %v4236_v52 = vmul.f32 %v7212_v25, %v6218_v45  ;;  %v6156_v47 = vpop.f32.mrb[69].mxu1  ;;  %7235 = vrcp.f32 %v10215_v40 }
 0x7e4   : > { %v6157_v16 = vadd.f32 %v6156_v47, %v6155_v31  ;;  %v6158_v41 = vpop.f32.mrb[70].mxu1  ;;  %v6219_v9 = vpop.f32.mrb[84].mxu0  ;;  %7237 = vrcp.f32 %v10217_v43 }
 0x7e5   : > { %v10238_v22 = vpop.xlane.xlu1 %3620  ;;  %v10240_v13 = vpop.xlane.xlu0 %3623  ;;  %4317 = vrot.lane.b32.xlu0 %v4236_v52, %s8010_s3  ;;  %7239 = vrcp.f32 %v10219_v53 }
 0x7e6   : > { %v6159_v26 = vpop.f32.mrb[71].mxu1  ;;  %v4221_v46 = vmul.f32 %v7214_v21, %v6157_v16  ;;  %v6220_v18 = vpop.f32.mrb[85].mxu0  ;;  %7241 = vrcp.f32 %v10221_v7 }
 0x7e7   : > { %v6160_v60 = vadd.f32 %v6159_v26, %v6158_v41  ;;  %v6221_v32 = vadd.f32 %v6220_v18, %v6219_v9  ;;  %v6222_v17 = vpop.f32.mrb[86].mxu0  ;;  %v7218_v12 = vpop.eup %7217  ;;  %7243 = vrcp.f32 %v10223_v0 }
 0x7e8   : > { %4285 = vst.msk [vmem:[#allocation5 + $0x10] sm:$0xff] %vm1919_vm1, %v4221_v46  ;;  %v6223_v19 = vpop.f32.mrb[87].mxu0  ;;  %v7220_v61 = vpop.eup %7219  ;;  %7245 = vrcp.f32 %v10225_v27 }
 0x7e9   : > { %v10243_v10 = vpop.xlane.xlu1 %3578  ;;  %v4222_v36 = vmul.f32 %v7216_v20, %v6160_v60  ;;  %v10246_v28 = vpop.xlane.xlu0 %3581  ;;  %v4237_v54 = vmul.f32 %v7218_v12, %v6221_v32  ;;  %v10248_v34 = vadd.f32 %v6223_v19, %v6222_v17  ;;  %7247 = vrcp.f32 %v10227_v59 }
 0x7ea   : > { %v6161_v33 = vpop.f32.mrb[72].mxu1  ;;  %v7222_v23 = vpop.eup %7221  ;;  %7249 = vrcp.f32 %v10229_v4 }
 0x7eb   : > { %4286 = vst.msk [vmem:[#allocation5 + $0x18] sm:$0xff] %vm1919_vm1, %v4222_v36  ;;  %v6162_v37 = vpop.f32.mrb[73].mxu1  ;;  %4319 = vrot.lane.b32.xlu0 %v4237_v54, %s8010_s3  ;;  %v7224_v25 = vpop.eup %7223  ;;  %7251 = vrcp.f32 %v10231_v48 }
 0x7ec   : > { %v6163_v56 = vadd.f32 %v6162_v37, %v6161_v33  ;;  %v6164_v51 = vpop.f32.mrb[74].mxu1  ;;  %v7226_v26 = vpop.eup %7225  ;;  %7253 = vrcp.f32 %v10233_v38 }
 0x7ed   : > { %v10251_v55 = vpop.xlane.xlu1 %3626  ;;  %v10254_v29 = vpop.xlane.xlu0 %3629  ;;  %7255 = vrcp.f32 %v10235_v58 }
 0x7ee   : > { %v6165_v39 = vpop.f32.mrb[75].mxu1  ;;  %v6225_v5 = vpop.f32.mrb[88].mxu0  ;;  %v4223_v2 = vmul.f32 %v7220_v61, %v6163_v56  ;;  %7257 = vrcp.f32 %v10238_v22 }
 0x7ef   : > { %v6166_v1 = vadd.f32 %v6165_v39, %v6164_v51  ;;  %v6226_v57 = vpop.f32.mrb[89].mxu0  ;;  %v7228_v19 = vpop.eup %7227  ;;  %7259 = vrcp.f32 %v10240_v13 }
 0x7f0   : > { %v10257_v44 = vadd.f32 %v6226_v57, %v6225_v5  ;;  %v6228_v42 = vpop.f32.mrb[90].mxu0  ;;  %4287 = vst.msk [vmem:[#allocation5 + $0x20] sm:$0xff] %vm1919_vm1, %v4223_v2  ;;  %v7230_v61 = vpop.eup %7229  ;;  %7261 = vrcp.f32 %v10243_v10 }
 0x7f1   : > { %v10259_v14 = vpop.xlane.xlu1 %3584  ;;  %v4224_v11 = vmul.f32 %v7222_v23, %v6166_v1  ;;  %v10262_v8 = vpop.xlane.xlu0 %3587 }
 0x7f2   : > { %v6229_v15 = vpop.f32.mrb[91].mxu0 }
 0x7f3   : > { %v10264_v6 = vadd.f32 %v6229_v15, %v6228_v42  ;;  %4288 = vst.msk [vmem:[#allocation5 + $0x28] sm:$0xff] %vm1919_vm1, %v4224_v11  ;;  %v6167_v30 = vpop.f32.mrb[76].mxu1 }
 0x7f4   : > { %v6168_v49 = vpop.f32.mrb[77].mxu1 }
 0x7f5   : > { %v10268_v62 = vpop.xlane.xlu1 %3632  ;;  %v6169_v3 = vadd.f32 %v6168_v49, %v6167_v30  ;;  %v6170_v45 = vpop.f32.mrb[78].mxu1 }
 0x7f6   : > { %v6171_v31 = vpop.f32.mrb[79].mxu1  ;;  %v6231_v52 = vpop.f32.mrb[92].mxu0 }
 0x7f7   : > { %v4225_v47 = vmul.f32 %v7224_v25, %v6169_v3  ;;  %v10271_v16 = vpop.xlane.xlu0 %3635  ;;  %v6172_v41 = vadd.f32 %v6171_v31, %v6170_v45  ;;  %v6232_v21 = vpop.f32.mrb[93].mxu0 }
 0x7f8   : > { %v10273_v9 = vadd.f32 %v6232_v21, %v6231_v52  ;;  %v6234_v46 = vpop.f32.mrb[94].mxu0  ;;  %v7232_v30 = vpop.eup %7231  ;;  %7263 = vrcp.f32 %v10246_v28 }
 0x7f9   : > { %4289 = vst.msk [vmem:[#allocation5 + $0x30] sm:$0xff] %vm1919_vm1, %v4225_v47  ;;  %v4226_v50 = vmul.f32 %v7226_v26, %v6172_v41  ;;  %v6235_v60 = vpop.f32.mrb[95].mxu0  ;;  %v10279_v24 = vpop.xlane.xlu1 %3590 }
 0x7fa   : > { %v10276_v18 = vadd.f32 %v6235_v60, %v6234_v46  ;;  %v7234_v47 = vpop.eup %7233  ;;  %7265 = vrcp.f32 %v10251_v55 }
 0x7fb   : > { %4290 = vst.msk [vmem:[#allocation5 + $0x38] sm:$0xff] %vm1919_vm1, %v4226_v50  ;;  %v6173_v20 = vpop.f32.mrb[80].mxu1  ;;  %v10282_v17 = vpop.xlane.xlu0 %3593 }
 0x7fc   : > { %v6174_v32 = vpop.f32.mrb[81].mxu1 }
 0x7fd   : > { %v6175_v12 = vadd.f32 %v6174_v32, %v6173_v20  ;;  %v6176_v36 = vpop.f32.mrb[82].mxu1  ;;  %v6237_v33 = vpop.f32.mrb[96].mxu0 }
 0x7fe   : > { %v6177_v54 = vpop.f32.mrb[83].mxu1  ;;  %v6238_v51 = vpop.f32.mrb[97].mxu0 }
 0x7ff   : > { %v4227_v37 = vmul.f32 %v7228_v19, %v6175_v12  ;;  %v6178_v56 = vadd.f32 %v6177_v54, %v6176_v36  ;;  %v10285_v39 = vadd.f32 %v6238_v51, %v6237_v33  ;;  %v6240_v5 = vpop.f32.mrb[98].mxu0  ;;  %v10287_v2 = vpop.xlane.xlu1 %3638 }
 0x800   : > { %v6241_v1 = vpop.f32.mrb[99].mxu0  ;;  %v10292_v23 = vpop.xlane.xlu0 %3641 }
 0x801   : > { %4291 = vst.msk [vmem:[#allocation5 + $0x40] sm:$0xff] %vm1919_vm1, %v4227_v37  ;;  %v4228_v63 = vmul.f32 %v7230_v61, %v6178_v56  ;;  %v10290_v57 = vadd.f32 %v6241_v1, %v6240_v5  ;;  %v7236_v36 = vpop.eup %7235  ;;  %7267 = vrcp.f32 %v10254_v29 }
 0x802   : > { %v7238_v61 = vpop.eup %7237  ;;  %7269 = vrcp.f32 %v10259_v14 }
 0x803   : > { %4292 = vst.msk [vmem:[#allocation5 + $0x48] sm:$0xff] %vm1919_vm1, %v4228_v63  ;;  %v6179_v35 = vpop.f32.mrb[84].mxu1  ;;  %v10297_v45 = vpop.xlane.xlu1 %3596 }
 0x804   : > { %v6180_v42 = vpop.f32.mrb[85].mxu1  ;;  %v10301_v26 = vpop.xlane.xlu0 %3599 }
 0x805   : > { %v6181_v11 = vadd.f32 %v6180_v42, %v6179_v35  ;;  %v6182_v15 = vpop.f32.mrb[86].mxu1  ;;  %v6243_v3 = vpop.f32.mrb[100].mxu0 }
 0x806   : > { %v6183_v49 = vpop.f32.mrb[87].mxu1  ;;  %v6244_v52 = vpop.f32.mrb[101].mxu0 }
 0x807   : > { %v4229_v25 = vmul.f32 %v7232_v30, %v6181_v11  ;;  %v6184_v31 = vadd.f32 %v6183_v49, %v6182_v15  ;;  %v10299_v41 = vadd.f32 %v6244_v52, %v6243_v3  ;;  %v6246_v21 = vpop.f32.mrb[102].mxu0  ;;  %v10308_v20 = vpop.xlane.xlu1 %3644 }
 0x808   : > { %v6247_v46 = vpop.f32.mrb[103].mxu0  ;;  %v10311_v33 = vpop.xlane.xlu0 %3647 }
 0x809   : > { %4293 = vst.msk [vmem:[#allocation5 + $0x50] sm:$0xff] %vm1919_vm1, %v4229_v25  ;;  %v4230_v40 = vmul.f32 %v7234_v47, %v6184_v31  ;;  %v10304_v50 = vadd.f32 %v6247_v46, %v6246_v21  ;;  %v7240_v3 = vpop.eup %7239  ;;  %7271 = vrcp.f32 %v10262_v8 }
 0x80b   : > { %4294 = vst.msk [vmem:[#allocation5 + $0x58] sm:$0xff] %vm1919_vm1, %v4230_v40  ;;  %v6185_v43 = vpop.f32.mrb[88].mxu1  ;;  %v10318_v42 = vpop.xlane.xlu1 %3602 }
 0x80c   : > { %v6186_v60 = vpop.f32.mrb[89].mxu1  ;;  %v10322_v15 = vpop.xlane.xlu0 %3605 }
 0x80d   : > { %v6187_v32 = vadd.f32 %v6186_v60, %v6185_v43  ;;  %v6188_v12 = vpop.f32.mrb[90].mxu1  ;;  %v7242_v40 = vpop.eup %7241  ;;  %7273 = vrcp.f32 %v10268_v62 }
 0x80e   : > { %v6189_v19 = vpop.f32.mrb[91].mxu1  ;;  %v6249_v54 = vpop.f32.mrb[104].mxu0 }
 0x80f   : > { %v4231_v37 = vmul.f32 %v7236_v36, %v6187_v32  ;;  %v6190_v56 = vadd.f32 %v6189_v19, %v6188_v12  ;;  %v6250_v51 = vpop.f32.mrb[105].mxu0  ;;  %v10327_v60 = vpop.xlane.xlu1 %3650 }
 0x810   : > { %v10313_v5 = vadd.f32 %v6250_v51, %v6249_v54  ;;  %v6252_v63 = vpop.f32.mrb[106].mxu0  ;;  %v10333_v36 = vpop.xlane.xlu0 %3653 }
 0x811   : > { %4295 = vst.msk [vmem:[#allocation5 + $0x60] sm:$0xff] %vm1919_vm1, %v4231_v37  ;;  %v4232_v53 = vmul.f32 %v7238_v61, %v6190_v56  ;;  %v6253_v1 = vpop.f32.mrb[107].mxu0  ;;  %v7244_v56 = vpop.eup %7243  ;;  %7275 = vrcp.f32 %v10271_v16 }
 0x812   : > { %v10316_v35 = vadd.f32 %v6253_v1, %v6252_v63 }
 0x813   : > { %4296 = vst.msk [vmem:[#allocation5 + $0x68] sm:$0xff] %vm1919_vm1, %v4232_v53  ;;  %v6191_v7 = vpop.f32.mrb[92].mxu1  ;;  %v10338_v63 = vpop.xlane.xlu1 %3656 }
 0x814   : > { %v6192_v11 = vpop.f32.mrb[93].mxu1 }
 0x815   : > { %v6193_v30 = vadd.f32 %v6192_v11, %v6191_v7  ;;  %v6194_v49 = vpop.f32.mrb[94].mxu1 }
 0x816   : > { %v6195_v25 = vpop.f32.mrb[95].mxu1  ;;  %v6255_v31 = vpop.f32.mrb[108].mxu0 }
 0x817   : > { %v4233_v52 = vmul.f32 %v7240_v3, %v6193_v30  ;;  %v6196_v47 = vadd.f32 %v6195_v25, %v6194_v49  ;;  %v6256_v21 = vpop.f32.mrb[109].mxu0  ;;  %v10343_v30 = vpop.xlane.xlu0 %3659 }
 0x818   : > { %v10325_v46 = vadd.f32 %v6256_v21, %v6255_v31  ;;  %v6258_v43 = vpop.f32.mrb[110].mxu0  ;;  %v7246_v49 = vpop.eup %7245  ;;  %7277 = vrcp.f32 %v10279_v24 }
 0x819   : > { %4297 = vst.msk [vmem:[#allocation5 + $0x70] sm:$0xff] %vm1919_vm1, %v4233_v52  ;;  %v4234_v0 = vmul.f32 %v7242_v40, %v6196_v47  ;;  %v6259_v32 = vpop.f32.mrb[111].mxu0  ;;  %v7248_v52 = vpop.eup %7247  ;;  %7279 = vrcp.f32 %v10338_v63 }
 0x81a   : > { %v10330_v12 = vadd.f32 %v6259_v32, %v6258_v43  ;;  %v10350_v38 = vpop.xlane.xlu1 %3662  ;;  %v7250_v40 = vpop.eup %7249  ;;  %v4238_v32 = vmul.f32 %v7248_v52, %v10248_v34  ;;  %7281 = vrcp.f32 %v10343_v30 }
 0x81b   : > { %4298 = vst.msk [vmem:[#allocation5 + $0x78] sm:$0xff] %vm1919_vm1, %v4234_v0  ;;  %v10355_v58 = vpop.xlane.xlu0 %3665 }
 0x81c   : > { %v6277_v19 = vpop.f32.mrb[96].mxu1 }
 0x81d   : > { %v6278_v27 = vpop.f32.mrb[97].mxu1 }
 0x81e   : > { %v6279_v54 = vadd.f32 %v6278_v27, %v6277_v19  ;;  %v6280_v37 = vpop.f32.mrb[98].mxu1  ;;  %v6341_v61 = vpop.f32.mrb[112].mxu0 }
 0x81f   : > { %v6281_v51 = vpop.f32.mrb[99].mxu1  ;;  %v6342_v59 = vpop.f32.mrb[113].mxu0 }
 0x820   : > { %v4251_v53 = vmul.f32 %v7244_v56, %v6279_v54  ;;  %v6282_v1 = vadd.f32 %v6281_v51, %v6280_v37  ;;  %v10341_v7 = vadd.f32 %v6342_v59, %v6341_v61  ;;  %v6344_v11 = vpop.f32.mrb[114].mxu0  ;;  %v7252_v56 = vpop.eup %7251  ;;  %7283 = vrcp.f32 %v10282_v17 }
 0x821   : > { %v6345_v4 = vpop.f32.mrb[115].mxu0  ;;  %v7254_v61 = vpop.eup %7253  ;;  %7285 = vrcp.f32 %v10287_v2 }
 0x822   : > { %4396 = vrot.lane.b32.xlu1 %v4251_v53, %s8011_s19  ;;  %v10346_v3 = vadd.f32 %v6345_v4, %v6344_v11  ;;  %v4252_v48 = vmul.f32 %v7246_v49, %v6282_v1  ;;  %v4239_v34 = vmul.f32 %v7254_v61, %v10257_v44  ;;  %v10367_v10 = vpop.xlane.xlu1 %3668  ;;  %v7256_v11 = vpop.eup %7255  ;;  %7287 = vrcp.f32 %v10350_v38 }
 0x823   : > { %v10369_v4 = vpop.xlane.xlu0 %3671  ;;  %v4240_v44 = vmul.f32 %v7256_v11, %v10264_v6 }
 0x824   : > { %v6283_v25 = vpop.f32.mrb[100].mxu1 }
 0x825   : > { %v6284_v31 = vpop.f32.mrb[101].mxu1 }
 0x826   : > { %v6285_v47 = vadd.f32 %v6284_v31, %v6283_v25  ;;  %v6286_v21 = vpop.f32.mrb[102].mxu1  ;;  %4398 = vrot.lane.b32.xlu1 %v4252_v48, %s8011_s19  ;;  %v6347_v0 = vpop.f32.mrb[116].mxu0 }
 0x827   : > { %v6287_v43 = vpop.f32.mrb[103].mxu1  ;;  %v6348_v22 = vpop.f32.mrb[117].mxu0 }
 0x828   : > { %v4253_v19 = vmul.f32 %v7250_v40, %v6285_v47  ;;  %v6288_v27 = vadd.f32 %v6287_v43, %v6286_v21  ;;  %v10358_v54 = vadd.f32 %v6348_v22, %v6347_v0  ;;  %v6350_v37 = vpop.f32.mrb[118].mxu0  ;;  %v7258_v25 = vpop.eup %7257  ;;  %7289 = vrcp.f32 %v10355_v58 }
 0x829   : > { %v6351_v51 = vpop.f32.mrb[119].mxu0  ;;  %v7260_v43 = vpop.eup %7259  ;;  %7291 = vrcp.f32 %v10292_v23 }
 0x82a   : > { %4400 = vrot.lane.b32.xlu0 %v4253_v19, %s8011_s19  ;;  %4321 = vrot.lane.b32.xlu1 %v4238_v32, %s8010_s3  ;;  %v10362_v13 = vadd.f32 %v6351_v51, %v6350_v37  ;;  %v4254_v53 = vmul.f32 %v7252_v56, %v6288_v27  ;;  %v7262_v32 = vpop.eup %7261  ;;  %v10384_v6 = vpop.xlane.xlu1 %3674  ;;  %7293 = vrcp.f32 %v10297_v45 }
 0x82b   : > { %v4241_v29 = vmul.f32 %v7262_v32, %v10273_v9  ;;  %v10387_v22 = vpop.xlane.xlu0 %3677  ;;  %v7264_v56 = vpop.eup %7263  ;;  %7295 = vrcp.f32 %v10367_v10 }
 0x82c   : > { %v6289_v1 = vpop.f32.mrb[104].mxu1  ;;  %v7266_v8 = vpop.eup %7265  ;;  %7297 = vrcp.f32 %v10369_v4 }
 0x82d   : > { %v6290_v59 = vpop.f32.mrb[105].mxu1 }
 0x82e   : > { %v6291_v49 = vadd.f32 %v6290_v59, %v6289_v1  ;;  %v6292_v48 = vpop.f32.mrb[106].mxu1  ;;  %4323 = vrot.lane.b32.xlu0 %v4239_v34, %s8010_s3  ;;  %4402 = vrot.lane.b32.xlu1 %v4254_v53, %s8011_s19  ;;  %v6353_v31 = vpop.f32.mrb[120].mxu0  ;;  %v4242_v1 = vmul.f32 %v7264_v56, %v10276_v18 }
 0x82f   : > { %v6293_v28 = vpop.f32.mrb[107].mxu1  ;;  %v6354_v47 = vpop.f32.mrb[121].mxu0 }
 0x830   : > { %v4255_v55 = vmul.f32 %v7258_v25, %v6291_v49  ;;  %v6294_v52 = vadd.f32 %v6293_v28, %v6292_v48  ;;  %v10376_v21 = vadd.f32 %v6354_v47, %v6353_v31  ;;  %v6356_v40 = vpop.f32.mrb[122].mxu0  ;;  %v7268_v25 = vpop.eup %7267  ;;  %7299 = vrcp.f32 %v10301_v26 }
 0x831   : > { %v6357_v0 = vpop.f32.mrb[123].mxu0  ;;  %v7270_v16 = vpop.eup %7269  ;;  %7301 = vrcp.f32 %v10308_v20 }
 0x832   : > { %4404 = vrot.lane.b32.xlu0 %v4255_v55, %s8011_s19  ;;  %4325 = vrot.lane.b32.xlu1 %v4240_v44, %s8010_s3  ;;  %v10380_v19 = vadd.f32 %v6357_v0, %v6356_v40  ;;  %v4256_v27 = vmul.f32 %v7260_v43, %v6294_v52  ;;  %v4243_v31 = vmul.f32 %v7270_v16, %v10285_v39  ;;  %v10402_v18 = vpop.xlane.xlu1 %3680  ;;  %v10405_v24 = vpop.xlane.xlu0 %3683 }
 0x833   : > { %v7272_v47 = vpop.eup %7271  ;;  %7303 = vrcp.f32 %v10384_v6 }
 0x834   : > { %v6295_v14 = vpop.f32.mrb[108].mxu1  ;;  %v7274_v39 = vpop.eup %7273  ;;  %7305 = vrcp.f32 %v10387_v22 }
 0x835   : > { %v6296_v37 = vpop.f32.mrb[109].mxu1  ;;  %v7276_v56 = vpop.eup %7275  ;;  %7307 = vrcp.f32 %v10311_v33 }
 0x836   : > { %v6297_v51 = vadd.f32 %v6296_v37, %v6295_v14  ;;  %v6298_v61 = vpop.f32.mrb[110].mxu1  ;;  %4327 = vrot.lane.b32.xlu0 %v4241_v29, %s8010_s3  ;;  %4406 = vrot.lane.b32.xlu1 %v4256_v27, %s8011_s19  ;;  %v6359_v34 = vpop.f32.mrb[124].mxu0  ;;  %v4244_v29 = vmul.f32 %v7272_v47, %v10290_v57 }
 0x837   : > { %v6299_v9 = vpop.f32.mrb[111].mxu1  ;;  %v6360_v53 = vpop.f32.mrb[125].mxu0 }
 0x838   : > { %v4257_v59 = vmul.f32 %v7266_v8, %v6297_v51  ;;  %v6300_v62 = vadd.f32 %v6299_v9, %v6298_v61  ;;  %v10393_v11 = vadd.f32 %v6360_v53, %v6359_v34  ;;  %v6362_v49 = vpop.f32.mrb[126].mxu0  ;;  %v7278_v17 = vpop.eup %7277  ;;  %7309 = vrcp.f32 %v10318_v42 }
 0x839   : > { %v6363_v48 = vpop.f32.mrb[127].mxu0  ;;  %v4245_v34 = vmul.f32 %v7278_v17, %v10299_v41  ;;  %v10420_v57 = vpop.xlane.xlu1 %3686 }
 0x83a   : > { %4408 = vrot.lane.b32.xlu0 %v4257_v59, %s8011_s19  ;;  %4329 = vrot.lane.b32.xlu1 %v4242_v1, %s8010_s3  ;;  %v10398_v28 = vadd.f32 %v6363_v48, %v6362_v49  ;;  %v4258_v44 = vmul.f32 %v7268_v25, %v6300_v62  ;;  %v10423_v53 = vpop.xlane.xlu0 %3689  ;;  %v7280_v1 = vpop.eup %7279  ;;  %7311 = vrcp.f32 %v10402_v18 }
 0x83b   : > { %v7282_v41 = vpop.eup %7281  ;;  %v4267_v25 = vmul.f32 %v7280_v1, %v10341_v7  ;;  %7313 = vrcp.f32 %v10405_v24 }
 0x83c   : > { %v6301_v55 = vpop.f32.mrb[112].mxu1  ;;  %v4268_v58 = vmul.f32 %v7282_v41, %v10346_v3 }
 0x83d   : > { %v6302_v52 = vpop.f32.mrb[113].mxu1  ;;  %v10439_v7 = vpop.xlane.xlu1 %3692 }
 0x83e   : > { %v6303_v40 = vadd.f32 %v6302_v52, %v6301_v55  ;;  %v6304_v43 = vpop.f32.mrb[114].mxu1  ;;  %4331 = vrot.lane.b32.xlu0 %v4243_v31, %s8010_s3  ;;  %4410 = vrot.lane.b32.xlu1 %v4258_v44, %s8011_s19  ;;  %v6365_v0 = vpop.f32.mrb[128].mxu0 }
 0x83f   : > { %v6305_v63 = vpop.f32.mrb[115].mxu1  ;;  %v6366_v32 = vpop.f32.mrb[129].mxu0 }
 0x840   : > { %v4259_v27 = vmul.f32 %v7274_v39, %v6303_v40  ;;  %v6306_v30 = vadd.f32 %v6305_v63, %v6304_v43  ;;  %v10411_v14 = vadd.f32 %v6366_v32, %v6365_v0  ;;  %v6368_v37 = vpop.f32.mrb[130].mxu0  ;;  %v7284_v55 = vpop.eup %7283  ;;  %7315 = vrcp.f32 %v10322_v15 }
 0x841   : > { %v6369_v51 = vpop.f32.mrb[131].mxu0  ;;  %v7286_v23 = vpop.eup %7285  ;;  %v4246_v40 = vmul.f32 %v7284_v55, %v10304_v50  ;;  %7317 = vrcp.f32 %v10327_v60 }
 0x842   : > { %4412 = vrot.lane.b32.xlu0 %v4259_v27, %s8011_s19  ;;  %4333 = vrot.lane.b32.xlu1 %v4244_v29, %s8010_s3  ;;  %v10416_v61 = vadd.f32 %v6369_v51, %v6368_v37  ;;  %v4260_v8 = vmul.f32 %v7276_v56, %v6306_v30  ;;  %v10442_v0 = vpop.xlane.xlu0 %3695  ;;  %v7288_v39 = vpop.eup %7287  ;;  %7319 = vrcp.f32 %v10420_v57 }
 0x843   : > { %v7290_v50 = vpop.eup %7289  ;;  %v4269_v30 = vmul.f32 %v7288_v39, %v10358_v54  ;;  %7321 = vrcp.f32 %v10423_v53 }
 0x844   : > { %v6307_v9 = vpop.f32.mrb[116].mxu1  ;;  %v4270_v4 = vmul.f32 %v7290_v50, %v10362_v13  ;;  %v7292_v17 = vpop.eup %7291  ;;  %7323 = vrcp.f32 %v10333_v36 }
 0x845   : > { %v6308_v2 = vpop.f32.mrb[117].mxu1  ;;  %v7294_v54 = vpop.eup %7293  ;;  %7325 = vrcp.f32 %v10439_v7 }
 0x846   : > { %v6309_v59 = vadd.f32 %v6308_v2, %v6307_v9  ;;  %v6310_v62 = vpop.f32.mrb[118].mxu1  ;;  %4335 = vrot.lane.b32.xlu0 %v4245_v34, %s8010_s3  ;;  %4414 = vrot.lane.b32.xlu1 %v4260_v8, %s8011_s19  ;;  %v6371_v49 = vpop.f32.mrb[132].mxu0  ;;  %v4247_v13 = vmul.f32 %v7294_v54, %v10313_v5 }
 0x847   : > { %v6311_v38 = vpop.f32.mrb[119].mxu1  ;;  %v6372_v48 = vpop.f32.mrb[133].mxu0 }
 0x848   : > { %v6312_v16 = vadd.f32 %v6311_v38, %v6310_v62  ;;  %v10430_v31 = vadd.f32 %v6372_v48, %v6371_v49  ;;  %v6374_v44 = vpop.f32.mrb[134].mxu0  ;;  %v4261_v3 = vmul.f32 %v7286_v23, %v6309_v59  ;;  %v10454_v8 = vpop.xlane.xlu1 %3698 }
 0x849   : > { %v6375_v52 = vpop.f32.mrb[135].mxu0  ;;  %v10463_v20 = vpop.xlane.xlu0 %3701 }
 0x84a   : > { %4477 = vrot.lane.b32.xlu0 %v4267_v25, %s8009_s18  ;;  %4479 = vrot.lane.b32.xlu1 %v4268_v58, %s8009_s18  ;;  %v10435_v47 = vadd.f32 %v6375_v52, %v6374_v44  ;;  %v4262_v9 = vmul.f32 %v7292_v17, %v6312_v16  ;;  %v7296_v59 = vpop.eup %7295  ;;  %7327 = vrcp.f32 %v10442_v0 }
 0x84b   : > { %v7298_v38 = vpop.eup %7297  ;;  %v4271_v22 = vmul.f32 %v7296_v59, %v10376_v21  ;;  %7329 = vrcp.f32 %v10454_v8 }
 0x84c   : > { %v6313_v43 = vpop.f32.mrb[120].mxu1  ;;  %v4272_v48 = vmul.f32 %v7298_v38, %v10380_v19  ;;  %v7300_v16 = vpop.eup %7299  ;;  %7331 = vrcp.f32 %v10463_v20 }
 0x84d   : > { %v6314_v45 = vpop.f32.mrb[121].mxu1  ;;  %v7302_v21 = vpop.eup %7301  ;;  %v4248_v19 = vmul.f32 %v7300_v16, %v10316_v35 }
 0x84e   : > { %v6315_v63 = vadd.f32 %v6314_v45, %v6313_v43  ;;  %v6316_v32 = vpop.f32.mrb[122].mxu1  ;;  %4416 = vrot.lane.b32.xlu0 %v4261_v3, %s8011_s19  ;;  %4337 = vrot.lane.b32.xlu1 %v4246_v40, %s8010_s3  ;;  %v6377_v29 = vpop.f32.mrb[136].mxu0 }
 0x84f   : > { %v6317_v10 = vpop.f32.mrb[123].mxu1  ;;  %v6378_v27 = vpop.f32.mrb[137].mxu0 }
 0x850   : > { %v10449_v37 = vadd.f32 %v6317_v10, %v6316_v32  ;;  %v10451_v56 = vadd.f32 %v6378_v27, %v6377_v29  ;;  %v6380_v51 = vpop.f32.mrb[138].mxu0  ;;  %v4263_v40 = vmul.f32 %v7302_v21, %v6315_v63  ;;  %v7304_v42 = vpop.eup %7303 }
 0x851   : > { %v6381_v34 = vpop.f32.mrb[139].mxu0  ;;  %v7306_v3 = vpop.eup %7305  ;;  %v4273_v45 = vmul.f32 %v7304_v42, %v10393_v11 }
 0x852   : > { %4481 = vrot.lane.b32.xlu0 %v4269_v30, %s8009_s18  ;;  %4483 = vrot.lane.b32.xlu1 %v4270_v4, %s8009_s18  ;;  %v10458_v26 = vadd.f32 %v6381_v34, %v6380_v51  ;;  %v4274_v39 = vmul.f32 %v7306_v3, %v10398_v28  ;;  %v7308_v35 = vpop.eup %7307 }
 0x853   : > { %v7310_v18 = vpop.eup %7309  ;;  %v4264_v15 = vmul.f32 %v7308_v35, %v10449_v37 }
 0x854   : > { %v6319_v2 = vpop.f32.mrb[124].mxu1  ;;  %v4249_v24 = vmul.f32 %v7310_v18, %v10325_v46  ;;  %v7312_v11 = vpop.eup %7311 }
 0x855   : > { %v6320_v1 = vpop.f32.mrb[125].mxu1  ;;  %v4316_v41 = vpop.permute.xlu1 %4315  ;;  %v4275_v28 = vmul.f32 %v7312_v11, %v10411_v14 }
 0x856   : > { %v6321_v62 = vadd.f32 %v6320_v1, %v6319_v2  ;;  %v6322_v49 = vpop.f32.mrb[126].mxu1  ;;  %4339 = vrot.lane.b32.xlu0 %v4247_v13, %s8010_s3  ;;  %4418 = vrot.lane.b32.xlu1 %v4262_v9, %s8011_s19  ;;  %4364 = vst.msk [vmem:[#allocation5] sm:$0xff] %vm4363_vm2, %v4316_v41  ;;  %v7314_v60 = vpop.eup %7313 }
 0x857   : > { %v6323_v5 = vpop.f32.mrb[127].mxu1  ;;  %v6383_v6 = vpop.f32.mrb[140].mxu0  ;;  %v4276_v63 = vmul.f32 %v7314_v60, %v10416_v61 }
 0x858   : > { %v10471_v25 = vadd.f32 %v6323_v5, %v6322_v49  ;;  %v6384_v58 = vpop.f32.mrb[141].mxu0  ;;  %v4318_v52 = vpop.permute.xlu0 %4317 }
 0x859   : > { %v10474_v44 = vadd.f32 %v6384_v58, %v6383_v6  ;;  %v6386_v55 = vpop.f32.mrb[142].mxu0  ;;  %4365 = vst.msk [vmem:[#allocation5 + $0x8] sm:$0xff] %vm4363_vm2, %v4318_v52  ;;  %v7316_v46 = vpop.eup %7315 }
 0x85a   : > { %4485 = vrot.lane.b32.xlu0 %v4271_v22, %s8009_s18  ;;  %4487 = vrot.lane.b32.xlu1 %v4272_v48, %s8009_s18  ;;  %v6387_v33 = vpop.f32.mrb[143].mxu0  ;;  %v7318_v57 = vpop.eup %7317  ;;  %v4250_v53 = vmul.f32 %v7316_v46, %v10330_v12  ;;  %v7401_v46 = vld [vmem:[%s9153_s23 + $0x28] sm:$0xff] }
 0x85b   : > { %v6388_v23 = vadd.f32 %v6387_v33, %v6386_v55  ;;  %v4265_v32 = vmul.f32 %v7318_v57, %v6321_v62  ;;  %v7320_v36 = vpop.eup %7319  ;;  %v7397_v55 = vld [vmem:[%s9153_s23 + $0x8] sm:$0xff]  ;;  %v7398_v33 = vld [vmem:[%s9153_s23] sm:$0xff] }
 0x85c   : > { %v7322_v14 = vpop.eup %7321  ;;  %v4277_v61 = vmul.f32 %v7320_v36, %v10430_v31 }
 0x85d   : > { %v4320_v43 = vpop.permute.xlu0 %4319  ;;  %v4278_v7 = vmul.f32 %v7322_v14, %v10435_v47  ;;  %v7324_v29 = vpop.eup %7323 }
 0x85e   : > { %4420 = vrot.lane.b32.xlu0 %v4263_v40, %s8011_s19  ;;  %4341 = vrot.lane.b32.xlu1 %v4248_v19, %s8010_s3  ;;  %4366 = vst.msk [vmem:[#allocation5 + $0x10] sm:$0xff] %vm4363_vm2, %v4320_v43  ;;  %v7326_v12 = vpop.eup %7325  ;;  %v4266_v50 = vmul.f32 %v7324_v29, %v10471_v25  ;;  %v7399_v43 = vld [vmem:[%s9153_s23 + $0x10] sm:$0xff] }
 0x85f   : > { %v4279_v0 = vmul.f32 %v7326_v12, %v10451_v56  ;;  %v7328_v10 = vpop.eup %7327 }
 0x860   : > { %v7330_v31 = vpop.eup %7329  ;;  %v4280_v47 = vmul.f32 %v7328_v10, %v10458_v26  ;;  %v7404_v10 = vld [vmem:[%s9153_s23 + $0x30] sm:$0xff] }
 0x861   : > { %v4281_v27 = vmul.f32 %v7330_v31, %v10474_v44  ;;  %v7332_v30 = vpop.eup %7331 }
 0x862   : > { %4489 = vrot.lane.b32.xlu0 %v4273_v45, %s8009_s18  ;;  %4491 = vrot.lane.b32.xlu1 %v4274_v39, %s8009_s18  ;;  %v4282_v4 = vmul.f32 %v7332_v30, %v6388_v23 }
 0x866   : > { %4343 = vrot.lane.b32.xlu0 %v4249_v24, %s8010_s3  ;;  %4422 = vrot.lane.b32.xlu1 %v4264_v15, %s8011_s19  ;;  %v7400_v24 = vld [vmem:[%s9153_s23 + $0x18] sm:$0xff] }
 0x86a   : > { %4493 = vrot.lane.b32.xlu0 %v4275_v28, %s8009_s18  ;;  %4495 = vrot.lane.b32.xlu1 %v4276_v63, %s8009_s18 }
 0x86e   : > { %4424 = vrot.lane.b32.xlu0 %v4265_v32, %s8011_s19  ;;  %4345 = vrot.lane.b32.xlu1 %v4250_v53, %s8010_s3  ;;  %v7402_v53 = vld [vmem:[%s9153_s23 + $0x20] sm:$0xff] }
 0x872   : > { %4497 = vrot.lane.b32.xlu0 %v4277_v61, %s8009_s18  ;;  %4499 = vrot.lane.b32.xlu1 %v4278_v7, %s8009_s18 }
 0x876   : > { %4501 = vrot.lane.b32.xlu0 %v4279_v0, %s8009_s18  ;;  %4426 = vrot.lane.b32.xlu1 %v4266_v50, %s8011_s19  ;;  %v7403_v0 = vld [vmem:[%s9153_s23 + $0x38] sm:$0xff]  ;;  %s11141_s19 = scalar_lea.sflag [#allocation8], %s709_s22 }
 0x87a   : > { %4505 = vrot.lane.b32.xlu0 %v4281_v27, %s8009_s18  ;;  %4503 = vrot.lane.b32.xlu1 %v4280_v47, %s8009_s18 }
 0x87e   : > { %4507 = vrot.lane.b32.xlu1 %v4282_v4, %s8009_s18 }
 0x894   : > { %v4397_v37 = vpop.permute.xlu1 %4396 }
 0x895   : > { %4445 = vst.msk [vmem:[#allocation5] sm:$0xff] %vm4444_vm3, %v4397_v37 }
 0x898   : > { %v4399_v56 = vpop.permute.xlu1 %4398 }
 0x899   : > { %4446 = vst.msk [vmem:[#allocation5 + $0x8] sm:$0xff] %vm4444_vm3, %v4399_v56 }
 0x89c   : > { %v4322_v51 = vpop.permute.xlu1 %4321  ;;  %v4401_v17 = vpop.permute.xlu0 %4400 }
 0x89d   : > { %4367 = vst.msk [vmem:[#allocation5 + $0x18] sm:$0xff] %vm4363_vm2, %v4322_v51  ;;  %v7405_v51 = vld [vmem:[%s9153_s23 + $0x48] sm:$0xff] }
 0x89e   : > { %4447 = vst.msk [vmem:[#allocation5 + $0x10] sm:$0xff] %vm4444_vm3, %v4401_v17 }
 0x8a0   : > { %v4403_v34 = vpop.permute.xlu1 %4402  ;;  %v4324_v8 = vpop.permute.xlu0 %4323 }
 0x8a1   : > { %4448 = vst.msk [vmem:[#allocation5 + $0x18] sm:$0xff] %vm4444_vm3, %v4403_v34  ;;  %v7406_v34 = vld [vmem:[%s9153_s23 + $0x40] sm:$0xff] }
 0x8a2   : > { %4368 = vst.msk [vmem:[#allocation5 + $0x20] sm:$0xff] %vm4363_vm2, %v4324_v8 }
 0x8a4   : > { %v4326_v26 = vpop.permute.xlu1 %4325  ;;  %v4405_v54 = vpop.permute.xlu0 %4404 }
 0x8a5   : > { %4369 = vst.msk [vmem:[#allocation5 + $0x28] sm:$0xff] %vm4363_vm2, %v4326_v26 }
 0x8a6   : > { %4449 = vst.msk [vmem:[#allocation5 + $0x20] sm:$0xff] %vm4444_vm3, %v4405_v54 }
 0x8a8   : > { %v4407_v13 = vpop.permute.xlu1 %4406  ;;  %v4328_v9 = vpop.permute.xlu0 %4327 }
 0x8a9   : > { %4450 = vst.msk [vmem:[#allocation5 + $0x28] sm:$0xff] %vm4444_vm3, %v4407_v13 }
 0x8aa   : > { %4370 = vst.msk [vmem:[#allocation5 + $0x30] sm:$0xff] %vm4363_vm2, %v4328_v9 }
 0x8ac   : > { %v4330_v2 = vpop.permute.xlu1 %4329  ;;  %v4409_v20 = vpop.permute.xlu0 %4408 }
 0x8ad   : > { %4371 = vst.msk [vmem:[#allocation5 + $0x38] sm:$0xff] %vm4363_vm2, %v4330_v2 }
 0x8ae   : > { %4451 = vst.msk [vmem:[#allocation5 + $0x30] sm:$0xff] %vm4444_vm3, %v4409_v20 }
 0x8b0   : > { %v4411_v1 = vpop.permute.xlu1 %4410  ;;  %v4332_v59 = vpop.permute.xlu0 %4331 }
 0x8b1   : > { %4452 = vst.msk [vmem:[#allocation5 + $0x38] sm:$0xff] %vm4444_vm3, %v4411_v1  ;;  %v7407_v1 = vld [vmem:[%s9153_s23 + $0x58] sm:$0xff] }
 0x8b2   : > { %4372 = vst.msk [vmem:[#allocation5 + $0x40] sm:$0xff] %vm4363_vm2, %v4332_v59 }
 0x8b4   : > { %v4334_v62 = vpop.permute.xlu1 %4333  ;;  %v4413_v49 = vpop.permute.xlu0 %4412 }
 0x8b5   : > { %4373 = vst.msk [vmem:[#allocation5 + $0x48] sm:$0xff] %vm4363_vm2, %v4334_v62  ;;  %v7408_v62 = vld [vmem:[%s9153_s23 + $0x50] sm:$0xff] }
 0x8b6   : > { %4453 = vst.msk [vmem:[#allocation5 + $0x40] sm:$0xff] %vm4444_vm3, %v4413_v49 }
 0x8b8   : > { %v4415_v41 = vpop.permute.xlu1 %4414  ;;  %v4336_v38 = vpop.permute.xlu0 %4335 }
 0x8b9   : > { %4454 = vst.msk [vmem:[#allocation5 + $0x48] sm:$0xff] %vm4444_vm3, %v4415_v41 }
 0x8ba   : > { %4374 = vst.msk [vmem:[#allocation5 + $0x50] sm:$0xff] %vm4363_vm2, %v4336_v38 }
 0x8bc   : > { %v4480_v5 = vpop.permute.xlu1 %4479  ;;  %v4478_v6 = vpop.permute.xlu0 %4477 }
 0x8bd   : > { %4527 = vst.msk [vmem:[#allocation5 + $0x8] sm:$0xff] %vm4525_vm4, %v4480_v5  ;;  %4526 = vst.msk [vmem:[#allocation5] sm:$0xff] %vm4525_vm4, %v4478_v6  ;;  %v7409_v5 = vld [vmem:[%s9153_s23 + $0x60] sm:$0xff] }
 0x8c0   : > { %v4338_v22 = vpop.permute.xlu1 %4337  ;;  %v4417_v48 = vpop.permute.xlu0 %4416 }
 0x8c1   : > { %4375 = vst.msk [vmem:[#allocation5 + $0x58] sm:$0xff] %vm4363_vm2, %v4338_v22 }
 0x8c2   : > { %4455 = vst.msk [vmem:[#allocation5 + $0x50] sm:$0xff] %vm4444_vm3, %v4417_v48 }
 0x8c4   : > { %v4484_v25 = vpop.permute.xlu1 %4483  ;;  %v4482_v58 = vpop.permute.xlu0 %4481  ;;  %v4543_v16 = vld [vmem:[#allocation5 + $0x8] sm:$0xff]  ;;  %v4542_v44 = vld [vmem:[#allocation5] sm:$0xff] }
 0x8c5   : > { %4529 = vst.msk [vmem:[#allocation5 + $0x18] sm:$0xff] %vm4525_vm4, %v4484_v25  ;;  %4528 = vst.msk [vmem:[#allocation5 + $0x10] sm:$0xff] %vm4525_vm4, %v4482_v58  ;;  %v10547_v52 = vadd.f32 %v7397_v55, %v4543_v16  ;;  %v10550_v21 = vadd.f32 %v7398_v33, %v4542_v44  ;;  %v7410_v25 = vld [vmem:[%s9153_s23 + $0x68] sm:$0xff]  ;;  %v7411_v16 = vld [vmem:[%s9153_s23 + $0x70] sm:$0xff] }
 0x8c6   : > { %v7412_v33 = vld [vmem:[%s9153_s23 + $0x78] sm:$0xff]  ;;  %s11540_s23 = sld [smem:[#allocation132_spill]] }
 0x8c7   : > { %4578 = vadd.xlane.f32.xlu1 %v10547_v52  ;;  %4576 = vadd.xlane.f32.xlu0 %v10550_v21 }
 0x8c8   : > { %v4419_v23 = vpop.permute.xlu1 %4418  ;;  %v4340_v19 = vpop.permute.xlu0 %4339 }
 0x8c9   : > { %4456 = vst.msk [vmem:[#allocation5 + $0x58] sm:$0xff] %vm4444_vm3, %v4419_v23 }
 0x8ca   : > { %4376 = vst.msk [vmem:[#allocation5 + $0x60] sm:$0xff] %vm4363_vm2, %v4340_v19  ;;  %v6909_v19 = vld [vmem:[#allocation18] ss:$8 sps:$4 sm:$0xff]  }
 0x8cc   : > { %v4488_v40 = vpop.permute.xlu1 %4487  ;;  %v4486_v42 = vpop.permute.xlu0 %4485  ;;  %v4544_v3 = vld [vmem:[#allocation5 + $0x10] sm:$0xff]  ;;  %v4545_v39 = vld [vmem:[#allocation5 + $0x18] sm:$0xff]  ;;  %s11541_s3 = smov %s11540_s23  ;;  %s11132_s18 = scalar_lea.hbm %s11540_s23, %s5937_s26 }
 0x8cd   : > { %4531 = vst.msk [vmem:[#allocation5 + $0x28] sm:$0xff] %vm4525_vm4, %v4488_v40  ;;  %4530 = vst.msk [vmem:[#allocation5 + $0x20] sm:$0xff] %vm4525_vm4, %v4486_v42  ;;  %v10559_v45 = vadd.f32 %v7399_v43, %v4544_v3  ;;  %v10565_v15 = vadd.f32 %v7400_v24, %v4545_v39  ;;  %v6911_v40 = vld [vmem:[#allocation18 + $0x4] ss:$8 sps:$4 sm:$0xff]   ;;  %v6914_v42 = vld [vmem:[#allocation18 + $0x14] ss:$8 sps:$4 sm:$0xff]  }
 0x8ce   : > { %4913 = vmatprep.subr.bf16.mxu1 %v6911_v40  ;;  %v6912_v3 = vld [vmem:[#allocation18 + $0x10] ss:$8 sps:$4 sm:$0xff]   ;;  %v6917_v43 = vld [vmem:[#allocation18 + $0x24] ss:$8 sps:$4 sm:$0xff]   ;;  %v6915_v39 = vld [vmem:[#allocation18 + $0x20] ss:$8 sps:$4 sm:$0xff]  }
 0x8cf   : > { %4580 = vadd.xlane.f32.xlu0 %v10559_v45  ;;  %4914 = vmatpush1.bf16.msra.mxu1 %v6909_v19  ;;  %v6923_v24 = vld [vmem:[#allocation18 + $0x44] ss:$8 sps:$4 sm:$0xff]  }
 0x8d0   : > { %v4342_v35 = vpop.permute.xlu1 %4341  ;;  %v4421_v18 = vpop.permute.xlu0 %4420  ;;  %4915 = vmatprep.subr.bf16.mxu1 %v6914_v42 }
 0x8d1   : > { %4377 = vst.msk [vmem:[#allocation5 + $0x68] sm:$0xff] %vm4363_vm2, %v4342_v35  ;;  %v6920_v35 = vld [vmem:[#allocation18 + $0x34] ss:$8 sps:$4 sm:$0xff]  }
 0x8d2   : > { %4457 = vst.msk [vmem:[#allocation5 + $0x60] sm:$0xff] %vm4444_vm3, %v4421_v18  ;;  %v6918_v18 = vld [vmem:[#allocation18 + $0x30] ss:$8 sps:$4 sm:$0xff]  }
 0x8d3   : > { %4582 = vadd.xlane.f32.xlu0 %v10565_v15  ;;  %4916 = vmatpush1.bf16.msra.mxu1 %v6912_v3 }
 0x8d4   : > { %v4492_v11 = vpop.permute.xlu1 %4491  ;;  %v4490_v60 = vpop.permute.xlu0 %4489  ;;  %v4547_v28 = vld [vmem:[#allocation5 + $0x28] sm:$0xff]  ;;  %v4546_v63 = vld [vmem:[#allocation5 + $0x20] sm:$0xff]  ;;  %4917 = vmatprep.subr.bf16.mxu1 %v6917_v43  ;;  %v8012_v43 = vmov 0  }
 0x8d5   : > { %4533 = vst.msk [vmem:[#allocation5 + $0x38] sm:$0xff] %vm4525_vm4, %v4492_v11  ;;  %4532 = vst.msk [vmem:[#allocation5 + $0x30] sm:$0xff] %vm4525_vm4, %v4490_v60  ;;  %v10571_v57 = vadd.f32 %v7401_v46, %v4547_v28  ;;  %v10574_v32 = vadd.f32 %v7402_v53, %v4546_v63  ;;  %v6921_v11 = vld [vmem:[#allocation18 + $0x40] ss:$8 sps:$4 sm:$0xff]   ;;  %4945 = vmatprep.mubr.bf16.mxu1 %v8012_v43 }
 0x8d7   : > { %4586 = vadd.xlane.f32.xlu0 %v10571_v57  ;;  %4584 = vadd.xlane.f32.xlu1 %v10574_v32 }
 0x8d8   : > { %v4423_v36 = vpop.permute.xlu1 %4422  ;;  %v4344_v14 = vpop.permute.xlu0 %4343  ;;  %4918 = vmatpush1.bf16.msra.mxu1 %v6915_v39 }
 0x8d9   : > { %4458 = vst.msk [vmem:[#allocation5 + $0x68] sm:$0xff] %vm4444_vm3, %v4423_v36  ;;  %4919 = vmatprep.subr.bf16.mxu1 %v6920_v35 }
 0x8da   : > { %4378 = vst.msk [vmem:[#allocation5 + $0x70] sm:$0xff] %vm4363_vm2, %v4344_v14 }
 0x8dc   : > { %v4496_v61 = vpop.permute.xlu1 %4495  ;;  %v4494_v7 = vpop.permute.xlu0 %4493  ;;  %v4549_v29 = vld [vmem:[#allocation5 + $0x38] sm:$0xff]  ;;  %v4548_v12 = vld [vmem:[#allocation5 + $0x30] sm:$0xff]  ;;  %4920 = vmatpush1.bf16.msra.mxu1 %v6918_v18 }
 0x8dd   : > { %4535 = vst.msk [vmem:[#allocation5 + $0x48] sm:$0xff] %vm4525_vm4, %v4496_v61  ;;  %4534 = vst.msk [vmem:[#allocation5 + $0x40] sm:$0xff] %vm4525_vm4, %v4494_v7  ;;  %v10583_v50 = vadd.f32 %v7403_v0, %v4549_v29  ;;  %v10586_v31 = vadd.f32 %v7404_v10, %v4548_v12  ;;  %4921 = vmatprep.subr.bf16.mxu1 %v6923_v24 }
 0x8df   : > { %4590 = vadd.xlane.f32.xlu0 %v10583_v50  ;;  %4588 = vadd.xlane.f32.xlu1 %v10586_v31 }
 0x8e0   : > { %v4346_v47 = vpop.permute.xlu1 %4345  ;;  %v4425_v27 = vpop.permute.xlu0 %4424  ;;  %4922 = vmatpush1.bf16.msra.mxu1 %v6921_v11 }
 0x8e1   : > { %4379 = vst.msk [vmem:[#allocation5 + $0x78] sm:$0xff] %vm4363_vm2, %v4346_v47 }
 0x8e2   : > { %4459 = vst.msk [vmem:[#allocation5 + $0x70] sm:$0xff] %vm4444_vm3, %v4425_v27 }
 0x8e4   : > { %v4500_v30 = vpop.permute.xlu1 %4499  ;;  %v4498_v4 = vpop.permute.xlu0 %4497  ;;  %v4551_v37 = vld [vmem:[#allocation5 + $0x48] sm:$0xff]  ;;  %v4550_v56 = vld [vmem:[#allocation5 + $0x40] sm:$0xff] }
 0x8e5   : > { %4537 = vst.msk [vmem:[#allocation5 + $0x58] sm:$0xff] %vm4525_vm4, %v4500_v30  ;;  %4536 = vst.msk [vmem:[#allocation5 + $0x50] sm:$0xff] %vm4525_vm4, %v4498_v4  ;;  %v10595_v17 = vadd.f32 %v7405_v51, %v4551_v37  ;;  %v10598_v8 = vadd.f32 %v7406_v34, %v4550_v56 }
 0x8e7   : > { %4594 = vadd.xlane.f32.xlu0 %v10595_v17  ;;  %4592 = vadd.xlane.f32.xlu1 %v10598_v8 }
 0x8e8   : > { %v4427_v26 = vpop.permute.xlu1 %4426  ;;  %v4502_v54 = vpop.permute.xlu0 %4501 }
 0x8e9   : > { %4460 = vst.msk [vmem:[#allocation5 + $0x78] sm:$0xff] %vm4444_vm3, %v4427_v26 }
 0x8ea   : > { %4538 = vst.msk [vmem:[#allocation5 + $0x60] sm:$0xff] %vm4525_vm4, %v4502_v54 }
 0x8ec   : > { %v4504_v13 = vpop.permute.xlu1 %4503  ;;  %v4506_v9 = vpop.permute.xlu0 %4505  ;;  %v4553_v2 = vld [vmem:[#allocation5 + $0x58] sm:$0xff]  ;;  %v4552_v20 = vld [vmem:[#allocation5 + $0x50] sm:$0xff] }
 0x8ed   : > { %4539 = vst.msk [vmem:[#allocation5 + $0x68] sm:$0xff] %vm4525_vm4, %v4504_v13  ;;  %4540 = vst.msk [vmem:[#allocation5 + $0x70] sm:$0xff] %vm4525_vm4, %v4506_v9  ;;  %v10607_v59 = vadd.f32 %v7407_v1, %v4553_v2  ;;  %v10610_v49 = vadd.f32 %v7408_v62, %v4552_v20  ;;  %v6926_v20 = vld [vmem:[#allocation18 + $0x54] ss:$8 sps:$4 sm:$0xff]  }
 0x8ee   : > { %4923 = vmatprep.subr.bf16.mxu1 %v6926_v20 }
 0x8ef   : > { %4598 = vadd.xlane.f32.xlu0 %v10607_v59  ;;  %4596 = vadd.xlane.f32.xlu1 %v10610_v49 }
 0x8f0   : > { %v4508_v41 = vpop.permute.xlu1 %4507 }
 0x8f1   : > { %v4554_v38 = vld [vmem:[#allocation5 + $0x60] sm:$0xff]  ;;  %4541 = vst.msk [vmem:[#allocation5 + $0x78] sm:$0xff] %vm4525_vm4, %v4508_v41 }
 0x8f2   : > { %v10616_v6 = vadd.f32 %v7409_v5, %v4554_v38  ;;  %v6924_v41 = vld [vmem:[#allocation18 + $0x50] ss:$8 sps:$4 sm:$0xff]  }
 0x8f3   : > { %4924 = vmatpush1.bf16.msra.mxu1 %v6924_v41 }
 0x8f4   : > { %4600 = vadd.xlane.f32.xlu1 %v10616_v6  ;;  %v4555_v22 = vld [vmem:[#allocation5 + $0x68] sm:$0xff]  ;;  %v4556_v48 = vld [vmem:[#allocation5 + $0x70] sm:$0xff] }
 0x8f5   : > { %v10620_v58 = vadd.f32 %v7410_v25, %v4555_v22  ;;  %v10623_v44 = vadd.f32 %v7411_v16, %v4556_v48  ;;  %v6929_v22 = vld [vmem:[#allocation18 + $0x64] ss:$8 sps:$4 sm:$0xff]   ;;  %v6927_v48 = vld [vmem:[#allocation18 + $0x60] ss:$8 sps:$4 sm:$0xff]  }
 0x8f6   : > { %4925 = vmatprep.subr.bf16.mxu1 %v6929_v22 }
 0x8f7   : > { %4602 = vadd.xlane.f32.xlu0 %v10620_v58  ;;  %4926 = vmatpush1.bf16.msra.mxu1 %v6927_v48  ;;  %v10745_v48 = vld [vmem:[#allocation24] ss:$0 sm:$0xff] }
 0x8f8   : > { %4604 = vadd.xlane.f32.xlu1 %v10623_v44  ;;  %v4557_v55 = vld [vmem:[#allocation5 + $0x78] sm:$0xff] }
 0x8f9   : > { %v10628_v23 = vadd.f32 %v7412_v33, %v4557_v55  ;;  %v6932_v55 = vld [vmem:[#allocation18 + $0x74] ss:$8 sps:$4 sm:$0xff]  }
 0x8fa   : > { %4927 = vmatprep.subr.bf16.mxu1 %v6932_v55 }
 0x8fb   : > { %4606 = vadd.xlane.f32.xlu0 %v10628_v23 }
 0x954   : > { %v4579_v60 = vpop.xlane.xlu1 %4578  ;;  %v4577_v28 = vpop.xlane.xlu0 %4576 }
 0x955   : > { %v4610_v63 = vmul.f32 0.0078125, %v4579_v60  ;;  %v4609_v46 = vmul.f32 0.0078125, %v4577_v28 }
 0x957   : > { %v10632_v53 = vsub.f32 %v10547_v52, %v4610_v63  ;;  %v10635_v36 = vsub.f32 %v10550_v21, %v4609_v46 }
 0x959   : > { %v4642_v14 = vmul.f32 %v10632_v53, %v10632_v53  ;;  %v4641_v61 = vmul.f32 %v10635_v36, %v10635_v36 }
 0x95b   : > { %4659 = vadd.xlane.f32.xlu0 %v4642_v14  ;;  %4657 = vadd.xlane.f32.xlu1 %v4641_v61 }
 0x95c   : > { %v4581_v7 = vpop.xlane.xlu0 %4580 }
 0x95d   : > { %v4611_v29 = vmul.f32 0.0078125, %v4581_v7 }
 0x95f   : > { %v10642_v12 = vsub.f32 %v10559_v45, %v4611_v29 }
 0x960   : > { %v4583_v0 = vpop.xlane.xlu0 %4582 }
 0x961   : > { %v4612_v10 = vmul.f32 0.0078125, %v4583_v0  ;;  %v4643_v52 = vmul.f32 %v10642_v12, %v10642_v12 }
 0x963   : > { %v10647_v21 = vsub.f32 %v10565_v15, %v4612_v10  ;;  %4661 = vadd.xlane.f32.xlu1 %v4643_v52  ;;  %v10712_v10 = vld [vmem:[#allocation21] sm:$0xff]   ;;  %v10714_v52 = vld [vmem:[#allocation21 + $0x48] sm:$0xff]  }
 0x964   : > { %v4585_v47 = vpop.xlane.xlu1 %4584  ;;  %v4587_v27 = vpop.xlane.xlu0 %4586 }
 0x965   : > { %v4613_v30 = vmul.f32 0.0078125, %v4585_v47  ;;  %v4614_v4 = vmul.f32 0.0078125, %v4587_v27  ;;  %v4644_v37 = vmul.f32 %v10647_v21, %v10647_v21  ;;  %v10717_v47 = vld [vmem:[#allocation21 + $0x8] sm:$0xff]   ;;  %v10723_v27 = vld [vmem:[#allocation21 + $0x10] sm:$0xff]  }
 0x967   : > { %v10652_v56 = vsub.f32 %v10574_v32, %v4613_v30  ;;  %v10655_v45 = vsub.f32 %v10571_v57, %v4614_v4  ;;  %4663 = vadd.xlane.f32.xlu0 %v4644_v37  ;;  %v10726_v30 = vld [vmem:[#allocation21 + $0x58] sm:$0xff]   ;;  %v10732_v37 = vld [vmem:[#allocation21 + $0x60] sm:$0xff]  }
 0x968   : > { %v10729_v4 = vld [vmem:[#allocation21 + $0x18] sm:$0xff]  }
 0x969   : > { %v4645_v51 = vmul.f32 %v10652_v56, %v10652_v56  ;;  %v4646_v15 = vmul.f32 %v10655_v45, %v10655_v45 }
 0x96b   : > { %4665 = vadd.xlane.f32.xlu1 %v4645_v51  ;;  %4667 = vadd.xlane.f32.xlu0 %v4646_v15  ;;  %v10735_v51 = vld [vmem:[#allocation21 + $0x20] sm:$0xff]   ;;  %v10738_v15 = vld [vmem:[#allocation21 + $0x68] sm:$0xff]  }
 0x96c   : > { %v4589_v34 = vpop.xlane.xlu1 %4588  ;;  %v4591_v26 = vpop.xlane.xlu0 %4590 }
 0x96d   : > { %v4615_v54 = vmul.f32 0.0078125, %v4589_v34  ;;  %v4616_v13 = vmul.f32 0.0078125, %v4591_v26  ;;  %v10741_v34 = vld [vmem:[#allocation21 + $0x28] sm:$0xff]  }
 0x96f   : > { %v10662_v9 = vsub.f32 %v10586_v31, %v4615_v54  ;;  %v10665_v32 = vsub.f32 %v10583_v50, %v4616_v13 }
 0x971   : > { %v4647_v57 = vmul.f32 %v10662_v9, %v10662_v9  ;;  %v4648_v2 = vmul.f32 %v10665_v32, %v10665_v32 }
 0x973   : > { %4669 = vadd.xlane.f32.xlu1 %v4647_v57  ;;  %4671 = vadd.xlane.f32.xlu0 %v4648_v2 }
 0x974   : > { %v4593_v1 = vpop.xlane.xlu1 %4592  ;;  %v4595_v62 = vpop.xlane.xlu0 %4594 }
 0x975   : > { %v4617_v38 = vmul.f32 0.0078125, %v4593_v1  ;;  %v4618_v5 = vmul.f32 0.0078125, %v4595_v62 }
 0x977   : > { %v10672_v31 = vsub.f32 %v10598_v8, %v4617_v38  ;;  %v10675_v50 = vsub.f32 %v10595_v17, %v4618_v5  ;;  %v6930_v8 = vld [vmem:[#allocation18 + $0x70] ss:$8 sps:$4 sm:$0xff]  }
 0x978   : > { %4928 = vmatpush1.bf16.msra.mxu1 %v6930_v8 }
 0x979   : > { %v4649_v25 = vmul.f32 %v10672_v31, %v10672_v31  ;;  %v4650_v16 = vmul.f32 %v10675_v50, %v10675_v50 }
 0x97b   : > { %4673 = vadd.xlane.f32.xlu1 %v4649_v25  ;;  %4675 = vadd.xlane.f32.xlu0 %v4650_v16 }
 0x97c   : > { %v4597_v33 = vpop.xlane.xlu1 %4596  ;;  %v4599_v19 = vpop.xlane.xlu0 %4598 }
 0x97d   : > { %v4619_v40 = vmul.f32 0.0078125, %v4597_v33  ;;  %v4620_v42 = vmul.f32 0.0078125, %v4599_v19 }
 0x97f   : > { %v10682_v17 = vsub.f32 %v10610_v49, %v4619_v40  ;;  %v10685_v3 = vsub.f32 %v10607_v59, %v4620_v42 }
 0x981   : > { %v4601_v39 = vpop.xlane.xlu1 %4600  ;;  %v4651_v18 = vmul.f32 %v10682_v17, %v10682_v17  ;;  %v4652_v24 = vmul.f32 %v10685_v3, %v10685_v3 }
 0x982   : > { %v4621_v35 = vmul.f32 0.0078125, %v4601_v39  ;;  %v10749_v39 = vld [vmem:[#allocation26] ss:$0 sm:$0xff] }
 0x983   : > { %4677 = vadd.xlane.f32.xlu1 %v4651_v18  ;;  %4679 = vadd.xlane.f32.xlu0 %v4652_v24 }
 0x984   : > { %v10693_v11 = vsub.f32 %v10616_v6, %v4621_v35  ;;  %v4603_v60 = vpop.xlane.xlu0 %4602 }
 0x985   : > { %v4605_v49 = vpop.xlane.xlu1 %4604  ;;  %v4622_v28 = vmul.f32 0.0078125, %v4603_v60 }
 0x986   : > { %v4623_v59 = vmul.f32 0.0078125, %v4605_v49  ;;  %v4653_v63 = vmul.f32 %v10693_v11, %v10693_v11 }
 0x987   : > { %v10701_v14 = vsub.f32 %v10620_v58, %v4622_v28  ;;  %v6933_v58 = vld [vmem:[#allocation21 + $0x40] sm:$0xff]  }
 0x988   : > { %v10698_v46 = vsub.f32 %v10623_v44, %v4623_v59  ;;  %4681 = vadd.xlane.f32.xlu1 %v4653_v63  ;;  %v4607_v61 = vpop.xlane.xlu0 %4606  ;;  %6389 = vmatprep.subr.bf16.mxu0 %v6933_v58 }
 0x989   : > { %v4624_v7 = vmul.f32 0.0078125, %v4607_v61  ;;  %v4654_v29 = vmul.f32 %v10701_v14, %v10701_v14  ;;  %6581 = vmatprep.subr.bf16.mxu1 %v6933_v58  ;;  %6390 = vmatpush3.bf16.msra.mxu0 %v10712_v10 }
 0x98a   : > { %v4655_v6 = vmul.f32 %v10698_v46, %v10698_v46  ;;  %6391 = vmatprep.subr.bf16.mxu0 %v10714_v52 }
 0x98b   : > { %v10708_v0 = vsub.f32 %v10628_v23, %v4624_v7  ;;  %4683 = vadd.xlane.f32.xlu0 %v4654_v29  ;;  %v10720_v23 = vld [vmem:[#allocation21 + $0x50] sm:$0xff]  }
 0x98c   : > { %4685 = vadd.xlane.f32.xlu1 %v4655_v6 }
 0x98d   : > { %v4656_v44 = vmul.f32 %v10708_v0, %v10708_v0  ;;  %6392 = vmatpush3.bf16.msra.mxu0 %v10717_v47 }
 0x98e   : > { %6393 = vmatprep.subr.bf16.mxu0 %v10720_v23 }
 0x98f   : > { %4687 = vadd.xlane.f32.xlu0 %v4656_v44 }
 0x991   : > { %6394 = vmatpush3.bf16.msra.mxu0 %v10723_v27 }
 0x992   : > { %6395 = vmatprep.subr.bf16.mxu0 %v10726_v30 }
 0x995   : > { %6396 = vmatpush3.bf16.msra.mxu0 %v10729_v4 }
 0x996   : > { %6397 = vmatprep.subr.bf16.mxu0 %v10732_v37 }
 0x999   : > { %6398 = vmatpush3.bf16.msra.mxu0 %v10735_v51 }
 0x99a   : > { %6399 = vmatprep.subr.bf16.mxu0 %v10738_v15 }
 0x99d   : > { %6400 = vmatpush3.bf16.msra.mxu0 %v10741_v34 }
 0x9e8   : > { %v4658_v26 = vpop.xlane.xlu1 %4657  ;;  %v4660_v54 = vpop.xlane.xlu0 %4659 }
 0x9e9   : > { %v4689_v13 = vmul.f32 0.0078125, %v4658_v26  ;;  %v4690_v57 = vmul.f32 0.0078125, %v4660_v54 }
 0x9eb   : > { %v4705_v2 = vadd.f32 1e-05, %v4689_v13  ;;  %v4706_v20 = vadd.f32 1e-05, %v4690_v57 }
 0x9ed   : > { %7333 = vrsqrt.f32 %v4705_v2 }
 0x9ee   : > { %7335 = vrsqrt.f32 %v4706_v20 }
 0x9f0   : > { %v4662_v1 = vpop.xlane.xlu1 %4661 }
 0x9f1   : > { %v4691_v62 = vmul.f32 0.0078125, %v4662_v1 }
 0x9f3   : > { %v4707_v41 = vadd.f32 1e-05, %v4691_v62 }
 0x9f4   : > { %v4664_v38 = vpop.xlane.xlu0 %4663 }
 0x9f5   : > { %7337 = vrsqrt.f32 %v4707_v41  ;;  %v4692_v5 = vmul.f32 0.0078125, %v4664_v38 }
 0x9f7   : > { %v7334_v22 = vpop.eup %7333  ;;  %v4708_v25 = vadd.f32 1e-05, %v4692_v5 }
 0x9f8   : > { %v7336_v16 = vpop.eup %7335  ;;  %v4737_v55 = vmul.f32 %v7334_v22, %v10635_v36  ;;  %v4666_v33 = vpop.xlane.xlu1 %4665 }
 0x9f9   : > { %v4668_v19 = vpop.xlane.xlu0 %4667  ;;  %v4738_v8 = vmul.f32 %v7336_v16, %v10632_v53  ;;  %7339 = vrsqrt.f32 %v4708_v25  ;;  %v4693_v40 = vmul.f32 0.0078125, %v4666_v33 }
 0x9fa   : > { %v4694_v42 = vmul.f32 0.0078125, %v4668_v19  ;;  %v4759_v35 = vmul.f32 %v10745_v48, %v4737_v55 }
 0x9fb   : > { %v4760_v18 = vmul.f32 %v10745_v48, %v4738_v8  ;;  %v4709_v24 = vadd.f32 1e-05, %v4693_v40 }
 0x9fc   : > { %v4710_v49 = vadd.f32 1e-05, %v4694_v42  ;;  %v10754_v60 = vadd.f32 %v10749_v39, %v4759_v35 }
 0x9fd   : > { %7341 = vrsqrt.f32 %v4709_v24  ;;  %v10757_v36 = vadd.f32 %v10749_v39, %v4760_v18 }
 0x9fe   : > { %7343 = vrsqrt.f32 %v4710_v49 }
 0x9ff   : > { %v7338_v53 = vpop.eup %7337  ;;  %v4797_v59 = vpack.c.bf16 %v10757_v36, %v10754_v60 }
 0xa00   : > { %v4670_v28 = vpop.xlane.xlu1 %4669  ;;  %v4672_v63 = vpop.xlane.xlu0 %4671  ;;  %v4739_v61 = vmul.f32 %v7338_v53, %v10642_v12 }
 0xa01   : > { %v4695_v7 = vmul.f32 0.0078125, %v4670_v28  ;;  %4946 = vmatmul.mubr.bf16.vlgmr.msra.gmra.mrb[128].mxu1 %v4797_v59  ;;  %v4696_v6 = vmul.f32 0.0078125, %v4672_v63 }
 0xa02   : > { %4955 = vmatprep.mubr.bf16.mxu1 %v8012_v43  ;;  %6589 = vmatpush3.bf16.msra.mxu1 %v10712_v10  ;;  %v4761_v54 = vmul.f32 %v10745_v48, %v4739_v61 }
 0xa03   : > { %v7340_v29 = vpop.eup %7339  ;;  %v4711_v44 = vadd.f32 1e-05, %v4695_v7  ;;  %v4712_v58 = vadd.f32 1e-05, %v4696_v6  ;;  %6582 = vmatprep.subr.bf16.mxu1 %v10714_v52 }
 0xa04   : > { %v4740_v26 = vmul.f32 %v7340_v29, %v10647_v21  ;;  %v10771_v20 = vadd.f32 %v10749_v39, %v4761_v54 }
 0xa05   : > { %7345 = vrsqrt.f32 %v4711_v44 }
 0xa06   : > { %7347 = vrsqrt.f32 %v4712_v58  ;;  %v4762_v12 = vmul.f32 %v10745_v48, %v4740_v26  ;;  %6590 = vmatpush3.bf16.msra.mxu1 %v10717_v47 }
 0xa07   : > { %v7342_v13 = vpop.eup %7341  ;;  %6583 = vmatprep.subr.bf16.mxu1 %v10720_v23 }
 0xa08   : > { %v7344_v57 = vpop.eup %7343  ;;  %v4674_v10 = vpop.xlane.xlu1 %4673  ;;  %v10774_v52 = vadd.f32 %v10749_v39, %v4762_v12  ;;  %v4741_v21 = vmul.f32 %v7342_v13, %v10652_v56 }
 0xa09   : > { %v4676_v2 = vpop.xlane.xlu0 %4675  ;;  %v4697_v1 = vmul.f32 0.0078125, %v4674_v10  ;;  %v4742_v41 = vmul.f32 %v7344_v57, %v10655_v45 }
 0xa0a   : > { %v4698_v62 = vmul.f32 0.0078125, %v4676_v2  ;;  %v4798_v47 = vpack.c.bf16 %v10774_v52, %v10771_v20  ;;  %v4763_v23 = vmul.f32 %v10745_v48, %v4741_v21  ;;  %6591 = vmatpush3.bf16.msra.mxu1 %v10723_v27 }
 0xa0b   : > { %v4713_v38 = vadd.f32 1e-05, %v4697_v1  ;;  %v4764_v22 = vmul.f32 %v10745_v48, %v4742_v41  ;;  %6584 = vmatprep.subr.bf16.mxu1 %v10726_v30 }
 0xa0c   : > { %v4714_v5 = vadd.f32 1e-05, %v4698_v62  ;;  %4956 = vmatmul.mubr.bf16.gmra.mrb[132].mxu1 %v4798_v47  ;;  %v10786_v56 = vadd.f32 %v10749_v39, %v4763_v23 }
 0xa0d   : > { %7349 = vrsqrt.f32 %v4713_v38  ;;  %4965 = vmatprep.mubr.bf16.mxu1 %v8012_v43  ;;  %v10789_v45 = vadd.f32 %v10749_v39, %v4764_v22 }
 0xa0e   : > { %7351 = vrsqrt.f32 %v4714_v5  ;;  %6592 = vmatpush3.bf16.msra.mxu1 %v10729_v4 }
 0xa0f   : > { %v7346_v27 = vpop.eup %7345  ;;  %6585 = vmatprep.subr.bf16.mxu1 %v10732_v37  ;;  %v4799_v40 = vpack.c.bf16 %v10789_v45, %v10786_v56 }
 0xa10   : > { %v7348_v25 = vpop.eup %7347  ;;  %v4678_v16 = vpop.xlane.xlu1 %4677  ;;  %v4743_v30 = vmul.f32 %v7346_v27, %v10662_v9 }
 0xa11   : > { %v4680_v55 = vpop.xlane.xlu0 %4679  ;;  %v4699_v33 = vmul.f32 0.0078125, %v4678_v16  ;;  %v4744_v8 = vmul.f32 %v7348_v25, %v10665_v32 }
 0xa12   : > { %v4700_v19 = vmul.f32 0.0078125, %v4680_v55  ;;  %v4765_v42 = vmul.f32 %v10745_v48, %v4743_v30  ;;  %6593 = vmatpush3.bf16.msra.mxu1 %v10735_v51 }
 0xa13   : > { %v4715_v4 = vadd.f32 1e-05, %v4699_v33  ;;  %v4766_v37 = vmul.f32 %v10745_v48, %v4744_v8  ;;  %6586 = vmatprep.subr.bf16.mxu1 %v10738_v15 }
 0xa14   : > { %v4716_v35 = vadd.f32 1e-05, %v4700_v19  ;;  %4966 = vmatmul.mubr.bf16.gmra.mrb[136].mxu1 %v4799_v40  ;;  %v10803_v32 = vadd.f32 %v10749_v39, %v4765_v42 }
 0xa15   : > { %v4682_v18 = vpop.xlane.xlu1 %4681  ;;  %7353 = vrsqrt.f32 %v4715_v4  ;;  %4975 = vmatprep.mubr.bf16.mxu1 %v8012_v43  ;;  %v10806_v24 = vadd.f32 %v10749_v39, %v4766_v37  ;;  %v6946_v4 = vld [vmem:[#allocation21 + $0x30] sm:$0xff]  }
 0xa16   : > { %v4701_v9 = vmul.f32 0.0078125, %v4682_v18  ;;  %7355 = vrsqrt.f32 %v4716_v35  ;;  %6594 = vmatpush3.bf16.msra.mxu1 %v10741_v34  ;;  %v6947_v35 = vld [vmem:[#allocation21 + $0x78] sm:$0xff]  }
 0xa17   : > { %v7350_v51 = vpop.eup %7349  ;;  %v4800_v7 = vpack.c.bf16 %v10806_v24, %v10803_v32  ;;  %v4821_v18 = vld [vmem:[#allocation20] sm:$0x3] }
 0xa18   : > { %v4717_v49 = vadd.f32 1e-05, %v4701_v9  ;;  %v7352_v53 = vpop.eup %7351  ;;  %v4684_v15 = vpop.xlane.xlu0 %4683  ;;  %v4745_v28 = vmul.f32 %v7350_v51, %v10672_v31 }
 0xa19   : > { %v4686_v59 = vpop.xlane.xlu1 %4685  ;;  %v4702_v63 = vmul.f32 0.0078125, %v4684_v15  ;;  %v4746_v61 = vmul.f32 %v7352_v53, %v10675_v50 }
 0xa1a   : > { %v4767_v6 = vmul.f32 %v10745_v48, %v4745_v28  ;;  %7357 = vrsqrt.f32 %v4717_v49  ;;  %v4703_v29 = vmul.f32 0.0078125, %v4686_v59 }
 0xa1b   : > { %v4718_v44 = vadd.f32 1e-05, %v4702_v63  ;;  %v4768_v34 = vmul.f32 %v10745_v48, %v4746_v61 }
 0xa1c   : > { %4976 = vmatmul.mubr.bf16.gmra.mrb[140].mxu1 %v4800_v7  ;;  %v4688_v58 = vpop.xlane.xlu0 %4687  ;;  %v10817_v31 = vadd.f32 %v10749_v39, %v4767_v6  ;;  %v4719_v12 = vadd.f32 1e-05, %v4703_v29 }
 0xa1d   : > { %v4704_v26 = vmul.f32 0.0078125, %v4688_v58  ;;  %4985 = vmatprep.mubr.bf16.mxu1 %v8012_v43  ;;  %7359 = vrsqrt.f32 %v4718_v44  ;;  %v10820_v50 = vadd.f32 %v10749_v39, %v4768_v34 }
 0xa1f   : > { %v7354_v54 = vpop.eup %7353  ;;  %v4720_v13 = vadd.f32 1e-05, %v4704_v26  ;;  %v4801_v21 = vpack.c.bf16 %v10820_v50, %v10817_v31 }
 0xa20   : > { %v7356_v57 = vpop.eup %7355  ;;  %v4747_v10 = vmul.f32 %v7354_v54, %v10682_v17 }
 0xa21   : > { %7361 = vrsqrt.f32 %v4720_v13  ;;  %v4748_v2 = vmul.f32 %v7356_v57, %v10685_v3 }
 0xa22   : > { %v4769_v1 = vmul.f32 %v10745_v48, %v4747_v10  ;;  %7363 = vrsqrt.f32 %v4719_v12 }
 0xa23   : > { %v4770_v62 = vmul.f32 %v10745_v48, %v4748_v2 }
 0xa24   : > { %4986 = vmatmul.mubr.bf16.gmra.mrb[144].mxu1 %v4801_v21  ;;  %v7358_v41 = vpop.eup %7357  ;;  %v10830_v47 = vadd.f32 %v10749_v39, %v4769_v1 }
 0xa25   : > { %4995 = vmatprep.mubr.bf16.mxu1 %v8012_v43  ;;  %v10833_v17 = vadd.f32 %v10749_v39, %v4770_v62  ;;  %v4749_v3 = vmul.f32 %v7358_v41, %v10693_v11 }
 0xa27   : > { %v7360_v23 = vpop.eup %7359  ;;  %v4802_v5 = vpack.c.bf16 %v10833_v17, %v10830_v47  ;;  %v4771_v25 = vmul.f32 %v10745_v48, %v4749_v3 }
 0xa28   : > { %v4750_v38 = vmul.f32 %v7360_v23, %v10701_v14 }
 0xa29   : > { %v10847_v11 = vadd.f32 %v10749_v39, %v4771_v25 }
 0xa2a   : > { %v4772_v27 = vmul.f32 %v10745_v48, %v4750_v38 }
 0xa2b   : > { %v7362_v22 = vpop.eup %7361 }
 0xa2c   : > { %4996 = vmatmul.mubr.bf16.gmra.mrb[148].mxu1 %v4802_v5  ;;  %v7364_v16 = vpop.eup %7363  ;;  %v10843_v55 = vadd.f32 %v10749_v39, %v4772_v27  ;;  %v4752_v30 = vmul.f32 %v7362_v22, %v10708_v0 }
 0xa2d   : > { %5005 = vmatprep.mubr.bf16.mxu1 %v8012_v43  ;;  %v4751_v14 = vmul.f32 %v7364_v16, %v10698_v46  ;;  %v6945_v46 = vld [vmem:[#allocation21 + $0x70] sm:$0xff]  }
 0xa2e   : > { %v4803_v33 = vpack.c.bf16 %v10843_v55, %v10847_v11  ;;  %v4774_v19 = vmul.f32 %v10745_v48, %v4752_v30  ;;  %6401 = vmatprep.subr.bf16.mxu0 %v6945_v46  ;;  %6587 = vmatprep.subr.bf16.mxu1 %v6945_v46 }
 0xa2f   : > { %v4773_v8 = vmul.f32 %v10745_v48, %v4751_v14  ;;  %6402 = vmatpush3.bf16.msra.mxu0 %v6946_v4  ;;  %6595 = vmatpush3.bf16.msra.mxu1 %v6946_v4  ;;  %v6948_v48 = vld [vmem:[#allocation21 + $0x38] sm:$0xff]  }
 0xa30   : > { %v10856_v40 = vadd.f32 %v10749_v39, %v4774_v19  ;;  %6403 = vmatprep.subr.bf16.mxu0 %v6947_v35  ;;  %6588 = vmatprep.subr.bf16.mxu1 %v6947_v35 }
 0xa31   : > { %v10859_v0 = vadd.f32 %v10749_v39, %v4773_v8 }
 0xa33   : > { %v4804_v42 = vpack.c.bf16 %v10856_v40, %v10859_v0  ;;  %6404 = vmatpush3.bf16.msra.mxu0 %v6948_v48  ;;  %6596 = vmatpush3.bf16.msra.mxu1 %v6948_v48 }
 0xa34   : > { %5006 = vmatmul.mubr.bf16.gmra.mrb[152].mxu1 %v4803_v33 }
 0xa35   : > { %5015 = vmatprep.mubr.bf16.mxu1 %v8012_v43  ;;  %v4823_v43 = vlaneseq }
 0xa37   : > { %v4824_v37 = vshrl.u32 %v4823_v43, 7 }
 0xa39   : > { %v4825_v39 = vsub.s32 0, %v4824_v37  ;;  %v4829_v9 = vsub.s32 1, %v4824_v37 }
 0xa3b   : > { %v10863_v51 = vrot.slane %v4821_v18, %v4825_v39  ;;  %v10865_v49 = vrot.slane %v4821_v18, %v4829_v9 }
 0xa3c   : > { %5016 = vmatmul.mubr.bf16.gmra.mrb[156].mxu1 %v4804_v42 }
 0xad4   : > { %v4947_v53 = vpop.f32.mrb[128].mxu1 }
 0xad5   : > { %v4948_v59 = vadd.f32 %v4947_v53, %v10863_v51  ;;  %v4949_v15 = vpop.f32.mrb[129].mxu1 }
 0xad6   : > { %v4950_v28 = vadd.f32 %v4949_v15, %v10865_v49  ;;  %v4951_v63 = vpop.f32.mrb[130].mxu1 }
 0xad7   : > { %v4952_v61 = vadd.f32 %v4951_v63, %v10863_v51  ;;  %v4953_v7 = vpop.f32.mrb[131].mxu1  ;;  %v5026_v29 = vmax.f32 %v4948_v59, 0.0 }
 0xad8   : > { %v4954_v6 = vadd.f32 %v4953_v7, %v10865_v49  ;;  %v5027_v34 = vmax.f32 %v4950_v28, 0.0 }
 0xad9   : > { %v5028_v44 = vmax.f32 %v4952_v61, 0.0 }
 0xada   : > { %v5029_v58 = vmax.f32 %v4954_v6, 0.0 }
 0xadb   : > { %v5058_v26 = vpack.c.bf16 %v5028_v44, %v5026_v29 }
 0xadc   : > { %v5059_v54 = vpack.c.bf16 %v5029_v58, %v5027_v34 }
 0xade   : > { %5241 = vmatprep.mubr.bf16.mxu0 %v5059_v54 }
 0xadf   : > { %5242 = vmatmul.mubr.bf16.vlgmr.msra.gmra.mrb[144].mxu0 %v5058_v26  ;;  %v4957_v12 = vpop.f32.mrb[132].mxu1 }
 0xae0   : > { %v4958_v13 = vadd.f32 %v4957_v12, %v10863_v51  ;;  %v4959_v57 = vpop.f32.mrb[133].mxu1 }
 0xae1   : > { %v4960_v10 = vadd.f32 %v4959_v57, %v10865_v49  ;;  %v4961_v2 = vpop.f32.mrb[134].mxu1 }
 0xae2   : > { %v4962_v21 = vadd.f32 %v4961_v2, %v10863_v51  ;;  %v4963_v1 = vpop.f32.mrb[135].mxu1  ;;  %v5030_v41 = vmax.f32 %v4958_v13, 0.0 }
 0xae3   : > { %v4964_v62 = vadd.f32 %v4963_v1, %v10865_v49  ;;  %v5031_v3 = vmax.f32 %v4960_v10, 0.0 }
 0xae4   : > { %v5032_v23 = vmax.f32 %v4962_v21, 0.0 }
 0xae5   : > { %v5033_v38 = vmax.f32 %v4964_v62, 0.0 }
 0xae6   : > { %v5060_v5 = vpack.c.bf16 %v5032_v23, %v5030_v41 }
 0xae7   : > { %v5061_v22 = vpack.c.bf16 %v5033_v38, %v5031_v3  ;;  %v4967_v27 = vpop.f32.mrb[136].mxu1 }
 0xae8   : > { %v4968_v25 = vadd.f32 %v4967_v27, %v10863_v51  ;;  %v4969_v16 = vpop.f32.mrb[137].mxu1 }
 0xae9   : > { %v4970_v30 = vadd.f32 %v4969_v16, %v10865_v49  ;;  %v4971_v14 = vpop.f32.mrb[138].mxu1  ;;  %5249 = vmatprep.mubr.bf16.mxu0 %v5061_v22 }
 0xaea   : > { %v4972_v33 = vadd.f32 %v4971_v14, %v10863_v51  ;;  %v4973_v19 = vpop.f32.mrb[139].mxu1  ;;  %5250 = vmatmul.mubr.bf16.gmra.mrb[148].mxu0 %v5060_v5  ;;  %v5034_v42 = vmax.f32 %v4968_v25, 0.0 }
 0xaeb   : > { %v4974_v8 = vadd.f32 %v4973_v19, %v10865_v49  ;;  %v5035_v4 = vmax.f32 %v4970_v30, 0.0 }
 0xaec   : > { %v5036_v46 = vmax.f32 %v4972_v33, 0.0 }
 0xaed   : > { %v5037_v35 = vmax.f32 %v4974_v8, 0.0 }
 0xaee   : > { %v5062_v48 = vpack.c.bf16 %v5036_v46, %v5034_v42 }
 0xaef   : > { %v5063_v43 = vpack.c.bf16 %v5037_v35, %v5035_v4  ;;  %v4977_v37 = vpop.f32.mrb[140].mxu1 }
 0xaf0   : > { %v4978_v39 = vadd.f32 %v4977_v37, %v10863_v51  ;;  %v4979_v18 = vpop.f32.mrb[141].mxu1 }
 0xaf1   : > { %v4980_v9 = vadd.f32 %v4979_v18, %v10865_v49  ;;  %v4981_v53 = vpop.f32.mrb[142].mxu1  ;;  %5257 = vmatprep.mubr.bf16.mxu0 %v5063_v43 }
 0xaf2   : > { %v4982_v59 = vadd.f32 %v4981_v53, %v10863_v51  ;;  %v4983_v15 = vpop.f32.mrb[143].mxu1  ;;  %5258 = vmatmul.mubr.bf16.gmra.mrb[152].mxu0 %v5062_v48  ;;  %v5038_v63 = vmax.f32 %v4978_v39, 0.0 }
 0xaf3   : > { %v4984_v28 = vadd.f32 %v4983_v15, %v10865_v49  ;;  %v5039_v7 = vmax.f32 %v4980_v9, 0.0 }
 0xaf4   : > { %v5040_v61 = vmax.f32 %v4982_v59, 0.0 }
 0xaf5   : > { %v5041_v6 = vmax.f32 %v4984_v28, 0.0 }
 0xaf6   : > { %v5064_v29 = vpack.c.bf16 %v5040_v61, %v5038_v63 }
 0xaf7   : > { %v5065_v44 = vpack.c.bf16 %v5041_v6, %v5039_v7  ;;  %v4987_v34 = vpop.f32.mrb[144].mxu1 }
 0xaf8   : > { %v4988_v58 = vadd.f32 %v4987_v34, %v10863_v51  ;;  %v4989_v26 = vpop.f32.mrb[145].mxu1 }
 0xaf9   : > { %v4990_v54 = vadd.f32 %v4989_v26, %v10865_v49  ;;  %v4991_v12 = vpop.f32.mrb[146].mxu1  ;;  %5265 = vmatprep.mubr.bf16.mxu0 %v5065_v44 }
 0xafa   : > { %v4992_v13 = vadd.f32 %v4991_v12, %v10863_v51  ;;  %v4993_v57 = vpop.f32.mrb[147].mxu1  ;;  %5266 = vmatmul.mubr.bf16.gmra.mrb[156].mxu0 %v5064_v29  ;;  %v5042_v2 = vmax.f32 %v4988_v58, 0.0 }
 0xafb   : > { %v4994_v10 = vadd.f32 %v4993_v57, %v10865_v49  ;;  %v5043_v1 = vmax.f32 %v4990_v54, 0.0 }
 0xafc   : > { %v5044_v21 = vmax.f32 %v4992_v13, 0.0 }
 0xafd   : > { %v5045_v62 = vmax.f32 %v4994_v10, 0.0 }
 0xafe   : > { %v5066_v41 = vpack.c.bf16 %v5044_v21, %v5042_v2 }
 0xaff   : > { %v5067_v23 = vpack.c.bf16 %v5045_v62, %v5043_v1  ;;  %v4997_v3 = vpop.f32.mrb[148].mxu1  ;;  %v10899_v62 = vld [vmem:[#allocation23] ss:$0 sm:$0xff] }
 0xb00   : > { %v4998_v38 = vadd.f32 %v4997_v3, %v10863_v51  ;;  %v4999_v5 = vpop.f32.mrb[149].mxu1 }
 0xb01   : > { %v5000_v22 = vadd.f32 %v4999_v5, %v10865_v49  ;;  %v5001_v27 = vpop.f32.mrb[150].mxu1  ;;  %5273 = vmatprep.mubr.bf16.mxu0 %v5067_v23 }
 0xb02   : > { %v5002_v25 = vadd.f32 %v5001_v27, %v10863_v51  ;;  %v5003_v16 = vpop.f32.mrb[151].mxu1  ;;  %5274 = vmatmul.mubr.bf16.gmra.mrb[160].mxu0 %v5066_v41  ;;  %v5046_v14 = vmax.f32 %v4998_v38, 0.0 }
 0xb03   : > { %v5004_v30 = vadd.f32 %v5003_v16, %v10865_v49  ;;  %v5047_v19 = vmax.f32 %v5000_v22, 0.0 }
 0xb04   : > { %v5048_v33 = vmax.f32 %v5002_v25, 0.0 }
 0xb05   : > { %v5049_v8 = vmax.f32 %v5004_v30, 0.0 }
 0xb06   : > { %v5068_v42 = vpack.c.bf16 %v5048_v33, %v5046_v14 }
 0xb07   : > { %v5069_v46 = vpack.c.bf16 %v5049_v8, %v5047_v19  ;;  %v5007_v4 = vpop.f32.mrb[152].mxu1 }
 0xb08   : > { %v5008_v35 = vadd.f32 %v5007_v4, %v10863_v51  ;;  %v5009_v48 = vpop.f32.mrb[153].mxu1 }
 0xb09   : > { %v5010_v43 = vadd.f32 %v5009_v48, %v10865_v49  ;;  %v5011_v37 = vpop.f32.mrb[154].mxu1  ;;  %5281 = vmatprep.mubr.bf16.mxu0 %v5069_v46 }
 0xb0a   : > { %v5012_v39 = vadd.f32 %v5011_v37, %v10863_v51  ;;  %v5013_v18 = vpop.f32.mrb[155].mxu1  ;;  %5282 = vmatmul.mubr.bf16.gmra.mrb[164].mxu0 %v5068_v42  ;;  %v5050_v53 = vmax.f32 %v5008_v35, 0.0 }
 0xb0b   : > { %v5014_v9 = vadd.f32 %v5013_v18, %v10865_v49  ;;  %v5051_v15 = vmax.f32 %v5010_v43, 0.0 }
 0xb0c   : > { %v5052_v59 = vmax.f32 %v5012_v39, 0.0 }
 0xb0d   : > { %v5053_v28 = vmax.f32 %v5014_v9, 0.0 }
 0xb0e   : > { %v5070_v63 = vpack.c.bf16 %v5052_v59, %v5050_v53 }
 0xb0f   : > { %v5071_v61 = vpack.c.bf16 %v5053_v28, %v5051_v15  ;;  %v5017_v7 = vpop.f32.mrb[156].mxu1 }
 0xb10   : > { %v5018_v6 = vadd.f32 %v5017_v7, %v10863_v51  ;;  %v5019_v29 = vpop.f32.mrb[157].mxu1 }
 0xb11   : > { %v5020_v44 = vadd.f32 %v5019_v29, %v10865_v49  ;;  %v5021_v34 = vpop.f32.mrb[158].mxu1  ;;  %5289 = vmatprep.mubr.bf16.mxu1 %v5071_v61 }
 0xb12   : > { %v5022_v58 = vadd.f32 %v5021_v34, %v10863_v51  ;;  %v5023_v26 = vpop.f32.mrb[159].mxu1  ;;  %5290 = vmatmul.mubr.bf16.vlgmr.msra.gmra.mrb[160].mxu1 %v5070_v63  ;;  %v5054_v12 = vmax.f32 %v5018_v6, 0.0 }
 0xb13   : > { %v5024_v54 = vadd.f32 %v5023_v26, %v10865_v49  ;;  %v5055_v57 = vmax.f32 %v5020_v44, 0.0 }
 0xb14   : > { %v5056_v13 = vmax.f32 %v5022_v58, 0.0 }
 0xb15   : > { %v5057_v10 = vmax.f32 %v5024_v54, 0.0 }
 0xb16   : > { %v5072_v2 = vpack.c.bf16 %v5056_v13, %v5054_v12 }
 0xb17   : > { %v5073_v21 = vpack.c.bf16 %v5057_v10, %v5055_v57 }
 0xb19   : > { %5297 = vmatprep.mubr.bf16.mxu1 %v5073_v21 }
 0xb1a   : > { %5298 = vmatmul.mubr.bf16.gmra.mrb[164].mxu1 %v5072_v2 }
 0xbb2   : > { %v6405_v1 = vpop.f32.mrb[144].mxu0 }
 0xbb3   : > { %v6406_v41 = vpop.f32.mrb[145].mxu0 }
 0xbb4   : > { %v6407_v23 = vadd.f32 %v6406_v41, %v6405_v1  ;;  %v6408_v3 = vpop.f32.mrb[146].mxu0 }
 0xbb5   : > { %v6409_v38 = vpop.f32.mrb[147].mxu0 }
 0xbb6   : > { %v5244_v51 = vadd.f32 %v6407_v23, %v10899_v62  ;;  %v6410_v5 = vadd.f32 %v6409_v38, %v6408_v3 }
 0xbb8   : > { %v5247_v49 = vadd.f32 %v6410_v5, %v10899_v62  ;;  %v10904_v22 = vadd.f32 %v5244_v51, %v10754_v60 }
 0xbba   : > { %5324 = vadd.xlane.f32.xlu1 %v10904_v22  ;;  %v10908_v27 = vadd.f32 %v5247_v49, %v10757_v36 }
 0xbbc   : > { %5326 = vadd.xlane.f32.xlu0 %v10908_v27 }
 0xbbd   : > { %v6411_v25 = vpop.f32.mrb[148].mxu0 }
 0xbbe   : > { %v6412_v16 = vpop.f32.mrb[149].mxu0 }
 0xbbf   : > { %v6413_v30 = vadd.f32 %v6412_v16, %v6411_v25  ;;  %v6414_v14 = vpop.f32.mrb[150].mxu0 }
 0xbc0   : > { %v6415_v33 = vpop.f32.mrb[151].mxu0 }
 0xbc1   : > { %v5252_v19 = vadd.f32 %v6413_v30, %v10899_v62  ;;  %v6416_v8 = vadd.f32 %v6415_v33, %v6414_v14 }
 0xbc3   : > { %v5255_v42 = vadd.f32 %v6416_v8, %v10899_v62  ;;  %v10914_v60 = vadd.f32 %v5252_v19, %v10771_v20 }
 0xbc5   : > { %5328 = vadd.xlane.f32.xlu1 %v10914_v60  ;;  %v6417_v46 = vpop.f32.mrb[152].mxu0  ;;  %v10918_v36 = vadd.f32 %v5255_v42, %v10774_v52 }
 0xbc6   : > { %v6418_v4 = vpop.f32.mrb[153].mxu0 }
 0xbc7   : > { %v6419_v35 = vadd.f32 %v6418_v4, %v6417_v46  ;;  %5330 = vadd.xlane.f32.xlu0 %v10918_v36  ;;  %v6420_v48 = vpop.f32.mrb[154].mxu0 }
 0xbc8   : > { %v6421_v43 = vpop.f32.mrb[155].mxu0 }
 0xbc9   : > { %v5260_v37 = vadd.f32 %v6419_v35, %v10899_v62  ;;  %v6422_v39 = vadd.f32 %v6421_v43, %v6420_v48 }
 0xbcb   : > { %v5263_v18 = vadd.f32 %v6422_v39, %v10899_v62  ;;  %v10924_v20 = vadd.f32 %v5260_v37, %v10786_v56 }
 0xbcd   : > { %5332 = vadd.xlane.f32.xlu1 %v10924_v20  ;;  %v6423_v9 = vpop.f32.mrb[156].mxu0  ;;  %v10928_v52 = vadd.f32 %v5263_v18, %v10789_v45 }
 0xbce   : > { %v6424_v53 = vpop.f32.mrb[157].mxu0 }
 0xbcf   : > { %v6425_v59 = vadd.f32 %v6424_v53, %v6423_v9  ;;  %5334 = vadd.xlane.f32.xlu0 %v10928_v52  ;;  %v6426_v15 = vpop.f32.mrb[158].mxu0 }
 0xbd0   : > { %v6427_v28 = vpop.f32.mrb[159].mxu0 }
 0xbd1   : > { %v5268_v63 = vadd.f32 %v6425_v59, %v10899_v62  ;;  %v6428_v61 = vadd.f32 %v6427_v28, %v6426_v15 }
 0xbd3   : > { %v5271_v7 = vadd.f32 %v6428_v61, %v10899_v62  ;;  %v10934_v56 = vadd.f32 %v5268_v63, %v10803_v32 }
 0xbd5   : > { %5336 = vadd.xlane.f32.xlu1 %v10934_v56  ;;  %v6429_v6 = vpop.f32.mrb[160].mxu0  ;;  %v10938_v45 = vadd.f32 %v5271_v7, %v10806_v24 }
 0xbd6   : > { %v6430_v29 = vpop.f32.mrb[161].mxu0 }
 0xbd7   : > { %v6431_v44 = vadd.f32 %v6430_v29, %v6429_v6  ;;  %5338 = vadd.xlane.f32.xlu0 %v10938_v45  ;;  %v6432_v34 = vpop.f32.mrb[162].mxu0 }
 0xbd8   : > { %v6433_v58 = vpop.f32.mrb[163].mxu0 }
 0xbd9   : > { %v5276_v26 = vadd.f32 %v6431_v44, %v10899_v62  ;;  %v6434_v54 = vadd.f32 %v6433_v58, %v6432_v34 }
 0xbdb   : > { %v5279_v12 = vadd.f32 %v6434_v54, %v10899_v62  ;;  %v10944_v32 = vadd.f32 %v5276_v26, %v10817_v31 }
 0xbdd   : > { %5340 = vadd.xlane.f32.xlu1 %v10944_v32  ;;  %v6435_v13 = vpop.f32.mrb[164].mxu0  ;;  %v10948_v24 = vadd.f32 %v5279_v12, %v10820_v50 }
 0xbde   : > { %v6436_v57 = vpop.f32.mrb[165].mxu0 }
 0xbdf   : > { %v6437_v10 = vadd.f32 %v6436_v57, %v6435_v13  ;;  %5342 = vadd.xlane.f32.xlu0 %v10948_v24  ;;  %v6438_v2 = vpop.f32.mrb[166].mxu0 }
 0xbe0   : > { %v6439_v21 = vpop.f32.mrb[167].mxu0 }
 0xbe1   : > { %v5284_v1 = vadd.f32 %v6437_v10, %v10899_v62  ;;  %v6440_v41 = vadd.f32 %v6439_v21, %v6438_v2 }
 0xbe3   : > { %v5287_v23 = vadd.f32 %v6440_v41, %v10899_v62  ;;  %v10954_v31 = vadd.f32 %v5284_v1, %v10830_v47 }
 0xbe5   : > { %5344 = vadd.xlane.f32.xlu1 %v10954_v31  ;;  %v6441_v3 = vpop.f32.mrb[160].mxu1  ;;  %v10958_v50 = vadd.f32 %v5287_v23, %v10833_v17 }
 0xbe6   : > { %v6442_v38 = vpop.f32.mrb[161].mxu1 }
 0xbe7   : > { %v6443_v51 = vadd.f32 %v6442_v38, %v6441_v3  ;;  %5346 = vadd.xlane.f32.xlu0 %v10958_v50  ;;  %v6444_v5 = vpop.f32.mrb[162].mxu1 }
 0xbe8   : > { %v6445_v49 = vpop.f32.mrb[163].mxu1 }
 0xbe9   : > { %v5292_v25 = vadd.f32 %v6443_v51, %v10899_v62  ;;  %v6446_v16 = vadd.f32 %v6445_v49, %v6444_v5 }
 0xbeb   : > { %v5295_v30 = vadd.f32 %v6446_v16, %v10899_v62  ;;  %v10964_v47 = vadd.f32 %v5292_v25, %v10847_v11 }
 0xbed   : > { %5348 = vadd.xlane.f32.xlu1 %v10964_v47  ;;  %v6447_v14 = vpop.f32.mrb[164].mxu1  ;;  %v10968_v17 = vadd.f32 %v5295_v30, %v10843_v55 }
 0xbee   : > { %v6448_v33 = vpop.f32.mrb[165].mxu1 }
 0xbef   : > { %v6449_v19 = vadd.f32 %v6448_v33, %v6447_v14  ;;  %5350 = vadd.xlane.f32.xlu0 %v10968_v17  ;;  %v6450_v8 = vpop.f32.mrb[166].mxu1 }
 0xbf0   : > { %v6451_v42 = vpop.f32.mrb[167].mxu1 }
 0xbf1   : > { %v5300_v46 = vadd.f32 %v6449_v19, %v10899_v62  ;;  %v6452_v4 = vadd.f32 %v6451_v42, %v6450_v8 }
 0xbf3   : > { %v5303_v35 = vadd.f32 %v6452_v4, %v10899_v62  ;;  %v10974_v11 = vadd.f32 %v5300_v46, %v10859_v0 }
 0xbf5   : > { %5352 = vadd.xlane.f32.xlu1 %v10974_v11  ;;  %v10978_v48 = vadd.f32 %v5303_v35, %v10856_v40 }
 0xbf7   : > { %5354 = vadd.xlane.f32.xlu0 %v10978_v48 }
 0xc47   : > { %v5325_v55 = vpop.xlane.xlu1 %5324 }
 0xc48   : > { %v5356_v43 = vmul.f32 0.0078125, %v5325_v55 }
 0xc49   : > { %v5327_v37 = vpop.xlane.xlu0 %5326 }
 0xc4a   : > { %v10982_v39 = vsub.f32 %v10904_v22, %v5356_v43  ;;  %v5357_v18 = vmul.f32 0.0078125, %v5327_v37 }
 0xc4c   : > { %v10985_v9 = vsub.f32 %v10908_v27, %v5357_v18  ;;  %v5388_v0 = vmul.f32 %v10982_v39, %v10982_v39 }
 0xc4e   : > { %5404 = vadd.xlane.f32.xlu1 %v5388_v0  ;;  %v5389_v40 = vmul.f32 %v10985_v9, %v10985_v9 }
 0xc50   : > { %5406 = vadd.xlane.f32.xlu0 %v5389_v40 }
 0xc52   : > { %v5329_v62 = vpop.xlane.xlu1 %5328 }
 0xc53   : > { %v5358_v53 = vmul.f32 0.0078125, %v5329_v62 }
 0xc54   : > { %v5331_v59 = vpop.xlane.xlu0 %5330 }
 0xc55   : > { %v10992_v15 = vsub.f32 %v10914_v60, %v5358_v53  ;;  %v5359_v22 = vmul.f32 0.0078125, %v5331_v59 }
 0xc57   : > { %v10995_v28 = vsub.f32 %v10918_v36, %v5359_v22  ;;  %v5390_v27 = vmul.f32 %v10992_v15, %v10992_v15 }
 0xc59   : > { %5408 = vadd.xlane.f32.xlu1 %v5390_v27  ;;  %v5391_v63 = vmul.f32 %v10995_v28, %v10995_v28 }
 0xc5a   : > { %v5333_v61 = vpop.xlane.xlu1 %5332 }
 0xc5b   : > { %v5360_v7 = vmul.f32 0.0078125, %v5333_v61  ;;  %5410 = vadd.xlane.f32.xlu0 %v5391_v63  ;;  %v11061_v61 = vld [vmem:[#allocation27] ss:$0 sm:$0xff] }
 0xc5c   : > { %v5335_v6 = vpop.xlane.xlu0 %5334 }
 0xc5d   : > { %v11002_v29 = vsub.f32 %v10924_v20, %v5360_v7  ;;  %v5361_v60 = vmul.f32 0.0078125, %v5335_v6 }
 0xc5f   : > { %v11005_v44 = vsub.f32 %v10928_v52, %v5361_v60  ;;  %v5392_v36 = vmul.f32 %v11002_v29, %v11002_v29 }
 0xc61   : > { %5412 = vadd.xlane.f32.xlu1 %v5392_v36  ;;  %v5393_v34 = vmul.f32 %v11005_v44, %v11005_v44  ;;  %v11064_v36 = vld [vmem:[#allocation29] ss:$0 sm:$0xff] }
 0xc62   : > { %v5337_v58 = vpop.xlane.xlu1 %5336 }
 0xc63   : > { %v5362_v26 = vmul.f32 0.0078125, %v5337_v58  ;;  %5414 = vadd.xlane.f32.xlu0 %v5393_v34 }
 0xc64   : > { %v5339_v54 = vpop.xlane.xlu0 %5338 }
 0xc65   : > { %v11012_v12 = vsub.f32 %v10934_v56, %v5362_v26  ;;  %v5363_v20 = vmul.f32 0.0078125, %v5339_v54 }
 0xc67   : > { %v11015_v13 = vsub.f32 %v10938_v45, %v5363_v20  ;;  %v5394_v52 = vmul.f32 %v11012_v12, %v11012_v12 }
 0xc69   : > { %5416 = vadd.xlane.f32.xlu1 %v5394_v52  ;;  %v5395_v57 = vmul.f32 %v11015_v13, %v11015_v13 }
 0xc6a   : > { %v5341_v10 = vpop.xlane.xlu1 %5340 }
 0xc6b   : > { %v5364_v2 = vmul.f32 0.0078125, %v5341_v10  ;;  %5418 = vadd.xlane.f32.xlu0 %v5395_v57 }
 0xc6c   : > { %v5343_v21 = vpop.xlane.xlu0 %5342 }
 0xc6d   : > { %v11022_v1 = vsub.f32 %v10944_v32, %v5364_v2  ;;  %v5365_v56 = vmul.f32 0.0078125, %v5343_v21 }
 0xc6f   : > { %v11025_v41 = vsub.f32 %v10948_v24, %v5365_v56  ;;  %v5396_v45 = vmul.f32 %v11022_v1, %v11022_v1 }
 0xc71   : > { %5420 = vadd.xlane.f32.xlu1 %v5396_v45  ;;  %v5397_v23 = vmul.f32 %v11025_v41, %v11025_v41 }
 0xc72   : > { %v5345_v3 = vpop.xlane.xlu1 %5344 }
 0xc73   : > { %v5366_v38 = vmul.f32 0.0078125, %v5345_v3  ;;  %5422 = vadd.xlane.f32.xlu0 %v5397_v23 }
 0xc74   : > { %v5347_v51 = vpop.xlane.xlu0 %5346 }
 0xc75   : > { %v11032_v5 = vsub.f32 %v10954_v31, %v5366_v38  ;;  %v5367_v32 = vmul.f32 0.0078125, %v5347_v51 }
 0xc77   : > { %v11035_v49 = vsub.f32 %v10958_v50, %v5367_v32  ;;  %v5398_v24 = vmul.f32 %v11032_v5, %v11032_v5 }
 0xc79   : > { %5424 = vadd.xlane.f32.xlu1 %v5398_v24  ;;  %v5399_v25 = vmul.f32 %v11035_v49, %v11035_v49 }
 0xc7a   : > { %v5349_v16 = vpop.xlane.xlu1 %5348 }
 0xc7b   : > { %v5368_v30 = vmul.f32 0.0078125, %v5349_v16  ;;  %5426 = vadd.xlane.f32.xlu0 %v5399_v25 }
 0xc7c   : > { %v5351_v14 = vpop.xlane.xlu0 %5350 }
 0xc7d   : > { %v11042_v33 = vsub.f32 %v10964_v47, %v5368_v30  ;;  %v5369_v31 = vmul.f32 0.0078125, %v5351_v14 }
 0xc7f   : > { %v11045_v19 = vsub.f32 %v10968_v17, %v5369_v31  ;;  %v5400_v50 = vmul.f32 %v11042_v33, %v11042_v33 }
 0xc81   : > { %5428 = vadd.xlane.f32.xlu1 %v5400_v50  ;;  %v5401_v8 = vmul.f32 %v11045_v19, %v11045_v19 }
 0xc82   : > { %v5353_v42 = vpop.xlane.xlu1 %5352 }
 0xc83   : > { %v5370_v46 = vmul.f32 0.0078125, %v5353_v42  ;;  %5430 = vadd.xlane.f32.xlu0 %v5401_v8 }
 0xc84   : > { %v5355_v4 = vpop.xlane.xlu0 %5354 }
 0xc85   : > { %v11052_v35 = vsub.f32 %v10974_v11, %v5370_v46  ;;  %v5371_v47 = vmul.f32 0.0078125, %v5355_v4 }
 0xc87   : > { %v11055_v55 = vsub.f32 %v10978_v48, %v5371_v47  ;;  %v5402_v17 = vmul.f32 %v11052_v35, %v11052_v35 }
 0xc89   : > { %5432 = vadd.xlane.f32.xlu1 %v5402_v17  ;;  %v5403_v43 = vmul.f32 %v11055_v55, %v11055_v55 }
 0xc8b   : > { %5434 = vadd.xlane.f32.xlu0 %v5403_v43 }
 0xcdb   : > { %v5405_v37 = vpop.xlane.xlu1 %5404 }
 0xcdc   : > { %v5436_v18 = vmul.f32 0.0078125, %v5405_v37 }
 0xcdd   : > { %v5407_v0 = vpop.xlane.xlu0 %5406 }
 0xcde   : > { %v5452_v40 = vadd.f32 1e-05, %v5436_v18  ;;  %v5437_v62 = vmul.f32 0.0078125, %v5407_v0 }
 0xce0   : > { %7365 = vrsqrt.f32 %v5452_v40  ;;  %v5453_v11 = vadd.f32 1e-05, %v5437_v62 }
 0xce2   : > { %7367 = vrsqrt.f32 %v5453_v11 }
 0xce6   : > { %v5409_v53 = vpop.xlane.xlu1 %5408 }
 0xce7   : > { %v5438_v59 = vmul.f32 0.0078125, %v5409_v53 }
 0xce8   : > { %v5411_v48 = vpop.xlane.xlu0 %5410 }
 0xce9   : > { %v5454_v22 = vadd.f32 1e-05, %v5438_v59  ;;  %v5439_v27 = vmul.f32 0.0078125, %v5411_v48 }
 0xcea   : > { %v7366_v63 = vpop.eup %7365 }
 0xceb   : > { %v5484_v7 = vmul.f32 %v7366_v63, %v10982_v39  ;;  %7369 = vrsqrt.f32 %v5454_v22  ;;  %v5455_v6 = vadd.f32 1e-05, %v5439_v27 }
 0xcec   : > { %v7368_v60 = vpop.eup %7367 }
 0xced   : > { %v5506_v34 = vmul.f32 %v11061_v61, %v5484_v7  ;;  %v5485_v58 = vmul.f32 %v7368_v60, %v10985_v9  ;;  %7371 = vrsqrt.f32 %v5455_v6 }
 0xcee   : > { %v5413_v26 = vpop.xlane.xlu1 %5412 }
 0xcef   : > { %v5528_v54 = vadd.f32 %v11064_v36, %v5506_v34  ;;  %v5507_v20 = vmul.f32 %v11061_v61, %v5485_v58  ;;  %v5440_v52 = vmul.f32 0.0078125, %v5413_v26 }
 0xcf0   : > { %v5415_v57 = vpop.xlane.xlu0 %5414 }
 0xcf1   : > { %5544 = vst [vmem:[%s8638_s24] sm:$0xff] %v5528_v54  ;;  %v5529_v39 = vadd.f32 %v11064_v36, %v5507_v20  ;;  %v5456_v10 = vadd.f32 1e-05, %v5440_v52  ;;  %v5441_v2 = vmul.f32 0.0078125, %v5415_v57 }
 0xcf3   : > { %5545 = vst [vmem:[%s8638_s24 + $0x8] sm:$0xff] %v5529_v39  ;;  %7373 = vrsqrt.f32 %v5456_v10  ;;  %v5457_v21 = vadd.f32 1e-05, %v5441_v2 }
 0xcf5   : > { %v7370_v56 = vpop.eup %7369  ;;  %7375 = vrsqrt.f32 %v5457_v21 }
 0xcf6   : > { %v5486_v9 = vmul.f32 %v7370_v56, %v10992_v15  ;;  %v5417_v45 = vpop.xlane.xlu1 %5416 }
 0xcf7   : > { %v7372_v23 = vpop.eup %7371  ;;  %v5442_v3 = vmul.f32 0.0078125, %v5417_v45 }
 0xcf8   : > { %v5508_v38 = vmul.f32 %v11061_v61, %v5486_v9  ;;  %v5487_v51 = vmul.f32 %v7372_v23, %v10995_v28  ;;  %v5419_v32 = vpop.xlane.xlu0 %5418 }
 0xcf9   : > { %v5458_v24 = vadd.f32 1e-05, %v5442_v3  ;;  %v5443_v25 = vmul.f32 0.0078125, %v5419_v32 }
 0xcfa   : > { %v5530_v16 = vadd.f32 %v11064_v36, %v5508_v38  ;;  %v5509_v30 = vmul.f32 %v11061_v61, %v5487_v51 }
 0xcfb   : > { %7377 = vrsqrt.f32 %v5458_v24  ;;  %v5459_v14 = vadd.f32 1e-05, %v5443_v25 }
 0xcfc   : > { %5546 = vst [vmem:[%s8638_s24 + $0x10] sm:$0xff] %v5530_v16  ;;  %v5531_v15 = vadd.f32 %v11064_v36, %v5509_v30 }
 0xcfd   : > { %v7374_v31 = vpop.eup %7373  ;;  %7379 = vrsqrt.f32 %v5459_v14 }
 0xcfe   : > { %5547 = vst [vmem:[%s8638_s24 + $0x18] sm:$0xff] %v5531_v15  ;;  %v5488_v50 = vmul.f32 %v7374_v31, %v11002_v29  ;;  %v5421_v8 = vpop.xlane.xlu1 %5420 }
 0xcff   : > { %v7376_v28 = vpop.eup %7375  ;;  %v5444_v42 = vmul.f32 0.0078125, %v5421_v8 }
 0xd00   : > { %v5510_v46 = vmul.f32 %v11061_v61, %v5488_v50  ;;  %v5489_v4 = vmul.f32 %v7376_v28, %v11005_v44  ;;  %v5423_v47 = vpop.xlane.xlu0 %5422 }
 0xd01   : > { %v5460_v17 = vadd.f32 1e-05, %v5444_v42  ;;  %v5445_v43 = vmul.f32 0.0078125, %v5423_v47 }
 0xd02   : > { %v5532_v37 = vadd.f32 %v11064_v36, %v5510_v46  ;;  %v5511_v18 = vmul.f32 %v11061_v61, %v5489_v4 }
 0xd03   : > { %7381 = vrsqrt.f32 %v5460_v17  ;;  %v5461_v0 = vadd.f32 1e-05, %v5445_v43 }
 0xd04   : > { %5548 = vst [vmem:[%s8638_s24 + $0x20] sm:$0xff] %v5532_v37  ;;  %v5533_v29 = vadd.f32 %v11064_v36, %v5511_v18 }
 0xd05   : > { %v7378_v40 = vpop.eup %7377  ;;  %7383 = vrsqrt.f32 %v5461_v0 }
 0xd06   : > { %5549 = vst [vmem:[%s8638_s24 + $0x28] sm:$0xff] %v5533_v29  ;;  %v5490_v62 = vmul.f32 %v7378_v40, %v11012_v12  ;;  %v5425_v11 = vpop.xlane.xlu1 %5424 }
 0xd07   : > { %v7380_v44 = vpop.eup %7379  ;;  %v5446_v53 = vmul.f32 0.0078125, %v5425_v11 }
 0xd08   : > { %v5512_v59 = vmul.f32 %v11061_v61, %v5490_v62  ;;  %v5491_v48 = vmul.f32 %v7380_v44, %v11015_v13  ;;  %v5427_v22 = vpop.xlane.xlu0 %5426 }
 0xd09   : > { %v5462_v27 = vadd.f32 1e-05, %v5446_v53  ;;  %v5447_v63 = vmul.f32 0.0078125, %v5427_v22 }
 0xd0a   : > { %v5534_v7 = vadd.f32 %v11064_v36, %v5512_v59  ;;  %v5513_v6 = vmul.f32 %v11061_v61, %v5491_v48 }
 0xd0b   : > { %7385 = vrsqrt.f32 %v5462_v27  ;;  %v5463_v60 = vadd.f32 1e-05, %v5447_v63 }
 0xd0c   : > { %5550 = vst [vmem:[%s8638_s24 + $0x30] sm:$0xff] %v5534_v7  ;;  %v5535_v12 = vadd.f32 %v11064_v36, %v5513_v6 }
 0xd0d   : > { %v7382_v34 = vpop.eup %7381  ;;  %7387 = vrsqrt.f32 %v5463_v60 }
 0xd0e   : > { %5551 = vst [vmem:[%s8638_s24 + $0x38] sm:$0xff] %v5535_v12  ;;  %v5492_v58 = vmul.f32 %v7382_v34, %v11022_v1  ;;  %v5429_v26 = vpop.xlane.xlu1 %5428 }
 0xd0f   : > { %v7384_v13 = vpop.eup %7383  ;;  %v5448_v54 = vmul.f32 0.0078125, %v5429_v26 }
 0xd10   : > { %v5514_v20 = vmul.f32 %v11061_v61, %v5492_v58  ;;  %v5493_v52 = vmul.f32 %v7384_v13, %v11025_v41  ;;  %v5431_v57 = vpop.xlane.xlu0 %5430 }
 0xd11   : > { %v5464_v39 = vadd.f32 1e-05, %v5448_v54  ;;  %v5449_v10 = vmul.f32 0.0078125, %v5431_v57 }
 0xd12   : > { %v5536_v2 = vadd.f32 %v11064_v36, %v5514_v20  ;;  %v5515_v21 = vmul.f32 %v11061_v61, %v5493_v52 }
 0xd13   : > { %7389 = vrsqrt.f32 %v5464_v39  ;;  %v5465_v56 = vadd.f32 1e-05, %v5449_v10 }
 0xd14   : > { %5552 = vst [vmem:[%s8638_s24 + $0x40] sm:$0xff] %v5536_v2  ;;  %v5537_v1 = vadd.f32 %v11064_v36, %v5515_v21 }
 0xd15   : > { %v7386_v9 = vpop.eup %7385  ;;  %7391 = vrsqrt.f32 %v5465_v56 }
 0xd16   : > { %5553 = vst [vmem:[%s8638_s24 + $0x48] sm:$0xff] %v5537_v1  ;;  %v5494_v45 = vmul.f32 %v7386_v9, %v11032_v5  ;;  %v5433_v23 = vpop.xlane.xlu1 %5432 }
 0xd17   : > { %v7388_v41 = vpop.eup %7387  ;;  %v5450_v3 = vmul.f32 0.0078125, %v5433_v23 }
 0xd18   : > { %v5516_v38 = vmul.f32 %v11061_v61, %v5494_v45  ;;  %v5495_v51 = vmul.f32 %v7388_v41, %v11035_v49  ;;  %v5435_v32 = vpop.xlane.xlu0 %5434 }
 0xd19   : > { %v5466_v24 = vadd.f32 1e-05, %v5450_v3  ;;  %v5451_v25 = vmul.f32 0.0078125, %v5435_v32 }
 0xd1a   : > { %v5538_v16 = vadd.f32 %v11064_v36, %v5516_v38  ;;  %v5517_v30 = vmul.f32 %v11061_v61, %v5495_v51 }
 0xd1b   : > { %7393 = vrsqrt.f32 %v5466_v24  ;;  %v5467_v5 = vadd.f32 1e-05, %v5451_v25 }
 0xd1c   : > { %5554 = vst [vmem:[%s8638_s24 + $0x50] sm:$0xff] %v5538_v16  ;;  %v5539_v14 = vadd.f32 %v11064_v36, %v5517_v30 }
 0xd1d   : > { %v7390_v15 = vpop.eup %7389  ;;  %7395 = vrsqrt.f32 %v5467_v5 }
 0xd1e   : > { %5555 = vst [vmem:[%s8638_s24 + $0x58] sm:$0xff] %v5539_v14  ;;  %v5496_v49 = vmul.f32 %v7390_v15, %v11042_v33 }
 0xd1f   : > { %v7392_v31 = vpop.eup %7391 }
 0xd20   : > { %v5518_v50 = vmul.f32 %v11061_v61, %v5496_v49  ;;  %v5497_v8 = vmul.f32 %v7392_v31, %v11045_v19 }
 0xd22   : > { %v5540_v28 = vadd.f32 %v11064_v36, %v5518_v50  ;;  %v5519_v42 = vmul.f32 %v11061_v61, %v5497_v8 }
 0xd24   : > { %5556 = vst [vmem:[%s8638_s24 + $0x60] sm:$0xff] %v5540_v28  ;;  %v5541_v46 = vadd.f32 %v11064_v36, %v5519_v42 }
 0xd25   : > { %v7394_v4 = vpop.eup %7393 }
 0xd26   : > { %5557 = vst [vmem:[%s8638_s24 + $0x68] sm:$0xff] %v5541_v46  ;;  %v5498_v33 = vmul.f32 %v7394_v4, %v11052_v35 }
 0xd27   : > { %v7396_v47 = vpop.eup %7395 }
 0xd28   : > { %v5520_v19 = vmul.f32 %v11061_v61, %v5498_v33  ;;  %v5499_v17 = vmul.f32 %v7396_v47, %v11055_v55 }
 0xd2a   : > { %v5542_v43 = vadd.f32 %v11064_v36, %v5520_v19  ;;  %v5521_v37 = vmul.f32 %v11061_v61, %v5499_v17 }
 0xd2c   : > { %5558 = vst [vmem:[%s8638_s24 + $0x70] sm:$0xff] %v5542_v43  ;;  %v5543_v35 = vadd.f32 %v11064_v36, %v5521_v37 }
 0xd2e   : > { %5559 = vst [vmem:[%s8638_s24 + $0x78] sm:$0xff] %v5543_v35 }
 0xd2f   : > { %7848 = shalt.err (!%p7845_p2)
}
 0xd30   : > { %s7849_s22 = scalar_lea.hbm %s11132_s18, 2048  ;;  %s7853_s26 = scalar_lea.hbm %s11541_s3, 8192 }
 0xd31   : > { %p7850_p12 = scmp.ne.s32.totalorder %s11132_s18, %s7849_s22  ;;  %p7854_p13 = scmp.lt.u32.totalorder %s11132_s18, %s11541_s3 }
 0xd32   : > { %p7855_p9 = scmp.lt.u32.totalorder %s7853_s26, %s7849_s22  ;;  %p7857_p3 = scmp.lt.u32.totalorder %s7849_s22, %s11132_s18 }
 0xd33   : > { %p7851_p6 = pnand %p7850_p12, %p11542_p11 }
 0xd34   : > { %p7856_p0 = por %p7855_p9, %p7854_p13 }
 0xd35   : > { %p7852_p8 = pneg %p7851_p6 }
 0xd36   : > { %p7858_p4 = por %p7857_p3, %p7856_p0 }
 0xd38   : > { %p7859_p10 = pnand %p7858_p4, %p7852_p8 }
 0xd3a   : > { %7862 = shalt.err (!%p7859_p10)
}
 0xd3b   : > { %s8014_s23 = smov 128   ;;  %s8015_s15 = smov 8  }
 0xd3c   : > { %6687 = dma.vmem_to_hbm [thread:$0]  (%p11542_p11), %s11134_s5, 2048, %s11132_s18, %s11141_s19, %s8014_s23, %s8014_s23, %s8015_s15  }
 0xd3d PF: > { %s11543_s6 = sld [smem:[#allocation40_spill]]  ;;  %p6769_p7 = scmp.ge.s32.totalorder %s7985_s28, 2 }
 0xd3e   : > { %p11544_p1 = scmp.ne.s32.totalorder %s11359_s4, 0 }
 0xd40   : > { %p6737_p5 = pnand %p6769_p7, %p11544_p1 }
 0xd43   : > { %s5591_s25 = sand.u32 1, %s11543_s6  }
 0xd44   : > { %s5592_s1 = scalar_lea.sflag [#allocation8], %s5591_s25 }
 0xd45   : > { %7940 = dma.done.wait (!%p6737_p5), %s5592_s1, 2048  }
 0xd46   : > { %7942 = vsyncadd (!%p6737_p5), %s5592_s1, 4294965248  ;;  %s38_s28 = sadd.s32 1, %s7985_s28   ;;  %s11545_s18 = sld [smem:[#allocation41_spill]] }
 0xd47   : > { %p35_p2 = scmp.ge.s32.totalorder %s38_s28, 6   ;;  %s11546_s19 = sld [smem:[#allocation42_spill]] }
 0xd48   : > { %s11547_s21 = sld [smem:[#allocation44_spill]]  ;;  %s11548_s22 = sld [smem:[#allocation45_spill]] }
 0xd49   : > { %s11549_s24 = sld [smem:[#allocation48_spill]]  ;;  %s11550_s25 = sld [smem:[#allocation49_spill]] }
 0xd4a   : > { %s11551_s5 = smov %s11557_s20  ;;  %s11552_s20 = smov %s11563_s27 }
 0xd4b   : > { %s11553_s23 = smov %s8540_s2  ;;  %s11554_s26 = smov %s11551_s5 }
 0xd4c   : > { %s11555_s27 = smov %s11561_s17  ;;  %37 = sbr.rel (!%p35_p2) target bundleno = 25 (0x19), region = 195 }
 0xd53   :  { %5597 = vsyncpa [#allocation7], 1 }
 0xd54   :  { %5599 = vsyncpa [#allocation7 + $0x1], 1 }
 0xd55   :  { %5600 = vsyncpa [#allocation10], 1 }
 0xd56   :  { %5601 = vsyncpa [#allocation13], 1 }
 0xd57   :  { %5602 = vsyncpa [#allocation16], 1 }
 0xd58   :  { %5603 = vsyncpa [#allocation19], 1 }
 0xd59   :  { %5604 = vsyncpa [#allocation22], 1 }
 0xd5a   :  { %5605 = vsyncpa [#allocation25], 1 }
 0xd5b   :  { %5606 = vsyncpa [#allocation28], 1 }
 0xd5c   :  { %5607 = vsyncpa [#allocation8], 1 }
 0xd5d   :  { %5609 = vsyncpa [#allocation8 + $0x1], 1 }

</bundles_post_ra>
